<compile_context>
chip_gen: v5e
topology: v5e:2x2
jax: 0.10.0
libtpu: 0.0.40
codegen_flags: <defaults>
</compile_context>

<pallas_src>
import functools
import math

import jax
import jax.numpy as jnp
from jax import lax
from jax.experimental import pallas as pl
from jax.experimental.pallas import tpu as pltpu

# ---- model configuration (OFENet(block='densenet')) --------------------------
DIM_STATE = 8
DIM_ACTION = 8
DIM_DISCRETIZE = 16
END = DIM_DISCRETIZE // 2 + 1            # self.end = dim_discretize*0.5 + 1
TOTAL_UNITS = 32
NUM_LAYERS = 4
PER_UNIT = TOTAL_UNITS // NUM_LAYERS     # densenet growth per block
PRED_HIDDEN = 1024
OUT_DIM = END * DIM_STATE                # Prediction output dim per head (72)
LN_EPS = 1e-5

C = PER_UNIT
assert DIM_STATE == C and DIM_ACTION == C, "chosen so all concat slices are 8-aligned"

NUM_BLOCKS = 2 * NUM_LAYERS              # 4 state + 4 action densenet blocks
FEAT_PAD = 128                           # padded feature lane width (one vreg span)
ACTION_OFF = (NUM_LAYERS + 1) * C        # 40: actions live at lanes [40:48]
BLOCK_OFF = tuple([(1 + i) * C for i in range(NUM_LAYERS)] +
                  [ACTION_OFF + (1 + j) * C for j in range(NUM_LAYERS)])
FEAT_VALID = ACTION_OFF + C + NUM_LAYERS * C   # 80 valid lanes, rest are zero
BIAS_LANE = FEAT_PAD - 1                 # lane 127 carries a constant 1.0 (bias fold)

HEAD_PAD = 256                           # lane-dense fused head: re @ [0:72], im @ [128:200]
IM_OFF = 128

# ---- execution configuration --------------------------------------------------
TILE_B = 128                             # batch rows per grid step
BATCH = 256                              # example batch -> 2 grid steps


# ----------------------------- Pallas kernel ---------------------------------
def ofenet_kernel(states_ref, actions_ref, blk_w_ref, pred_w_ref, head_w_ref,
                  ln_g_ref, ln_b_ref, head_b_ref, out_ref, feat0_ref):
    tb = states_ref.shape[0]

    # Assemble the zero-padded 128-lane feature buffer ONCE (densenet concat as
    # lane placement), then keep it as a register value for the whole trunk.
    feat0_ref[...] = jnp.zeros_like(feat0_ref)
    feat0_ref[:, 0:C] = states_ref[...]
    feat0_ref[:, ACTION_OFF:ACTION_OFF + C] = actions_ref[...]
    feat0_ref[:, BIAS_LANE:BIAS_LANE + 1] = jnp.ones((tb, 1), jnp.float32)
    feat = feat0_ref[...]

    lane = lax.broadcasted_iota(jnp.int32, (tb, FEAT_PAD), 1)

    # 8 densenet blocks.  Block i's weight columns are pre-placed at that
    # block's own output lanes, so its output lands in the right lanes of the
    # matmul result and a lane-masked select appends it to `feat` (no VMEM
    # round-trip on the serial chain).  Bias is folded into weight row 127,
    # matched by the constant-1.0 feature lane.
    for i in range(NUM_BLOCKS):
        h = jnp.dot(feat, blk_w_ref[...], preferred_element_type=jnp.float32)
        off = BLOCK_OFF[i]
        mask = (lane >= off) & (lane < off + C)
        feat = jnp.where(mask, jnp.maximum(h, 0.0), feat)

    # Prediction head: Linear(1024) (bias folded) -> LayerNorm -> ReLU.
    # bf16 operands, f32 MXU accumulation; LayerNorm stats stay in f32.
    x = jnp.dot(feat.astype(jnp.bfloat16), pred_w_ref[...],
                preferred_element_type=jnp.float32)
    mu = jnp.mean(x, axis=-1, keepdims=True)
    var = jnp.maximum(jnp.mean(x * x, axis=-1, keepdims=True) - mu * mu, 0.0)
    x = (x - mu) * lax.rsqrt(var + LN_EPS)
    x = x * ln_g_ref[...] + ln_b_ref[...]
    x = jnp.maximum(x, 0.0)

    # Fused lane-dense (re | im) output head (bf16 weights, f32 accumulation).
    out = jnp.dot(x.astype(jnp.bfloat16), head_w_ref[...],
                  preferred_element_type=jnp.float32)
    out_ref[...] = out + head_b_ref[...]


# ----------------------------- wrapper ----------------------------------------
@functools.partial(jax.jit, static_argnames=("tile_b",))
def ofenet_forward(states, actions, packed, *, tile_b=TILE_B):
    batch = states.shape[0]
    assert batch % tile_b == 0, "batch must be a multiple of the batch tile"
    grid = (batch // tile_b,)

    flops = 2 * batch * (NUM_BLOCKS * FEAT_PAD * FEAT_PAD
                         + FEAT_PAD * PRED_HIDDEN + PRED_HIDDEN * HEAD_PAD)
    bytes_accessed = (states.size * 4 + actions.size * 4
                      + packed["blk_w"].size * 4
                      + packed["pred_w"].size * 2 + packed["head_w"].size * 2
                      + (packed["ln_g"].size + packed["ln_b"].size
                         + packed["head_b"].size) * 4
                      + batch * HEAD_PAD * 4)

    out = pl.pallas_call(
        ofenet_kernel,
        out_shape=jax.ShapeDtypeStruct((batch, HEAD_PAD), jnp.float32),
        grid_spec=pltpu.PrefetchScalarGridSpec(
            num_scalar_prefetch=0,
            grid=grid,
            in_specs=[
                pl.BlockSpec((tile_b, DIM_STATE), lambda i: (i, 0)),
                pl.BlockSpec((tile_b, DIM_ACTION), lambda i: (i, 0)),
                # Weights: constant index_map -> fetched once, VMEM-resident
                # across all batch tiles.
                pl.BlockSpec((FEAT_PAD, FEAT_PAD), lambda i: (0, 0)),
                pl.BlockSpec((FEAT_PAD, PRED_HIDDEN), lambda i: (0, 0)),
                pl.BlockSpec((PRED_HIDDEN, HEAD_PAD), lambda i: (0, 0)),
                pl.BlockSpec((1, PRED_HIDDEN), lambda i: (0, 0)),
                pl.BlockSpec((1, PRED_HIDDEN), lambda i: (0, 0)),
                pl.BlockSpec((1, HEAD_PAD), lambda i: (0, 0)),
            ],
            out_specs=pl.BlockSpec((tile_b, HEAD_PAD), lambda i: (i, 0)),
            scratch_shapes=[pltpu.VMEM((tile_b, FEAT_PAD), jnp.float32)],
        ),
        compiler_params=pltpu.CompilerParams(
            dimension_semantics=("parallel",)),
        cost_estimate=pl.CostEstimate(
            flops=flops, transcendentals=batch, bytes_accessed=bytes_accessed),
    )(states, actions, packed["blk_w"], packed["pred_w"], packed["head_w"],
      packed["ln_g"], packed["ln_b"], packed["head_b"])

    re = out[:, :OUT_DIM].reshape(batch, END, DIM_STATE)
    im = out[:, IM_OFF:IM_OFF + OUT_DIM].reshape(batch, END, DIM_STATE)
    return re, im


# ----------------------------- host-side packing ------------------------------
def pack_params(params):
    """Pad/fold weights once, host-side, into the kernel's operand layout."""
    # One lane-dense (128,128) block-weight matrix: block i's columns at its
    # own output lanes; row 127 = bias (matched by feature lane 127 == 1.0).
    blk_w = jnp.zeros((FEAT_PAD, FEAT_PAD), jnp.float32)
    for i, (w, b) in enumerate(params["state_blocks"] + params["action_blocks"]):
        off = BLOCK_OFF[i]
        blk_w = blk_w.at[:w.shape[0], off:off + C].set(w)
        blk_w = blk_w.at[BIAS_LANE, off:off + C].set(b[0])

    assert params["pred_w"].shape[0] == FEAT_VALID
    pred_w = jnp.zeros((FEAT_PAD, PRED_HIDDEN), jnp.float32)
    pred_w = pred_w.at[:FEAT_VALID, :].set(params["pred_w"])
    pred_w = pred_w.at[BIAS_LANE, :].set(params["pred_b"][0])   # bias fold

    head_w = jnp.zeros((PRED_HIDDEN, HEAD_PAD), jnp.float32)
    head_w = head_w.at[:, :OUT_DIM].set(params["re_w"])
    head_w = head_w.at[:, IM_OFF:IM_OFF + OUT_DIM].set(params["im_w"])
    head_b = jnp.zeros((1, HEAD_PAD), jnp.float32)
    head_b = head_b.at[:, :OUT_DIM].set(params["re_b"])
    head_b = head_b.at[:, IM_OFF:IM_OFF + OUT_DIM].set(params["im_b"])

    return {
        "blk_w": blk_w,                              # (128, 128)  f32
        "pred_w": pred_w.astype(jnp.bfloat16),       # (128, 1024) bf16
        "head_w": head_w.astype(jnp.bfloat16),       # (1024, 256) bf16
        "head_b": head_b,                            # (1, 256)    f32
        "ln_g": params["ln_g"],                      # (1, 1024)   f32
        "ln_b": params["ln_b"],                      # (1, 1024)   f32
    }


# ----------------------------- params (deterministic) -------------------------
def _linear_init(key, fan_in, fan_out):
    kw, kb = jax.random.split(key)
    bound = 1.0 / math.sqrt(fan_in)
    w = jax.random.uniform(kw, (fan_in, fan_out), jnp.float32, -bound, bound)
    b = jax.random.uniform(kb, (1, fan_out), jnp.float32, -bound, bound)
    return w, b


def init_params(key):
    keys = jax.random.split(key, 2 * NUM_LAYERS + 3)
    params = {"state_blocks": [], "action_blocks": []}
    k = 0
    in_dim = DIM_STATE
    for _ in range(NUM_LAYERS):
        params["state_blocks"].append(_linear_init(keys[k], in_dim, PER_UNIT)); k += 1
        in_dim += PER_UNIT
    in_dim += DIM_ACTION
    for _ in range(NUM_LAYERS):
        params["action_blocks"].append(_linear_init(keys[k], in_dim, PER_UNIT)); k += 1
        in_dim += PER_UNIT
    params["pred_w"], params["pred_b"] = _linear_init(keys[k], in_dim, PRED_HIDDEN); k += 1
    params["re_w"], params["re_b"] = _linear_init(keys[k], PRED_HIDDEN, OUT_DIM); k += 1
    params["im_w"], params["im_b"] = _linear_init(keys[k], PRED_HIDDEN, OUT_DIM); k += 1
    params["ln_g"] = jnp.ones((1, PRED_HIDDEN), jnp.float32)
    params["ln_b"] = jnp.zeros((1, PRED_HIDDEN), jnp.float32)
    return params


# ----------------------------- pure-JAX reference -----------------------------
def ofenet_reference(states, actions, params):
    dot = functools.partial(jnp.dot, precision=jax.lax.Precision.HIGHEST)
    feat = states
    for w, b in params["state_blocks"]:
        h = jnp.maximum(dot(feat, w) + b, 0.0)
        feat = jnp.concatenate([feat, h], axis=1)
    feat = jnp.concatenate([feat, actions], axis=1)
    for w, b in params["action_blocks"]:
        h = jnp.maximum(dot(feat, w) + b, 0.0)
        feat = jnp.concatenate([feat, h], axis=1)
    x = dot(feat, params["pred_w"]) + params["pred_b"]
    mu = jnp.mean(x, axis=-1, keepdims=True)
    var = jnp.mean(jnp.square(x - mu), axis=-1, keepdims=True)
    x = (x - mu) / jnp.sqrt(var + LN_EPS) * params["ln_g"] + params["ln_b"]
    x = jnp.maximum(x, 0.0)
    re = dot(x, params["re_w"]) + params["re_b"]
    im = dot(x, params["im_w"]) + params["im_b"]
    return re.reshape(-1, END, DIM_STATE), im.reshape(-1, END, DIM_STATE)


if __name__ == "__main__":
    key = jax.random.PRNGKey(0)
    kp, ks, ka = jax.random.split(key, 3)
    params = init_params(kp)
    packed = pack_params(params)
    states = jax.random.normal(ks, (BATCH, DIM_STATE), jnp.float32)
    actions = jax.random.normal(ka, (BATCH, DIM_ACTION), jnp.float32)

    re, im = ofenet_forward(states, actions, packed)
    jax.block_until_ready((re, im))

    re_ref, im_ref = ofenet_reference(states, actions, params)
    assert re.shape == (BATCH, END, DIM_STATE) and im.shape == (BATCH, END, DIM_STATE)
    # bf16 weights / activations on the two big matmuls (f32 accumulation).
    assert jnp.allclose(re, re_ref, atol=2e-2, rtol=2e-2), "re mismatch vs reference"
    assert jnp.allclose(im, im_ref, atol=2e-2, rtol=2e-2), "im mismatch vs reference"
    print("KERNEL_OK")
</pallas_src>

<mosaic_0001>
module attributes {stable_mosaic.version = 11 : i64} {
  func.func @ofenet_kernel(%arg0: i32, %arg1: memref<128x8xf32, #tpu.memory_space<vmem>>, %arg2: memref<128x8xf32, #tpu.memory_space<vmem>>, %arg3: memref<128x128xf32, #tpu.memory_space<vmem>>, %arg4: memref<128x1024xbf16, #tpu.memory_space<vmem>>, %arg5: memref<1024x256xbf16, #tpu.memory_space<vmem>>, %arg6: memref<1x1024xf32, #tpu.memory_space<vmem>>, %arg7: memref<1x1024xf32, #tpu.memory_space<vmem>>, %arg8: memref<1x256xf32, #tpu.memory_space<vmem>>, %arg9: memref<128x256xf32, #tpu.memory_space<vmem>>, %arg10: memref<128x128xf32, #tpu.memory_space<vmem>>) attributes {dimension_semantics = [#tpu.dimension_semantics<parallel>], iteration_bounds = array<i64: 2>, scalar_prefetch = 0 : i64, scratch_operands = 1 : i64, tpu.core_type = #tpu.core_type<tc>, window_params = [{transform_indices = @transform_0, window_bounds = array<i64: 128, 8>}, {transform_indices = @transform_1, window_bounds = array<i64: 128, 8>}, {pipeline_mode = #tpu.pipeline_mode<synchronous>, transform_indices = @transform_2, window_bounds = array<i64: 128, 128>}, {pipeline_mode = #tpu.pipeline_mode<synchronous>, transform_indices = @transform_3, window_bounds = array<i64: 128, 1024>}, {pipeline_mode = #tpu.pipeline_mode<synchronous>, transform_indices = @transform_4, window_bounds = array<i64: 1024, 256>}, {pipeline_mode = #tpu.pipeline_mode<synchronous>, transform_indices = @transform_5, window_bounds = array<i64: 1, 1024>}, {pipeline_mode = #tpu.pipeline_mode<synchronous>, transform_indices = @transform_6, window_bounds = array<i64: 1, 1024>}, {pipeline_mode = #tpu.pipeline_mode<synchronous>, transform_indices = @transform_7, window_bounds = array<i64: 1, 256>}, {transform_indices = @transform_8, window_bounds = array<i64: 128, 256>}]} {
    %cst = arith.constant 0.000000e+00 : f32
    %0 = vector.broadcast %cst : f32 to vector<128x128xf32>
    %c0 = arith.constant 0 : index
    %c0_0 = arith.constant 0 : index
    %1 = vector.load %arg10[%c0, %c0_0] : memref<128x128xf32, #tpu.memory_space<vmem>>, vector<128x128xf32>
    tpu.vector_store %arg10[%c0, %c0_0], %0 {strides = array<i32>} : memref<128x128xf32, #tpu.memory_space<vmem>>, vector<128x128xf32>,
    %c0_1 = arith.constant 0 : index
    %c0_2 = arith.constant 0 : index
    %2 = vector.load %arg1[%c0_1, %c0_2] : memref<128x8xf32, #tpu.memory_space<vmem>>, vector<128x8xf32>
    %c0_3 = arith.constant 0 : index
    %c0_4 = arith.constant 0 : index
    %3 = vector.load %arg10[%c0_3, %c0_4] : memref<128x128xf32, #tpu.memory_space<vmem>>, vector<128x8xf32>
    tpu.vector_store %arg10[%c0_3, %c0_4], %2 {strides = array<i32>} : memref<128x128xf32, #tpu.memory_space<vmem>>, vector<128x8xf32>,
    %c0_5 = arith.constant 0 : index
    %c0_6 = arith.constant 0 : index
    %4 = vector.load %arg2[%c0_5, %c0_6] : memref<128x8xf32, #tpu.memory_space<vmem>>, vector<128x8xf32>
    %c0_7 = arith.constant 0 : index
    %c40 = arith.constant 40 : index
    %5 = vector.load %arg10[%c0_7, %c40] : memref<128x128xf32, #tpu.memory_space<vmem>>, vector<128x8xf32>
    tpu.vector_store %arg10[%c0_7, %c40], %4 {strides = array<i32>} : memref<128x128xf32, #tpu.memory_space<vmem>>, vector<128x8xf32>,
    %cst_8 = arith.constant 1.000000e+00 : f32
    %6 = vector.broadcast %cst_8 : f32 to vector<128x1xf32>
    %c0_9 = arith.constant 0 : index
    %c127 = arith.constant 127 : index
    %7 = vector.load %arg10[%c0_9, %c127] : memref<128x128xf32, #tpu.memory_space<vmem>>, vector<128x1xf32>
    tpu.vector_store %arg10[%c0_9, %c127], %6 {strides = array<i32>} : memref<128x128xf32, #tpu.memory_space<vmem>>, vector<128x1xf32>,
    %c0_10 = arith.constant 0 : index
    %c0_11 = arith.constant 0 : index
    %8 = vector.load %arg10[%c0_10, %c0_11] : memref<128x128xf32, #tpu.memory_space<vmem>>, vector<128x128xf32>
    %9 = tpu.iota {dimensions = array<i32: 1>} : vector<128x128xi32>
    %c0_12 = arith.constant 0 : index
    %c0_13 = arith.constant 0 : index
    %10 = vector.load %arg3[%c0_12, %c0_13] : memref<128x128xf32, #tpu.memory_space<vmem>>, vector<128x128xf32>
    %cst_14 = arith.constant dense<0.000000e+00> : vector<128x128xf32>
    %11 = tpu.matmul %8, %10, %cst_14 {dimension_numbers = #tpu.dot_dimension_numbers<[1], [0], [0], [1], [0, 0, 1, 1], [], []>} : vector<128x128xf32>, vector<128x128xf32>, vector<128x128xf32> -> vector<128x128xf32>
    %c8_i32 = arith.constant 8 : i32
    %12 = vector.broadcast %c8_i32 : i32 to vector<128x128xi32>
    %13 = arith.cmpi sge, %9, %12 : vector<128x128xi32>
    %c16_i32 = arith.constant 16 : i32
    %14 = vector.broadcast %c16_i32 : i32 to vector<128x128xi32>
    %15 = arith.cmpi slt, %9, %14 : vector<128x128xi32>
    %16 = arith.andi %13, %15 : vector<128x128xi1>
    %cst_15 = arith.constant 0.000000e+00 : f32
    %17 = vector.broadcast %cst_15 : f32 to vector<128x128xf32>
    %18 = arith.maximumf %11, %17 : vector<128x128xf32>
    %19 = arith.select %16, %18, %8 : vector<128x128xi1>, vector<128x128xf32>
    %c0_16 = arith.constant 0 : index
    %c0_17 = arith.constant 0 : index
    %20 = vector.load %arg3[%c0_16, %c0_17] : memref<128x128xf32, #tpu.memory_space<vmem>>, vector<128x128xf32>
    %cst_18 = arith.constant dense<0.000000e+00> : vector<128x128xf32>
    %21 = tpu.matmul %19, %20, %cst_18 {dimension_numbers = #tpu.dot_dimension_numbers<[1], [0], [0], [1], [0, 0, 1, 1], [], []>} : vector<128x128xf32>, vector<128x128xf32>, vector<128x128xf32> -> vector<128x128xf32>
    %c16_i32_19 = arith.constant 16 : i32
    %22 = vector.broadcast %c16_i32_19 : i32 to vector<128x128xi32>
    %23 = arith.cmpi sge, %9, %22 : vector<128x128xi32>
    %c24_i32 = arith.constant 24 : i32
    %24 = vector.broadcast %c24_i32 : i32 to vector<128x128xi32>
    %25 = arith.cmpi slt, %9, %24 : vector<128x128xi32>
    %26 = arith.andi %23, %25 : vector<128x128xi1>
    %cst_20 = arith.constant 0.000000e+00 : f32
    %27 = vector.broadcast %cst_20 : f32 to vector<128x128xf32>
    %28 = arith.maximumf %21, %27 : vector<128x128xf32>
    %29 = arith.select %26, %28, %19 : vector<128x128xi1>, vector<128x128xf32>
    %c0_21 = arith.constant 0 : index
    %c0_22 = arith.constant 0 : index
    %30 = vector.load %arg3[%c0_21, %c0_22] : memref<128x128xf32, #tpu.memory_space<vmem>>, vector<128x128xf32>
    %cst_23 = arith.constant dense<0.000000e+00> : vector<128x128xf32>
    %31 = tpu.matmul %29, %30, %cst_23 {dimension_numbers = #tpu.dot_dimension_numbers<[1], [0], [0], [1], [0, 0, 1, 1], [], []>} : vector<128x128xf32>, vector<128x128xf32>, vector<128x128xf32> -> vector<128x128xf32>
    %c24_i32_24 = arith.constant 24 : i32
    %32 = vector.broadcast %c24_i32_24 : i32 to vector<128x128xi32>
    %33 = arith.cmpi sge, %9, %32 : vector<128x128xi32>
    %c32_i32 = arith.constant 32 : i32
    %34 = vector.broadcast %c32_i32 : i32 to vector<128x128xi32>
    %35 = arith.cmpi slt, %9, %34 : vector<128x128xi32>
    %36 = arith.andi %33, %35 : vector<128x128xi1>
    %cst_25 = arith.constant 0.000000e+00 : f32
    %37 = vector.broadcast %cst_25 : f32 to vector<128x128xf32>
    %38 = arith.maximumf %31, %37 : vector<128x128xf32>
    %39 = arith.select %36, %38, %29 : vector<128x128xi1>, vector<128x128xf32>
    %c0_26 = arith.constant 0 : index
    %c0_27 = arith.constant 0 : index
    %40 = vector.load %arg3[%c0_26, %c0_27] : memref<128x128xf32, #tpu.memory_space<vmem>>, vector<128x128xf32>
    %cst_28 = arith.constant dense<0.000000e+00> : vector<128x128xf32>
    %41 = tpu.matmul %39, %40, %cst_28 {dimension_numbers = #tpu.dot_dimension_numbers<[1], [0], [0], [1], [0, 0, 1, 1], [], []>} : vector<128x128xf32>, vector<128x128xf32>, vector<128x128xf32> -> vector<128x128xf32>
    %c32_i32_29 = arith.constant 32 : i32
    %42 = vector.broadcast %c32_i32_29 : i32 to vector<128x128xi32>
    %43 = arith.cmpi sge, %9, %42 : vector<128x128xi32>
    %c40_i32 = arith.constant 40 : i32
    %44 = vector.broadcast %c40_i32 : i32 to vector<128x128xi32>
    %45 = arith.cmpi slt, %9, %44 : vector<128x128xi32>
    %46 = arith.andi %43, %45 : vector<128x128xi1>
    %cst_30 = arith.constant 0.000000e+00 : f32
    %47 = vector.broadcast %cst_30 : f32 to vector<128x128xf32>
    %48 = arith.maximumf %41, %47 : vector<128x128xf32>
    %49 = arith.select %46, %48, %39 : vector<128x128xi1>, vector<128x128xf32>
    %c0_31 = arith.constant 0 : index
    %c0_32 = arith.constant 0 : index
    %50 = vector.load %arg3[%c0_31, %c0_32] : memref<128x128xf32, #tpu.memory_space<vmem>>, vector<128x128xf32>
    %cst_33 = arith.constant dense<0.000000e+00> : vector<128x128xf32>
    %51 = tpu.matmul %49, %50, %cst_33 {dimension_numbers = #tpu.dot_dimension_numbers<[1], [0], [0], [1], [0, 0, 1, 1], [], []>} : vector<128x128xf32>, vector<128x128xf32>, vector<128x128xf32> -> vector<128x128xf32>
    %c48_i32 = arith.constant 48 : i32
    %52 = vector.broadcast %c48_i32 : i32 to vector<128x128xi32>
    %53 = arith.cmpi sge, %9, %52 : vector<128x128xi32>
    %c56_i32 = arith.constant 56 : i32
    %54 = vector.broadcast %c56_i32 : i32 to vector<128x128xi32>
    %55 = arith.cmpi slt, %9, %54 : vector<128x128xi32>
    %56 = arith.andi %53, %55 : vector<128x128xi1>
    %cst_34 = arith.constant 0.000000e+00 : f32
    %57 = vector.broadcast %cst_34 : f32 to vector<128x128xf32>
    %58 = arith.maximumf %51, %57 : vector<128x128xf32>
    %59 = arith.select %56, %58, %49 : vector<128x128xi1>, vector<128x128xf32>
    %c0_35 = arith.constant 0 : index
    %c0_36 = arith.constant 0 : index
    %60 = vector.load %arg3[%c0_35, %c0_36] : memref<128x128xf32, #tpu.memory_space<vmem>>, vector<128x128xf32>
    %cst_37 = arith.constant dense<0.000000e+00> : vector<128x128xf32>
    %61 = tpu.matmul %59, %60, %cst_37 {dimension_numbers = #tpu.dot_dimension_numbers<[1], [0], [0], [1], [0, 0, 1, 1], [], []>} : vector<128x128xf32>, vector<128x128xf32>, vector<128x128xf32> -> vector<128x128xf32>
    %c56_i32_38 = arith.constant 56 : i32
    %62 = vector.broadcast %c56_i32_38 : i32 to vector<128x128xi32>
    %63 = arith.cmpi sge, %9, %62 : vector<128x128xi32>
    %c64_i32 = arith.constant 64 : i32
    %64 = vector.broadcast %c64_i32 : i32 to vector<128x128xi32>
    %65 = arith.cmpi slt, %9, %64 : vector<128x128xi32>
    %66 = arith.andi %63, %65 : vector<128x128xi1>
    %cst_39 = arith.constant 0.000000e+00 : f32
    %67 = vector.broadcast %cst_39 : f32 to vector<128x128xf32>
    %68 = arith.maximumf %61, %67 : vector<128x128xf32>
    %69 = arith.select %66, %68, %59 : vector<128x128xi1>, vector<128x128xf32>
    %c0_40 = arith.constant 0 : index
    %c0_41 = arith.constant 0 : index
    %70 = vector.load %arg3[%c0_40, %c0_41] : memref<128x128xf32, #tpu.memory_space<vmem>>, vector<128x128xf32>
    %cst_42 = arith.constant dense<0.000000e+00> : vector<128x128xf32>
    %71 = tpu.matmul %69, %70, %cst_42 {dimension_numbers = #tpu.dot_dimension_numbers<[1], [0], [0], [1], [0, 0, 1, 1], [], []>} : vector<128x128xf32>, vector<128x128xf32>, vector<128x128xf32> -> vector<128x128xf32>
    %c64_i32_43 = arith.constant 64 : i32
    %72 = vector.broadcast %c64_i32_43 : i32 to vector<128x128xi32>
    %73 = arith.cmpi sge, %9, %72 : vector<128x128xi32>
    %c72_i32 = arith.constant 72 : i32
    %74 = vector.broadcast %c72_i32 : i32 to vector<128x128xi32>
    %75 = arith.cmpi slt, %9, %74 : vector<128x128xi32>
    %76 = arith.andi %73, %75 : vector<128x128xi1>
    %cst_44 = arith.constant 0.000000e+00 : f32
    %77 = vector.broadcast %cst_44 : f32 to vector<128x128xf32>
    %78 = arith.maximumf %71, %77 : vector<128x128xf32>
    %79 = arith.select %76, %78, %69 : vector<128x128xi1>, vector<128x128xf32>
    %c0_45 = arith.constant 0 : index
    %c0_46 = arith.constant 0 : index
    %80 = vector.load %arg3[%c0_45, %c0_46] : memref<128x128xf32, #tpu.memory_space<vmem>>, vector<128x128xf32>
    %cst_47 = arith.constant dense<0.000000e+00> : vector<128x128xf32>
    %81 = tpu.matmul %79, %80, %cst_47 {dimension_numbers = #tpu.dot_dimension_numbers<[1], [0], [0], [1], [0, 0, 1, 1], [], []>} : vector<128x128xf32>, vector<128x128xf32>, vector<128x128xf32> -> vector<128x128xf32>
    %c72_i32_48 = arith.constant 72 : i32
    %82 = vector.broadcast %c72_i32_48 : i32 to vector<128x128xi32>
    %83 = arith.cmpi sge, %9, %82 : vector<128x128xi32>
    %c80_i32 = arith.constant 80 : i32
    %84 = vector.broadcast %c80_i32 : i32 to vector<128x128xi32>
    %85 = arith.cmpi slt, %9, %84 : vector<128x128xi32>
    %86 = arith.andi %83, %85 : vector<128x128xi1>
    %cst_49 = arith.constant 0.000000e+00 : f32
    %87 = vector.broadcast %cst_49 : f32 to vector<128x128xf32>
    %88 = arith.maximumf %81, %87 : vector<128x128xf32>
    %89 = arith.select %86, %88, %79 : vector<128x128xi1>, vector<128x128xf32>
    %90 = arith.truncf %89 : vector<128x128xf32> to vector<128x128xbf16>
    %c0_50 = arith.constant 0 : index
    %c0_51 = arith.constant 0 : index
    %91 = vector.load %arg4[%c0_50, %c0_51] : memref<128x1024xbf16, #tpu.memory_space<vmem>>, vector<128x1024xbf16>
    %cst_52 = arith.constant dense<0.000000e+00> : vector<128x1024xf32>
    %92 = tpu.matmul %90, %91, %cst_52 {dimension_numbers = #tpu.dot_dimension_numbers<[1], [0], [0], [1], [0, 0, 1, 1], [], []>} : vector<128x128xbf16>, vector<128x1024xbf16>, vector<128x1024xf32> -> vector<128x1024xf32>
    %cst_53 = arith.constant dense<0.000000e+00> : vector<128xf32>
    %93 = vector.multi_reduction <add>, %92, %cst_53 [1] : vector<128x1024xf32> to vector<128xf32>
    %94 = vector.shape_cast %93 : vector<128xf32> to vector<128x1xf32>
    %cst_54 = arith.constant 1.024000e+03 : f32
    %95 = vector.broadcast %cst_54 : f32 to vector<128x1xf32>
    %96 = arith.divf %94, %95 : vector<128x1xf32>
    %97 = arith.mulf %92, %92 : vector<128x1024xf32>
    %cst_55 = arith.constant dense<0.000000e+00> : vector<128xf32>
    %98 = vector.multi_reduction <add>, %97, %cst_55 [1] : vector<128x1024xf32> to vector<128xf32>
    %99 = vector.shape_cast %98 : vector<128xf32> to vector<128x1xf32>
    %cst_56 = arith.constant 1.024000e+03 : f32
    %100 = vector.broadcast %cst_56 : f32 to vector<128x1xf32>
    %101 = arith.divf %99, %100 : vector<128x1xf32>
    %102 = arith.mulf %96, %96 : vector<128x1xf32>
    %103 = arith.subf %101, %102 : vector<128x1xf32>
    %cst_57 = arith.constant 0.000000e+00 : f32
    %104 = vector.broadcast %cst_57 : f32 to vector<128x1xf32>
    %105 = arith.maximumf %103, %104 : vector<128x1xf32>
    %106 = vector.broadcast %96 : vector<128x1xf32> to vector<128x1024xf32>
    %107 = arith.subf %92, %106 : vector<128x1024xf32>
    %cst_58 = arith.constant 9.99999974E-6 : f32
    %108 = vector.broadcast %cst_58 : f32 to vector<128x1xf32>
    %109 = arith.addf %105, %108 : vector<128x1xf32>
    %110 = math.rsqrt %109 : vector<128x1xf32>
    %111 = vector.broadcast %110 : vector<128x1xf32> to vector<128x1024xf32>
    %112 = arith.mulf %107, %111 : vector<128x1024xf32>
    %c0_59 = arith.constant 0 : index
    %c0_60 = arith.constant 0 : index
    %113 = vector.load %arg6[%c0_59, %c0_60] : memref<1x1024xf32, #tpu.memory_space<vmem>>, vector<1x1024xf32>
    %114 = vector.broadcast %113 : vector<1x1024xf32> to vector<128x1024xf32>
    %115 = arith.mulf %112, %114 : vector<128x1024xf32>
    %c0_61 = arith.constant 0 : index
    %c0_62 = arith.constant 0 : index
    %116 = vector.load %arg7[%c0_61, %c0_62] : memref<1x1024xf32, #tpu.memory_space<vmem>>, vector<1x1024xf32>
    %117 = vector.broadcast %116 : vector<1x1024xf32> to vector<128x1024xf32>
    %118 = arith.addf %115, %117 : vector<128x1024xf32>
    %cst_63 = arith.constant 0.000000e+00 : f32
    %119 = vector.broadcast %cst_63 : f32 to vector<128x1024xf32>
    %120 = arith.maximumf %118, %119 : vector<128x1024xf32>
    %121 = arith.truncf %120 : vector<128x1024xf32> to vector<128x1024xbf16>
    %c0_64 = arith.constant 0 : index
    %c0_65 = arith.constant 0 : index
    %122 = vector.load %arg5[%c0_64, %c0_65] : memref<1024x256xbf16, #tpu.memory_space<vmem>>, vector<1024x256xbf16>
    %cst_66 = arith.constant dense<0.000000e+00> : vector<128x256xf32>
    %123 = tpu.matmul %121, %122, %cst_66 {dimension_numbers = #tpu.dot_dimension_numbers<[1], [0], [0], [1], [0, 0, 1, 1], [], []>} : vector<128x1024xbf16>, vector<1024x256xbf16>, vector<128x256xf32> -> vector<128x256xf32>
    %c0_67 = arith.constant 0 : index
    %c0_68 = arith.constant 0 : index
    %124 = vector.load %arg8[%c0_67, %c0_68] : memref<1x256xf32, #tpu.memory_space<vmem>>, vector<1x256xf32>
    %125 = vector.broadcast %124 : vector<1x256xf32> to vector<128x256xf32>
    %126 = arith.addf %123, %125 : vector<128x256xf32>
    %c0_69 = arith.constant 0 : index
    %c0_70 = arith.constant 0 : index
    %127 = vector.load %arg9[%c0_69, %c0_70] : memref<128x256xf32, #tpu.memory_space<vmem>>, vector<128x256xf32>
    tpu.vector_store %arg9[%c0_69, %c0_70], %126 {strides = array<i32>} : memref<128x256xf32, #tpu.memory_space<vmem>>, vector<128x256xf32>,
    return
  }
  func.func @transform_0(%arg0: i32) -> (i32, i32) {
    %c0_i32 = arith.constant 0 : i32
    %c0_i32_0 = arith.constant 0 : i32
    return %arg0, %c0_i32 : i32, i32
  }
  func.func @transform_1(%arg0: i32) -> (i32, i32) {
    %c0_i32 = arith.constant 0 : i32
    %c0_i32_0 = arith.constant 0 : i32
    return %arg0, %c0_i32 : i32, i32
  }
  func.func @transform_2(%arg0: i32) -> (i32, i32) {
    %c0_i32 = arith.constant 0 : i32
    %c0_i32_0 = arith.constant 0 : i32
    %c0_i32_1 = arith.constant 0 : i32
    return %c0_i32, %c0_i32_0 : i32, i32
  }
  func.func @transform_3(%arg0: i32) -> (i32, i32) {
    %c0_i32 = arith.constant 0 : i32
    %c0_i32_0 = arith.constant 0 : i32
    %c0_i32_1 = arith.constant 0 : i32
    return %c0_i32, %c0_i32_0 : i32, i32
  }
  func.func @transform_4(%arg0: i32) -> (i32, i32) {
    %c0_i32 = arith.constant 0 : i32
    %c0_i32_0 = arith.constant 0 : i32
    %c0_i32_1 = arith.constant 0 : i32
    return %c0_i32, %c0_i32_0 : i32, i32
  }
  func.func @transform_5(%arg0: i32) -> (i32, i32) {
    %c0_i32 = arith.constant 0 : i32
    %c0_i32_0 = arith.constant 0 : i32
    %c0_i32_1 = arith.constant 0 : i32
    return %c0_i32, %c0_i32_0 : i32, i32
  }
  func.func @transform_6(%arg0: i32) -> (i32, i32) {
    %c0_i32 = arith.constant 0 : i32
    %c0_i32_0 = arith.constant 0 : i32
    %c0_i32_1 = arith.constant 0 : i32
    return %c0_i32, %c0_i32_0 : i32, i32
  }
  func.func @transform_7(%arg0: i32) -> (i32, i32) {
    %c0_i32 = arith.constant 0 : i32
    %c0_i32_0 = arith.constant 0 : i32
    %c0_i32_1 = arith.constant 0 : i32
    return %c0_i32, %c0_i32_0 : i32, i32
  }
  func.func @transform_8(%arg0: i32) -> (i32, i32) {
    %c0_i32 = arith.constant 0 : i32
    %c0_i32_0 = arith.constant 0 : i32
    return %arg0, %c0_i32 : i32, i32
  }
}

</mosaic_0001>

<bundles_post_ra>
// kernel: ofenet_forward.1
= control target key start
LH: loop header
LB: loop body
LE: loop exit
PB: predicated region body
PF: predicated region fallthrough
CT: control target
= control target key end

     0   :  { %13 = vsyncpa [#allocation4], 0  ;;  %s10228_s0 = inlined_call_operand.vmem [shape: f32[256,8], index: 0, kind: input, shape index: {}]   ;;  %s10229_s1 = inlined_call_operand.vmem [shape: f32[256,8], index: 1, kind: input, shape index: {}]   ;;  %s10230_s2 = inlined_call_operand.hbm [shape: f32[128,128], index: 2, kind: input, shape index: {}]   ;;  %s10231_s3 = inlined_call_operand.vmem [shape: bf16[128,1024], index: 3, kind: input, shape index: {}]   ;;  %s10232_s4 = inlined_call_operand.hbm [shape: bf16[1024,256], index: 4, kind: input, shape index: {}]   ;;  %s10233_s5 = inlined_call_operand.vmem [shape: f32[1,1024], index: 5, kind: input, shape index: {}]   ;;  %s10234_s6 = inlined_call_operand.vmem [shape: f32[1,1024], index: 6, kind: input, shape index: {}]   ;;  %s10235_s7 = inlined_call_operand.vmem [shape: f32[1,256], index: 7, kind: input, shape index: {}]   ;;  %s10236_s8 = inlined_call_operand.vmem [shape: f32[256,256], index: 8, kind: output, shape index: {}]  }
   0x1   :  { %14 = vsyncpa [#allocation6], 0  ;;  %s6429_s27 = smov 0  }
   0x2 LB: > { %s240_s30 = sshll.u32 %s10230_s2, 4  ;;  %s5249_s9 = sadd.s32 4294967295, %s6374_s27   ;;  %s6374_s27 = sphi %s6429_s27, %s20_s27   ;;  %s241_s30 = int_to_ptr.hbm [resolvable:$true] %s240_s30 }
   0x3   : > { %p5251_p0 = scmp.ge.s32.totalorder %s6374_s27, 1  ;;  %p229_p1 = scmp.lt.s32.totalorder %s6374_s27, 3 }
   0x4   : > { %p6440_p2 = scmp.eq.s32.totalorder %s5249_s9, 0  ;;  %s6376_s12 = smov [#allocation3]  }
   0x5   : > { %p6444_p3 = pnand %p5251_p0, %p229_p1  ;;  %s242_s13 = sshll.u32 %s6376_s12, 4  ;;  %s243_s13 = int_to_ptr.vmem [resolvable:$true] %s242_s13 }
   0x6   : > { %s257_s16 = sshll.u32 %s10232_s4, 4  ;;  %s6377_s17 = smov [#allocation5]   ;;  %s258_s16 = int_to_ptr.hbm [resolvable:$true] %s257_s16 }
   0x7   : > { %p6236_p4 = pneg %p6444_p3  ;;  %s259_s18 = sshll.u32 %s6377_s17, 4  ;;  %s260_s18 = int_to_ptr.vmem [resolvable:$true] %s259_s18 }
   0x8   : > { %s6378_s19 = smov 128   ;;  %s6379_s20 = smov 8  }
   0x9   : > { %p6237_p5 = pnand %p6440_p2, %p6236_p4  ;;  %302 = sbr.rel (%p6444_p3) target bundleno = 2311 (0x907), region = 52 }
   0xb   : > { %6239 = dma.hbm_to_vmem [thread:$0]  (!%p6237_p5), %s241_s30, 2048, %s243_s13, [#allocation4], %s6378_s19, %s6378_s19, %s6379_s20  }
   0xc   : > { %6242 = dma.hbm_to_vmem [thread:$0]  (!%p6237_p5), %s258_s16, 16384, %s260_s18, [#allocation6], %s6378_s19, %s6378_s19, %s6379_s20  }
   0xe   : > { %6365 = dma.done.wait (%p6440_p2), [#allocation4], 2048  }
   0xf   : > { %6367 = vsyncadd (%p6440_p2), [#allocation4], 4294965248 }
  0x10   : > { %6369 = dma.done.wait (%p6440_p2), [#allocation6], 16384  }
  0x11   : > { %6371 = vsyncadd (%p6440_p2), [#allocation6], 4294950912  ;;  %s5258_s21 = sshll.u32 %s5249_s9, 4  ;;  %s6380_s26 = smov 40   ;;  %v6479_v2 = vld [vmem:[#allocation3 + $0x78] sm:$0xff]  ;;  %v6381_v4 = vmov 0.0  }
  0x12   : > { %p349_p6 = scmp.lt.s32.totalorder %s5258_s21, 31  ;;  %564 = vmatpush.msra.mxu0 %v6479_v2  ;;  %367 = vst [vmem:[#allocation2] sm:$0xff] %v6381_v4  ;;  %664 = vmatpush.msra.mxu1 %v6479_v2  ;;  %v6486_v5 = vld [vmem:[#allocation3 + $0x70] sm:$0xff]  ;;  %v6488_v6 = vld [vmem:[#allocation3 + $0x68] sm:$0xff]  ;;  %v6498_v9 = vld [vmem:[#allocation3 + $0x60] sm:$0xff]  ;;  %vm399_vm0 = vcmask 64512  }
  0x13   : > { %368 = vst [vmem:[#allocation2 + $0x8] sm:$0xff] %v6381_v4  ;;  %764 = vmatpush.msra.mxu2 %v6479_v2  ;;  %864 = vmatpush.msra.mxu3 %v6479_v2  ;;  %v6506_v11 = vld [vmem:[#allocation3 + $0x58] sm:$0xff]  ;;  %v6511_v12 = vld [vmem:[#allocation3 + $0x50] sm:$0xff]  ;;  %v6516_v13 = vld [vmem:[#allocation3 + $0x48] sm:$0xff]  ;;  %vm496_vm1 = vcmask 392512   ;;  %vm513_vm2 = vcmask 1048568  }
  0x14   : > { %s10854_s21 = smov (!%p349_p6, %s5258_s21), 31  ;;  %369 = vst [vmem:[#allocation2 + $0x10] sm:$0xff] %v6381_v4  ;;  %565 = vmatpush.msra.mxu0 %v6486_v5  ;;  %665 = vmatpush.msra.mxu1 %v6486_v5  ;;  %v6524_v16 = vld [vmem:[#allocation3 + $0x40] sm:$0xff]  ;;  %v6533_v18 = vld [vmem:[#allocation3 + $0x38] sm:$0xff]  ;;  %v6538_v19 = vld [vmem:[#allocation3 + $0x30] sm:$0xff]  ;;  %v6382_v39 = vmov 1.0  }
  0x15   : > { %s5259_s22 = sshll.u32 %s10854_s21, 3  ;;  %370 = vst [vmem:[#allocation2 + $0x18] sm:$0xff] %v6381_v4  ;;  %765 = vmatpush.msra.mxu2 %v6486_v5  ;;  %865 = vmatpush.msra.mxu3 %v6486_v5  ;;  %v6543_v20 = vld [vmem:[#allocation3 + $0x28] sm:$0xff]  ;;  %v6578_v27 = vld [vmem:[#allocation3 + $0x20] sm:$0xff]  ;;  %v6582_v28 = vld [vmem:[#allocation3 + $0x18] sm:$0xff]  ;;  %s6035_s15 = sshll.u32 %s10854_s21, 4 }
  0x16   : > { %s6473_s25 = scalar_lea.vmem %s10229_s1, %s5259_s22  ;;  %371 = vst [vmem:[#allocation2 + $0x20] sm:$0xff] %v6381_v4  ;;  %566 = vmatpush.msra.mxu0 %v6488_v6  ;;  %666 = vmatpush.msra.mxu1 %v6488_v6  ;;  %s6574_s30 = scalar_lea.vmem %s10228_s0, %s5259_s22  ;;  %v6584_v29 = vld [vmem:[#allocation3 + $0x10] sm:$0xff]  ;;  %v6591_v31 = vld [vmem:[#allocation3 + $0x8] sm:$0xff]  ;;  %v6603_v33 = vld [vmem:[#allocation3] sm:$0xff] }
  0x17   : > { %v416_v0 = vld [vmem:[%s6473_s25] sm:$0xff]  ;;  %v418_v1 = vld [vmem:[%s6473_s25 + $0x10] sm:$0xff]  ;;  %v417_v7 = vld [vmem:[%s6473_s25 + $0x8] sm:$0xff]  ;;  %372 = vst [vmem:[#allocation2 + $0x28] sm:$0xff] %v6381_v4  ;;  %766 = vmatpush.msra.mxu2 %v6488_v6  ;;  %866 = vmatpush.msra.mxu3 %v6488_v6  ;;  %s10040_s21 = scalar_lea.vmem %s10236_s8, %s6035_s15 }
  0x18   : > { %448 = vrot.lane.b32.xlu0 %v416_v0, %s6380_s26  ;;  %452 = vrot.lane.b32.xlu1 %v418_v1, %s6380_s26  ;;  %v420_v3 = vld [vmem:[%s6473_s25 + $0x20] sm:$0xff]  ;;  %v419_v8 = vld [vmem:[%s6473_s25 + $0x18] sm:$0xff]  ;;  %373 = vst [vmem:[#allocation2 + $0x30] sm:$0xff] %v6381_v4 }
  0x19   : > { %456 = vrot.lane.b32.xlu2 %v420_v3, %s6380_s26  ;;  %v421_v10 = vld [vmem:[%s6473_s25 + $0x28] sm:$0xff]  ;;  %374 = vst [vmem:[#allocation2 + $0x38] sm:$0xff] %v6381_v4  ;;  %567 = vmatpush.msra.mxu0 %v6498_v9  ;;  %v422_v14 = vld [vmem:[%s6473_s25 + $0x30] sm:$0xff]  ;;  %v423_v15 = vld [vmem:[%s6473_s25 + $0x38] sm:$0xff] }
  0x1a   : > { %375 = vst [vmem:[#allocation2 + $0x40] sm:$0xff] %v6381_v4  ;;  %667 = vmatpush.msra.mxu1 %v6498_v9  ;;  %767 = vmatpush.msra.mxu2 %v6498_v9  ;;  %v424_v17 = vld [vmem:[%s6473_s25 + $0x40] sm:$0xff]  ;;  %v425_v21 = vld [vmem:[%s6473_s25 + $0x48] sm:$0xff]  ;;  %v426_v22 = vld [vmem:[%s6473_s25 + $0x50] sm:$0xff] }
  0x1b   : > { %376 = vst [vmem:[#allocation2 + $0x48] sm:$0xff] %v6381_v4  ;;  %568 = vmatpush.msra.mxu0 %v6506_v11  ;;  %867 = vmatpush.msra.mxu3 %v6498_v9  ;;  %v427_v23 = vld [vmem:[%s6473_s25 + $0x58] sm:$0xff]  ;;  %v428_v24 = vld [vmem:[%s6473_s25 + $0x60] sm:$0xff]  ;;  %v429_v25 = vld [vmem:[%s6473_s25 + $0x68] sm:$0xff] }
  0x1c   : > { %377 = vst [vmem:[#allocation2 + $0x50] sm:$0xff] %v6381_v4  ;;  %668 = vmatpush.msra.mxu1 %v6506_v11  ;;  %768 = vmatpush.msra.mxu2 %v6506_v11  ;;  %v383_v26 = vld [vmem:[%s6574_s30] sm:$0xff]  ;;  %v431_v30 = vld [vmem:[%s6473_s25 + $0x78] sm:$0xff]  ;;  %v384_v32 = vld [vmem:[%s6574_s30 + $0x8] sm:$0xff] }
  0x1d   : > { %378 = vst [vmem:[#allocation2 + $0x58] sm:$0xff] %v6381_v4  ;;  %569 = vmatpush.msra.mxu0 %v6511_v12  ;;  %868 = vmatpush.msra.mxu3 %v6506_v11  ;;  %v385_v34 = vld [vmem:[%s6574_s30 + $0x10] sm:$0xff]  ;;  %v386_v36 = vld [vmem:[%s6574_s30 + $0x18] sm:$0xff]  ;;  %v387_v38 = vld [vmem:[%s6574_s30 + $0x20] sm:$0xff] }
  0x1e   : > { %379 = vst [vmem:[#allocation2 + $0x60] sm:$0xff] %v6381_v4  ;;  %669 = vmatpush.msra.mxu1 %v6511_v12  ;;  %769 = vmatpush.msra.mxu2 %v6511_v12  ;;  %v430_v35 = vld [vmem:[%s6473_s25 + $0x70] sm:$0xff]  ;;  %v388_v42 = vld [vmem:[%s6574_s30 + $0x28] sm:$0xff]  ;;  %v390_v51 = vld [vmem:[%s6574_s30 + $0x38] sm:$0xff] }
  0x1f   : > { %380 = vst [vmem:[#allocation2 + $0x68] sm:$0xff] %v6381_v4  ;;  %570 = vmatpush.msra.mxu0 %v6516_v13  ;;  %869 = vmatpush.msra.mxu3 %v6511_v12  ;;  %v389_v47 = vld [vmem:[%s6574_s30 + $0x30] sm:$0xff]  ;;  %v391_v54 = vld [vmem:[%s6574_s30 + $0x40] sm:$0xff]  ;;  %v392_v57 = vld [vmem:[%s6574_s30 + $0x48] sm:$0xff] }
  0x20   : > { %450 = vrot.lane.b32.xlu0 %v417_v7, %s6380_s26  ;;  %454 = vrot.lane.b32.xlu1 %v419_v8, %s6380_s26  ;;  %381 = vst [vmem:[#allocation2 + $0x70] sm:$0xff] %v6381_v4  ;;  %v393_v60 = vld [vmem:[%s6574_s30 + $0x50] sm:$0xff]  ;;  %v394_v63 = vld [vmem:[%s6574_s30 + $0x58] sm:$0xff] }
  0x21   : > { %458 = vrot.lane.b32.xlu2 %v421_v10, %s6380_s26  ;;  %670 = vmatpush.msra.mxu1 %v6516_v13  ;;  %382 = vst [vmem:[#allocation2 + $0x78] sm:$0xff] %v6381_v4  ;;  %v397_v7 = vld [vmem:[%s6574_s30 + $0x70] sm:$0xff]  ;;  %v398_v10 = vld [vmem:[%s6574_s30 + $0x78] sm:$0xff] }
  0x22   : > { %571 = vmatpush.msra.mxu0 %v6524_v16  ;;  %770 = vmatpush.msra.mxu2 %v6516_v13  ;;  %400 = vst.msk [vmem:[#allocation2] sm:$0xff] %vm399_vm0, %v383_v26 }
  0x23   : > { %671 = vmatpush.msra.mxu1 %v6524_v16  ;;  %870 = vmatpush.msra.mxu3 %v6516_v13  ;;  %401 = vst.msk [vmem:[#allocation2 + $0x8] sm:$0xff] %vm399_vm0, %v384_v32 }
  0x24   : > { %572 = vmatpush.msra.mxu0 %v6533_v18  ;;  %771 = vmatpush.msra.mxu2 %v6524_v16  ;;  %402 = vst.msk [vmem:[#allocation2 + $0x10] sm:$0xff] %vm399_vm0, %v385_v34 }
  0x25   : > { %672 = vmatpush.msra.mxu1 %v6533_v18  ;;  %871 = vmatpush.msra.mxu3 %v6524_v16  ;;  %403 = vst.msk [vmem:[#allocation2 + $0x18] sm:$0xff] %vm399_vm0, %v386_v36 }
  0x26   : > { %573 = vmatpush.msra.mxu0 %v6538_v19  ;;  %772 = vmatpush.msra.mxu2 %v6533_v18  ;;  %404 = vst.msk [vmem:[#allocation2 + $0x20] sm:$0xff] %vm399_vm0, %v387_v38 }
  0x27   : > { %673 = vmatpush.msra.mxu1 %v6538_v19  ;;  %872 = vmatpush.msra.mxu3 %v6533_v18  ;;  %405 = vst.msk [vmem:[#allocation2 + $0x28] sm:$0xff] %vm399_vm0, %v388_v42 }
  0x28   : > { %460 = vrot.lane.b32.xlu0 %v422_v14, %s6380_s26  ;;  %462 = vrot.lane.b32.xlu1 %v423_v15, %s6380_s26  ;;  %406 = vst.msk [vmem:[#allocation2 + $0x30] sm:$0xff] %vm399_vm0, %v389_v47 }
  0x29   : > { %464 = vrot.lane.b32.xlu2 %v424_v17, %s6380_s26  ;;  %574 = vmatpush.msra.mxu0 %v6543_v20  ;;  %407 = vst.msk [vmem:[#allocation2 + $0x38] sm:$0xff] %vm399_vm0, %v390_v51  ;;  %v546_v17 = vlaneseq }
  0x2a   : > { %674 = vmatpush.msra.mxu1 %v6543_v20  ;;  %773 = vmatpush.msra.mxu2 %v6538_v19  ;;  %408 = vst.msk [vmem:[#allocation2 + $0x40] sm:$0xff] %vm399_vm0, %v391_v54 }
  0x2b   : > { %873 = vmatpush.msra.mxu3 %v6538_v19  ;;  %575 = vmatpush.msra.mxu0 %v6578_v27  ;;  %409 = vst.msk [vmem:[#allocation2 + $0x48] sm:$0xff] %vm399_vm0, %v392_v57 }
  0x2c   : > { %774 = vmatpush.msra.mxu2 %v6543_v20  ;;  %675 = vmatpush.msra.mxu1 %v6578_v27  ;;  %410 = vst.msk [vmem:[#allocation2 + $0x50] sm:$0xff] %vm399_vm0, %v393_v60 }
  0x2d   : > { %874 = vmatpush.msra.mxu3 %v6543_v20  ;;  %576 = vmatpush.msra.mxu0 %v6582_v28  ;;  %411 = vst.msk [vmem:[#allocation2 + $0x58] sm:$0xff] %vm399_vm0, %v394_v63 }
  0x2e   : > { %775 = vmatpush.msra.mxu2 %v6578_v27  ;;  %676 = vmatpush.msra.mxu1 %v6582_v28  ;;  %414 = vst.msk [vmem:[#allocation2 + $0x70] sm:$0xff] %vm399_vm0, %v397_v7 }
  0x2f   : > { %875 = vmatpush.msra.mxu3 %v6578_v27  ;;  %577 = vmatpush.msra.mxu0 %v6584_v29  ;;  %415 = vst.msk [vmem:[#allocation2 + $0x78] sm:$0xff] %vm399_vm0, %v398_v10 }
  0x30   : > { %466 = vrot.lane.b32.xlu0 %v425_v21, %s6380_s26  ;;  %468 = vrot.lane.b32.xlu1 %v426_v22, %s6380_s26 }
  0x31   : > { %470 = vrot.lane.b32.xlu2 %v427_v23, %s6380_s26  ;;  %776 = vmatpush.msra.mxu2 %v6582_v28 }
  0x32   : > { %876 = vmatpush.msra.mxu3 %v6582_v28  ;;  %677 = vmatpush.msra.mxu1 %v6584_v29 }
  0x33   : > { %777 = vmatpush.msra.mxu2 %v6584_v29  ;;  %578 = vmatpush.msra.mxu0 %v6591_v31 }
  0x34   : > { %877 = vmatpush.msra.mxu3 %v6584_v29  ;;  %678 = vmatpush.msra.mxu1 %v6591_v31 }
  0x35   : > { %778 = vmatpush.msra.mxu2 %v6591_v31  ;;  %579 = vmatpush.msra.mxu0 %v6603_v33 }
  0x36   : > { %878 = vmatpush.msra.mxu3 %v6591_v31  ;;  %679 = vmatpush.msra.mxu1 %v6603_v33 }
  0x37   : > { %779 = vmatpush.msra.mxu2 %v6603_v33  ;;  %964 = vmatpush.msrb.mxu0 %v6479_v2 }
  0x38   : > { %472 = vrot.lane.b32.xlu0 %v428_v24, %s6380_s26  ;;  %474 = vrot.lane.b32.xlu1 %v429_v25, %s6380_s26 }
  0x39   : > { %879 = vmatpush.msra.mxu3 %v6603_v33  ;;  %1064 = vmatpush.msrb.mxu1 %v6479_v2 }
  0x3a   : > { %1164 = vmatpush.msrb.mxu2 %v6479_v2  ;;  %965 = vmatpush.msrb.mxu0 %v6486_v5 }
  0x3b   : > { %1264 = vmatpush.msrb.mxu3 %v6479_v2  ;;  %1065 = vmatpush.msrb.mxu1 %v6486_v5  ;;  %v395_v2 = vld [vmem:[%s6574_s30 + $0x60] sm:$0xff] }
  0x3c   : > { %1165 = vmatpush.msrb.mxu2 %v6486_v5  ;;  %966 = vmatpush.msrb.mxu0 %v6488_v6  ;;  %412 = vst.msk [vmem:[#allocation2 + $0x60] sm:$0xff] %vm399_vm0, %v395_v2 }
  0x3d   : > { %1265 = vmatpush.msrb.mxu3 %v6486_v5  ;;  %1066 = vmatpush.msrb.mxu1 %v6488_v6  ;;  %v396_v5 = vld [vmem:[%s6574_s30 + $0x68] sm:$0xff] }
  0x3e   : > { %1166 = vmatpush.msrb.mxu2 %v6488_v6  ;;  %967 = vmatpush.msrb.mxu0 %v6498_v9  ;;  %413 = vst.msk [vmem:[#allocation2 + $0x68] sm:$0xff] %vm399_vm0, %v396_v5 }
  0x3f   : > { %1266 = vmatpush.msrb.mxu3 %v6488_v6  ;;  %1067 = vmatpush.msrb.mxu1 %v6498_v9 }
  0x40   : > { %478 = vrot.lane.b32.xlu0 %v431_v30, %s6380_s26  ;;  %1167 = vmatpush.msrb.mxu2 %v6498_v9 }
  0x41   : > { %476 = vrot.lane.b32.xlu2 %v430_v35, %s6380_s26  ;;  %968 = vmatpush.msrb.mxu0 %v6506_v11 }
  0x42   : > { %1068 = vmatpush.msrb.mxu1 %v6506_v11  ;;  %1168 = vmatpush.msrb.mxu2 %v6506_v11 }
  0x43   : > { %969 = vmatpush.msrb.mxu0 %v6511_v12  ;;  %1267 = vmatpush.msrb.mxu3 %v6498_v9 }
  0x44   : > { %1069 = vmatpush.msrb.mxu1 %v6511_v12  ;;  %1169 = vmatpush.msrb.mxu2 %v6511_v12 }
  0x45   : > { %970 = vmatpush.msrb.mxu0 %v6516_v13  ;;  %1268 = vmatpush.msrb.mxu3 %v6506_v11 }
  0x46   : > { %1070 = vmatpush.msrb.mxu1 %v6516_v13  ;;  %1170 = vmatpush.msrb.mxu2 %v6516_v13 }
  0x47   : > { %971 = vmatpush.msrb.mxu0 %v6524_v16  ;;  %1269 = vmatpush.msrb.mxu3 %v6511_v12 }
  0x48   : > { %1071 = vmatpush.msrb.mxu1 %v6524_v16  ;;  %1171 = vmatpush.msrb.mxu2 %v6524_v16 }
  0x49   : > { %972 = vmatpush.msrb.mxu0 %v6533_v18  ;;  %1270 = vmatpush.msrb.mxu3 %v6516_v13 }
  0x4a   : > { %1072 = vmatpush.msrb.mxu1 %v6533_v18  ;;  %1172 = vmatpush.msrb.mxu2 %v6533_v18 }
  0x4b   : > { %973 = vmatpush.msrb.mxu0 %v6538_v19  ;;  %1271 = vmatpush.msrb.mxu3 %v6524_v16 }
  0x4c   : > { %1073 = vmatpush.msrb.mxu1 %v6538_v19  ;;  %1173 = vmatpush.msrb.mxu2 %v6538_v19 }
  0x4d   : > { %974 = vmatpush.msrb.mxu0 %v6543_v20  ;;  %1272 = vmatpush.msrb.mxu3 %v6533_v18 }
  0x4e   : > { %1074 = vmatpush.msrb.mxu1 %v6543_v20  ;;  %1174 = vmatpush.msrb.mxu2 %v6543_v20 }
  0x4f   : > { %975 = vmatpush.msrb.mxu0 %v6578_v27  ;;  %1273 = vmatpush.msrb.mxu3 %v6538_v19  ;;  %v6795_v19 = vand.u32 127, %v546_v17 }
  0x50   : > { %1075 = vmatpush.msrb.mxu1 %v6578_v27  ;;  %1175 = vmatpush.msrb.mxu2 %v6578_v27 }
  0x51   : > { %976 = vmatpush.msrb.mxu0 %v6582_v28  ;;  %1274 = vmatpush.msrb.mxu3 %v6543_v20  ;;  %vm629_vm3 = vcmp.ge.s32.totalorder %v6795_v19, 8  ;;  %vm630_vm4 = vcmp.lt.s32.totalorder %v6795_v19, 16  ;;  %vm729_vm6 = vcmp.ge.s32.totalorder %v6795_v19, 16  ;;  %vm730_vm7 = vcmp.lt.s32.totalorder %v6795_v19, 24 }
  0x52   : > { %1076 = vmatpush.msrb.mxu1 %v6582_v28  ;;  %1176 = vmatpush.msrb.mxu2 %v6582_v28  ;;  %vm6800_vm5 = vmand %vm629_vm3, %vm630_vm4  ;;  %vm829_vm9 = vcmp.ge.s32.totalorder %v6795_v19, 24  ;;  %vm830_vm10 = vcmp.lt.s32.totalorder %v6795_v19, 32  ;;  %vm929_vm12 = vcmp.ge.s32.totalorder %v6795_v19, 32  ;;  %vm930_vm13 = vcmp.lt.s32.totalorder %v6795_v19, 40 }
  0x53   : > { %977 = vmatpush.msrb.mxu0 %v6584_v29  ;;  %1275 = vmatpush.msrb.mxu3 %v6578_v27  ;;  %vm6900_vm8 = vmand %vm729_vm6, %vm730_vm7  ;;  %vm1029_vm15 = vcmp.ge.s32.totalorder %v6795_v19, 48  ;;  %vm1030_vm0 = vcmp.lt.s32.totalorder %v6795_v19, 56  ;;  %vm1130_vm3 = vcmp.lt.s32.totalorder %v6795_v19, 64  ;;  %vm1230_vm6 = vcmp.lt.s32.totalorder %v6795_v19, 72 }
  0x54   : > { %1077 = vmatpush.msrb.mxu1 %v6584_v29  ;;  %1177 = vmatpush.msrb.mxu2 %v6584_v29  ;;  %vm7002_vm11 = vmand %vm829_vm9, %vm830_vm10  ;;  %vm1330_vm9 = vcmp.lt.s32.totalorder %v6795_v19, 80 }
  0x55   : > { %978 = vmatpush.msrb.mxu0 %v6591_v31  ;;  %1276 = vmatpush.msrb.mxu3 %v6582_v28  ;;  %vm7104_vm14 = vmand %vm929_vm12, %vm930_vm13 }
  0x56   : > { %1078 = vmatpush.msrb.mxu1 %v6591_v31  ;;  %1178 = vmatpush.msrb.mxu2 %v6591_v31 }
  0x57   : > { %979 = vmatpush.msrb.mxu0 %v6603_v33  ;;  %1277 = vmatpush.msrb.mxu3 %v6584_v29 }
  0x58   : > { %1079 = vmatpush.msrb.mxu1 %v6603_v33  ;;  %1179 = vmatpush.msrb.mxu2 %v6603_v33 }
  0x59   : > { %1278 = vmatpush.msrb.mxu3 %v6591_v31 }
  0x5b   : > { %1279 = vmatpush.msrb.mxu3 %v6603_v33 }
  0x73   : > { %v457_v37 = vpop.permute.xlu2 %456 }
  0x74   : > { %501 = vst.msk [vmem:[#allocation2 + $0x20] sm:$0xff] %vm496_vm1, %v457_v37 }
  0x75   : > { %518 = vst.msk [vmem:[#allocation2 + $0x20] sm:$0xff] %vm513_vm2, %v6382_v39 }
  0x7b   : > { %v459_v43 = vpop.permute.xlu2 %458 }
  0x7c   : > { %502 = vst.msk [vmem:[#allocation2 + $0x28] sm:$0xff] %vm496_vm1, %v459_v43  ;;  %v6736_v58 = vld [vmem:[#allocation2 + $0x20] sm:$0xff] }
  0x7d   : > { %519 = vst.msk [vmem:[#allocation2 + $0x28] sm:$0xff] %vm513_vm2, %v6382_v39 }
  0x83   : > { %v465_v53 = vpop.permute.xlu2 %464 }
  0x84   : > { %505 = vst.msk [vmem:[#allocation2 + $0x40] sm:$0xff] %vm496_vm1, %v465_v53  ;;  %v6744_v61 = vld [vmem:[#allocation2 + $0x28] sm:$0xff] }
  0x85   : > { %522 = vst.msk [vmem:[#allocation2 + $0x40] sm:$0xff] %vm513_vm2, %v6382_v39 }
  0x8a   : > { %v449_v40 = vpop.permute.xlu0 %448  ;;  %v453_v41 = vpop.permute.xlu1 %452 }
  0x8b   : > { %497 = vst.msk [vmem:[#allocation2] sm:$0xff] %vm496_vm1, %v449_v40  ;;  %v471_v62 = vpop.permute.xlu2 %470 }
  0x8c   : > { %514 = vst.msk [vmem:[#allocation2] sm:$0xff] %vm513_vm2, %v6382_v39  ;;  %v6768_v6 = vld [vmem:[#allocation2 + $0x40] sm:$0xff] }
  0x8d   : > { %499 = vst.msk [vmem:[#allocation2 + $0x10] sm:$0xff] %vm496_vm1, %v453_v41 }
  0x8e   : > { %516 = vst.msk [vmem:[#allocation2 + $0x10] sm:$0xff] %vm513_vm2, %v6382_v39 }
  0x8f   : > { %508 = vst.msk [vmem:[#allocation2 + $0x58] sm:$0xff] %vm496_vm1, %v471_v62 }
  0x90   : > { %525 = vst.msk [vmem:[#allocation2 + $0x58] sm:$0xff] %vm513_vm2, %v6382_v39 }
  0x92   : > { %v451_v44 = vpop.permute.xlu0 %450  ;;  %v455_v45 = vpop.permute.xlu1 %454 }
  0x93   : > { %498 = vst.msk [vmem:[#allocation2 + $0x8] sm:$0xff] %vm496_vm1, %v451_v44  ;;  %v6693_v46 = vld [vmem:[#allocation2] sm:$0xff] }
  0x94   : > { %515 = vst.msk [vmem:[#allocation2 + $0x8] sm:$0xff] %vm513_vm2, %v6382_v39  ;;  %580 = vmatmul.f32.vlgmr.msra.gmra.mxu0 %v6693_v46 }
  0x95   : > { %500 = vst.msk [vmem:[#allocation2 + $0x18] sm:$0xff] %vm496_vm1, %v455_v45  ;;  %v6720_v52 = vld [vmem:[#allocation2 + $0x10] sm:$0xff] }
  0x96   : > { %517 = vst.msk [vmem:[#allocation2 + $0x18] sm:$0xff] %vm513_vm2, %v6382_v39 }
  0x97   : > { %v541_v13 = vld [vmem:[#allocation2 + $0x58] sm:$0xff] }
  0x9a   : > { %v461_v48 = vpop.permute.xlu0 %460  ;;  %v463_v50 = vpop.permute.xlu1 %462 }
  0x9b   : > { %v6709_v49 = vld [vmem:[#allocation2 + $0x8] sm:$0xff]  ;;  %503 = vst.msk [vmem:[#allocation2 + $0x30] sm:$0xff] %vm496_vm1, %v461_v48  ;;  %v477_v8 = vpop.permute.xlu2 %476 }
  0x9c   : > { %583 = vmatmul.f32.gmra.mxu0 %v6709_v49  ;;  %520 = vst.msk [vmem:[#allocation2 + $0x30] sm:$0xff] %vm513_vm2, %v6382_v39 }
  0x9d   : > { %504 = vst.msk [vmem:[#allocation2 + $0x38] sm:$0xff] %vm496_vm1, %v463_v50  ;;  %v6728_v55 = vld [vmem:[#allocation2 + $0x18] sm:$0xff] }
  0x9e   : > { %521 = vst.msk [vmem:[#allocation2 + $0x38] sm:$0xff] %vm513_vm2, %v6382_v39 }
  0x9f   : > { %511 = vst.msk [vmem:[#allocation2 + $0x70] sm:$0xff] %vm496_vm1, %v477_v8 }
  0xa0   : > { %528 = vst.msk [vmem:[#allocation2 + $0x70] sm:$0xff] %vm513_vm2, %v6382_v39 }
  0xa2   : > { %v467_v56 = vpop.permute.xlu0 %466  ;;  %v469_v59 = vpop.permute.xlu1 %468 }
  0xa3   : > { %506 = vst.msk [vmem:[#allocation2 + $0x48] sm:$0xff] %vm496_vm1, %v467_v56  ;;  %v6752_v0 = vld [vmem:[#allocation2 + $0x30] sm:$0xff] }
  0xa4   : > { %586 = vmatmul.f32.gmra.mxu0 %v6720_v52  ;;  %523 = vst.msk [vmem:[#allocation2 + $0x48] sm:$0xff] %vm513_vm2, %v6382_v39 }
  0xa5   : > { %507 = vst.msk [vmem:[#allocation2 + $0x50] sm:$0xff] %vm496_vm1, %v469_v59  ;;  %v6760_v3 = vld [vmem:[#allocation2 + $0x38] sm:$0xff] }
  0xa6   : > { %524 = vst.msk [vmem:[#allocation2 + $0x50] sm:$0xff] %vm513_vm2, %v6382_v39 }
  0xa7   : > { %v6790_v16 = vld [vmem:[#allocation2 + $0x70] sm:$0xff] }
  0xaa   : > { %v473_v1 = vpop.permute.xlu0 %472  ;;  %v475_v4 = vpop.permute.xlu1 %474 }
  0xab   : > { %509 = vst.msk [vmem:[#allocation2 + $0x60] sm:$0xff] %vm496_vm1, %v473_v1  ;;  %v6774_v9 = vld [vmem:[#allocation2 + $0x48] sm:$0xff] }
  0xac   : > { %589 = vmatmul.f32.gmra.mxu0 %v6728_v55  ;;  %526 = vst.msk [vmem:[#allocation2 + $0x60] sm:$0xff] %vm513_vm2, %v6382_v39 }
  0xad   : > { %510 = vst.msk [vmem:[#allocation2 + $0x68] sm:$0xff] %vm496_vm1, %v475_v4  ;;  %v540_v12 = vld [vmem:[#allocation2 + $0x50] sm:$0xff] }
  0xae   : > { %527 = vst.msk [vmem:[#allocation2 + $0x68] sm:$0xff] %vm513_vm2, %v6382_v39 }
  0xb2   : > { %v479_v11 = vpop.permute.xlu0 %478 }
  0xb3   : > { %512 = vst.msk [vmem:[#allocation2 + $0x78] sm:$0xff] %vm496_vm1, %v479_v11  ;;  %v6784_v14 = vld [vmem:[#allocation2 + $0x60] sm:$0xff]  ;;  %vm7206_vm1 = vmand %vm1029_vm15, %vm1030_vm0 }
  0xb4   : > { %592 = vmatmul.f32.gmra.mxu0 %v6736_v58  ;;  %529 = vst.msk [vmem:[#allocation2 + $0x78] sm:$0xff] %vm513_vm2, %v6382_v39  ;;  %vm1129_vm2 = vcmp.ge.s32.totalorder %v6795_v19, 56 }
  0xb5   : > { %v6787_v15 = vld [vmem:[#allocation2 + $0x68] sm:$0xff]  ;;  %vm7308_vm4 = vmand %vm1129_vm2, %vm1130_vm3 }
  0xbb   : > { %v6793_v18 = vld [vmem:[#allocation2 + $0x78] sm:$0xff] }
  0xbc   : > { %595 = vmatmul.f32.gmra.mxu0 %v6744_v61 }
  0xc4   : > { %598 = vmatmul.f32.gmra.mxu0 %v6752_v0 }
  0xcc   : > { %601 = vmatmul.f32.gmra.mxu0 %v6760_v3 }
  0xd4   : > { %604 = vmatmul.f32.gmra.mxu0 %v6768_v6 }
  0xdc   : > { %607 = vmatmul.f32.gmra.mxu0 %v6774_v9 }
  0xe4   : > { %610 = vmatmul.f32.gmra.mxu0 %v540_v12 }
  0xec   : > { %613 = vmatmul.f32.gmra.mxu0 %v541_v13 }
  0xf4   : > { %616 = vmatmul.f32.gmra.mxu0 %v6784_v14 }
  0xfc   : > { %619 = vmatmul.f32.gmra.mxu0 %v6787_v15 }
 0x104   : > { %622 = vmatmul.f32.gmra.mxu0 %v6790_v16 }
 0x10c   : > { %625 = vmatmul.f32.gmra.mxu0 %v6793_v18 }
 0x111   : > { %v581_v20 = vpop.f32.mrf.mxu0 }
 0x112   : > { %v632_v22 = vmax.f32 %v581_v20, 0.0 }
 0x114   : > { %v6807_v23 = vsel %vm6800_vm5, %v632_v22, %v6693_v46 }
 0x115   : > { %680 = vmatmul.f32.vlgmr.msra.gmra.mxu1 %v6807_v23 }
 0x119   : > { %v584_v24 = vpop.f32.mrf.mxu0 }
 0x11a   : > { %v633_v25 = vmax.f32 %v584_v24, 0.0 }
 0x11c   : > { %v6813_v26 = vsel %vm6800_vm5, %v633_v25, %v6709_v49 }
 0x11d   : > { %683 = vmatmul.f32.gmra.mxu1 %v6813_v26 }
 0x121   : > { %v587_v27 = vpop.f32.mrf.mxu0 }
 0x122   : > { %v634_v28 = vmax.f32 %v587_v27, 0.0 }
 0x124   : > { %v6819_v29 = vsel %vm6800_vm5, %v634_v28, %v6720_v52 }
 0x125   : > { %686 = vmatmul.f32.gmra.mxu1 %v6819_v29 }
 0x129   : > { %v590_v30 = vpop.f32.mrf.mxu0 }
 0x12a   : > { %v635_v31 = vmax.f32 %v590_v30, 0.0 }
 0x12c   : > { %v6825_v32 = vsel %vm6800_vm5, %v635_v31, %v6728_v55 }
 0x12d   : > { %689 = vmatmul.f32.gmra.mxu1 %v6825_v32 }
 0x131   : > { %v593_v33 = vpop.f32.mrf.mxu0 }
 0x132   : > { %v636_v34 = vmax.f32 %v593_v33, 0.0 }
 0x134   : > { %v6831_v35 = vsel %vm6800_vm5, %v636_v34, %v6736_v58 }
 0x135   : > { %692 = vmatmul.f32.gmra.mxu1 %v6831_v35 }
 0x139   : > { %v596_v36 = vpop.f32.mrf.mxu0 }
 0x13a   : > { %v637_v37 = vmax.f32 %v596_v36, 0.0 }
 0x13c   : > { %v6837_v38 = vsel %vm6800_vm5, %v637_v37, %v6744_v61 }
 0x13d   : > { %695 = vmatmul.f32.gmra.mxu1 %v6837_v38 }
 0x141   : > { %v599_v39 = vpop.f32.mrf.mxu0 }
 0x142   : > { %v638_v40 = vmax.f32 %v599_v39, 0.0 }
 0x144   : > { %v6843_v41 = vsel %vm6800_vm5, %v638_v40, %v6752_v0 }
 0x145   : > { %698 = vmatmul.f32.gmra.mxu1 %v6843_v41 }
 0x149   : > { %v602_v42 = vpop.f32.mrf.mxu0 }
 0x14a   : > { %v639_v43 = vmax.f32 %v602_v42, 0.0 }
 0x14c   : > { %v6849_v44 = vsel %vm6800_vm5, %v639_v43, %v6760_v3 }
 0x14d   : > { %701 = vmatmul.f32.gmra.mxu1 %v6849_v44 }
 0x151   : > { %v605_v45 = vpop.f32.mrf.mxu0 }
 0x152   : > { %v640_v46 = vmax.f32 %v605_v45, 0.0 }
 0x154   : > { %v6855_v47 = vsel %vm6800_vm5, %v640_v46, %v6768_v6 }
 0x155   : > { %704 = vmatmul.f32.gmra.mxu1 %v6855_v47 }
 0x159   : > { %v608_v48 = vpop.f32.mrf.mxu0 }
 0x15a   : > { %v641_v49 = vmax.f32 %v608_v48, 0.0 }
 0x15c   : > { %v6861_v50 = vsel %vm6800_vm5, %v641_v49, %v6774_v9 }
 0x15d   : > { %707 = vmatmul.f32.gmra.mxu1 %v6861_v50 }
 0x161   : > { %v611_v51 = vpop.f32.mrf.mxu0 }
 0x162   : > { %v642_v52 = vmax.f32 %v611_v51, 0.0 }
 0x164   : > { %v6866_v53 = vsel %vm6800_vm5, %v642_v52, %v540_v12 }
 0x165   : > { %710 = vmatmul.f32.gmra.mxu1 %v6866_v53 }
 0x169   : > { %v614_v54 = vpop.f32.mrf.mxu0 }
 0x16a   : > { %v643_v55 = vmax.f32 %v614_v54, 0.0 }
 0x16c   : > { %v6871_v56 = vsel %vm6800_vm5, %v643_v55, %v541_v13 }
 0x16d   : > { %713 = vmatmul.f32.gmra.mxu1 %v6871_v56 }
 0x171   : > { %v617_v57 = vpop.f32.mrf.mxu0 }
 0x172   : > { %v644_v58 = vmax.f32 %v617_v57, 0.0 }
 0x174   : > { %v6877_v59 = vsel %vm6800_vm5, %v644_v58, %v6784_v14 }
 0x175   : > { %716 = vmatmul.f32.gmra.mxu1 %v6877_v59 }
 0x179   : > { %v620_v60 = vpop.f32.mrf.mxu0 }
 0x17a   : > { %v645_v61 = vmax.f32 %v620_v60, 0.0 }
 0x17c   : > { %v6883_v62 = vsel %vm6800_vm5, %v645_v61, %v6787_v15 }
 0x17d   : > { %719 = vmatmul.f32.gmra.mxu1 %v6883_v62 }
 0x181   : > { %v623_v63 = vpop.f32.mrf.mxu0 }
 0x182   : > { %v646_v0 = vmax.f32 %v623_v63, 0.0 }
 0x184   : > { %v6889_v1 = vsel %vm6800_vm5, %v646_v0, %v6790_v16 }
 0x185   : > { %722 = vmatmul.f32.gmra.mxu1 %v6889_v1 }
 0x189   : > { %v626_v2 = vpop.f32.mrf.mxu0 }
 0x18a   : > { %v647_v3 = vmax.f32 %v626_v2, 0.0 }
 0x18c   : > { %v6895_v4 = vsel %vm6800_vm5, %v647_v3, %v6793_v18  ;;  %vm1229_vm5 = vcmp.ge.s32.totalorder %v6795_v19, 64 }
 0x18d   : > { %725 = vmatmul.f32.gmra.mxu1 %v6895_v4  ;;  %vm7434_vm7 = vmand %vm1229_vm5, %vm1230_vm6 }
 0x192   : > { %v681_v5 = vpop.f32.mrf.mxu1 }
 0x193   : > { %v732_v7 = vmax.f32 %v681_v5, 0.0 }
 0x195   : > { %v6907_v8 = vsel %vm6900_vm8, %v732_v7, %v6807_v23 }
 0x196   : > { %780 = vmatmul.f32.vlgmr.msra.gmra.mxu2 %v6907_v8 }
 0x19a   : > { %v684_v9 = vpop.f32.mrf.mxu1 }
 0x19b   : > { %v733_v10 = vmax.f32 %v684_v9, 0.0 }
 0x19d   : > { %v6913_v11 = vsel %vm6900_vm8, %v733_v10, %v6813_v26 }
 0x19e   : > { %783 = vmatmul.f32.gmra.mxu2 %v6913_v11 }
 0x1a2   : > { %v687_v12 = vpop.f32.mrf.mxu1 }
 0x1a3   : > { %v734_v13 = vmax.f32 %v687_v12, 0.0 }
 0x1a5   : > { %v6919_v14 = vsel %vm6900_vm8, %v734_v13, %v6819_v29 }
 0x1a6   : > { %786 = vmatmul.f32.gmra.mxu2 %v6919_v14 }
 0x1aa   : > { %v690_v15 = vpop.f32.mrf.mxu1 }
 0x1ab   : > { %v735_v16 = vmax.f32 %v690_v15, 0.0 }
 0x1ad   : > { %v6925_v17 = vsel %vm6900_vm8, %v735_v16, %v6825_v32 }
 0x1ae   : > { %789 = vmatmul.f32.gmra.mxu2 %v6925_v17 }
 0x1b2   : > { %v693_v18 = vpop.f32.mrf.mxu1 }
 0x1b3   : > { %v736_v20 = vmax.f32 %v693_v18, 0.0 }
 0x1b5   : > { %v6931_v21 = vsel %vm6900_vm8, %v736_v20, %v6831_v35 }
 0x1b6   : > { %792 = vmatmul.f32.gmra.mxu2 %v6931_v21 }
 0x1ba   : > { %v696_v22 = vpop.f32.mrf.mxu1 }
 0x1bb   : > { %v737_v23 = vmax.f32 %v696_v22, 0.0 }
 0x1bd   : > { %v6937_v24 = vsel %vm6900_vm8, %v737_v23, %v6837_v38 }
 0x1be   : > { %795 = vmatmul.f32.gmra.mxu2 %v6937_v24 }
 0x1c2   : > { %v699_v25 = vpop.f32.mrf.mxu1 }
 0x1c3   : > { %v738_v26 = vmax.f32 %v699_v25, 0.0 }
 0x1c5   : > { %v6943_v27 = vsel %vm6900_vm8, %v738_v26, %v6843_v41 }
 0x1c6   : > { %798 = vmatmul.f32.gmra.mxu2 %v6943_v27 }
 0x1ca   : > { %v702_v28 = vpop.f32.mrf.mxu1 }
 0x1cb   : > { %v739_v29 = vmax.f32 %v702_v28, 0.0 }
 0x1cd   : > { %v6949_v30 = vsel %vm6900_vm8, %v739_v29, %v6849_v44 }
 0x1ce   : > { %801 = vmatmul.f32.gmra.mxu2 %v6949_v30 }
 0x1d2   : > { %v705_v31 = vpop.f32.mrf.mxu1 }
 0x1d3   : > { %v740_v32 = vmax.f32 %v705_v31, 0.0 }
 0x1d5   : > { %v6955_v33 = vsel %vm6900_vm8, %v740_v32, %v6855_v47 }
 0x1d6   : > { %804 = vmatmul.f32.gmra.mxu2 %v6955_v33 }
 0x1da   : > { %v708_v34 = vpop.f32.mrf.mxu1 }
 0x1db   : > { %v741_v35 = vmax.f32 %v708_v34, 0.0 }
 0x1dd   : > { %v6961_v36 = vsel %vm6900_vm8, %v741_v35, %v6861_v50 }
 0x1de   : > { %807 = vmatmul.f32.gmra.mxu2 %v6961_v36 }
 0x1e2   : > { %v711_v37 = vpop.f32.mrf.mxu1 }
 0x1e3   : > { %v742_v38 = vmax.f32 %v711_v37, 0.0 }
 0x1e5   : > { %v6967_v39 = vsel %vm6900_vm8, %v742_v38, %v6866_v53 }
 0x1e6   : > { %810 = vmatmul.f32.gmra.mxu2 %v6967_v39 }
 0x1ea   : > { %v714_v40 = vpop.f32.mrf.mxu1 }
 0x1eb   : > { %v743_v41 = vmax.f32 %v714_v40, 0.0 }
 0x1ed   : > { %v6973_v42 = vsel %vm6900_vm8, %v743_v41, %v6871_v56 }
 0x1ee   : > { %813 = vmatmul.f32.gmra.mxu2 %v6973_v42 }
 0x1f2   : > { %v717_v43 = vpop.f32.mrf.mxu1 }
 0x1f3   : > { %v744_v44 = vmax.f32 %v717_v43, 0.0 }
 0x1f5   : > { %v6979_v45 = vsel %vm6900_vm8, %v744_v44, %v6877_v59 }
 0x1f6   : > { %816 = vmatmul.f32.gmra.mxu2 %v6979_v45 }
 0x1fa   : > { %v720_v46 = vpop.f32.mrf.mxu1 }
 0x1fb   : > { %v745_v47 = vmax.f32 %v720_v46, 0.0 }
 0x1fd   : > { %v6985_v48 = vsel %vm6900_vm8, %v745_v47, %v6883_v62 }
 0x1fe   : > { %819 = vmatmul.f32.gmra.mxu2 %v6985_v48 }
 0x202   : > { %v723_v49 = vpop.f32.mrf.mxu1 }
 0x203   : > { %v746_v50 = vmax.f32 %v723_v49, 0.0 }
 0x205   : > { %v6991_v51 = vsel %vm6900_vm8, %v746_v50, %v6889_v1 }
 0x206   : > { %822 = vmatmul.f32.gmra.mxu2 %v6991_v51 }
 0x20a   : > { %v726_v52 = vpop.f32.mrf.mxu1 }
 0x20b   : > { %v747_v53 = vmax.f32 %v726_v52, 0.0 }
 0x20d   : > { %v6997_v54 = vsel %vm6900_vm8, %v747_v53, %v6895_v4  ;;  %vm1329_vm8 = vcmp.ge.s32.totalorder %v6795_v19, 72 }
 0x20e   : > { %825 = vmatmul.f32.gmra.mxu2 %v6997_v54  ;;  %vm7752_vm10 = vmand %vm1329_vm8, %vm1330_vm9 }
 0x219   : > { %v781_v55 = vpop.f32.mrf.mxu2 }
 0x21a   : > { %v832_v57 = vmax.f32 %v781_v55, 0.0 }
 0x21c   : > { %v7009_v58 = vsel %vm7002_vm11, %v832_v57, %v6907_v8 }
 0x21d   : > { %880 = vmatmul.f32.vlgmr.msra.gmra.mxu3 %v7009_v58 }
 0x221   : > { %v784_v59 = vpop.f32.mrf.mxu2 }
 0x222   : > { %v833_v60 = vmax.f32 %v784_v59, 0.0 }
 0x224   : > { %v7015_v61 = vsel %vm7002_vm11, %v833_v60, %v6913_v11 }
 0x225   : > { %883 = vmatmul.f32.gmra.mxu3 %v7015_v61 }
 0x229   : > { %v787_v62 = vpop.f32.mrf.mxu2 }
 0x22a   : > { %v834_v63 = vmax.f32 %v787_v62, 0.0 }
 0x22c   : > { %v7021_v0 = vsel %vm7002_vm11, %v834_v63, %v6919_v14 }
 0x22d   : > { %886 = vmatmul.f32.gmra.mxu3 %v7021_v0 }
 0x231   : > { %v790_v1 = vpop.f32.mrf.mxu2 }
 0x232   : > { %v835_v2 = vmax.f32 %v790_v1, 0.0 }
 0x234   : > { %v7027_v3 = vsel %vm7002_vm11, %v835_v2, %v6925_v17 }
 0x235   : > { %889 = vmatmul.f32.gmra.mxu3 %v7027_v3 }
 0x239   : > { %v793_v4 = vpop.f32.mrf.mxu2 }
 0x23a   : > { %v836_v5 = vmax.f32 %v793_v4, 0.0 }
 0x23c   : > { %v7033_v6 = vsel %vm7002_vm11, %v836_v5, %v6931_v21 }
 0x23d   : > { %892 = vmatmul.f32.gmra.mxu3 %v7033_v6 }
 0x241   : > { %v796_v7 = vpop.f32.mrf.mxu2 }
 0x242   : > { %v837_v8 = vmax.f32 %v796_v7, 0.0 }
 0x244   : > { %v7039_v9 = vsel %vm7002_vm11, %v837_v8, %v6937_v24 }
 0x245   : > { %895 = vmatmul.f32.gmra.mxu3 %v7039_v9 }
 0x249   : > { %v799_v10 = vpop.f32.mrf.mxu2 }
 0x24a   : > { %v838_v11 = vmax.f32 %v799_v10, 0.0 }
 0x24c   : > { %v7045_v12 = vsel %vm7002_vm11, %v838_v11, %v6943_v27 }
 0x24d   : > { %898 = vmatmul.f32.gmra.mxu3 %v7045_v12 }
 0x251   : > { %v802_v13 = vpop.f32.mrf.mxu2 }
 0x252   : > { %v839_v14 = vmax.f32 %v802_v13, 0.0 }
 0x254   : > { %v7051_v15 = vsel %vm7002_vm11, %v839_v14, %v6949_v30 }
 0x255   : > { %901 = vmatmul.f32.gmra.mxu3 %v7051_v15 }
 0x259   : > { %v805_v16 = vpop.f32.mrf.mxu2 }
 0x25a   : > { %v840_v17 = vmax.f32 %v805_v16, 0.0 }
 0x25c   : > { %v7057_v18 = vsel %vm7002_vm11, %v840_v17, %v6955_v33 }
 0x25d   : > { %904 = vmatmul.f32.gmra.mxu3 %v7057_v18 }
 0x261   : > { %v808_v20 = vpop.f32.mrf.mxu2 }
 0x262   : > { %v841_v21 = vmax.f32 %v808_v20, 0.0 }
 0x264   : > { %v7063_v22 = vsel %vm7002_vm11, %v841_v21, %v6961_v36 }
 0x265   : > { %907 = vmatmul.f32.gmra.mxu3 %v7063_v22 }
 0x269   : > { %v811_v23 = vpop.f32.mrf.mxu2 }
 0x26a   : > { %v842_v24 = vmax.f32 %v811_v23, 0.0 }
 0x26c   : > { %v7069_v25 = vsel %vm7002_vm11, %v842_v24, %v6967_v39 }
 0x26d   : > { %910 = vmatmul.f32.gmra.mxu3 %v7069_v25 }
 0x271   : > { %v814_v26 = vpop.f32.mrf.mxu2 }
 0x272   : > { %v843_v27 = vmax.f32 %v814_v26, 0.0 }
 0x274   : > { %v7075_v28 = vsel %vm7002_vm11, %v843_v27, %v6973_v42 }
 0x275   : > { %913 = vmatmul.f32.gmra.mxu3 %v7075_v28 }
 0x279   : > { %v817_v29 = vpop.f32.mrf.mxu2 }
 0x27a   : > { %v844_v30 = vmax.f32 %v817_v29, 0.0 }
 0x27c   : > { %v7081_v31 = vsel %vm7002_vm11, %v844_v30, %v6979_v45 }
 0x27d   : > { %916 = vmatmul.f32.gmra.mxu3 %v7081_v31 }
 0x281   : > { %v820_v32 = vpop.f32.mrf.mxu2 }
 0x282   : > { %v845_v33 = vmax.f32 %v820_v32, 0.0 }
 0x284   : > { %v7087_v34 = vsel %vm7002_vm11, %v845_v33, %v6985_v48 }
 0x285   : > { %919 = vmatmul.f32.gmra.mxu3 %v7087_v34 }
 0x289   : > { %v823_v35 = vpop.f32.mrf.mxu2 }
 0x28a   : > { %v846_v36 = vmax.f32 %v823_v35, 0.0 }
 0x28c   : > { %v7093_v37 = vsel %vm7002_vm11, %v846_v36, %v6991_v51 }
 0x28d   : > { %922 = vmatmul.f32.gmra.mxu3 %v7093_v37 }
 0x291   : > { %v826_v38 = vpop.f32.mrf.mxu2 }
 0x292   : > { %v847_v39 = vmax.f32 %v826_v38, 0.0 }
 0x294   : > { %v7099_v40 = vsel %vm7002_vm11, %v847_v39, %v6997_v54 }
 0x295   : > { %925 = vmatmul.f32.gmra.mxu3 %v7099_v40 }
 0x2a0   : > { %v881_v41 = vpop.f32.mrf.mxu3 }
 0x2a1   : > { %v932_v43 = vmax.f32 %v881_v41, 0.0 }
 0x2a3   : > { %v7111_v44 = vsel %vm7104_vm14, %v932_v43, %v7009_v58 }
 0x2a4   : > { %980 = vmatmul.f32.vlgmr.msrb.gmra.mxu0 %v7111_v44 }
 0x2a8   : > { %v884_v45 = vpop.f32.mrf.mxu3 }
 0x2a9   : > { %v933_v46 = vmax.f32 %v884_v45, 0.0 }
 0x2ab   : > { %v7117_v47 = vsel %vm7104_vm14, %v933_v46, %v7015_v61 }
 0x2ac   : > { %983 = vmatmul.f32.gmra.mxu0 %v7117_v47 }
 0x2b0   : > { %v887_v48 = vpop.f32.mrf.mxu3 }
 0x2b1   : > { %v934_v49 = vmax.f32 %v887_v48, 0.0 }
 0x2b3   : > { %v7123_v50 = vsel %vm7104_vm14, %v934_v49, %v7021_v0 }
 0x2b4   : > { %986 = vmatmul.f32.gmra.mxu0 %v7123_v50 }
 0x2b8   : > { %v890_v51 = vpop.f32.mrf.mxu3 }
 0x2b9   : > { %v935_v52 = vmax.f32 %v890_v51, 0.0 }
 0x2bb   : > { %v7129_v53 = vsel %vm7104_vm14, %v935_v52, %v7027_v3 }
 0x2bc   : > { %989 = vmatmul.f32.gmra.mxu0 %v7129_v53 }
 0x2c0   : > { %v893_v54 = vpop.f32.mrf.mxu3 }
 0x2c1   : > { %v936_v55 = vmax.f32 %v893_v54, 0.0 }
 0x2c3   : > { %v7135_v56 = vsel %vm7104_vm14, %v936_v55, %v7033_v6 }
 0x2c4   : > { %992 = vmatmul.f32.gmra.mxu0 %v7135_v56 }
 0x2c8   : > { %v896_v57 = vpop.f32.mrf.mxu3 }
 0x2c9   : > { %v937_v58 = vmax.f32 %v896_v57, 0.0 }
 0x2cb   : > { %v7141_v59 = vsel %vm7104_vm14, %v937_v58, %v7039_v9 }
 0x2cc   : > { %995 = vmatmul.f32.gmra.mxu0 %v7141_v59 }
 0x2d0   : > { %v899_v60 = vpop.f32.mrf.mxu3 }
 0x2d1   : > { %v938_v61 = vmax.f32 %v899_v60, 0.0 }
 0x2d3   : > { %v7147_v62 = vsel %vm7104_vm14, %v938_v61, %v7045_v12 }
 0x2d4   : > { %998 = vmatmul.f32.gmra.mxu0 %v7147_v62 }
 0x2d8   : > { %v902_v63 = vpop.f32.mrf.mxu3 }
 0x2d9   : > { %v939_v0 = vmax.f32 %v902_v63, 0.0 }
 0x2db   : > { %v7153_v1 = vsel %vm7104_vm14, %v939_v0, %v7051_v15 }
 0x2dc   : > { %1001 = vmatmul.f32.gmra.mxu0 %v7153_v1 }
 0x2e0   : > { %v905_v2 = vpop.f32.mrf.mxu3 }
 0x2e1   : > { %v940_v3 = vmax.f32 %v905_v2, 0.0 }
 0x2e3   : > { %v7159_v4 = vsel %vm7104_vm14, %v940_v3, %v7057_v18 }
 0x2e4   : > { %1004 = vmatmul.f32.gmra.mxu0 %v7159_v4 }
 0x2e8   : > { %v908_v5 = vpop.f32.mrf.mxu3 }
 0x2e9   : > { %v941_v6 = vmax.f32 %v908_v5, 0.0 }
 0x2eb   : > { %v7165_v7 = vsel %vm7104_vm14, %v941_v6, %v7063_v22 }
 0x2ec   : > { %1007 = vmatmul.f32.gmra.mxu0 %v7165_v7 }
 0x2f0   : > { %v911_v8 = vpop.f32.mrf.mxu3 }
 0x2f1   : > { %v942_v9 = vmax.f32 %v911_v8, 0.0 }
 0x2f3   : > { %v7171_v10 = vsel %vm7104_vm14, %v942_v9, %v7069_v25 }
 0x2f4   : > { %1010 = vmatmul.f32.gmra.mxu0 %v7171_v10 }
 0x2f8   : > { %v914_v11 = vpop.f32.mrf.mxu3 }
 0x2f9   : > { %v943_v12 = vmax.f32 %v914_v11, 0.0 }
 0x2fb   : > { %v7177_v13 = vsel %vm7104_vm14, %v943_v12, %v7075_v28 }
 0x2fc   : > { %1013 = vmatmul.f32.gmra.mxu0 %v7177_v13 }
 0x300   : > { %v917_v14 = vpop.f32.mrf.mxu3 }
 0x301   : > { %v944_v15 = vmax.f32 %v917_v14, 0.0 }
 0x303   : > { %v7183_v16 = vsel %vm7104_vm14, %v944_v15, %v7081_v31 }
 0x304   : > { %1016 = vmatmul.f32.gmra.mxu0 %v7183_v16 }
 0x308   : > { %v920_v17 = vpop.f32.mrf.mxu3 }
 0x309   : > { %v945_v18 = vmax.f32 %v920_v17, 0.0 }
 0x30b   : > { %v7189_v20 = vsel %vm7104_vm14, %v945_v18, %v7087_v34 }
 0x30c   : > { %1019 = vmatmul.f32.gmra.mxu0 %v7189_v20 }
 0x310   : > { %v923_v21 = vpop.f32.mrf.mxu3 }
 0x311   : > { %v946_v22 = vmax.f32 %v923_v21, 0.0 }
 0x313   : > { %v7195_v23 = vsel %vm7104_vm14, %v946_v22, %v7093_v37 }
 0x314   : > { %1022 = vmatmul.f32.gmra.mxu0 %v7195_v23 }
 0x318   : > { %v926_v24 = vpop.f32.mrf.mxu3 }
 0x319   : > { %v947_v25 = vmax.f32 %v926_v24, 0.0 }
 0x31b   : > { %v7201_v26 = vsel %vm7104_vm14, %v947_v25, %v7099_v40 }
 0x31c   : > { %1025 = vmatmul.f32.gmra.mxu0 %v7201_v26 }
 0x321   : > { %v981_v27 = vpop.f32.mrf.mxu0 }
 0x322   : > { %v1032_v29 = vmax.f32 %v981_v27, 0.0 }
 0x324   : > { %v7213_v30 = vsel %vm7206_vm1, %v1032_v29, %v7111_v44 }
 0x325   : > { %1080 = vmatmul.f32.vlgmr.msrb.gmra.mxu1 %v7213_v30 }
 0x329   : > { %v984_v31 = vpop.f32.mrf.mxu0 }
 0x32a   : > { %v1033_v32 = vmax.f32 %v984_v31, 0.0 }
 0x32c   : > { %v7219_v33 = vsel %vm7206_vm1, %v1033_v32, %v7117_v47 }
 0x32d   : > { %1083 = vmatmul.f32.gmra.mxu1 %v7219_v33 }
 0x331   : > { %v987_v34 = vpop.f32.mrf.mxu0 }
 0x332   : > { %v1034_v35 = vmax.f32 %v987_v34, 0.0 }
 0x334   : > { %v7225_v36 = vsel %vm7206_vm1, %v1034_v35, %v7123_v50 }
 0x335   : > { %1086 = vmatmul.f32.gmra.mxu1 %v7225_v36 }
 0x339   : > { %v990_v37 = vpop.f32.mrf.mxu0 }
 0x33a   : > { %v1035_v38 = vmax.f32 %v990_v37, 0.0 }
 0x33c   : > { %v7231_v39 = vsel %vm7206_vm1, %v1035_v38, %v7129_v53 }
 0x33d   : > { %1089 = vmatmul.f32.gmra.mxu1 %v7231_v39 }
 0x341   : > { %v993_v40 = vpop.f32.mrf.mxu0 }
 0x342   : > { %v1036_v41 = vmax.f32 %v993_v40, 0.0 }
 0x344   : > { %v7237_v42 = vsel %vm7206_vm1, %v1036_v41, %v7135_v56 }
 0x345   : > { %1092 = vmatmul.f32.gmra.mxu1 %v7237_v42 }
 0x349   : > { %v996_v43 = vpop.f32.mrf.mxu0 }
 0x34a   : > { %v1037_v44 = vmax.f32 %v996_v43, 0.0 }
 0x34c   : > { %v7243_v45 = vsel %vm7206_vm1, %v1037_v44, %v7141_v59 }
 0x34d   : > { %1095 = vmatmul.f32.gmra.mxu1 %v7243_v45 }
 0x351   : > { %v999_v46 = vpop.f32.mrf.mxu0 }
 0x352   : > { %v1038_v47 = vmax.f32 %v999_v46, 0.0 }
 0x354   : > { %v7249_v48 = vsel %vm7206_vm1, %v1038_v47, %v7147_v62 }
 0x355   : > { %1098 = vmatmul.f32.gmra.mxu1 %v7249_v48 }
 0x359   : > { %v1002_v49 = vpop.f32.mrf.mxu0 }
 0x35a   : > { %v1039_v50 = vmax.f32 %v1002_v49, 0.0 }
 0x35c   : > { %v7255_v51 = vsel %vm7206_vm1, %v1039_v50, %v7153_v1 }
 0x35d   : > { %1101 = vmatmul.f32.gmra.mxu1 %v7255_v51 }
 0x361   : > { %v1005_v52 = vpop.f32.mrf.mxu0 }
 0x362   : > { %v1040_v53 = vmax.f32 %v1005_v52, 0.0 }
 0x364   : > { %v7261_v54 = vsel %vm7206_vm1, %v1040_v53, %v7159_v4 }
 0x365   : > { %1104 = vmatmul.f32.gmra.mxu1 %v7261_v54 }
 0x369   : > { %v1008_v55 = vpop.f32.mrf.mxu0 }
 0x36a   : > { %v1041_v56 = vmax.f32 %v1008_v55, 0.0 }
 0x36c   : > { %v7267_v57 = vsel %vm7206_vm1, %v1041_v56, %v7165_v7 }
 0x36d   : > { %1107 = vmatmul.f32.gmra.mxu1 %v7267_v57 }
 0x371   : > { %v1011_v58 = vpop.f32.mrf.mxu0 }
 0x372   : > { %v1042_v59 = vmax.f32 %v1011_v58, 0.0 }
 0x374   : > { %v7273_v60 = vsel %vm7206_vm1, %v1042_v59, %v7171_v10 }
 0x375   : > { %1110 = vmatmul.f32.gmra.mxu1 %v7273_v60 }
 0x379   : > { %v1014_v61 = vpop.f32.mrf.mxu0 }
 0x37a   : > { %v1043_v62 = vmax.f32 %v1014_v61, 0.0 }
 0x37c   : > { %v7279_v63 = vsel %vm7206_vm1, %v1043_v62, %v7177_v13  ;;  %v5499_v62 = vld [vmem:[%s10231_s3 + $0x1c8] sm:$0xf] }
 0x37d   : > { %1113 = vmatmul.f32.gmra.mxu1 %v7279_v63 }
 0x381   : > { %v1017_v0 = vpop.f32.mrf.mxu0 }
 0x382   : > { %v1044_v1 = vmax.f32 %v1017_v0, 0.0  ;;  %v5491_v0 = vld [vmem:[%s10231_s3 + $0x1c0] sm:$0xf] }
 0x384   : > { %v7285_v2 = vsel %vm7206_vm1, %v1044_v1, %v7183_v16 }
 0x385   : > { %1116 = vmatmul.f32.gmra.mxu1 %v7285_v2 }
 0x389   : > { %v1020_v3 = vpop.f32.mrf.mxu0 }
 0x38a   : > { %v1045_v4 = vmax.f32 %v1020_v3, 0.0  ;;  %v6093_v3 = vld [vmem:[%s10231_s3 + $0x1cc] sm:$0xf] }
 0x38c   : > { %v7291_v5 = vsel %vm7206_vm1, %v1045_v4, %v7189_v20  ;;  %v5501_v4 = vld [vmem:[%s10231_s3 + $0x1e8] sm:$0xf0] }
 0x38d   : > { %1119 = vmatmul.f32.gmra.mxu1 %v7291_v5 }
 0x391   : > { %v1023_v6 = vpop.f32.mrf.mxu0 }
 0x392   : > { %v1046_v7 = vmax.f32 %v1023_v6, 0.0  ;;  %v5504_v6 = vor.u32 %v6093_v3, %v5501_v4  ;;  %v6069_v3 = vld [vmem:[%s10231_s3 + $0x10c] sm:$0xf] }
 0x393   : > { %v5405_v4 = vld [vmem:[%s10231_s3 + $0x128] sm:$0xf0] }
 0x394   : > { %v7297_v8 = vsel %vm7206_vm1, %v1046_v7, %v7195_v23  ;;  %1903 = vmatpush.bf16.msra.mxu3 %v5504_v6  ;;  %v6092_v7 = vld [vmem:[%s10231_s3 + $0x1c4] sm:$0xf]  ;;  %v5408_v6 = vor.u32 %v6069_v3, %v5405_v4  ;;  %v5299_v3 = vld [vmem:[%s10231_s3 + $0x40] sm:$0xf] }
 0x395   : > { %1122 = vmatmul.f32.gmra.mxu1 %v7297_v8 }
 0x399   : > { %v1026_v9 = vpop.f32.mrf.mxu0 }
 0x39a   : > { %v1047_v10 = vmax.f32 %v1026_v9, 0.0 }
 0x39c   : > { %v7303_v11 = vsel %vm7206_vm1, %v1047_v10, %v7201_v26 }
 0x39d   : > { %1125 = vmatmul.f32.gmra.mxu1 %v7303_v11 }
 0x3a2   : > { %v1081_v12 = vpop.f32.mrf.mxu1 }
 0x3a3   : > { %v1132_v14 = vmax.f32 %v1081_v12, 0.0 }
 0x3a5   : > { %v7315_v15 = vsel %vm7308_vm4, %v1132_v14, %v7213_v30  ;;  %v5467_v14 = vld [vmem:[%s10231_s3 + $0x188] sm:$0xf] }
 0x3a6   : > { %1180 = vmatmul.f32.vlgmr.msrb.gmra.mxu2 %v7315_v15 }
 0x3aa   : > { %v1084_v16 = vpop.f32.mrf.mxu1 }
 0x3ab   : > { %v1133_v17 = vmax.f32 %v1084_v16, 0.0  ;;  %v6089_v16 = vld [vmem:[%s10231_s3 + $0x1a4] sm:$0xf0] }
 0x3ad   : > { %v7321_v18 = vsel %vm7308_vm4, %v1133_v17, %v7219_v33  ;;  %v5459_v17 = vld [vmem:[%s10231_s3 + $0x180] sm:$0xf] }
 0x3ae   : > { %1183 = vmatmul.f32.gmra.mxu2 %v7321_v18 }
 0x3b2   : > { %v1087_v20 = vpop.f32.mrf.mxu1 }
 0x3b3   : > { %v1134_v21 = vmax.f32 %v1087_v20, 0.0  ;;  %v5468_v20 = vor.u32 %v6089_v16, %v5467_v14 }
 0x3b5   : > { %v7327_v22 = vsel %vm7308_vm4, %v1134_v21, %v7225_v36  ;;  %v6085_v21 = vld [vmem:[%s10231_s3 + $0x18c] sm:$0xf] }
 0x3b6   : > { %1186 = vmatmul.f32.gmra.mxu2 %v7327_v22 }
 0x3ba   : > { %v1090_v23 = vpop.f32.mrf.mxu1 }
 0x3bb   : > { %v1135_v24 = vmax.f32 %v1090_v23, 0.0  ;;  %v5469_v23 = vld [vmem:[%s10231_s3 + $0x1a8] sm:$0xf0] }
 0x3bd   : > { %v7333_v25 = vsel %vm7308_vm4, %v1135_v24, %v7231_v39 }
 0x3be   : > { %1189 = vmatmul.f32.gmra.mxu2 %v7333_v25 }
 0x3c2   : > { %v1093_v26 = vpop.f32.mrf.mxu1 }
 0x3c3   : > { %v1136_v27 = vmax.f32 %v1093_v26, 0.0  ;;  %v5472_v26 = vor.u32 %v6085_v21, %v5469_v23  ;;  %v5363_v21 = vld [vmem:[%s10231_s3 + $0xc0] sm:$0xf] }
 0x3c5   : > { %v7339_v28 = vsel %vm7308_vm4, %v1136_v27, %v7237_v42  ;;  %1904 = vmatpush.bf16.msra.mxu3 %v5472_v26  ;;  %v5373_v26 = vld [vmem:[%s10231_s3 + $0xe8] sm:$0xf0] }
 0x3c6   : > { %1192 = vmatmul.f32.gmra.mxu2 %v7339_v28 }
 0x3ca   : > { %v1096_v29 = vpop.f32.mrf.mxu1 }
 0x3cb   : > { %v1137_v30 = vmax.f32 %v1096_v29, 0.0 }
 0x3cd   : > { %v7345_v31 = vsel %vm7308_vm4, %v1137_v30, %v7243_v45  ;;  %v6084_v30 = vld [vmem:[%s10231_s3 + $0x184] sm:$0xf] }
 0x3ce   : > { %1195 = vmatmul.f32.gmra.mxu2 %v7345_v31 }
 0x3d2   : > { %v1099_v32 = vpop.f32.mrf.mxu1 }
 0x3d3   : > { %v1138_v33 = vmax.f32 %v1099_v32, 0.0  ;;  %v5461_v32 = vld [vmem:[%s10231_s3 + $0x1a0] sm:$0xf0] }
 0x3d5   : > { %v7351_v34 = vsel %vm7308_vm4, %v1138_v33, %v7249_v48  ;;  %v5464_v33 = vor.u32 %v6084_v30, %v5461_v32 }
 0x3d6   : > { %1198 = vmatmul.f32.gmra.mxu2 %v7351_v34 }
 0x3da   : > { %v1102_v35 = vpop.f32.mrf.mxu1 }
 0x3db   : > { %v1139_v36 = vmax.f32 %v1102_v35, 0.0 }
 0x3dd   : > { %v7357_v37 = vsel %vm7308_vm4, %v1139_v36, %v7255_v51 }
 0x3de   : > { %1201 = vmatmul.f32.gmra.mxu2 %v7357_v37 }
 0x3e2   : > { %v1105_v38 = vpop.f32.mrf.mxu1 }
 0x3e3   : > { %v1140_v39 = vmax.f32 %v1105_v38, 0.0 }
 0x3e5   : > { %v7363_v40 = vsel %vm7308_vm4, %v1140_v39, %v7261_v54 }
 0x3e6   : > { %1204 = vmatmul.f32.gmra.mxu2 %v7363_v40 }
 0x3ea   : > { %v1108_v41 = vpop.f32.mrf.mxu1 }
 0x3eb   : > { %v1141_v42 = vmax.f32 %v1108_v41, 0.0  ;;  %v5435_v41 = vld [vmem:[%s10231_s3 + $0x148] sm:$0xf] }
 0x3ed   : > { %v7369_v43 = vsel %vm7308_vm4, %v1141_v42, %v7267_v57  ;;  %v5427_v42 = vld [vmem:[%s10231_s3 + $0x140] sm:$0xf] }
 0x3ee   : > { %1207 = vmatmul.f32.gmra.mxu2 %v7369_v43 }
 0x3f2   : > { %v1111_v44 = vpop.f32.mrf.mxu1 }
 0x3f3   : > { %v1142_v45 = vmax.f32 %v1111_v44, 0.0 }
 0x3f5   : > { %v7375_v46 = vsel %vm7308_vm4, %v1142_v45, %v7273_v60  ;;  %v6077_v45 = vld [vmem:[%s10231_s3 + $0x14c] sm:$0xf] }
 0x3f6   : > { %1210 = vmatmul.f32.gmra.mxu2 %v7375_v46 }
 0x3fa   : > { %v1114_v47 = vpop.f32.mrf.mxu1 }
 0x3fb   : > { %v1143_v48 = vmax.f32 %v1114_v47, 0.0  ;;  %v5437_v47 = vld [vmem:[%s10231_s3 + $0x168] sm:$0xf0] }
 0x3fd   : > { %v7381_v49 = vsel %vm7308_vm4, %v1143_v48, %v7279_v63  ;;  %v6097_v63 = vld [vmem:[%s10231_s3 + $0x1e4] sm:$0xf0] }
 0x3fe   : > { %1213 = vmatmul.f32.gmra.mxu2 %v7381_v49  ;;  %v5500_v1 = vor.u32 %v6097_v63, %v5499_v62 }
 0x400   : > { %1854 = vmatpush.bf16.msra.mxu2 %v5500_v1  ;;  %v5395_v1 = vld [vmem:[%s10231_s3 + $0x100] sm:$0xf] }
 0x402   : > { %v1117_v50 = vpop.f32.mrf.mxu1 }
 0x403   : > { %v1144_v51 = vmax.f32 %v1117_v50, 0.0  ;;  %v5440_v50 = vor.u32 %v6077_v45, %v5437_v47  ;;  %v5331_v45 = vld [vmem:[%s10231_s3 + $0x80] sm:$0xf] }
 0x404   : > { %1855 = vmatpush.bf16.msra.mxu2 %v5468_v20 }
 0x405   : > { %v7387_v52 = vsel %vm7308_vm4, %v1144_v51, %v7285_v2  ;;  %v6096_v2 = vld [vmem:[%s10231_s3 + $0x1dc] sm:$0xf0]  ;;  %1905 = vmatpush.bf16.msra.mxu3 %v5440_v50  ;;  %v5341_v50 = vld [vmem:[%s10231_s3 + $0xa8] sm:$0xf0] }
 0x406   : > { %1216 = vmatmul.f32.gmra.mxu2 %v7387_v52 }
 0x409   : > { %1906 = vmatpush.bf16.msra.mxu3 %v5408_v6  ;;  %v5309_v6 = vld [vmem:[%s10231_s3 + $0x68] sm:$0xf0] }
 0x40a   : > { %v1120_v53 = vpop.f32.mrf.mxu1 }
 0x40b   : > { %v1145_v54 = vmax.f32 %v1120_v53, 0.0 }
 0x40d   : > { %v7393_v55 = vsel %vm7308_vm4, %v1145_v54, %v7291_v5  ;;  %v5492_v5 = vor.u32 %v6096_v2, %v5491_v0  ;;  %v6076_v54 = vld [vmem:[%s10231_s3 + $0x144] sm:$0xf]  ;;  %v5403_v0 = vld [vmem:[%s10231_s3 + $0x108] sm:$0xf] }
 0x40e   : > { %1219 = vmatmul.f32.gmra.mxu2 %v7393_v55 }
 0x40f   : > { %1756 = vmatpush.bf16.msra.mxu0 %v5492_v5 }
 0x412   : > { %v1123_v56 = vpop.f32.mrf.mxu1 }
 0x413   : > { %v1146_v57 = vmax.f32 %v1123_v56, 0.0  ;;  %v5429_v56 = vld [vmem:[%s10231_s3 + $0x160] sm:$0xf0] }
 0x415   : > { %v7399_v58 = vsel %vm7308_vm4, %v1146_v57, %v7297_v8  ;;  %v5493_v8 = vld [vmem:[%s10231_s3 + $0x1e0] sm:$0xf0]  ;;  %v5432_v57 = vor.u32 %v6076_v54, %v5429_v56 }
 0x416   : > { %1222 = vmatmul.f32.gmra.mxu2 %v7399_v58  ;;  %v5496_v9 = vor.u32 %v6092_v7, %v5493_v8 }
 0x418   : > { %1805 = vmatpush.bf16.msra.mxu1 %v5496_v9  ;;  %v6068_v9 = vld [vmem:[%s10231_s3 + $0x104] sm:$0xf] }
 0x41a   : > { %v1126_v59 = vpop.f32.mrf.mxu1 }
 0x41b   : > { %v1147_v60 = vmax.f32 %v1126_v59, 0.0 }
 0x41c   : > { %1806 = vmatpush.bf16.msra.mxu1 %v5464_v33  ;;  %v6060_v33 = vld [vmem:[%s10231_s3 + $0xc4] sm:$0xf] }
 0x41d   : > { %v7405_v61 = vsel %vm7308_vm4, %v1147_v60, %v7303_v11  ;;  %v6091_v11 = vld [vmem:[%s10231_s3 + $0x1b4] sm:$0xf0] }
 0x41e   : > { %1225 = vmatmul.f32.gmra.mxu2 %v7405_v61 }
 0x420   : > { %1807 = vmatpush.bf16.msra.mxu1 %v5432_v57  ;;  %v6052_v57 = vld [vmem:[%s10231_s3 + $0x84] sm:$0xf] }
 0x429   : > { %v1181_v10 = vpop.f32.mrf.mxu2 }
 0x42a   : > { %v1232_v12 = vmax.f32 %v1181_v10, 0.0  ;;  %v5397_v10 = vld [vmem:[%s10231_s3 + $0x120] sm:$0xf0] }
 0x42c   : > { %v7441_v13 = vsel %vm7434_vm7, %v1232_v12, %v7315_v15  ;;  %v6088_v15 = vld [vmem:[%s10231_s3 + $0x19c] sm:$0xf0]  ;;  %v5400_v12 = vor.u32 %v6068_v9, %v5397_v10 }
 0x42d   : > { %1280 = vmatmul.f32.vlgmr.msrb.gmra.mxu3 %v7441_v13  ;;  %v5460_v24 = vor.u32 %v6088_v15, %v5459_v17  ;;  %v5371_v15 = vld [vmem:[%s10231_s3 + $0xc8] sm:$0xf] }
 0x42e   : > { %1808 = vmatpush.bf16.msra.mxu1 %v5400_v12  ;;  %v6044_v12 = vld [vmem:[%s10231_s3 + $0x44] sm:$0xf] }
 0x42f   : > { %1757 = vmatpush.bf16.msra.mxu0 %v5460_v24  ;;  %v6061_v24 = vld [vmem:[%s10231_s3 + $0xcc] sm:$0xf] }
 0x431   : > { %v1184_v27 = vpop.f32.mrf.mxu2 }
 0x432   : > { %v1233_v29 = vmax.f32 %v1184_v27, 0.0 }
 0x434   : > { %v7471_v35 = vsel %vm7434_vm7, %v1233_v29, %v7321_v18  ;;  %v6081_v18 = vld [vmem:[%s10231_s3 + $0x164] sm:$0xf0]  ;;  %v5376_v29 = vor.u32 %v6061_v24, %v5373_v26 }
 0x435   : > { %1283 = vmatmul.f32.gmra.mxu3 %v7471_v35  ;;  %v5436_v44 = vor.u32 %v6081_v18, %v5435_v41 }
 0x436   : > { %1907 = vmatpush.bf16.msra.mxu3 %v5376_v29  ;;  %v5267_v29 = vld [vmem:[%s10231_s3] sm:$0xf] }
 0x437   : > { %1856 = vmatpush.bf16.msra.mxu2 %v5436_v44 }
 0x439   : > { %v1187_v36 = vpop.f32.mrf.mxu2 }
 0x43a   : > { %v1234_v38 = vmax.f32 %v1187_v36, 0.0  ;;  %v5365_v36 = vld [vmem:[%s10231_s3 + $0xe0] sm:$0xf0] }
 0x43c   : > { %v7477_v39 = vsel %vm7434_vm7, %v1234_v38, %v7327_v22  ;;  %v6080_v22 = vld [vmem:[%s10231_s3 + $0x15c] sm:$0xf0]  ;;  %v5368_v38 = vor.u32 %v6060_v33, %v5365_v36  ;;  %v5277_v36 = vld [vmem:[%s10231_s3 + $0x28] sm:$0xf0] }
 0x43d   : > { %1286 = vmatmul.f32.gmra.mxu3 %v7477_v39  ;;  %v5428_v48 = vor.u32 %v6080_v22, %v5427_v42  ;;  %v5339_v22 = vld [vmem:[%s10231_s3 + $0x88] sm:$0xf] }
 0x43e   : > { %1809 = vmatpush.bf16.msra.mxu1 %v5368_v38  ;;  %v6036_v38 = vld [vmem:[%s10231_s3 + $0x4] sm:$0xf] }
 0x43f   : > { %1758 = vmatpush.bf16.msra.mxu0 %v5428_v48  ;;  %v6053_v48 = vld [vmem:[%s10231_s3 + $0x8c] sm:$0xf] }
 0x441   : > { %v1190_v51 = vpop.f32.mrf.mxu2 }
 0x442   : > { %v1235_v53 = vmax.f32 %v1190_v51, 0.0 }
 0x444   : > { %v7507_v59 = vsel %vm7434_vm7, %v1235_v53, %v7333_v25  ;;  %v6073_v25 = vld [vmem:[%s10231_s3 + $0x124] sm:$0xf0]  ;;  %v5344_v53 = vor.u32 %v6053_v48, %v5341_v50 }
 0x445   : > { %1289 = vmatmul.f32.gmra.mxu3 %v7507_v59  ;;  %v5404_v2 = vor.u32 %v6073_v25, %v5403_v0 }
 0x446   : > { %1908 = vmatpush.bf16.msra.mxu3 %v5344_v53  ;;  %v5507_v53 = vld [vmem:[%s10231_s3 + $0x1d0] sm:$0xf] }
 0x447   : > { %1857 = vmatpush.bf16.msra.mxu2 %v5404_v2 }
 0x449   : > { %v1193_v60 = vpop.f32.mrf.mxu2 }
 0x44a   : > { %v1236_v62 = vmax.f32 %v1193_v60, 0.0  ;;  %v5333_v60 = vld [vmem:[%s10231_s3 + $0xa0] sm:$0xf0] }
 0x44c   : > { %v7513_v63 = vsel %vm7434_vm7, %v1236_v62, %v7339_v28  ;;  %v6072_v28 = vld [vmem:[%s10231_s3 + $0x11c] sm:$0xf0]  ;;  %v5336_v62 = vor.u32 %v6052_v57, %v5333_v60  ;;  %v5517_v60 = vld [vmem:[%s10231_s3 + $0x1f8] sm:$0xf0] }
 0x44d   : > { %1292 = vmatmul.f32.gmra.mxu3 %v7513_v63  ;;  %v5396_v5 = vor.u32 %v6072_v28, %v5395_v1  ;;  %v5307_v28 = vld [vmem:[%s10231_s3 + $0x48] sm:$0xf] }
 0x44e   : > { %1810 = vmatpush.bf16.msra.mxu1 %v5336_v62  ;;  %v6094_v62 = vld [vmem:[%s10231_s3 + $0x1d4] sm:$0xf] }
 0x44f   : > { %1759 = vmatpush.bf16.msra.mxu0 %v5396_v5  ;;  %v6045_v5 = vld [vmem:[%s10231_s3 + $0x4c] sm:$0xf] }
 0x451   : > { %v1196_v7 = vpop.f32.mrf.mxu2 }
 0x452   : > { %v1237_v8 = vmax.f32 %v1196_v7, 0.0 }
 0x454   : > { %v7543_v14 = vsel %vm7434_vm7, %v1237_v8, %v7345_v31  ;;  %v6065_v31 = vld [vmem:[%s10231_s3 + $0xe4] sm:$0xf0]  ;;  %v5312_v8 = vor.u32 %v6045_v5, %v5309_v6  ;;  %v6087_v5 = vld [vmem:[%s10231_s3 + $0x19c] sm:$0xf] }
 0x455   : > { %1295 = vmatmul.f32.gmra.mxu3 %v7543_v14  ;;  %v5372_v23 = vor.u32 %v6065_v31, %v5371_v15  ;;  %v5275_v31 = vld [vmem:[%s10231_s3 + $0x8] sm:$0xf] }
 0x456   : > { %1909 = vmatpush.bf16.msra.mxu3 %v5312_v8  ;;  %v6086_v8 = vld [vmem:[%s10231_s3 + $0x194] sm:$0xf] }
 0x457   : > { %1858 = vmatpush.bf16.msra.mxu2 %v5372_v23 }
 0x459   : > { %v1199_v16 = vpop.f32.mrf.mxu2 }
 0x45a   : > { %v1238_v17 = vmax.f32 %v1199_v16, 0.0  ;;  %v5301_v16 = vld [vmem:[%s10231_s3 + $0x60] sm:$0xf0] }
 0x45c   : > { %v7549_v20 = vsel %vm7434_vm7, %v1238_v17, %v7351_v34  ;;  %v6064_v34 = vld [vmem:[%s10231_s3 + $0xdc] sm:$0xf0]  ;;  %v5304_v17 = vor.u32 %v6044_v12, %v5301_v16 }
 0x45d   : > { %1298 = vmatmul.f32.gmra.mxu3 %v7549_v20  ;;  %v5364_v27 = vor.u32 %v6064_v34, %v5363_v21  ;;  %v6041_v21 = vld [vmem:[%s10231_s3 + $0x24] sm:$0xf0] }
 0x45e   : > { %1811 = vmatpush.bf16.msra.mxu1 %v5304_v17  ;;  %v5276_v23 = vor.u32 %v6041_v21, %v5275_v31 }
 0x45f   : > { %1760 = vmatpush.bf16.msra.mxu0 %v5364_v27 }
 0x461   : > { %v1202_v30 = vpop.f32.mrf.mxu2 }
 0x462   : > { %v1239_v32 = vmax.f32 %v1202_v30, 0.0  ;;  %v6040_v30 = vld [vmem:[%s10231_s3 + $0x1c] sm:$0xf0] }
 0x463   : > { %v5268_v33 = vor.u32 %v6040_v30, %v5267_v29  ;;  %v6082_v29 = vld [vmem:[%s10231_s3 + $0x16c] sm:$0xf0]  ;;  %v6079_v30 = vld [vmem:[%s10231_s3 + $0x15c] sm:$0xf] }
 0x464   : > { %v7579_v41 = vsel %vm7434_vm7, %v1239_v32, %v7357_v37  ;;  %v6057_v37 = vld [vmem:[%s10231_s3 + $0xa4] sm:$0xf0]  ;;  %v6037_v32 = vld [vmem:[%s10231_s3 + $0xc] sm:$0xf] }
 0x465   : > { %1301 = vmatmul.f32.gmra.mxu3 %v7579_v41  ;;  %v5340_v47 = vor.u32 %v6057_v37, %v5339_v22 }
 0x467   : > { %1859 = vmatpush.bf16.msra.mxu2 %v5340_v47  ;;  %v5515_v47 = vld [vmem:[%s10231_s3 + $0x1d8] sm:$0xf] }
 0x469   : > { %v1205_v18 = vpop.f32.mrf.mxu2 }
 0x46a   : > { %v1240_v42 = vmax.f32 %v1205_v18, 0.0  ;;  %v5269_v18 = vld [vmem:[%s10231_s3 + $0x20] sm:$0xf0] }
 0x46b   : > { %v5272_v22 = vor.u32 %v6036_v38, %v5269_v18  ;;  %v5445_v38 = vld [vmem:[%s10231_s3 + $0x170] sm:$0xf0] }
 0x46c   : > { %v7585_v44 = vsel %vm7434_vm7, %v1240_v42, %v7363_v40  ;;  %v6056_v40 = vld [vmem:[%s10231_s3 + $0x9c] sm:$0xf0]  ;;  %v5280_v42 = vor.u32 %v6037_v32, %v5277_v36  ;;  %v6078_v36 = vld [vmem:[%s10231_s3 + $0x154] sm:$0xf] }
 0x46d   : > { %1304 = vmatmul.f32.gmra.mxu3 %v7585_v44  ;;  %v5332_v51 = vor.u32 %v6056_v40, %v5331_v45  ;;  %1812 = vmatpush.bf16.msra.mxu1 %v5272_v22  ;;  %v6099_v40 = vld [vmem:[%s10231_s3 + $0x1f4] sm:$0xf0] }
 0x46e   : > { %1910 = vmatpush.bf16.msra.mxu3 %v5280_v42  ;;  %v5516_v48 = vor.u32 %v6099_v40, %v5515_v47  ;;  %v5448_v42 = vor.u32 %v6078_v36, %v5445_v38  ;;  %v6055_v36 = vld [vmem:[%s10231_s3 + $0x9c] sm:$0xf] }
 0x46f   : > { %1761 = vmatpush.bf16.msra.mxu0 %v5332_v51 }
 0x471   : > { %v1208_v54 = vpop.f32.mrf.mxu2 }
 0x472   : > { %v1241_v56 = vmax.f32 %v1208_v54, 0.0  ;;  %v6095_v54 = vld [vmem:[%s10231_s3 + $0x1dc] sm:$0xf] }
 0x474   : > { %v7615_v0 = vsel %vm7434_vm7, %v1241_v56, %v7369_v43  ;;  %v6049_v43 = vld [vmem:[%s10231_s3 + $0x64] sm:$0xf0] }
 0x475   : > { %1307 = vmatmul.f32.gmra.mxu3 %v7615_v0  ;;  %v5308_v4 = vor.u32 %v6049_v43, %v5307_v28 }
 0x477   : > { %1860 = vmatpush.bf16.msra.mxu2 %v5308_v4  ;;  %v5475_v4 = vld [vmem:[%s10231_s3 + $0x190] sm:$0xf] }
 0x479   : > { %v1211_v25 = vpop.f32.mrf.mxu2 }
 0x47a   : > { %v1242_v1 = vmax.f32 %v1211_v25, 0.0  ;;  %v5509_v25 = vld [vmem:[%s10231_s3 + $0x1f0] sm:$0xf0] }
 0x47b   : > { %1861 = vmatpush.bf16.msra.mxu2 %v5276_v23  ;;  %v5512_v28 = vor.u32 %v6094_v62, %v5509_v25  ;;  %v6070_v62 = vld [vmem:[%s10231_s3 + $0x114] sm:$0xf] }
 0x47c   : > { %v7621_v2 = vsel %vm7434_vm7, %v1242_v1, %v7375_v46  ;;  %v6048_v46 = vld [vmem:[%s10231_s3 + $0x5c] sm:$0xf0]  ;;  %v5520_v1 = vor.u32 %v6095_v54, %v5517_v60  ;;  %v6071_v54 = vld [vmem:[%s10231_s3 + $0x11c] sm:$0xf]  ;;  %v5413_v25 = vld [vmem:[%s10231_s3 + $0x130] sm:$0xf0] }
 0x47d   : > { %1310 = vmatmul.f32.gmra.mxu3 %v7621_v2  ;;  %v5300_v7 = vor.u32 %v6048_v46, %v5299_v3  ;;  %2001 = vmatpush.bf16.msrb.mxu1 %v5512_v28  ;;  %v6090_v46 = vld [vmem:[%s10231_s3 + $0x1ac] sm:$0xf0]  ;;  %v5421_v60 = vld [vmem:[%s10231_s3 + $0x138] sm:$0xf0]  ;;  %v5416_v28 = vor.u32 %v6070_v62, %v5413_v25 }
 0x47e   : > { %2099 = vmatpush.bf16.msrb.mxu3 %v5520_v1  ;;  %v5476_v6 = vor.u32 %v6090_v46, %v5475_v4  ;;  %v5424_v1 = vor.u32 %v6071_v54, %v5421_v60  ;;  %v5315_v54 = vld [vmem:[%s10231_s3 + $0x50] sm:$0xf]  ;;  %v6047_v60 = vld [vmem:[%s10231_s3 + $0x5c] sm:$0xf] }
 0x47f   : > { %1762 = vmatpush.bf16.msra.mxu0 %v5300_v7  ;;  %2050 = vmatpush.bf16.msrb.mxu2 %v5516_v48  ;;  %v5485_v7 = vld [vmem:[%s10231_s3 + $0x1b8] sm:$0xf0] }
 0x480   : > { %v5325_v25 = vld [vmem:[%s10231_s3 + $0x78] sm:$0xf0] }
 0x481   : > { %v1214_v9 = vpop.f32.mrf.mxu2 }
 0x482   : > { %v1243_v10 = vmax.f32 %v1214_v9, 0.0  ;;  %v5477_v9 = vld [vmem:[%s10231_s3 + $0x1b0] sm:$0xf0] }
 0x483   : > { %1763 = vmatpush.bf16.msra.mxu0 %v5268_v33  ;;  %v5480_v12 = vor.u32 %v6086_v8, %v5477_v9  ;;  %v5453_v33 = vld [vmem:[%s10231_s3 + $0x178] sm:$0xf0]  ;;  %v6066_v8 = vld [vmem:[%s10231_s3 + $0xec] sm:$0xf0] }
 0x484   : > { %v7651_v15 = vsel %vm7434_vm7, %v1243_v10, %v7381_v49  ;;  %v5488_v10 = vor.u32 %v6087_v5, %v5485_v7  ;;  %v5456_v18 = vor.u32 %v6079_v30, %v5453_v33  ;;  %v5387_v5 = vld [vmem:[%s10231_s3 + $0xd8] sm:$0xf]  ;;  %v5379_v7 = vld [vmem:[%s10231_s3 + $0xd0] sm:$0xf]  ;;  %v6063_v9 = vld [vmem:[%s10231_s3 + $0xdc] sm:$0xf] }
 0x485   : > { %1313 = vmatmul.f32.gmra.mxu3 %v7651_v15  ;;  %2002 = vmatpush.bf16.msrb.mxu1 %v5480_v12  ;;  %v5389_v12 = vld [vmem:[%s10231_s3 + $0xf8] sm:$0xf0]  ;;  %v6058_v33 = vld [vmem:[%s10231_s3 + $0xac] sm:$0xf0] }
 0x486   : > { %2100 = vmatpush.bf16.msrb.mxu3 %v5488_v10  ;;  %v5380_v10 = vor.u32 %v6066_v8, %v5379_v7 }
 0x489   : > { %v1217_v34 = vpop.f32.mrf.mxu2  ;;  %2003 = vmatpush.bf16.msrb.mxu1 %v5448_v42  ;;  %v6054_v42 = vld [vmem:[%s10231_s3 + $0x94] sm:$0xf] }
 0x48a   : > { %v1244_v24 = vmax.f32 %v1217_v34, 0.0  ;;  %2101 = vmatpush.bf16.msrb.mxu3 %v5456_v18  ;;  %v5357_v18 = vld [vmem:[%s10231_s3 + $0xb8] sm:$0xf0] }
 0x48c   : > { %v7663_v49 = vsel %vm7434_vm7, %v1244_v24, %v7387_v52  ;;  %v5451_v24 = vld [vmem:[%s10231_s3 + $0x158] sm:$0xf] }
 0x48d   : > { %1316 = vmatmul.f32.gmra.mxu3 %v7663_v49  ;;  %2004 = vmatpush.bf16.msrb.mxu1 %v5416_v28  ;;  %v5317_v28 = vld [vmem:[%s10231_s3 + $0x70] sm:$0xf0] }
 0x48e   : > { %2102 = vmatpush.bf16.msrb.mxu3 %v5424_v1  ;;  %v6046_v1 = vld [vmem:[%s10231_s3 + $0x54] sm:$0xf] }
 0x491   : > { %v1220_v26 = vpop.f32.mrf.mxu2 }
 0x492   : > { %v1245_v27 = vmax.f32 %v1220_v26, 0.0 }
 0x494   : > { %v7678_v52 = vsel %vm7434_vm7, %v1245_v27, %v7393_v55  ;;  %v5443_v27 = vld [vmem:[%s10231_s3 + $0x150] sm:$0xf] }
 0x495   : > { %1319 = vmatmul.f32.gmra.mxu3 %v7678_v52  ;;  %v5444_v32 = vor.u32 %v6082_v29, %v5443_v27  ;;  %v5355_v29 = vld [vmem:[%s10231_s3 + $0x98] sm:$0xf] }
 0x499   : > { %v1223_v55 = vpop.f32.mrf.mxu2 }
 0x49a   : > { %v1246_v37 = vmax.f32 %v1223_v55, 0.0 }
 0x49c   : > { %v7693_v45 = vsel %vm7434_vm7, %v1246_v37, %v7399_v58  ;;  %v6098_v58 = vld [vmem:[%s10231_s3 + $0x1ec] sm:$0xf0] }
 0x49d   : > { %1322 = vmatmul.f32.gmra.mxu3 %v7693_v45  ;;  %v5508_v57 = vor.u32 %v6098_v58, %v5507_v53  ;;  %v5411_v53 = vld [vmem:[%s10231_s3 + $0x110] sm:$0xf] }
 0x49e   : > { %v6074_v58 = vld [vmem:[%s10231_s3 + $0x12c] sm:$0xf0] }
 0x49f   : > { %1952 = vmatpush.bf16.msrb.mxu0 %v5508_v57  ;;  %v5412_v57 = vor.u32 %v6074_v58, %v5411_v53  ;;  %v5323_v53 = vld [vmem:[%s10231_s3 + $0x58] sm:$0xf] }
 0x4a1   : > { %v1226_v50 = vpop.f32.mrf.mxu2 }
 0x4a2   : > { %v1247_v51 = vmax.f32 %v1226_v50, 0.0  ;;  %v5419_v50 = vld [vmem:[%s10231_s3 + $0x118] sm:$0xf] }
 0x4a3   : > { %1953 = vmatpush.bf16.msrb.mxu0 %v5476_v6 }
 0x4a4   : > { %v7714_v56 = vsel %vm7434_vm7, %v1247_v51, %v7405_v61  ;;  %v5483_v61 = vld [vmem:[%s10231_s3 + $0x198] sm:$0xf] }
 0x4a5   : > { %1325 = vmatmul.f32.gmra.mxu3 %v7714_v56  ;;  %v5484_v3 = vor.u32 %v6091_v11, %v5483_v61 }
 0x4a7   : > { %2051 = vmatpush.bf16.msrb.mxu2 %v5484_v3  ;;  %1954 = vmatpush.bf16.msrb.mxu0 %v5444_v32  ;;  %v5347_v32 = vld [vmem:[%s10231_s3 + $0x90] sm:$0xf] }
 0x4a8   : > { %v5348_v38 = vor.u32 %v6058_v33, %v5347_v32 }
 0x4ab   : > { %1955 = vmatpush.bf16.msrb.mxu0 %v5412_v57  ;;  %v6050_v57 = vld [vmem:[%s10231_s3 + $0x6c] sm:$0xf0] }
 0x4ac   : > { %v5316_v62 = vor.u32 %v6050_v57, %v5315_v54 }
 0x4af   : > { %1956 = vmatpush.bf16.msrb.mxu0 %v5380_v10  ;;  %v6039_v10 = vld [vmem:[%s10231_s3 + $0x1c] sm:$0xf] }
 0x4b0   : > { %v1281_v43 = vpop.f32.mrf.mxu3 }
 0x4b1   : > { %v1332_v16 = vmax.f32 %v1281_v43, 0.0 }
 0x4b3   : > { %v1348_v23 = vsel %vm7752_vm10, %v1332_v16, %v7441_v13  ;;  %v6083_v13 = vld [vmem:[%s10231_s3 + $0x174] sm:$0xf0]  ;;  %v6062_v16 = vld [vmem:[%s10231_s3 + $0xd4] sm:$0xf]  ;;  %1957 = vmatpush.bf16.msrb.mxu0 %v5348_v38 }
 0x4b7   : > { %1958 = vmatpush.bf16.msrb.mxu0 %v5316_v62 }
 0x4b8   : > { %v1284_v31 = vpop.f32.mrf.mxu3 }
 0x4b9   : > { %v1333_v21 = vmax.f32 %v1284_v31, 0.0  ;;  %v5381_v31 = vld [vmem:[%s10231_s3 + $0xf0] sm:$0xf0] }
 0x4bb   : > { %v1349_v19 = vsel %vm7752_vm10, %v1333_v21, %v7471_v35  ;;  %v5452_v35 = vor.u32 %v6083_v13, %v5451_v24  ;;  %v5392_v21 = vor.u32 %v6063_v9, %v5389_v12  ;;  %v6042_v9 = vld [vmem:[%s10231_s3 + $0x2c] sm:$0xf0]  ;;  %v5293_v12 = vld [vmem:[%s10231_s3 + $0x38] sm:$0xf0] }
 0x4bc   : > { %v7762_v34 = vpack.c.bf16 %v1349_v19, %v1348_v23  ;;  %v5384_v23 = vor.u32 %v6062_v16, %v5381_v31  ;;  %v5296_v31 = vor.u32 %v6039_v10, %v5293_v12 }
 0x4bd   : > { %2052 = vmatpush.bf16.msrb.mxu2 %v5452_v35  ;;  %2103 = vmatpush.bf16.msrb.mxu3 %v5392_v21  ;;  %v6038_v21 = vld [vmem:[%s10231_s3 + $0x14] sm:$0xf] }
 0x4be   : > { %1764 = vmatmul.bf16.vlgmr.msra.gmra.mxu0 %v7762_v34  ;;  %1813 = vmatmul.bf16.vlgmr.msra.gmra.mxu1 %v7762_v34 }
 0x4bf   : > { %1862 = vmatmul.bf16.vlgmr.msra.gmra.mxu2 %v7762_v34  ;;  %1911 = vmatmul.bf16.vlgmr.msra.gmra.mxu3 %v7762_v34 }
 0x4c0   : > { %v1287_v26 = vpop.f32.mrf.mxu3  ;;  %2005 = vmatpush.bf16.msrb.mxu1 %v5384_v23  ;;  %v5285_v23 = vld [vmem:[%s10231_s3 + $0x30] sm:$0xf0] }
 0x4c1   : > { %v1334_v22 = vmax.f32 %v1287_v26, 0.0 }
 0x4c3   : > { %v1350_v47 = vsel %vm7752_vm10, %v1334_v22, %v7477_v39  ;;  %v6075_v39 = vld [vmem:[%s10231_s3 + $0x134] sm:$0xf0]  ;;  %v5349_v22 = vld [vmem:[%s10231_s3 + $0xb0] sm:$0xf0] }
 0x4c8   : > { %v1290_v55 = vpop.f32.mrf.mxu3 }
 0x4c9   : > { %v1335_v37 = vmax.f32 %v1290_v55, 0.0  ;;  %v5360_v55 = vor.u32 %v6055_v36, %v5357_v18 }
 0x4cb   : > { %v1351_v40 = vsel %vm7752_vm10, %v1335_v37, %v7507_v59  ;;  %v5420_v59 = vor.u32 %v6075_v39, %v5419_v50  ;;  %v5352_v37 = vor.u32 %v6054_v42, %v5349_v22  ;;  %2104 = vmatpush.bf16.msrb.mxu3 %v5360_v55 }
 0x4cc   : > { %v7798_v48 = vpack.c.bf16 %v1351_v40, %v1350_v47 }
 0x4cd   : > { %2053 = vmatpush.bf16.msrb.mxu2 %v5420_v59  ;;  %2006 = vmatpush.bf16.msrb.mxu1 %v5352_v37 }
 0x4ce   : > { %1769 = vmatmul.bf16.gmra.mxu0 %v7798_v48  ;;  %1818 = vmatmul.bf16.gmra.mxu1 %v7798_v48 }
 0x4cf   : > { %1867 = vmatmul.bf16.gmra.mxu2 %v7798_v48  ;;  %1916 = vmatmul.bf16.gmra.mxu3 %v7798_v48 }
 0x4d0   : > { %v1293_v51 = vpop.f32.mrf.mxu3 }
 0x4d1   : > { %v1336_v61 = vmax.f32 %v1293_v51, 0.0 }
 0x4d3   : > { %v1352_v3 = vsel %vm7752_vm10, %v1336_v61, %v7513_v63  ;;  %v6067_v63 = vld [vmem:[%s10231_s3 + $0xf4] sm:$0xf0]  ;;  %v5328_v61 = vor.u32 %v6047_v60, %v5325_v25 }
 0x4d5   : > { %2105 = vmatpush.bf16.msrb.mxu3 %v5328_v61 }
 0x4d8   : > { %v1296_v11 = vpop.f32.mrf.mxu3 }
 0x4d9   : > { %v1337_v43 = vmax.f32 %v1296_v11, 0.0  ;;  %v5320_v11 = vor.u32 %v6046_v1, %v5317_v28  ;;  %2106 = vmatpush.bf16.msrb.mxu3 %v5296_v31 }
 0x4db   : > { %v1353_v4 = vsel %vm7752_vm10, %v1337_v43, %v7543_v14  ;;  %v5388_v14 = vor.u32 %v6067_v63, %v5387_v5  ;;  %2007 = vmatpush.bf16.msrb.mxu1 %v5320_v11 }
 0x4dc   : > { %v7834_v46 = vpack.c.bf16 %v1353_v4, %v1352_v3 }
 0x4dd   : > { %2054 = vmatpush.bf16.msrb.mxu2 %v5388_v14  ;;  %v5291_v14 = vld [vmem:[%s10231_s3 + $0x18] sm:$0xf] }
 0x4de   : > { %1774 = vmatmul.bf16.gmra.mxu0 %v7834_v46  ;;  %1823 = vmatmul.bf16.gmra.mxu1 %v7834_v46 }
 0x4df   : > { %1872 = vmatmul.bf16.gmra.mxu2 %v7834_v46  ;;  %1921 = vmatmul.bf16.gmra.mxu3 %v7834_v46 }
 0x4e0   : > { %v1299_v6 = vpop.f32.mrf.mxu3 }
 0x4e1   : > { %v1338_v19 = vmax.f32 %v1299_v6, 0.0 }
 0x4e3   : > { %v1354_v26 = vsel %vm7752_vm10, %v1338_v19, %v7549_v20  ;;  %v6059_v20 = vld [vmem:[%s10231_s3 + $0xb4] sm:$0xf0]  ;;  %v5288_v19 = vor.u32 %v6038_v21, %v5285_v23 }
 0x4e5   : > { %2008 = vmatpush.bf16.msrb.mxu1 %v5288_v19 }
 0x4e8   : > { %v1302_v24 = vpop.f32.mrf.mxu3 }
 0x4e9   : > { %v1339_v13 = vmax.f32 %v1302_v24, 0.0 }
 0x4eb   : > { %v1355_v35 = vsel %vm7752_vm10, %v1339_v13, %v7579_v41  ;;  %v5356_v41 = vor.u32 %v6059_v20, %v5355_v29 }
 0x4ec   : > { %v7870_v27 = vpack.c.bf16 %v1355_v35, %v1354_v26 }
 0x4ed   : > { %2055 = vmatpush.bf16.msrb.mxu2 %v5356_v41 }
 0x4ee   : > { %1779 = vmatmul.bf16.gmra.mxu0 %v7870_v27  ;;  %1828 = vmatmul.bf16.gmra.mxu1 %v7870_v27 }
 0x4ef   : > { %1877 = vmatmul.bf16.gmra.mxu2 %v7870_v27  ;;  %1926 = vmatmul.bf16.gmra.mxu3 %v7870_v27 }
 0x4f0   : > { %v1305_v30 = vpop.f32.mrf.mxu3 }
 0x4f1   : > { %v1340_v47 = vmax.f32 %v1305_v30, 0.0 }
 0x4f3   : > { %v1356_v39 = vsel %vm7752_vm10, %v1340_v47, %v7585_v44  ;;  %v6051_v44 = vld [vmem:[%s10231_s3 + $0x74] sm:$0xf0] }
 0x4f8   : > { %v1308_v40 = vpop.f32.mrf.mxu3 }
 0x4f9   : > { %v1341_v50 = vmax.f32 %v1308_v40, 0.0 }
 0x4fb   : > { %v1357_v51 = vsel %vm7752_vm10, %v1341_v50, %v7615_v0  ;;  %v5324_v0 = vor.u32 %v6051_v44, %v5323_v53 }
 0x4fc   : > { %v7906_v59 = vpack.c.bf16 %v1357_v51, %v1356_v39 }
 0x4fd   : > { %2056 = vmatpush.bf16.msrb.mxu2 %v5324_v0 }
 0x4fe   : > { %1784 = vmatmul.bf16.gmra.mxu0 %v7906_v59  ;;  %1833 = vmatmul.bf16.gmra.mxu1 %v7906_v59 }
 0x4ff   : > { %1882 = vmatmul.bf16.gmra.mxu2 %v7906_v59  ;;  %1931 = vmatmul.bf16.gmra.mxu3 %v7906_v59 }
 0x500   : > { %v1311_v58 = vpop.f32.mrf.mxu3 }
 0x501   : > { %v1342_v43 = vmax.f32 %v1311_v58, 0.0 }
 0x503   : > { %v1358_v5 = vsel %vm7752_vm10, %v1342_v43, %v7621_v2  ;;  %v6043_v2 = vld [vmem:[%s10231_s3 + $0x34] sm:$0xf0] }
 0x504   : > { %v5292_v8 = vor.u32 %v6043_v2, %v5291_v14 }
 0x506   : > { %2057 = vmatpush.bf16.msrb.mxu2 %v5292_v8 }
 0x508   : > { %v1314_v3 = vpop.f32.mrf.mxu3 }
 0x509   : > { %v1343_v4 = vmax.f32 %v1314_v3, 0.0 }
 0x50b   : > { %v1359_v63 = vsel %vm7752_vm10, %v1343_v4, %v7651_v15  ;;  %v5283_v15 = vld [vmem:[%s10231_s3 + $0x10] sm:$0xf] }
 0x50c   : > { %v7942_v6 = vpack.c.bf16 %v1359_v63, %v1358_v5  ;;  %v5284_v16 = vor.u32 %v6042_v9, %v5283_v15 }
 0x50e   : > { %1789 = vmatmul.bf16.gmra.mxu0 %v7942_v6  ;;  %1838 = vmatmul.bf16.gmra.mxu1 %v7942_v6 }
 0x50f   : > { %1887 = vmatmul.bf16.gmra.mxu2 %v7942_v6  ;;  %1936 = vmatmul.bf16.gmra.mxu3 %v7942_v6 }
 0x510   : > { %v1317_v7 = vpop.f32.mrf.mxu3  ;;  %1959 = vmatpush.bf16.msrb.mxu0 %v5284_v16 }
 0x511   : > { %v1344_v24 = vmax.f32 %v1317_v7, 0.0 }
 0x513   : > { %v1360_v35 = vsel %vm7752_vm10, %v1344_v24, %v7663_v49 }
 0x518   : > { %v1320_v13 = vpop.f32.mrf.mxu3 }
 0x519   : > { %v1345_v26 = vmax.f32 %v1320_v13, 0.0 }
 0x51b   : > { %v1361_v29 = vsel %vm7752_vm10, %v1345_v26, %v7678_v52 }
 0x51c   : > { %v7978_v20 = vpack.c.bf16 %v1361_v29, %v1360_v35 }
 0x51e   : > { %1794 = vmatmul.bf16.gmra.mxu0 %v7978_v20  ;;  %1843 = vmatmul.bf16.gmra.mxu1 %v7978_v20 }
 0x51f   : > { %1892 = vmatmul.bf16.gmra.mxu2 %v7978_v20  ;;  %1941 = vmatmul.bf16.gmra.mxu3 %v7978_v20 }
 0x520   : > { %v1323_v30 = vpop.f32.mrf.mxu3 }
 0x521   : > { %v1346_v41 = vmax.f32 %v1323_v30, 0.0 }
 0x523   : > { %v1362_v49 = vsel %vm7752_vm10, %v1346_v41, %v7693_v45 }
 0x528   : > { %v1326_v32 = vpop.f32.mrf.mxu3 }
 0x529   : > { %v1347_v33 = vmax.f32 %v1326_v32, 0.0 }
 0x52b   : > { %v1363_v52 = vsel %vm7752_vm10, %v1347_v33, %v7714_v56 }
 0x52c   : > { %v7990_v36 = vpack.c.bf16 %v1363_v52, %v1362_v49 }
 0x52e   : > { %1799 = vmatmul.bf16.gmra.mxu0 %v7990_v36  ;;  %1848 = vmatmul.bf16.gmra.mxu1 %v7990_v36 }
 0x52f   : > { %1897 = vmatmul.bf16.gmra.mxu2 %v7990_v36  ;;  %1946 = vmatmul.bf16.gmra.mxu3 %v7990_v36 }
 0x53b   : > { %v7996_v38 = vpop.f32.mrf.mxu0  ;;  %v7998_v18 = vpop.f32.mrf.mxu1 }
 0x53c   : > { %10460 = vst [vmem:[#allocation9_spill] sm:$0xff] %v7996_v38  ;;  %v2315_v33 = vmul.f32 %v7996_v38, %v7996_v38  ;;  %v2316_v49 = vmul.f32 %v7998_v18, %v7998_v18 }
 0x53d   : > { %10461 = vst [vmem:[#allocation10_spill] sm:$0xff] %v7998_v18 }
 0x53e   : > { %1960 = vmatmul.bf16.vlgmr.msrb.gmra.mxu0 %v7762_v34  ;;  %2009 = vmatmul.bf16.vlgmr.msrb.gmra.mxu1 %v7762_v34 }
 0x53f   : > { %2058 = vmatmul.bf16.vlgmr.msrb.gmra.mxu2 %v7762_v34  ;;  %2107 = vmatmul.bf16.vlgmr.msrb.gmra.mxu3 %v7762_v34 }
 0x542   : > { %v8004_v45 = vpop.f32.mrf.mxu2  ;;  %v8006_v56 = vpop.f32.mrf.mxu3 }
 0x543   : > { %10462 = vst [vmem:[#allocation11_spill] sm:$0xff] %v8004_v45  ;;  %v8008_v17 = vpop.f32.mrf.mxu0  ;;  %v8010_v42 = vpop.f32.mrf.mxu1 }
 0x544   : > { %10463 = vst [vmem:[#allocation12_spill] sm:$0xff] %v8006_v56 }
 0x545   : > { %10464 = vst [vmem:[#allocation13_spill] sm:$0xff] %v8008_v17 }
 0x546   : > { %10465 = vst [vmem:[#allocation14_spill] sm:$0xff] %v8010_v42 }
 0x54a   : > { %v8012_v22 = vpop.f32.mrf.mxu2  ;;  %v8014_v55 = vpop.f32.mrf.mxu3 }
 0x54b   : > { %10466 = vst [vmem:[#allocation15_spill] sm:$0xff] %v8012_v22  ;;  %v8016_v37 = vpop.f32.mrf.mxu0  ;;  %v8018_v47 = vpop.f32.mrf.mxu1 }
 0x54c   : > { %10467 = vst [vmem:[#allocation16_spill] sm:$0xff] %v8014_v55 }
 0x54d   : > { %10468 = vst [vmem:[#allocation17_spill] sm:$0xff] %v8016_v37 }
 0x54e   : > { %10469 = vst [vmem:[#allocation18_spill] sm:$0xff] %v8018_v47  ;;  %1965 = vmatmul.bf16.gmra.mxu0 %v7798_v48  ;;  %2014 = vmatmul.bf16.gmra.mxu1 %v7798_v48 }
 0x54f   : > { %2063 = vmatmul.bf16.gmra.mxu2 %v7798_v48  ;;  %2112 = vmatmul.bf16.gmra.mxu3 %v7798_v48 }
 0x552   : > { %v8024_v34 = vpop.f32.mrf.mxu2  ;;  %v8026_v40 = vpop.f32.mrf.mxu3 }
 0x553   : > { %10470 = vst [vmem:[#allocation19_spill] sm:$0xff] %v8024_v34  ;;  %v8028_v50 = vpop.f32.mrf.mxu0  ;;  %v8030_v39 = vpop.f32.mrf.mxu1 }
 0x554   : > { %10471 = vst [vmem:[#allocation20_spill] sm:$0xff] %v8026_v40 }
 0x555   : > { %10472 = vst [vmem:[#allocation21_spill] sm:$0xff] %v8028_v50 }
 0x556   : > { %10473 = vst [vmem:[#allocation22_spill] sm:$0xff] %v8030_v39 }
 0x55a   : > { %v8032_v51 = vpop.f32.mrf.mxu2  ;;  %v8034_v53 = vpop.f32.mrf.mxu3 }
 0x55b   : > { %v8036_v44 = vpop.f32.mrf.mxu0  ;;  %v8038_v58 = vpop.f32.mrf.mxu1 }
 0x55e   : > { %1970 = vmatmul.bf16.gmra.mxu0 %v7834_v46  ;;  %2019 = vmatmul.bf16.gmra.mxu1 %v7834_v46 }
 0x55f   : > { %2068 = vmatmul.bf16.gmra.mxu2 %v7834_v46  ;;  %2117 = vmatmul.bf16.gmra.mxu3 %v7834_v46 }
 0x562   : > { %v8044_v48 = vpop.f32.mrf.mxu2  ;;  %v8046_v0 = vpop.f32.mrf.mxu3 }
 0x563   : > { %v8048_v54 = vpop.f32.mrf.mxu0  ;;  %v8050_v57 = vpop.f32.mrf.mxu1 }
 0x56a   : > { %v8052_v60 = vpop.f32.mrf.mxu2  ;;  %v8054_v62 = vpop.f32.mrf.mxu3 }
 0x56b   : > { %10474 = vst [vmem:[#allocation23_spill] sm:$0xff] %v8054_v62  ;;  %v8056_v25 = vpop.f32.mrf.mxu0  ;;  %v8058_v1 = vpop.f32.mrf.mxu1 }
 0x56c   : > { %10475 = vst [vmem:[#allocation24_spill] sm:$0xff] %v8056_v25 }
 0x56d   : > { %10476 = vst [vmem:[#allocation25_spill] sm:$0xff] %v8058_v1 }
 0x56e   : > { %1975 = vmatmul.bf16.gmra.mxu0 %v7870_v27  ;;  %2024 = vmatmul.bf16.gmra.mxu1 %v7870_v27 }
 0x56f   : > { %2073 = vmatmul.bf16.gmra.mxu2 %v7870_v27  ;;  %2122 = vmatmul.bf16.gmra.mxu3 %v7870_v27 }
 0x572   : > { %v8064_v46 = vpop.f32.mrf.mxu2  ;;  %v8066_v28 = vpop.f32.mrf.mxu3 }
 0x573   : > { %10477 = vst [vmem:[#allocation26_spill] sm:$0xff] %v8064_v46  ;;  %v8068_v61 = vpop.f32.mrf.mxu0  ;;  %v8070_v11 = vpop.f32.mrf.mxu1 }
 0x574   : > { %10478 = vst [vmem:[#allocation27_spill] sm:$0xff] %v8066_v28 }
 0x575   : > { %10479 = vst [vmem:[#allocation28_spill] sm:$0xff] %v8068_v61 }
 0x576   : > { %10480 = vst [vmem:[#allocation29_spill] sm:$0xff] %v8070_v11 }
 0x57a   : > { %v8072_v43 = vpop.f32.mrf.mxu2  ;;  %v8074_v3 = vpop.f32.mrf.mxu3 }
 0x57b   : > { %10481 = vst [vmem:[#allocation30_spill] sm:$0xff] %v8072_v43  ;;  %v8076_v4 = vpop.f32.mrf.mxu0  ;;  %v8078_v5 = vpop.f32.mrf.mxu1 }
 0x57c   : > { %10482 = vst [vmem:[#allocation31_spill] sm:$0xff] %v8074_v3 }
 0x57d   : > { %10483 = vst [vmem:[#allocation32_spill] sm:$0xff] %v8076_v4 }
 0x57e   : > { %10484 = vst [vmem:[#allocation33_spill] sm:$0xff] %v8078_v5  ;;  %1980 = vmatmul.bf16.gmra.mxu0 %v7906_v59  ;;  %2029 = vmatmul.bf16.gmra.mxu1 %v7906_v59 }
 0x57f   : > { %2078 = vmatmul.bf16.gmra.mxu2 %v7906_v59  ;;  %2127 = vmatmul.bf16.gmra.mxu3 %v7906_v59 }
 0x582   : > { %v8084_v27 = vpop.f32.mrf.mxu2  ;;  %v8086_v63 = vpop.f32.mrf.mxu3 }
 0x583   : > { %10485 = vst [vmem:[#allocation34_spill] sm:$0xff] %v8084_v27  ;;  %v8088_v14 = vpop.f32.mrf.mxu0  ;;  %v8090_v2 = vpop.f32.mrf.mxu1 }
 0x584   : > { %10486 = vst [vmem:[#allocation35_spill] sm:$0xff] %v8086_v63 }
 0x585   : > { %10487 = vst [vmem:[#allocation36_spill] sm:$0xff] %v8088_v14 }
 0x586   : > { %10488 = vst [vmem:[#allocation37_spill] sm:$0xff] %v8090_v2 }
 0x58a   : > { %v8092_v15 = vpop.f32.mrf.mxu2  ;;  %v8094_v7 = vpop.f32.mrf.mxu3 }
 0x58b   : > { %10489 = vst [vmem:[#allocation38_spill] sm:$0xff] %v8092_v15  ;;  %v8096_v8 = vpop.f32.mrf.mxu0  ;;  %v8098_v9 = vpop.f32.mrf.mxu1 }
 0x58c   : > { %10490 = vst [vmem:[#allocation39_spill] sm:$0xff] %v8094_v7 }
 0x58d   : > { %10491 = vst [vmem:[#allocation40_spill] sm:$0xff] %v8096_v8 }
 0x58e   : > { %10492 = vst [vmem:[#allocation41_spill] sm:$0xff] %v8098_v9  ;;  %1985 = vmatmul.bf16.gmra.mxu0 %v7942_v6  ;;  %2034 = vmatmul.bf16.gmra.mxu1 %v7942_v6 }
 0x58f   : > { %2083 = vmatmul.bf16.gmra.mxu2 %v7942_v6  ;;  %2132 = vmatmul.bf16.gmra.mxu3 %v7942_v6 }
 0x592   : > { %v8104_v59 = vpop.f32.mrf.mxu2  ;;  %v8106_v10 = vpop.f32.mrf.mxu3 }
 0x593   : > { %10493 = vst [vmem:[#allocation42_spill] sm:$0xff] %v8104_v59  ;;  %v8108_v12 = vpop.f32.mrf.mxu0  ;;  %v8110_v16 = vpop.f32.mrf.mxu1 }
 0x594   : > { %10494 = vst [vmem:[#allocation43_spill] sm:$0xff] %v8106_v10 }
 0x595   : > { %10495 = vst [vmem:[#allocation44_spill] sm:$0xff] %v8108_v12 }
 0x596   : > { %10496 = vst [vmem:[#allocation45_spill] sm:$0xff] %v8110_v16 }
 0x59a   : > { %v8112_v31 = vpop.f32.mrf.mxu2  ;;  %v8114_v21 = vpop.f32.mrf.mxu3 }
 0x59b   : > { %10497 = vst [vmem:[#allocation46_spill] sm:$0xff] %v8112_v31  ;;  %v8116_v23 = vpop.f32.mrf.mxu0  ;;  %v8118_v19 = vpop.f32.mrf.mxu1 }
 0x59c   : > { %10498 = vst [vmem:[#allocation47_spill] sm:$0xff] %v8114_v21 }
 0x59d   : > { %10499 = vst [vmem:[#allocation48_spill] sm:$0xff] %v8116_v23  ;;  %v2326_v23 = vmul.f32 %v8014_v55, %v8014_v55 }
 0x59e   : > { %10500 = vst [vmem:[#allocation49_spill] sm:$0xff] %v8118_v19  ;;  %1990 = vmatmul.bf16.gmra.mxu0 %v7978_v20  ;;  %2039 = vmatmul.bf16.gmra.mxu1 %v7978_v20 }
 0x59f   : > { %2088 = vmatmul.bf16.gmra.mxu2 %v7978_v20  ;;  %2137 = vmatmul.bf16.gmra.mxu3 %v7978_v20 }
 0x5a2   : > { %v8124_v6 = vpop.f32.mrf.mxu2  ;;  %v8126_v24 = vpop.f32.mrf.mxu3 }
 0x5a3   : > { %10501 = vst [vmem:[#allocation50_spill] sm:$0xff] %v8124_v6  ;;  %v8128_v13 = vpop.f32.mrf.mxu0  ;;  %v8130_v26 = vpop.f32.mrf.mxu1 }
 0x5a4   : > { %10502 = vst [vmem:[#allocation51_spill] sm:$0xff] %v8126_v24 }
 0x5a5   : > { %10503 = vst [vmem:[#allocation52_spill] sm:$0xff] %v8128_v13 }
 0x5a6   : > { %10504 = vst [vmem:[#allocation53_spill] sm:$0xff] %v8130_v26 }
 0x5aa   : > { %v8132_v35 = vpop.f32.mrf.mxu2  ;;  %v8134_v29 = vpop.f32.mrf.mxu3 }
 0x5ab   : > { %10505 = vst [vmem:[#allocation54_spill] sm:$0xff] %v8132_v35  ;;  %v8136_v30 = vpop.f32.mrf.mxu0  ;;  %v8138_v41 = vpop.f32.mrf.mxu1 }
 0x5ac   : > { %10506 = vst [vmem:[#allocation55_spill] sm:$0xff] %v8134_v29  ;;  %v2443_v29 = vadd.f32 %v2316_v49, %v2315_v33  ;;  %v2323_v49 = vmul.f32 %v8008_v17, %v8008_v17 }
 0x5ad   : > { %10507 = vst [vmem:[#allocation56_spill] sm:$0xff] %v8136_v30  ;;  %v2148_v30 = vadd.f32 %v7998_v18, %v7996_v38 }
 0x5ae   : > { %10508 = vst [vmem:[#allocation57_spill] sm:$0xff] %v8138_v41  ;;  %1995 = vmatmul.bf16.gmra.mxu0 %v7990_v36  ;;  %2044 = vmatmul.bf16.gmra.mxu1 %v7990_v36 }
 0x5af   : > { %2093 = vmatmul.bf16.gmra.mxu2 %v7990_v36  ;;  %2142 = vmatmul.bf16.gmra.mxu3 %v7990_v36  ;;  %v2317_v36 = vmul.f32 %v8004_v45, %v8004_v45 }
 0x5b2   : > { %v8144_v20 = vpop.f32.mrf.mxu2  ;;  %v8146_v32 = vpop.f32.mrf.mxu3 }
 0x5b3   : > { %10509 = vst [vmem:[#allocation58_spill] sm:$0xff] %v8144_v20  ;;  %v8152_v52 = vpop.f32.mrf.mxu0  ;;  %v8154_v41 = vpop.f32.mrf.mxu1  ;;  %v2149_v20 = vadd.f32 %v2148_v30, %v8004_v45  ;;  %v2325_v45 = vmul.f32 %v8012_v22, %v8012_v22 }
 0x5b4   : > { %10510 = vst [vmem:[#allocation59_spill] sm:$0xff] %v8146_v32  ;;  %v2444_v32 = vadd.f32 %v2443_v29, %v2317_v36  ;;  %v2157_v29 = vadd.f32 %v8010_v42, %v8008_v17 }
 0x5b5   : > { %10511 = vst [vmem:[#allocation60_spill] sm:$0xff] %v8152_v52  ;;  %v2150_v13 = vadd.f32 %v2149_v20, %v8006_v56  ;;  %v2318_v52 = vmul.f32 %v8006_v56, %v8006_v56  ;;  %v2324_v20 = vmul.f32 %v8010_v42, %v8010_v42 }
 0x5b6   : > { %10512 = vst [vmem:[#allocation61_spill] sm:$0xff] %v8154_v41  ;;  %v2158_v36 = vadd.f32 %v2157_v29, %v8012_v22  ;;  %v2166_v22 = vadd.f32 %v8018_v47, %v8016_v37 }
 0x5b7   : > { %v2445_v33 = vadd.f32 %v2444_v32, %v2318_v52  ;;  %v2452_v52 = vadd.f32 %v2324_v20, %v2323_v49 }
 0x5ba   : > { %v8161_v35 = vpop.f32.mrf.mxu2  ;;  %v8163_v26 = vpop.f32.mrf.mxu3 }
 0x5bb   : > { %10513 = vst [vmem:[#allocation62_spill] sm:$0xff] %v8161_v35  ;;  %v8168_v41 = vpop.f32.mrf.mxu0  ;;  %v8170_v24 = vpop.f32.mrf.mxu1 }
 0x5bc   : > { %10514 = vst [vmem:[#allocation63_spill] sm:$0xff] %v8163_v26  ;;  %v2319_v18 = vmul.f32 %v8168_v41, %v8168_v41  ;;  %v2151_v30 = vadd.f32 %v2150_v13, %v8168_v41  ;;  %v2320_v32 = vmul.f32 %v8170_v24, %v8170_v24  ;;  %v2331_v13 = vmul.f32 %v8016_v37, %v8016_v37  ;;  %v6115_v37 = vld [vmem:[#allocation5 + $0x74] sm:$0xf0] }
 0x5bd   : > { %10515 = vst [vmem:[#allocation64_spill] sm:$0xff] %v8168_v41  ;;  %v2332_v41 = vmul.f32 %v8018_v47, %v8018_v47  ;;  %v2333_v26 = vmul.f32 %v8024_v34, %v8024_v34  ;;  %v5579_v47 = vld [vmem:[#allocation5 + $0x70] sm:$0xf] }
 0x5be   : > { %10516 = vst [vmem:[#allocation65_spill] sm:$0xff] %v8170_v24  ;;  %v2446_v56 = vadd.f32 %v2445_v33, %v2319_v18  ;;  %v2152_v38 = vadd.f32 %v2151_v30, %v8170_v24  ;;  %v2159_v18 = vadd.f32 %v2158_v36, %v8014_v55  ;;  %v2453_v24 = vadd.f32 %v2452_v52, %v2325_v45  ;;  %v5771_v55 = vld [vmem:[#allocation5 + $0x1f0] sm:$0xf] }
 0x5bf   : > { %v2461_v45 = vadd.f32 %v2332_v41, %v2331_v13 }
 0x5c0   : > { %v2447_v20 = vadd.f32 %v2446_v56, %v2320_v32  ;;  %v2167_v56 = vadd.f32 %v2166_v22, %v8024_v34  ;;  %v2454_v52 = vadd.f32 %v2453_v24, %v2326_v23  ;;  %v2334_v23 = vmul.f32 %v8026_v40, %v8026_v40 }
 0x5c2   : > { %v8191_v17 = vpop.f32.mrf.mxu2  ;;  %v8193_v42 = vpop.f32.mrf.mxu3  ;;  %v2168_v22 = vadd.f32 %v2167_v56, %v8026_v40  ;;  %v5707_v40 = vld [vmem:[#allocation5 + $0x170] sm:$0xf] }
 0x5c3   : > { %10517 = vst [vmem:[#allocation66_spill] sm:$0xff] %v8191_v17  ;;  %v2321_v33 = vmul.f32 %v8191_v17, %v8191_v17  ;;  %v8198_v29 = vpop.f32.mrf.mxu0  ;;  %v8200_v30 = vpop.f32.mrf.mxu1  ;;  %v2153_v49 = vadd.f32 %v2152_v38, %v8191_v17  ;;  %v2322_v6 = vmul.f32 %v8193_v42, %v8193_v42  ;;  %v2462_v17 = vadd.f32 %v2461_v45, %v2333_v26 }
 0x5c4   : > { %10518 = vst [vmem:[#allocation67_spill] sm:$0xff] %v8193_v42  ;;  %v2160_v35 = vadd.f32 %v2159_v18, %v8198_v29  ;;  %v2327_v38 = vmul.f32 %v8198_v29, %v8198_v29  ;;  %v2339_v18 = vmul.f32 %v8028_v50, %v8028_v50  ;;  %v2328_v13 = vmul.f32 %v8200_v30, %v8200_v30 }
 0x5c5   : > { %10519 = vst [vmem:[#allocation68_spill] sm:$0xff] %v8198_v29  ;;  %v2154_v36 = vadd.f32 %v2153_v49, %v8193_v42  ;;  %v2448_v19 = vadd.f32 %v2447_v20, %v2321_v33  ;;  %v2340_v49 = vmul.f32 %v8030_v39, %v8030_v39  ;;  %v2463_v45 = vadd.f32 %v2462_v17, %v2334_v23 }
 0x5c6   : > { %10520 = vst [vmem:[#allocation69_spill] sm:$0xff] %v8200_v30  ;;  %v2161_v33 = vadd.f32 %v2160_v35, %v8200_v30  ;;  %v2455_v41 = vadd.f32 %v2454_v52, %v2327_v38  ;;  %v2175_v35 = vadd.f32 %v8030_v39, %v8028_v50  ;;  %v6147_v39 = vld [vmem:[#allocation5 + $0x174] sm:$0xf0]  ;;  %v2342_v17 = vmul.f32 %v8034_v53, %v8034_v53 }
 0x5c7   : > { %2155 = vadd.xlane.f32.xlu1 %v2154_v36  ;;  %v2449_v32 = vadd.f32 %v2448_v19, %v2322_v6  ;;  %v2341_v19 = vmul.f32 %v8032_v51, %v8032_v51  ;;  %v2470_v56 = vadd.f32 %v2340_v49, %v2339_v18  ;;  %v5708_v30 = vor.u32 %v6147_v39, %v5707_v40 }
 0x5c8   : > { %v2456_v29 = vadd.f32 %v2455_v41, %v2328_v13  ;;  %v5580_v49 = vor.u32 %v6115_v37, %v5579_v47  ;;  %v2347_v23 = vmul.f32 %v8036_v44, %v8036_v44  ;;  %v2184_v39 = vadd.f32 %v8038_v58, %v8036_v44 }
 0x5c9   : > { %2450 = vadd.xlane.f32.xlu0 %v2449_v32  ;;  %v2471_v50 = vadd.f32 %v2470_v56, %v2341_v19  ;;  %4439 = vmatpush.bf16.msra.mxu2 %v5708_v30  ;;  %v5643_v56 = vld [vmem:[#allocation5 + $0xf0] sm:$0xf] }
 0x5ca   : > { %v8221_v20 = vpop.f32.mrf.mxu2  ;;  %v8223_v42 = vpop.f32.mrf.mxu3  ;;  %4341 = vmatpush.bf16.msra.mxu0 %v5580_v49 }
 0x5cb   : > { %10521 = vst [vmem:[#allocation70_spill] sm:$0xff] %v8221_v20  ;;  %v8230_v6 = vpop.f32.mrf.mxu0  ;;  %v8232_v24 = vpop.f32.mrf.mxu1  ;;  %v2162_v26 = vadd.f32 %v2161_v33, %v8221_v20  ;;  %v2329_v38 = vmul.f32 %v8221_v20, %v8221_v20  ;;  %v2176_v33 = vadd.f32 %v2175_v35, %v8032_v51  ;;  %v2330_v35 = vmul.f32 %v8223_v42, %v8223_v42 }
 0x5cc   : > { %10522 = vst [vmem:[#allocation71_spill] sm:$0xff] %v8223_v42  ;;  %v2335_v36 = vmul.f32 %v8230_v6, %v8230_v6  ;;  %v2169_v32 = vadd.f32 %v2168_v22, %v8230_v6  ;;  %v6163_v22 = vld [vmem:[#allocation5 + $0x1f4] sm:$0xf0]  ;;  %v2336_v19 = vmul.f32 %v8232_v24, %v8232_v24  ;;  %v2472_v13 = vadd.f32 %v2471_v50, %v2342_v17 }
 0x5cd   : > { %10523 = vst [vmem:[#allocation72_spill] sm:$0xff] %v8230_v6  ;;  %v2163_v52 = vadd.f32 %v2162_v26, %v8223_v42  ;;  %v2457_v18 = vadd.f32 %v2456_v29, %v2329_v38  ;;  %v5772_v26 = vor.u32 %v6163_v22, %v5771_v55  ;;  %v2177_v40 = vadd.f32 %v2176_v33, %v8034_v53 }
 0x5ce   : > { %10524 = vst [vmem:[#allocation73_spill] sm:$0xff] %v8232_v24  ;;  %v2464_v34 = vadd.f32 %v2463_v45, %v2335_v36  ;;  %v2170_v41 = vadd.f32 %v2169_v32, %v8232_v24  ;;  %v2348_v29 = vmul.f32 %v8038_v58, %v8038_v58  ;;  %v6131_v32 = vld [vmem:[#allocation5 + $0xf4] sm:$0xf0] }
 0x5cf   : > { %2164 = vadd.xlane.f32.xlu2 %v2163_v52  ;;  %4488 = vmatpush.bf16.msra.mxu3 %v5772_v26  ;;  %v2349_v52 = vmul.f32 %v8044_v48, %v8044_v48  ;;  %v2458_v50 = vadd.f32 %v2457_v18, %v2330_v35  ;;  %v5644_v17 = vor.u32 %v6131_v32, %v5643_v56 }
 0x5d0   : > { %v2465_v45 = vadd.f32 %v2464_v34, %v2336_v19  ;;  %v2479_v34 = vadd.f32 %v2348_v29, %v2347_v23  ;;  %v2185_v19 = vadd.f32 %v2184_v39, %v8044_v48  ;;  %v2350_v35 = vmul.f32 %v8046_v0, %v8046_v0 }
 0x5d1   : > { %4390 = vmatpush.bf16.msra.mxu1 %v5644_v17  ;;  %v2355_v23 = vmul.f32 %v8048_v54, %v8048_v54  ;;  %v2356_v39 = vmul.f32 %v8050_v57, %v8050_v57 }
 0x5d2   : > { %v8258_v37 = vpop.f32.mrf.mxu2  ;;  %v8260_v47 = vpop.f32.mrf.mxu3  ;;  %v2480_v6 = vadd.f32 %v2479_v34, %v2349_v52 }
 0x5d3   : > { %10525 = vst [vmem:[#allocation74_spill] sm:$0xff] %v8258_v37  ;;  %v2337_v55 = vmul.f32 %v8258_v37, %v8258_v37  ;;  %v8266_v30 = vpop.f32.mrf.mxu0  ;;  %v8268_v36 = vpop.f32.mrf.mxu1  ;;  %v2171_v38 = vadd.f32 %v2170_v41, %v8258_v37  ;;  %v2338_v24 = vmul.f32 %v8260_v47, %v8260_v47 }
 0x5d4   : > { %10526 = vst [vmem:[#allocation75_spill] sm:$0xff] %v8260_v47  ;;  %v2343_v33 = vmul.f32 %v8266_v30, %v8266_v30  ;;  %v2178_v49 = vadd.f32 %v2177_v40, %v8266_v30  ;;  %v2344_v18 = vmul.f32 %v8268_v36, %v8268_v36  ;;  %v2481_v52 = vadd.f32 %v2480_v6, %v2350_v35  ;;  %v6145_v6 = vld [vmem:[#allocation5 + $0x164] sm:$0xf0] }
 0x5d5   : > { %10527 = vst [vmem:[#allocation76_spill] sm:$0xff] %v8266_v30  ;;  %v2172_v22 = vadd.f32 %v2171_v38, %v8260_v47  ;;  %v2466_v41 = vadd.f32 %v2465_v45, %v2337_v55  ;;  %v5571_v47 = vld [vmem:[#allocation5 + $0x60] sm:$0xf] }
 0x5d6   : > { %10528 = vst [vmem:[#allocation77_spill] sm:$0xff] %v8268_v36  ;;  %v2473_v37 = vadd.f32 %v2472_v13, %v2343_v33  ;;  %v2179_v40 = vadd.f32 %v2178_v49, %v8268_v36  ;;  %v2186_v13 = vadd.f32 %v2185_v19, %v8046_v0  ;;  %v2193_v33 = vadd.f32 %v8050_v57, %v8048_v54  ;;  %v5763_v36 = vld [vmem:[#allocation5 + $0x1e0] sm:$0xf] }
 0x5d7   : > { %2459 = vadd.xlane.f32.xlu2 %v2458_v50  ;;  %2173 = vadd.xlane.f32.xlu1 %v2172_v22  ;;  %v2467_v26 = vadd.f32 %v2466_v41, %v2338_v24  ;;  %v2357_v50 = vmul.f32 %v8052_v60, %v8052_v60  ;;  %v2488_v19 = vadd.f32 %v2356_v39, %v2355_v23 }
 0x5d8   : > { %v2474_v32 = vadd.f32 %v2473_v37, %v2344_v18  ;;  %v5699_v37 = vld [vmem:[#allocation5 + $0x160] sm:$0xf]  ;;  %v2358_v39 = vmul.f32 %v8054_v62, %v8054_v62 }
 0x5d9   : > { %2468 = vadd.xlane.f32.xlu0 %v2467_v26  ;;  %v2194_v26 = vadd.f32 %v2193_v33, %v8052_v60  ;;  %v5700_v35 = vor.u32 %v6145_v6, %v5699_v37  ;;  %v2489_v30 = vadd.f32 %v2488_v19, %v2357_v50  ;;  %v2365_v37 = vmul.f32 %v8064_v46, %v8064_v46 }
 0x5da   : > { %v8289_v29 = vpop.f32.mrf.mxu2  ;;  %v8291_v24 = vpop.f32.mrf.mxu3 }
 0x5db   : > { %10529 = vst [vmem:[#allocation78_spill] sm:$0xff] %v8289_v29  ;;  %v8294_v55 = vpop.f32.mrf.mxu0  ;;  %v8296_v38 = vpop.f32.mrf.mxu1  ;;  %v2180_v45 = vadd.f32 %v2179_v40, %v8289_v29  ;;  %v2345_v56 = vmul.f32 %v8289_v29, %v8289_v29  ;;  %v2346_v41 = vmul.f32 %v8291_v24, %v8291_v24  ;;  %v6113_v29 = vld [vmem:[#allocation5 + $0x64] sm:$0xf0]  ;;  %4440 = vmatpush.bf16.msra.mxu2 %v5700_v35 }
 0x5dc   : > { %10530 = vst [vmem:[#allocation79_spill] sm:$0xff] %v8291_v24  ;;  %v2351_v17 = vmul.f32 %v8294_v55, %v8294_v55  ;;  %v2187_v49 = vadd.f32 %v2186_v13, %v8294_v55  ;;  %v5572_v13 = vor.u32 %v6113_v29, %v5571_v47  ;;  %v2364_v47 = vmul.f32 %v8058_v1, %v8058_v1 }
 0x5dd   : > { %10531 = vst [vmem:[#allocation80_spill] sm:$0xff] %v8294_v55  ;;  %v2181_v22 = vadd.f32 %v2180_v45, %v8291_v24  ;;  %v2475_v34 = vadd.f32 %v2474_v32, %v2345_v56  ;;  %v6161_v55 = vld [vmem:[#allocation5 + $0x1e4] sm:$0xf0]  ;;  %v2352_v56 = vmul.f32 %v8296_v38, %v8296_v38  ;;  %v2363_v32 = vmul.f32 %v8056_v25, %v8056_v25 }
 0x5de   : > { %10532 = vst [vmem:[#allocation81_spill] sm:$0xff] %v8296_v38  ;;  %v2482_v18 = vadd.f32 %v2481_v52, %v2351_v17  ;;  %v2188_v45 = vadd.f32 %v2187_v49, %v8296_v38  ;;  %v5764_v23 = vor.u32 %v6161_v55, %v5763_v36  ;;  %v2202_v52 = vadd.f32 %v8058_v1, %v8056_v25  ;;  %v6111_v38 = vld [vmem:[#allocation5 + $0x54] sm:$0xf0]  ;;  %v6027_v1 = vld [vmem:[#allocation5 + $0x3f0] sm:$0xf] }
 0x5df   : > { %2182 = vadd.xlane.f32.xlu2 %v2181_v22  ;;  %v2476_v40 = vadd.f32 %v2475_v34, %v2346_v41  ;;  %4342 = vmatpush.bf16.msra.mxu0 %v5572_v13  ;;  %v2195_v50 = vadd.f32 %v2194_v26, %v8054_v62  ;;  %v5635_v41 = vld [vmem:[#allocation5 + $0xe0] sm:$0xf]  ;;  %v6129_v34 = vld [vmem:[#allocation5 + $0xe4] sm:$0xf0]  ;;  %v2490_v19 = vadd.f32 %v2489_v30, %v2358_v39 }
 0x5e0   : > { %v2483_v22 = vadd.f32 %v2482_v18, %v2352_v56  ;;  %4489 = vmatpush.bf16.msra.mxu3 %v5764_v23  ;;  %v5636_v26 = vor.u32 %v6129_v34, %v5635_v41  ;;  %v2497_v18 = vadd.f32 %v2364_v47, %v2363_v32  ;;  %v2203_v56 = vadd.f32 %v2202_v52, %v8064_v46 }
 0x5e1   : > { %2477 = vadd.xlane.f32.xlu1 %v2476_v40  ;;  %v2372_v32 = vmul.f32 %v8070_v11, %v8070_v11 }
 0x5e2   : > { %v8323_v29 = vpop.f32.mrf.mxu2  ;;  %v8325_v33 = vpop.f32.mrf.mxu3  ;;  %4391 = vmatpush.bf16.msra.mxu1 %v5636_v26  ;;  %v2498_v39 = vadd.f32 %v2497_v18, %v2365_v37 }
 0x5e3   : > { %10533 = vst [vmem:[#allocation82_spill] sm:$0xff] %v8323_v29  ;;  %v2353_v36 = vmul.f32 %v8323_v29, %v8323_v29  ;;  %v8330_v55 = vpop.f32.mrf.mxu0  ;;  %v8332_v17 = vpop.f32.mrf.mxu1  ;;  %v2189_v49 = vadd.f32 %v2188_v45, %v8323_v29  ;;  %v2354_v13 = vmul.f32 %v8325_v33, %v8325_v33 }
 0x5e4   : > { %10534 = vst [vmem:[#allocation83_spill] sm:$0xff] %v8325_v33  ;;  %v2359_v6 = vmul.f32 %v8330_v55, %v8330_v55  ;;  %v2196_v40 = vadd.f32 %v2195_v50, %v8330_v55  ;;  %v2360_v29 = vmul.f32 %v8332_v17, %v8332_v17 }
 0x5e5   : > { %10535 = vst [vmem:[#allocation84_spill] sm:$0xff] %v8330_v55  ;;  %v2190_v35 = vadd.f32 %v2189_v49, %v8325_v33  ;;  %v2484_v45 = vadd.f32 %v2483_v22, %v2353_v36  ;;  %v2366_v49 = vmul.f32 %v8066_v28, %v8066_v28  ;;  %v2371_v36 = vmul.f32 %v8068_v61, %v8068_v61  ;;  %v5755_v55 = vld [vmem:[#allocation5 + $0x1d0] sm:$0xf] }
 0x5e6   : > { %10536 = vst [vmem:[#allocation85_spill] sm:$0xff] %v8332_v17  ;;  %v2491_v23 = vadd.f32 %v2490_v19, %v2359_v6  ;;  %v2197_v50 = vadd.f32 %v2196_v40, %v8332_v17  ;;  %v2204_v22 = vadd.f32 %v2203_v56, %v8066_v28  ;;  %v2211_v40 = vadd.f32 %v8070_v11, %v8068_v61  ;;  %v5563_v17 = vld [vmem:[#allocation5 + $0x50] sm:$0xf]  ;;  %v6211_v28 = vld [vmem:[#allocation5 + $0x374] sm:$0xf0] }
 0x5e7   : > { %2191 = vadd.xlane.f32.xlu2 %v2190_v35  ;;  %v2485_v30 = vadd.f32 %v2484_v45, %v2354_v13  ;;  %v2499_v26 = vadd.f32 %v2498_v39, %v2366_v49  ;;  %v2373_v35 = vmul.f32 %v8072_v43, %v8072_v43  ;;  %v5899_v61 = vld [vmem:[#allocation5 + $0x2f0] sm:$0xf] }
 0x5e8   : > { %v2492_v6 = vadd.f32 %v2491_v23, %v2360_v29  ;;  %v5691_v29 = vld [vmem:[#allocation5 + $0x150] sm:$0xf]  ;;  %v6143_v23 = vld [vmem:[#allocation5 + $0x154] sm:$0xf0]  ;;  %v2212_v39 = vadd.f32 %v2211_v40, %v8072_v43 }
 0x5e9   : > { %2486 = vadd.xlane.f32.xlu1 %v2485_v30 }
 0x5ea   : > { %v8353_v52 = vpop.f32.mrf.mxu2  ;;  %v8355_v47 = vpop.f32.mrf.mxu3 }
 0x5eb   : > { %10537 = vst [vmem:[#allocation86_spill] sm:$0xff] %v8353_v52  ;;  %v8358_v41 = vpop.f32.mrf.mxu0  ;;  %v8360_v34 = vpop.f32.mrf.mxu1  ;;  %v2198_v19 = vadd.f32 %v2197_v50, %v8353_v52  ;;  %v2361_v37 = vmul.f32 %v8353_v52, %v8353_v52  ;;  %v2362_v56 = vmul.f32 %v8355_v47, %v8355_v47  ;;  %v2506_v50 = vadd.f32 %v2372_v32, %v2371_v36 }
 0x5ec   : > { %10538 = vst [vmem:[#allocation87_spill] sm:$0xff] %v8355_v47  ;;  %v2367_v13 = vmul.f32 %v8358_v41, %v8358_v41  ;;  %v2205_v45 = vadd.f32 %v2204_v22, %v8358_v41  ;;  %v5692_v52 = vor.u32 %v6143_v23, %v5691_v29  ;;  %v5564_v22 = vor.u32 %v6111_v38, %v5563_v17 }
 0x5ed   : > { %10539 = vst [vmem:[#allocation88_spill] sm:$0xff] %v8358_v41  ;;  %v2199_v18 = vadd.f32 %v2198_v19, %v8355_v47  ;;  %v2493_v30 = vadd.f32 %v2492_v6, %v2361_v37  ;;  %v2507_v24 = vadd.f32 %v2506_v50, %v2373_v35  ;;  %v6159_v41 = vld [vmem:[#allocation5 + $0x1d4] sm:$0xf0]  ;;  %v2368_v37 = vmul.f32 %v8360_v34, %v8360_v34 }
 0x5ee   : > { %10540 = vst [vmem:[#allocation89_spill] sm:$0xff] %v8360_v34  ;;  %v2500_v49 = vadd.f32 %v2499_v26, %v2367_v13  ;;  %v2206_v19 = vadd.f32 %v2205_v45, %v8360_v34  ;;  %4441 = vmatpush.bf16.msra.mxu2 %v5692_v52  ;;  %v5756_v36 = vor.u32 %v6159_v41, %v5755_v55  ;;  %v5627_v45 = vld [vmem:[#allocation5 + $0xd0] sm:$0xf]  ;;  %v6109_v34 = vld [vmem:[#allocation5 + $0x44] sm:$0xf0] }
 0x5ef   : > { %2200 = vadd.xlane.f32.xlu0 %v2199_v18  ;;  %v2494_v33 = vadd.f32 %v2493_v30, %v2362_v56  ;;  %v2374_v32 = vmul.f32 %v8074_v3, %v8074_v3  ;;  %v2379_v6 = vmul.f32 %v8076_v4, %v8076_v4  ;;  %v2220_v26 = vadd.f32 %v8078_v5, %v8076_v4  ;;  %v6127_v18 = vld [vmem:[#allocation5 + $0xd4] sm:$0xf0] }
 0x5f0   : > { %v2380_v38 = vmul.f32 %v8078_v5, %v8078_v5  ;;  %4343 = vmatpush.bf16.msra.mxu0 %v5564_v22  ;;  %v2501_v13 = vadd.f32 %v2500_v49, %v2368_v37  ;;  %4490 = vmatpush.bf16.msra.mxu3 %v5756_v36  ;;  %v2381_v30 = vmul.f32 %v8084_v27, %v8084_v27 }
 0x5f1   : > { %2495 = vadd.xlane.f32.xlu2 %v2494_v33  ;;  %v2213_v33 = vadd.f32 %v2212_v39, %v8074_v3  ;;  %v2508_v56 = vadd.f32 %v2507_v24, %v2374_v32  ;;  %v5628_v29 = vor.u32 %v6127_v18, %v5627_v45  ;;  %v2221_v37 = vadd.f32 %v2220_v26, %v8084_v27  ;;  %v5963_v3 = vld [vmem:[#allocation5 + $0x370] sm:$0xf] }
 0x5f2   : > { %v8387_v17 = vpop.f32.mrf.mxu2  ;;  %v8389_v40 = vpop.f32.mrf.mxu3  ;;  %v2515_v49 = vadd.f32 %v2380_v38, %v2379_v6  ;;  %v2388_v6 = vmul.f32 %v8090_v2, %v8090_v2  ;;  %v5964_v11 = vor.u32 %v6211_v28, %v5963_v3 }
 0x5f3   : > { %10541 = vst [vmem:[#allocation90_spill] sm:$0xff] %v8387_v17  ;;  %v2369_v55 = vmul.f32 %v8387_v17, %v8387_v17  ;;  %v8394_v52 = vpop.f32.mrf.mxu0  ;;  %v8396_v41 = vpop.f32.mrf.mxu1  ;;  %v2207_v35 = vadd.f32 %v2206_v19, %v8387_v17  ;;  %v2370_v22 = vmul.f32 %v8389_v40, %v8389_v40  ;;  %4392 = vmatpush.bf16.msra.mxu1 %v5628_v29 }
 0x5f4   : > { %10542 = vst [vmem:[#allocation91_spill] sm:$0xff] %v8389_v40  ;;  %v2375_v50 = vmul.f32 %v8394_v52, %v8394_v52  ;;  %v2214_v23 = vadd.f32 %v2213_v33, %v8394_v52  ;;  %v2516_v32 = vadd.f32 %v2515_v49, %v2381_v30  ;;  %v2376_v17 = vmul.f32 %v8396_v41, %v8396_v41 }
 0x5f5   : > { %10543 = vst [vmem:[#allocation92_spill] sm:$0xff] %v8394_v52  ;;  %v2208_v39 = vadd.f32 %v2207_v35, %v8389_v40  ;;  %v2502_v19 = vadd.f32 %v2501_v13, %v2369_v55  ;;  %v2382_v35 = vmul.f32 %v8086_v63, %v8086_v63  ;;  %v2387_v55 = vmul.f32 %v8088_v14, %v8088_v14  ;;  %v5747_v52 = vld [vmem:[#allocation5 + $0x1c0] sm:$0xf] }
 0x5f6   : > { %10544 = vst [vmem:[#allocation93_spill] sm:$0xff] %v8396_v41  ;;  %v2509_v36 = vadd.f32 %v2508_v56, %v2375_v50  ;;  %v2215_v33 = vadd.f32 %v2214_v23, %v8396_v41  ;;  %v2222_v13 = vadd.f32 %v2221_v37, %v8086_v63  ;;  %v2229_v23 = vadd.f32 %v8090_v2, %v8088_v14  ;;  %v5555_v41 = vld [vmem:[#allocation5 + $0x40] sm:$0xf] }
 0x5f7   : > { %2209 = vadd.xlane.f32.xlu0 %v2208_v39  ;;  %v2503_v24 = vadd.f32 %v2502_v19, %v2370_v22  ;;  %v2517_v29 = vadd.f32 %v2516_v32, %v2382_v35  ;;  %v2389_v39 = vmul.f32 %v8092_v15, %v8092_v15 }
 0x5f8   : > { %v2510_v50 = vadd.f32 %v2509_v36, %v2376_v17  ;;  %v5683_v17 = vld [vmem:[#allocation5 + $0x140] sm:$0xf]  ;;  %v6141_v36 = vld [vmem:[#allocation5 + $0x144] sm:$0xf0]  ;;  %v2230_v32 = vadd.f32 %v2229_v23, %v8092_v15 }
 0x5f9   : > { %2504 = vadd.xlane.f32.xlu2 %v2503_v24 }
 0x5fa   : > { %v8417_v26 = vpop.f32.mrf.mxu2  ;;  %v8419_v38 = vpop.f32.mrf.mxu3 }
 0x5fb   : > { %10545 = vst [vmem:[#allocation94_spill] sm:$0xff] %v8417_v26  ;;  %v8422_v45 = vpop.f32.mrf.mxu0  ;;  %v8424_v18 = vpop.f32.mrf.mxu1  ;;  %v2216_v56 = vadd.f32 %v2215_v33, %v8417_v26  ;;  %v2377_v30 = vmul.f32 %v8417_v26, %v8417_v26  ;;  %v2378_v37 = vmul.f32 %v8419_v38, %v8419_v38  ;;  %v2524_v33 = vadd.f32 %v2388_v6, %v2387_v55 }
 0x5fc   : > { %10546 = vst [vmem:[#allocation95_spill] sm:$0xff] %v8419_v38  ;;  %v2383_v22 = vmul.f32 %v8422_v45, %v8422_v45  ;;  %v2223_v19 = vadd.f32 %v2222_v13, %v8422_v45  ;;  %v5684_v26 = vor.u32 %v6141_v36, %v5683_v17  ;;  %v5556_v13 = vor.u32 %v6109_v34, %v5555_v41 }
 0x5fd   : > { %10547 = vst [vmem:[#allocation96_spill] sm:$0xff] %v8422_v45  ;;  %v2217_v49 = vadd.f32 %v2216_v56, %v8419_v38  ;;  %v2511_v24 = vadd.f32 %v2510_v50, %v2377_v30  ;;  %v2525_v47 = vadd.f32 %v2524_v33, %v2389_v39  ;;  %v6157_v45 = vld [vmem:[#allocation5 + $0x1c4] sm:$0xf0]  ;;  %v2384_v30 = vmul.f32 %v8424_v18, %v8424_v18 }
 0x5fe   : > { %10548 = vst [vmem:[#allocation97_spill] sm:$0xff] %v8424_v18  ;;  %v2518_v35 = vadd.f32 %v2517_v29, %v2383_v22  ;;  %v2224_v56 = vadd.f32 %v2223_v19, %v8424_v18  ;;  %4442 = vmatpush.bf16.msra.mxu2 %v5684_v26  ;;  %v5748_v55 = vor.u32 %v6157_v45, %v5747_v52  ;;  %v5619_v19 = vld [vmem:[#allocation5 + $0xc0] sm:$0xf]  ;;  %v6107_v18 = vld [vmem:[#allocation5 + $0x34] sm:$0xf0] }
 0x5ff   : > { %2218 = vadd.xlane.f32.xlu1 %v2217_v49  ;;  %v2512_v40 = vadd.f32 %v2511_v24, %v2378_v37  ;;  %v2390_v6 = vmul.f32 %v8094_v7, %v8094_v7  ;;  %v2395_v50 = vmul.f32 %v8096_v8, %v8096_v8  ;;  %v2238_v29 = vadd.f32 %v8098_v9, %v8096_v8  ;;  %v6125_v49 = vld [vmem:[#allocation5 + $0xc4] sm:$0xf0] }
 0x600   : > { %v2396_v34 = vmul.f32 %v8098_v9, %v8098_v9  ;;  %4344 = vmatpush.bf16.msra.mxu0 %v5556_v13  ;;  %v2519_v22 = vadd.f32 %v2518_v35, %v2384_v30  ;;  %4491 = vmatpush.bf16.msra.mxu3 %v5748_v55  ;;  %v2397_v24 = vmul.f32 %v8104_v59, %v8104_v59 }
 0x601   : > { %2513 = vadd.xlane.f32.xlu0 %v2512_v40  ;;  %v2231_v40 = vadd.f32 %v2230_v32, %v8094_v7  ;;  %v2526_v37 = vadd.f32 %v2525_v47, %v2390_v6  ;;  %v5620_v17 = vor.u32 %v6125_v49, %v5619_v19  ;;  %v2239_v30 = vadd.f32 %v2238_v29, %v8104_v59 }
 0x602   : > { %v8451_v41 = vpop.f32.mrf.mxu2  ;;  %v8453_v23 = vpop.f32.mrf.mxu3  ;;  %v2533_v35 = vadd.f32 %v2396_v34, %v2395_v50  ;;  %v2404_v50 = vmul.f32 %v8110_v16, %v8110_v16 }
 0x603   : > { %10549 = vst [vmem:[#allocation98_spill] sm:$0xff] %v8451_v41  ;;  %v2385_v52 = vmul.f32 %v8451_v41, %v8451_v41  ;;  %v8458_v26 = vpop.f32.mrf.mxu0  ;;  %v8460_v45 = vpop.f32.mrf.mxu1  ;;  %v2225_v39 = vadd.f32 %v2224_v56, %v8451_v41  ;;  %v2386_v13 = vmul.f32 %v8453_v23, %v8453_v23  ;;  %4393 = vmatpush.bf16.msra.mxu1 %v5620_v17 }
 0x604   : > { %10550 = vst [vmem:[#allocation99_spill] sm:$0xff] %v8453_v23  ;;  %v2391_v33 = vmul.f32 %v8458_v26, %v8458_v26  ;;  %v2232_v36 = vadd.f32 %v2231_v40, %v8458_v26  ;;  %v2534_v6 = vadd.f32 %v2533_v35, %v2397_v24  ;;  %v2392_v41 = vmul.f32 %v8460_v45, %v8460_v45 }
 0x605   : > { %10551 = vst [vmem:[#allocation100_spill] sm:$0xff] %v8458_v26  ;;  %v2226_v32 = vadd.f32 %v2225_v39, %v8453_v23  ;;  %v2520_v56 = vadd.f32 %v2519_v22, %v2385_v52  ;;  %v2398_v39 = vmul.f32 %v8106_v10, %v8106_v10  ;;  %v2403_v52 = vmul.f32 %v8108_v12, %v8108_v12  ;;  %v5739_v26 = vld [vmem:[#allocation5 + $0x1b0] sm:$0xf] }
 0x606   : > { %10552 = vst [vmem:[#allocation101_spill] sm:$0xff] %v8460_v45  ;;  %v2527_v55 = vadd.f32 %v2526_v37, %v2391_v33  ;;  %v2233_v40 = vadd.f32 %v2232_v36, %v8460_v45  ;;  %v2240_v22 = vadd.f32 %v2239_v30, %v8106_v10  ;;  %v2247_v36 = vadd.f32 %v8110_v16, %v8108_v12  ;;  %v5547_v45 = vld [vmem:[#allocation5 + $0x30] sm:$0xf] }
 0x607   : > { %2227 = vadd.xlane.f32.xlu1 %v2226_v32  ;;  %v2521_v47 = vadd.f32 %v2520_v56, %v2386_v13  ;;  %v2535_v17 = vadd.f32 %v2534_v6, %v2398_v39  ;;  %v2405_v32 = vmul.f32 %v8112_v31, %v8112_v31 }
 0x608   : > { %v2528_v33 = vadd.f32 %v2527_v55, %v2392_v41  ;;  %v5675_v41 = vld [vmem:[#allocation5 + $0x130] sm:$0xf]  ;;  %v6139_v55 = vld [vmem:[#allocation5 + $0x134] sm:$0xf0]  ;;  %v2248_v6 = vadd.f32 %v2247_v36, %v8112_v31  ;;  %v10558_v36 = vld [vmem:[#allocation49_spill] sm:$0xff] }
 0x609   : > { %2522 = vadd.xlane.f32.xlu0 %v2521_v47 }
 0x60a   : > { %v8481_v29 = vpop.f32.mrf.mxu2  ;;  %v8483_v34 = vpop.f32.mrf.mxu3 }
 0x60b   : > { %10553 = vst [vmem:[#allocation102_spill] sm:$0xff] %v8481_v29  ;;  %v8486_v19 = vpop.f32.mrf.mxu0  ;;  %v8488_v49 = vpop.f32.mrf.mxu1  ;;  %v2234_v37 = vadd.f32 %v2233_v40, %v8481_v29  ;;  %v2393_v24 = vmul.f32 %v8481_v29, %v8481_v29  ;;  %v2394_v30 = vmul.f32 %v8483_v34, %v8483_v34  ;;  %v2542_v40 = vadd.f32 %v2404_v50, %v2403_v52 }
 0x60c   : > { %10554 = vst [vmem:[#allocation103_spill] sm:$0xff] %v8483_v34  ;;  %v2399_v13 = vmul.f32 %v8486_v19, %v8486_v19  ;;  %v2241_v56 = vadd.f32 %v2240_v22, %v8486_v19  ;;  %v5676_v29 = vor.u32 %v6139_v55, %v5675_v41  ;;  %v5548_v22 = vor.u32 %v6107_v18, %v5547_v45  ;;  %v10563_v41 = vld [vmem:[#allocation50_spill] sm:$0xff] }
 0x60d   : > { %10555 = vst [vmem:[#allocation104_spill] sm:$0xff] %v8486_v19  ;;  %v2235_v35 = vadd.f32 %v2234_v37, %v8483_v34  ;;  %v2529_v47 = vadd.f32 %v2528_v33, %v2393_v24  ;;  %v2543_v38 = vadd.f32 %v2542_v40, %v2405_v32  ;;  %v6155_v19 = vld [vmem:[#allocation5 + $0x1b4] sm:$0xf0]  ;;  %v2400_v24 = vmul.f32 %v8488_v49, %v8488_v49 }
 0x60e   : > { %10556 = vst [vmem:[#allocation105_spill] sm:$0xff] %v8488_v49  ;;  %v2536_v39 = vadd.f32 %v2535_v17, %v2399_v13  ;;  %v2242_v37 = vadd.f32 %v2241_v56, %v8488_v49  ;;  %4443 = vmatpush.bf16.msra.mxu2 %v5676_v29  ;;  %v5740_v52 = vor.u32 %v6155_v19, %v5739_v26  ;;  %v10557_v33 = vld [vmem:[#allocation48_spill] sm:$0xff] }
 0x60f   : > { %2236 = vadd.xlane.f32.xlu2 %v2235_v35  ;;  %v2530_v23 = vadd.f32 %v2529_v47, %v2394_v30  ;;  %v2406_v50 = vmul.f32 %v8114_v21, %v8114_v21  ;;  %v2411_v17 = vmul.f32 %v10557_v33, %v10557_v33  ;;  %v2256_v13 = vadd.f32 %v10558_v36, %v10557_v33  ;;  %v5611_v30 = vld [vmem:[#allocation5 + $0xb0] sm:$0xf]  ;;  %v6123_v47 = vld [vmem:[#allocation5 + $0xb4] sm:$0xf0] }
 0x610   : > { %v2412_v18 = vmul.f32 %v10558_v36, %v10558_v36  ;;  %4345 = vmatpush.bf16.msra.mxu0 %v5548_v22  ;;  %v2537_v35 = vadd.f32 %v2536_v39, %v2400_v24  ;;  %4492 = vmatpush.bf16.msra.mxu3 %v5740_v52  ;;  %v2413_v55 = vmul.f32 %v10563_v41, %v10563_v41 }
 0x611   : > { %2531 = vadd.xlane.f32.xlu1 %v2530_v23  ;;  %v2249_v23 = vadd.f32 %v2248_v6, %v8114_v21  ;;  %v2544_v40 = vadd.f32 %v2543_v38, %v2406_v50  ;;  %v5612_v22 = vor.u32 %v6123_v47, %v5611_v30  ;;  %v2257_v24 = vadd.f32 %v2256_v13, %v10563_v41  ;;  %v10564_v30 = vld [vmem:[#allocation51_spill] sm:$0xff]  ;;  %v10565_v47 = vld [vmem:[#allocation52_spill] sm:$0xff] }
 0x612   : > { %v8515_v45 = vpop.f32.mrf.mxu2  ;;  %v8517_v32 = vpop.f32.mrf.mxu3  ;;  %v2551_v39 = vadd.f32 %v2412_v18, %v2411_v17  ;;  %v10566_v17 = vld [vmem:[#allocation53_spill] sm:$0xff]  ;;  %v10600_v21 = vld [vmem:[#allocation12_spill] sm:$0xff] }
 0x613   : > { %10559 = vst [vmem:[#allocation106_spill] sm:$0xff] %v8515_v45  ;;  %v2401_v26 = vmul.f32 %v8515_v45, %v8515_v45  ;;  %v8522_v29 = vpop.f32.mrf.mxu0  ;;  %v8524_v19 = vpop.f32.mrf.mxu1  ;;  %v2243_v56 = vadd.f32 %v2242_v37, %v8515_v45  ;;  %v2402_v42 = vmul.f32 %v8517_v32, %v8517_v32  ;;  %4394 = vmatpush.bf16.msra.mxu1 %v5612_v22 }
 0x614   : > { %10560 = vst [vmem:[#allocation107_spill] sm:$0xff] %v8517_v32  ;;  %v2407_v6 = vmul.f32 %v8522_v29, %v8522_v29  ;;  %v2250_v49 = vadd.f32 %v2249_v23, %v8522_v29  ;;  %v2552_v50 = vadd.f32 %v2551_v39, %v2413_v55  ;;  %v2408_v45 = vmul.f32 %v8524_v19, %v8524_v19  ;;  %v10571_v39 = vld [vmem:[#allocation54_spill] sm:$0xff] }
 0x615   : > { %10561 = vst [vmem:[#allocation108_spill] sm:$0xff] %v8522_v29  ;;  %v2244_v34 = vadd.f32 %v2243_v56, %v8517_v32  ;;  %v2538_v37 = vadd.f32 %v2537_v35, %v2401_v26  ;;  %v2414_v56 = vmul.f32 %v10564_v30, %v10564_v30  ;;  %v2419_v26 = vmul.f32 %v10565_v47, %v10565_v47 }
 0x616   : > { %10562 = vst [vmem:[#allocation109_spill] sm:$0xff] %v8524_v19  ;;  %v2545_v52 = vadd.f32 %v2544_v40, %v2407_v6  ;;  %v2251_v23 = vadd.f32 %v2250_v49, %v8524_v19  ;;  %v2265_v18 = vadd.f32 %v10566_v17, %v10565_v47  ;;  %v2258_v35 = vadd.f32 %v2257_v24, %v10564_v30 }
 0x617   : > { %2245 = vadd.xlane.f32.xlu2 %v2244_v34  ;;  %v2539_v38 = vadd.f32 %v2538_v37, %v2402_v42  ;;  %v2420_v42 = vmul.f32 %v10566_v17, %v10566_v17  ;;  %v2553_v37 = vadd.f32 %v2552_v50, %v2414_v56 }
 0x618   : > { %v2546_v22 = vadd.f32 %v2545_v52, %v2408_v45  ;;  %v2266_v30 = vadd.f32 %v2265_v18, %v10571_v39  ;;  %v6383_v52 = vmov 1024.0  }
 0x619   : > { %2540 = vadd.xlane.f32.xlu1 %v2539_v38  ;;  %v2421_v38 = vmul.f32 %v10571_v39, %v10571_v39  ;;  %6263 = vrcp.f32 %v6383_v52 }
 0x61a   : > { %v8547_v34 = vpop.f32.mrf.mxu2  ;;  %v8549_v13 = vpop.f32.mrf.mxu3 }
 0x61b   : > { %10567 = vst [vmem:[#allocation110_spill] sm:$0xff] %v8547_v34  ;;  %v8552_v40 = vpop.f32.mrf.mxu0  ;;  %v8554_v49 = vpop.f32.mrf.mxu1  ;;  %v2252_v55 = vadd.f32 %v2251_v23, %v8547_v34  ;;  %v2409_v6 = vmul.f32 %v8547_v34, %v8547_v34  ;;  %v2410_v29 = vmul.f32 %v8549_v13, %v8549_v13  ;;  %v2560_v23 = vadd.f32 %v2420_v42, %v2419_v26  ;;  %v10574_v42 = vld [vmem:[#allocation57_spill] sm:$0xff] }
 0x61c   : > { %10568 = vst [vmem:[#allocation111_spill] sm:$0xff] %v8549_v13  ;;  %v2415_v32 = vmul.f32 %v8552_v40, %v8552_v40  ;;  %v2259_v19 = vadd.f32 %v2258_v35, %v8552_v40  ;;  %v2416_v35 = vmul.f32 %v8554_v49, %v8554_v49 }
 0x61d   : > { %10569 = vst [vmem:[#allocation112_spill] sm:$0xff] %v8552_v40  ;;  %v2253_v24 = vadd.f32 %v2252_v55, %v8549_v13  ;;  %v2547_v20 = vadd.f32 %v2546_v22, %v2409_v6  ;;  %v2561_v50 = vadd.f32 %v2560_v23, %v2421_v38  ;;  %v10572_v55 = vld [vmem:[#allocation55_spill] sm:$0xff]  ;;  %v10573_v13 = vld [vmem:[#allocation56_spill] sm:$0xff] }
 0x61e   : > { %10570 = vst [vmem:[#allocation113_spill] sm:$0xff] %v8554_v49  ;;  %v2554_v34 = vadd.f32 %v2553_v37, %v2415_v32  ;;  %v2260_v56 = vadd.f32 %v2259_v19, %v8554_v49  ;;  %v2422_v40 = vmul.f32 %v10572_v55, %v10572_v55  ;;  %v2427_v26 = vmul.f32 %v10573_v13, %v10573_v13 }
 0x61f   : > { %2254 = vadd.xlane.f32.xlu0 %v2253_v24  ;;  %v2548_v45 = vadd.f32 %v2547_v20, %v2410_v29  ;;  %v2428_v32 = vmul.f32 %v10574_v42, %v10574_v42  ;;  %v2267_v29 = vadd.f32 %v2266_v30, %v10572_v55  ;;  %v2274_v23 = vadd.f32 %v10574_v42, %v10573_v13  ;;  %v8595_v49 = vpop.eup %6263 }
 0x620   : > { %v2555_v38 = vadd.f32 %v2554_v34, %v2416_v35  ;;  %v2562_v24 = vadd.f32 %v2561_v50, %v2422_v40  ;;  %v2293_v13 = vmul.f32 1024.0, %v8595_v49  ;;  %vm2297_vm11 = vweird.f32 %v8595_v49 }
 0x621   : > { %2549 = vadd.xlane.f32.xlu2 %v2548_v45  ;;  %v10579_v45 = vld [vmem:[#allocation58_spill] sm:$0xff]  ;;  %v2569_v40 = vadd.f32 %v2428_v32, %v2427_v26  ;;  %v10582_v32 = vld [vmem:[#allocation61_spill] sm:$0xff] }
 0x622   : > { %v8577_v18 = vpop.f32.mrf.mxu2  ;;  %v8579_v20 = vpop.f32.mrf.mxu3  ;;  %v2429_v52 = vmul.f32 %v10579_v45, %v10579_v45  ;;  %v2275_v50 = vadd.f32 %v2274_v23, %v10579_v45 }
 0x623   : > { %10575 = vst [vmem:[#allocation114_spill] sm:$0xff] %v8577_v18  ;;  %v2417_v19 = vmul.f32 %v8577_v18, %v8577_v18  ;;  %v8584_v6 = vpop.f32.mrf.mxu0  ;;  %v8586_v22 = vpop.f32.mrf.mxu1  ;;  %v2261_v37 = vadd.f32 %v2260_v56, %v8577_v18  ;;  %v2418_v56 = vmul.f32 %v8579_v20, %v8579_v20 }
 0x624   : > { %10576 = vst [vmem:[#allocation115_spill] sm:$0xff] %v8579_v20  ;;  %v2423_v30 = vmul.f32 %v8584_v6, %v8584_v6  ;;  %v2268_v55 = vadd.f32 %v2267_v29, %v8584_v6  ;;  %v2570_v42 = vadd.f32 %v2569_v40, %v2429_v52  ;;  %v2424_v41 = vmul.f32 %v8586_v22, %v8586_v22  ;;  %v10586_v40 = vld [vmem:[#allocation62_spill] sm:$0xff] }
 0x625   : > { %10577 = vst [vmem:[#allocation116_spill] sm:$0xff] %v8584_v6  ;;  %v2262_v39 = vadd.f32 %v2261_v37, %v8579_v20  ;;  %v2556_v34 = vadd.f32 %v2555_v38, %v2417_v19  ;;  %v10580_v37 = vld [vmem:[#allocation59_spill] sm:$0xff]  ;;  %v10581_v20 = vld [vmem:[#allocation60_spill] sm:$0xff]  ;;  %v2436_v19 = vmul.f32 %v10582_v32, %v10582_v32 }
 0x626   : > { %10578 = vst [vmem:[#allocation117_spill] sm:$0xff] %v8586_v22  ;;  %v2563_v18 = vadd.f32 %v2562_v24, %v2423_v30  ;;  %v2269_v29 = vadd.f32 %v2268_v55, %v8586_v22  ;;  %v2430_v6 = vmul.f32 %v10580_v37, %v10580_v37  ;;  %v2435_v26 = vmul.f32 %v10581_v20, %v10581_v20 }
 0x627   : > { %2263 = vadd.xlane.f32.xlu0 %v2262_v39  ;;  %v2557_v35 = vadd.f32 %v2556_v34, %v2418_v56  ;;  %v2283_v39 = vadd.f32 %v10582_v32, %v10581_v20  ;;  %v2276_v23 = vadd.f32 %v2275_v50, %v10580_v37  ;;  %v2294_v32 = vsub.f32 1.0, %v2293_v13 }
 0x628   : > { %v2564_v56 = vadd.f32 %v2563_v18, %v2424_v41  ;;  %v2571_v34 = vadd.f32 %v2570_v42, %v2430_v6 }
 0x629   : > { %2558 = vadd.xlane.f32.xlu2 %v2557_v35  ;;  %v2437_v35 = vmul.f32 %v10586_v40, %v10586_v40  ;;  %v2284_v41 = vadd.f32 %v2283_v39, %v10586_v40  ;;  %v2295_v17 = vmul.f32 %v8595_v49, %v2294_v32 }
 0x62a   : > { %v8614_v38 = vpop.f32.mrf.mxu2  ;;  %v8616_v24 = vpop.f32.mrf.mxu3 }
 0x62b   : > { %10583 = vst [vmem:[#allocation118_spill] sm:$0xff] %v8614_v38  ;;  %v8619_v52 = vpop.f32.mrf.mxu0  ;;  %v2270_v55 = vadd.f32 %v2269_v29, %v8614_v38  ;;  %v2425_v30 = vmul.f32 %v8614_v38, %v8614_v38  ;;  %v8628_v45 = vpop.f32.mrf.mxu1  ;;  %v2426_v29 = vmul.f32 %v8616_v24, %v8616_v24  ;;  %v2578_v38 = vadd.f32 %v2436_v19, %v2435_v26 }
 0x62c   : > { %10584 = vst [vmem:[#allocation119_spill] sm:$0xff] %v8616_v24  ;;  %v2431_v22 = vmul.f32 %v8619_v52, %v8619_v52  ;;  %v2277_v50 = vadd.f32 %v2276_v23, %v8619_v52  ;;  %v2432_v13 = vmul.f32 %v8628_v45, %v8628_v45  ;;  %v10588_v23 = vld [vmem:[#allocation63_spill] sm:$0xff] }
 0x62d   : > { %10585 = vst [vmem:[#allocation120_spill] sm:$0xff] %v8619_v52  ;;  %v2271_v37 = vadd.f32 %v2270_v55, %v8616_v24  ;;  %v2565_v20 = vadd.f32 %v2564_v56, %v2425_v30  ;;  %v2579_v6 = vadd.f32 %v2578_v38, %v2437_v35  ;;  %v2438_v55 = vmul.f32 %v10588_v23, %v10588_v23 }
 0x62e   : > { %10587 = vst [vmem:[#allocation121_spill] sm:$0xff] %v8628_v45  ;;  %v2572_v42 = vadd.f32 %v2571_v34, %v2431_v22  ;;  %v2278_v36 = vadd.f32 %v2277_v50, %v8628_v45  ;;  %v2285_v22 = vadd.f32 %v2284_v41, %v10588_v23  ;;  %v2296_v30 = vadd.f32 %v8595_v49, %v2295_v17  ;;  %v5667_v41 = vld [vmem:[#allocation5 + $0x120] sm:$0xf] }
 0x62f   : > { %2272 = vadd.xlane.f32.xlu1 %v2271_v37  ;;  %v2566_v18 = vadd.f32 %v2565_v20, %v2426_v29  ;;  %v2580_v19 = vadd.f32 %v2579_v6, %v2438_v55  ;;  %v6105_v55 = vld [vmem:[#allocation5 + $0x24] sm:$0xf0] }
 0x630   : > { %v2573_v39 = vadd.f32 %v2572_v42, %v2432_v13  ;;  %v6137_v42 = vld [vmem:[#allocation5 + $0x124] sm:$0xf0]  ;;  %v8662_v17 = vsel %vm2297_vm11, %v8595_v49, %v2296_v30 }
 0x631   : > { %2567 = vadd.xlane.f32.xlu0 %v2566_v18  ;;  %v5539_v18 = vld [vmem:[#allocation5 + $0x20] sm:$0xf]  ;;  %v5668_v13 = vor.u32 %v6137_v42, %v5667_v41 }
 0x632   : > { %v8641_v52 = vpop.f32.mrf.mxu2  ;;  %v8643_v26 = vpop.f32.mrf.mxu3 }
 0x633   : > { %10589 = vst [vmem:[#allocation122_spill] sm:$0xff] %v8641_v52  ;;  %v2433_v20 = vmul.f32 %v8641_v52, %v8641_v52  ;;  %v8648_v37 = vpop.f32.mrf.mxu0  ;;  %v2279_v32 = vadd.f32 %v2278_v36, %v8641_v52  ;;  %v2434_v35 = vmul.f32 %v8643_v26, %v8643_v26  ;;  %v8659_v29 = vpop.f32.mrf.mxu1  ;;  %v6153_v52 = vld [vmem:[#allocation5 + $0x1a4] sm:$0xf0]  ;;  %4444 = vmatpush.bf16.msra.mxu2 %v5668_v13 }
 0x634   : > { %10590 = vst [vmem:[#allocation123_spill] sm:$0xff] %v8643_v26  ;;  %v2439_v38 = vmul.f32 %v8648_v37, %v8648_v37  ;;  %v2286_v56 = vadd.f32 %v2285_v22, %v8648_v37  ;;  %v5731_v22 = vld [vmem:[#allocation5 + $0x1a0] sm:$0xf] }
 0x635   : > { %10591 = vst [vmem:[#allocation124_spill] sm:$0xff] %v8648_v37  ;;  %v2280_v34 = vadd.f32 %v2279_v32, %v8643_v26  ;;  %v2574_v50 = vadd.f32 %v2573_v39, %v2433_v20  ;;  %v2440_v32 = vmul.f32 %v8659_v29, %v8659_v29  ;;  %v5540_v39 = vor.u32 %v6105_v55, %v5539_v18 }
 0x636   : > { %10592 = vst [vmem:[#allocation125_spill] sm:$0xff] %v8659_v29  ;;  %v2581_v6 = vadd.f32 %v2580_v19, %v2439_v38  ;;  %v2287_v20 = vadd.f32 %v2286_v56, %v8659_v29  ;;  %v6117_v29 = vld [vmem:[#allocation5 + $0x84] sm:$0xf0] }
 0x637   : > { %2281 = vadd.xlane.f32.xlu1 %v2280_v34  ;;  %v2575_v36 = vadd.f32 %v2574_v50, %v2434_v35  ;;  %v5732_v34 = vor.u32 %v6153_v52, %v5731_v22  ;;  %v5603_v35 = vld [vmem:[#allocation5 + $0xa0] sm:$0xf]  ;;  %v6121_v50 = vld [vmem:[#allocation5 + $0xa4] sm:$0xf0]  ;;  %4346 = vmatpush.bf16.msra.mxu0 %v5540_v39 }
 0x638   : > { %v5604_v49 = vor.u32 %v6121_v50, %v5603_v35  ;;  %v2582_v41 = vadd.f32 %v2581_v6, %v2440_v32  ;;  %v5659_v35 = vld [vmem:[#allocation5 + $0x110] sm:$0xf]  ;;  %v6135_v50 = vld [vmem:[#allocation5 + $0x114] sm:$0xf0] }
 0x639   : > { %2576 = vadd.xlane.f32.xlu0 %v2575_v36  ;;  %4493 = vmatpush.bf16.msra.mxu3 %v5732_v34 }
 0x63a   : > { %v8667_v26 = vpop.f32.mrf.mxu2  ;;  %v8669_v19 = vpop.f32.mrf.mxu3  ;;  %4395 = vmatpush.bf16.msra.mxu1 %v5604_v49  ;;  %v5531_v49 = vld [vmem:[#allocation5 + $0x10] sm:$0xf] }
 0x63b   : > { %10593 = vst [vmem:[#allocation126_spill] sm:$0xff] %v8667_v26  ;;  %v2156_v38 = vpop.xlane.xlu1 %2155  ;;  %v2288_v30 = vadd.f32 %v2287_v20, %v8667_v26  ;;  %v2441_v36 = vmul.f32 %v8667_v26, %v8667_v26  ;;  %v2442_v13 = vmul.f32 %v8669_v19, %v8669_v19  ;;  %v5523_v26 = vld [vmem:[#allocation5] sm:$0xf] }
 0x63c   : > { %10594 = vst [vmem:[#allocation127_spill] sm:$0xff] %v8669_v19  ;;  %v8675_v56 = vmul.f32 %v8662_v17, %v2156_v38  ;;  %v2451_v52 = vpop.xlane.xlu0 %2450 }
 0x63d   : > { %v2587_v42 = vmul.f32 %v2451_v52, %v8662_v17  ;;  %v2289_v18 = vadd.f32 %v2288_v30, %v8669_v19  ;;  %v2583_v55 = vadd.f32 %v2582_v41, %v2441_v36  ;;  %v5660_v30 = vor.u32 %v6135_v50, %v5659_v35  ;;  %v6103_v36 = vld [vmem:[#allocation5 + $0x14] sm:$0xf0]  ;;  %v5723_v41 = vld [vmem:[#allocation5 + $0x190] sm:$0xf]  ;;  %v6133_v19 = vld [vmem:[#allocation5 + $0x104] sm:$0xf0] }
 0x63e   : > { %10595 = vst [vmem:[#allocation128_spill] sm:$0xff] %v8675_v56  ;;  %v2603_v22 = vmul.f32 %v8675_v56, %v8675_v56  ;;  %v6151_v52 = vld [vmem:[#allocation5 + $0x194] sm:$0xf0] }
 0x63f   : > { %2290 = vadd.xlane.f32.xlu2 %v2289_v18  ;;  %v2584_v20 = vadd.f32 %v2583_v55, %v2442_v13  ;;  %v5532_v18 = vor.u32 %v6103_v36, %v5531_v49  ;;  %v5724_v13 = vor.u32 %v6151_v52, %v5723_v41  ;;  %v6119_v55 = vld [vmem:[#allocation5 + $0x94] sm:$0xf0]  ;;  %4445 = vmatpush.bf16.msra.mxu2 %v5660_v30  ;;  %v6101_v36 = vld [vmem:[#allocation5 + $0x4] sm:$0xf0]  ;;  %v5715_v30 = vld [vmem:[#allocation5 + $0x180] sm:$0xf] }
 0x640   : > { %v2619_v39 = vsub.f32 %v2587_v42, %v2603_v22  ;;  %v5595_v42 = vld [vmem:[#allocation5 + $0x90] sm:$0xf]  ;;  %v6149_v41 = vld [vmem:[#allocation5 + $0x184] sm:$0xf0] }
 0x641   : > { %2585 = vadd.xlane.f32.xlu1 %v2584_v20  ;;  %v5596_v22 = vor.u32 %v6119_v55, %v5595_v42  ;;  %4347 = vmatpush.bf16.msra.mxu0 %v5532_v18  ;;  %v5524_v18 = vor.u32 %v6101_v36, %v5523_v26  ;;  %v5587_v55 = vld [vmem:[#allocation5 + $0x80] sm:$0xf] }
 0x642   : > { %v2635_v6 = vmax.f32 %v2619_v39, 0.0  ;;  %v2165_v32 = vpop.xlane.xlu2 %2164  ;;  %4494 = vmatpush.bf16.msra.mxu3 %v5724_v13  ;;  %v5716_v13 = vor.u32 %v6149_v41, %v5715_v30  ;;  %v3083_v26 = vld [vmem:[%s10233_s5] sm:$0xff] }
 0x643   : > { %v8687_v38 = vmul.f32 %v8662_v17, %v2165_v32  ;;  %4396 = vmatpush.bf16.msra.mxu1 %v5596_v22  ;;  %v8707_v41 = vperm.slane %v3083_v26, 0  ;;  %v8738_v40 = vperm.slane %v3083_v26, 3 }
 0x644   : > { %v8683_v34 = vadd.f32 1e-05, %v2635_v6  ;;  %v5651_v6 = vld [vmem:[#allocation5 + $0x100] sm:$0xf] }
 0x645   : > { %v2604_v32 = vmul.f32 %v8687_v38, %v8687_v38  ;;  %v5652_v49 = vor.u32 %v6133_v19, %v5651_v6  ;;  %4348 = vmatpush.bf16.msra.mxu0 %v5524_v18  ;;  %v5588_v19 = vor.u32 %v6117_v29, %v5587_v55  ;;  %v8709_v29 = vperm.slane %v3083_v26, 1 }
 0x646   : > { %6265 = vrsqrt.f32 %v8683_v34  ;;  %4495 = vmatpush.bf16.msra.mxu3 %v5716_v13  ;;  %v8721_v55 = vperm.slane %v3083_v26, 2  ;;  %vm2801_vm13 = vweird.f32 %v8683_v34 }
 0x647   : > { %4446 = vmatpush.bf16.msra.mxu2 %v5652_v49  ;;  %4397 = vmatpush.bf16.msra.mxu1 %v5588_v19 }
 0x64a   : > { %v2460_v20 = vpop.xlane.xlu2 %2459  ;;  %v2174_v39 = vpop.xlane.xlu1 %2173 }
 0x64b   : > { %v2588_v35 = vmul.f32 %v2460_v20, %v8662_v17  ;;  %v8693_v50 = vmul.f32 %v8662_v17, %v2174_v39  ;;  %4635 = vmatpush.bf16.msrb.mxu2 %v5964_v11 }
 0x64c   : > { %v6266_v52 = vpop.eup %6265  ;;  %v2469_v42 = vpop.xlane.xlu0 %2468 }
 0x64d   : > { %v2796_v45 = vmul.f32 %v6266_v52, %v8683_v34  ;;  %v2620_v37 = vsub.f32 %v2588_v35, %v2604_v32  ;;  %v2589_v24 = vmul.f32 %v2469_v42, %v8662_v17  ;;  %v2605_v20 = vmul.f32 %v8693_v50, %v8693_v50  ;;  %v3229_v32 = vld [vmem:[%s10234_s6] sm:$0xff]  ;;  %v10599_v34 = vld [vmem:[#allocation11_spill] sm:$0xff] }
 0x64e   : > { %vm2802_vm12 = vweird.f32 %v6266_v52  ;;  %v8717_v18 = vperm.slane %v3229_v32, 0  ;;  %v8719_v13 = vperm.slane %v3229_v32, 1  ;;  %v8744_v10 = vperm.slane %v3229_v32, 3 }
 0x64f   : > { %v2797_v22 = vmul.f32 %v6266_v52, %v2796_v45  ;;  %v2636_v39 = vmax.f32 %v2620_v37, 0.0  ;;  %v2621_v6 = vsub.f32 %v2589_v24, %v2605_v20  ;;  %vm2803_vm14 = vmor %vm2801_vm13, %vm2802_vm12 }
 0x651   : > { %v2798_v36 = vmul.f32 0.5, %v2797_v22  ;;  %v8702_v30 = vadd.f32 1e-05, %v2636_v39  ;;  %v2637_v35 = vmax.f32 %v2621_v6, 0.0  ;;  %v10596_v39 = vld [vmem:[#allocation9_spill] sm:$0xff] }
 0x652   : > { %v2183_v49 = vpop.xlane.xlu2 %2182  ;;  %v2651_v6 = vsub.f32 %v10596_v39, %v8675_v56  ;;  %v2654_v39 = vsub.f32 %v10600_v21, %v8675_v56  ;;  %v10604_v21 = vld [vmem:[#allocation16_spill] sm:$0xff] }
 0x653   : > { %v2799_v45 = vsub.f32 1.5, %v2798_v36  ;;  %6267 = vrsqrt.f32 %v8702_v30  ;;  %v8713_v24 = vmul.f32 %v8662_v17, %v2183_v49  ;;  %v8715_v37 = vadd.f32 1e-05, %v2637_v35  ;;  %v10597_v36 = vld [vmem:[#allocation10_spill] sm:$0xff] }
 0x654   : > { %v2478_v42 = vpop.xlane.xlu1 %2477  ;;  %v2652_v35 = vsub.f32 %v10597_v36, %v8675_v56  ;;  %v8732_v49 = vperm.slane %v3229_v32, 2  ;;  %v10606_v32 = vld [vmem:[#allocation18_spill] sm:$0xff]  ;;  %vm2811_vm15 = vweird.f32 %v8702_v30 }
 0x655   : > { %v2800_v20 = vmul.f32 %v6266_v52, %v2799_v45  ;;  %v2590_v19 = vmul.f32 %v2478_v42, %v8662_v17  ;;  %v2606_v22 = vmul.f32 %v8713_v24, %v8713_v24  ;;  %6269 = vrsqrt.f32 %v8715_v37 }
 0x656   : > { %v2653_v42 = vsub.f32 %v10599_v34, %v8675_v56  ;;  %v10605_v56 = vld [vmem:[#allocation17_spill] sm:$0xff]  ;;  %vm2821_vm3 = vweird.f32 %v8715_v37 }
 0x657   : > { %v8734_v23 = vsel %vm2803_vm14, %v6266_v52, %v2800_v20  ;;  %v2622_v45 = vsub.f32 %v2590_v19, %v2606_v22  ;;  %v10601_v52 = vld [vmem:[#allocation13_spill] sm:$0xff]  ;;  %v10602_v19 = vld [vmem:[#allocation14_spill] sm:$0xff] }
 0x658   : > { %10598 = vst [vmem:[#allocation9_spill] sm:$0xff] %v8734_v23  ;;  %v2955_v47 = vmul.f32 %v8734_v23, %v2651_v6  ;;  %v2956_v33 = vmul.f32 %v8734_v23, %v2652_v35  ;;  %v2659_v20 = vsub.f32 %v10601_v52, %v8687_v38  ;;  %v2660_v22 = vsub.f32 %v10602_v19, %v8687_v38  ;;  %v10603_v35 = vld [vmem:[#allocation15_spill] sm:$0xff] }
 0x659   : > { %v6268_v36 = vpop.eup %6267  ;;  %v2638_v31 = vmax.f32 %v2622_v45, 0.0  ;;  %v2957_v26 = vmul.f32 %v8734_v23, %v2653_v42  ;;  %v2661_v59 = vsub.f32 %v10603_v35, %v8687_v38  ;;  %v2958_v35 = vmul.f32 %v8734_v23, %v2654_v39  ;;  %v10607_v45 = vld [vmem:[#allocation19_spill] sm:$0xff] }
 0x65a   : > { %v2806_v34 = vmul.f32 %v6268_v36, %v8702_v30  ;;  %v2192_v6 = vpop.xlane.xlu2 %2191  ;;  %v3101_v19 = vmul.f32 %v8707_v41, %v2955_v47  ;;  %v3102_v42 = vmul.f32 %v8709_v29, %v2956_v33  ;;  %v10608_v33 = vld [vmem:[#allocation20_spill] sm:$0xff]  ;;  %vm2812_vm0 = vweird.f32 %v6268_v36 }
 0x65b   : > { %v8758_v16 = vadd.f32 1e-05, %v2638_v31  ;;  %v8761_v52 = vmul.f32 %v8662_v17, %v2192_v6  ;;  %v8765_v9 = vpop.eup %6269  ;;  %v3103_v47 = vmul.f32 %v8721_v55, %v2957_v26  ;;  %v10609_v26 = vld [vmem:[#allocation21_spill] sm:$0xff]  ;;  %v3104_v2 = vmul.f32 %v8738_v40, %v2958_v35  ;;  %vm2813_vm2 = vmor %vm2811_vm15, %vm2812_vm0 }
 0x65c   : > { %v2807_v12 = vmul.f32 %v6268_v36, %v2806_v34  ;;  %v2487_v8 = vpop.xlane.xlu1 %2486  ;;  %v2816_v6 = vmul.f32 %v8765_v9, %v8715_v37  ;;  %v8784_v23 = vadd.f32 %v8717_v18, %v3101_v19  ;;  %v8787_v15 = vadd.f32 %v8719_v13, %v3102_v42 }
 0x65d   : > { %6271 = vrsqrt.f32 %v8758_v16  ;;  %v2591_v39 = vmul.f32 %v2487_v8, %v8662_v17  ;;  %v2607_v7 = vmul.f32 %v8761_v52, %v8761_v52  ;;  %v8793_v5 = vadd.f32 %v8732_v49, %v3103_v47 }
 0x65e   : > { %v2808_v34 = vmul.f32 0.5, %v2807_v12  ;;  %v2817_v31 = vmul.f32 %v8765_v9, %v2816_v6  ;;  %v10610_v6 = vld [vmem:[#allocation22_spill] sm:$0xff]  ;;  %vm2822_vm1 = vweird.f32 %v8765_v9  ;;  %vm2831_vm4 = vweird.f32 %v8758_v16 }
 0x65f   : > { %v2623_v12 = vsub.f32 %v2591_v39, %v2607_v7  ;;  %vm2823_vm6 = vmor %vm2821_vm3, %vm2822_vm1 }
 0x660   : > { %v2809_v63 = vsub.f32 1.5, %v2808_v34  ;;  %v2818_v8 = vmul.f32 0.5, %v2817_v31 }
 0x661   : > { %v2639_v4 = vmax.f32 %v2623_v12, 0.0 }
 0x662   : > { %v2810_v42 = vmul.f32 %v6268_v36, %v2809_v63  ;;  %v2201_v27 = vpop.xlane.xlu0 %2200  ;;  %v2819_v35 = vsub.f32 1.5, %v2818_v8  ;;  %v8820_v8 = vadd.f32 %v8744_v10, %v3104_v2 }
 0x663   : > { %v8802_v34 = vpop.eup %6271  ;;  %v8808_v31 = vmul.f32 %v8662_v17, %v2201_v27  ;;  %v8817_v7 = vadd.f32 1e-05, %v2639_v4 }
 0x664   : > { %v8812_v39 = vsel %vm2813_vm2, %v6268_v36, %v2810_v42  ;;  %v2826_v12 = vmul.f32 %v8802_v34, %v8758_v16  ;;  %v2496_v30 = vpop.xlane.xlu2 %2495  ;;  %vm2832_vm5 = vweird.f32 %v8802_v34  ;;  %v2820_v2 = vmul.f32 %v8765_v9, %v2819_v35 }
 0x665   : > { %v2592_v27 = vmul.f32 %v2496_v30, %v8662_v17  ;;  %v2608_v19 = vmul.f32 %v8808_v31, %v8808_v31  ;;  %v2963_v14 = vmul.f32 %v8812_v39, %v2659_v20  ;;  %6273 = vrsqrt.f32 %v8817_v7  ;;  %v5835_v20 = vld [vmem:[#allocation5 + $0x270] sm:$0xf]  ;;  %vm2833_vm7 = vmor %vm2831_vm4, %vm2832_vm5 }
 0x666   : > { %v2827_v42 = vmul.f32 %v8802_v34, %v2826_v12  ;;  %v2964_v4 = vmul.f32 %v8812_v39, %v2660_v22  ;;  %v2965_v63 = vmul.f32 %v8812_v39, %v2661_v59  ;;  %v10611_v12 = vsub.f32 %v10604_v21, %v8687_v38  ;;  %v6179_v22 = vld [vmem:[#allocation5 + $0x274] sm:$0xf0] }
 0x667   : > { %v2624_v47 = vsub.f32 %v2592_v27, %v2608_v19  ;;  %v3109_v30 = vmul.f32 %v8707_v41, %v2963_v14  ;;  %v5836_v59 = vor.u32 %v6179_v22, %v5835_v20  ;;  %v6227_v27 = vld [vmem:[#allocation5 + $0x3f4] sm:$0xf0]  ;;  %v8858_v20 = vsel %vm2823_vm6, %v8765_v9, %v2820_v2 }
 0x668   : > { %v2828_v43 = vmul.f32 0.5, %v2827_v42  ;;  %v3110_v36 = vmul.f32 %v8709_v29, %v2964_v4  ;;  %v2966_v46 = vmul.f32 %v8812_v39, %v10611_v12  ;;  %v3111_v14 = vmul.f32 %v8721_v55, %v2965_v63  ;;  %v6195_v12 = vld [vmem:[#allocation5 + $0x2f4] sm:$0xf0] }
 0x669   : > { %v2640_v35 = vmax.f32 %v2624_v47, 0.0  ;;  %v3255_v19 = vadd.f32 %v8717_v18, %v3109_v30  ;;  %v6028_v21 = vor.u32 %v6227_v27, %v6027_v1  ;;  %4537 = vmatpush.bf16.msrb.mxu0 %v5836_v59  ;;  %v10612_v9 = vmax.f32 %v8784_v23, 0.0 }
 0x66a   : > { %v2829_v25 = vsub.f32 1.5, %v2828_v43  ;;  %v2210_v42 = vpop.xlane.xlu0 %2209  ;;  %v3256_v4 = vadd.f32 %v8719_v13, %v3110_v36  ;;  %v3112_v62 = vmul.f32 %v8738_v40, %v2966_v46  ;;  %v3257_v63 = vadd.f32 %v8732_v49, %v3111_v14 }
 0x66b   : > { %v8843_v28 = vadd.f32 1e-05, %v2640_v35  ;;  %v8846_v3 = vmul.f32 %v8662_v17, %v2210_v42  ;;  %v3383_v47 = vmax.f32 %v3255_v19, 0.0  ;;  %v8849_v30 = vpop.eup %6273  ;;  %4684 = vmatpush.bf16.msrb.mxu3 %v6028_v21  ;;  %v5900_v36 = vor.u32 %v6195_v12, %v5899_v61 }
 0x66c   : > { %v2830_v46 = vmul.f32 %v8802_v34, %v2829_v25  ;;  %v2505_v1 = vpop.xlane.xlu2 %2504  ;;  %v3384_v11 = vmax.f32 %v3256_v4, 0.0  ;;  %v3258_v43 = vadd.f32 %v8744_v10, %v3112_v62  ;;  %v2836_v37 = vmul.f32 %v8849_v30, %v8817_v7 }
 0x66d   : > { %6275 = vrsqrt.f32 %v8843_v28  ;;  %v3378_v25 = vmax.f32 %v8820_v8, 0.0  ;;  %v2593_v62 = vmul.f32 %v2505_v1, %v8662_v17  ;;  %v2609_v61 = vmul.f32 %v8846_v3, %v8846_v3  ;;  %4586 = vmatpush.bf16.msrb.mxu1 %v5900_v36 }
 0x66e   : > { %v8869_v22 = vsel %vm2833_vm7, %v8802_v34, %v2830_v46  ;;  %v8876_v2 = vpack.c.bf16 %v3383_v47, %v10612_v9  ;;  %v2837_v16 = vmul.f32 %v8849_v30, %v2836_v37  ;;  %v10614_v35 = vmax.f32 %v8787_v15, 0.0 }
 0x66f   : > { %v3385_v8 = vmax.f32 %v3257_v63, 0.0  ;;  %v3386_v14 = vmax.f32 %v3258_v43, 0.0  ;;  %v2625_v34 = vsub.f32 %v2593_v62, %v2609_v61  ;;  %v10616_v59 = vsub.f32 %v10605_v56, %v8693_v50 }
 0x670   : > { %10613 = vst [vmem:[#allocation10_spill] sm:$0xff] %v8876_v2  ;;  %v8881_v19 = vpack.c.bf16 %v3384_v11, %v10614_v35  ;;  %4349 = vmatmul.bf16.vlgmr.msra.gmra.mxu0 %v8876_v2  ;;  %v10617_v23 = vsub.f32 %v10609_v26, %v8713_v24  ;;  %v10618_v15 = vsub.f32 %v10606_v32, %v8693_v50  ;;  %v2838_v21 = vmul.f32 0.5, %v2837_v16 }
 0x671   : > { %v2971_v27 = vmul.f32 %v8858_v20, %v10616_v59  ;;  %v10619_v12 = vmax.f32 %v8793_v5, 0.0  ;;  %v8901_v56 = vpack.c.bf16 %v3386_v14, %v3378_v25  ;;  %v10622_v63 = vsub.f32 %v10610_v6, %v8713_v24 }
 0x672   : > { %10615 = vst [vmem:[#allocation11_spill] sm:$0xff] %v8881_v19  ;;  %v2979_v42 = vmul.f32 %v8869_v22, %v10617_v23  ;;  %v2972_v4 = vmul.f32 %v8858_v20, %v10618_v15  ;;  %4398 = vmatmul.bf16.vlgmr.msra.gmra.mxu1 %v8881_v19  ;;  %v2641_v46 = vmax.f32 %v2625_v34, 0.0  ;;  %v2219_v1 = vpop.xlane.xlu1 %2218  ;;  %v2839_v5 = vsub.f32 1.5, %v2838_v21 }
 0x673   : > { %v8899_v47 = vpack.c.bf16 %v3385_v8, %v10619_v12  ;;  %10621 = vst [vmem:[#allocation13_spill] sm:$0xff] %v8901_v56  ;;  %v2980_v26 = vmul.f32 %v8869_v22, %v10622_v63  ;;  %v3117_v32 = vmul.f32 %v8707_v41, %v2971_v27  ;;  %v8911_v36 = vpop.eup %6275  ;;  %4496 = vmatmul.bf16.vlgmr.msra.gmra.mxu3 %v8901_v56  ;;  %vm2841_vm8 = vweird.f32 %v8817_v7 }
 0x674   : > { %v3125_v11 = vmul.f32 %v8707_v41, %v2979_v42  ;;  %v8916_v6 = vmul.f32 %v8662_v17, %v2219_v1  ;;  %v3118_v37 = vmul.f32 %v8709_v29, %v2972_v4  ;;  %v2846_v62 = vmul.f32 %v8911_v36, %v8843_v28  ;;  %v2514_v9 = vpop.xlane.xlu0 %2513 }
 0x675   : > { %10620 = vst [vmem:[#allocation12_spill] sm:$0xff] %v8899_v47  ;;  %4447 = vmatmul.bf16.vlgmr.msra.gmra.mxu2 %v8899_v47  ;;  %v3126_v25 = vmul.f32 %v8709_v29, %v2980_v26  ;;  %v8922_v61 = vadd.f32 1e-05, %v2641_v46  ;;  %v3263_v16 = vadd.f32 %v8717_v18, %v3117_v32  ;;  %v10623_v35 = vsub.f32 %v10607_v45, %v8693_v50 }
 0x676   : > { %v2594_v14 = vmul.f32 %v2514_v9, %v8662_v17  ;;  %v2610_v34 = vmul.f32 %v8916_v6, %v8916_v6  ;;  %v3271_v59 = vadd.f32 %v8717_v18, %v3125_v11  ;;  %vm2842_vm9 = vweird.f32 %v8849_v30 }
 0x677   : > { %v2973_v8 = vmul.f32 %v8858_v20, %v10623_v35  ;;  %v2847_v27 = vmul.f32 %v8911_v36, %v2846_v62  ;;  %vm2851_vm10 = vweird.f32 %v8843_v28  ;;  %6277 = vrsqrt.f32 %v8922_v61  ;;  %vm2843_vm11 = vmor %vm2841_vm8, %vm2842_vm9 }
 0x678   : > { %v2840_v45 = vmul.f32 %v8849_v30, %v2839_v5  ;;  %v2626_v23 = vsub.f32 %v2594_v14, %v2610_v34  ;;  %v3391_v42 = vmax.f32 %v3263_v16, 0.0  ;;  %v3264_v15 = vadd.f32 %v8719_v13, %v3118_v37 }
 0x679   : > { %v2848_v4 = vmul.f32 0.5, %v2847_v27  ;;  %v3272_v21 = vadd.f32 %v8719_v13, %v3126_v25  ;;  %v10624_v12 = vsub.f32 %v8032_v51, %v8713_v24  ;;  %v3119_v26 = vmul.f32 %v8721_v55, %v2973_v8 }
 0x67a   : > { %v2642_v46 = vmax.f32 %v2626_v23, 0.0  ;;  %v3399_v1 = vmax.f32 %v3271_v59, 0.0  ;;  %v3392_v32 = vmax.f32 %v3264_v15, 0.0  ;;  %v10625_v11 = vsub.f32 %v10608_v33, %v8693_v50  ;;  %v2228_v37 = vpop.xlane.xlu1 %2227  ;;  %v5955_v15 = vld [vmem:[#allocation5 + $0x360] sm:$0xf] }
 0x67b   : > { %v2981_v63 = vmul.f32 %v8869_v22, %v10624_v12  ;;  %v2849_v62 = vsub.f32 1.5, %v2848_v4  ;;  %v3400_v9 = vmax.f32 %v3272_v21, 0.0  ;;  %v3265_v16 = vadd.f32 %v8732_v49, %v3119_v26  ;;  %v6209_v4 = vld [vmem:[#allocation5 + $0x364] sm:$0xf0]  ;;  %v5827_v21 = vld [vmem:[#allocation5 + $0x260] sm:$0xf] }
 0x67c   : > { %v2974_v5 = vmul.f32 %v8858_v20, %v10625_v11  ;;  %v8956_v51 = vadd.f32 1e-05, %v2642_v46  ;;  %v8959_v35 = vmul.f32 %v8662_v17, %v2228_v37  ;;  %v10626_v33 = vsub.f32 %v8034_v53, %v8713_v24  ;;  %v2523_v27 = vpop.xlane.xlu0 %2522  ;;  %v6225_v26 = vld [vmem:[#allocation5 + $0x3e4] sm:$0xf0]  ;;  %v5891_v37 = vld [vmem:[#allocation5 + $0x2e0] sm:$0xf] }
 0x67d   : > { %v3127_v25 = vmul.f32 %v8721_v55, %v2981_v63  ;;  %v8966_v34 = vpop.eup %6277  ;;  %v8969_v59 = vsel %vm2843_vm11, %v8849_v30, %v2840_v45  ;;  %v2850_v7 = vmul.f32 %v8911_v36, %v2849_v62  ;;  %vm2852_vm12 = vweird.f32 %v8911_v36  ;;  %v6177_v30 = vld [vmem:[#allocation5 + $0x264] sm:$0xf0]  ;;  %v6019_v45 = vld [vmem:[#allocation5 + $0x3e0] sm:$0xf] }
 0x67e   : > { %v2982_v8 = vmul.f32 %v8869_v22, %v10626_v33  ;;  %v3120_v14 = vmul.f32 %v8738_v40, %v2974_v5  ;;  %v2856_v53 = vmul.f32 %v8966_v34, %v8922_v61  ;;  %6279 = vrsqrt.f32 %v8956_v51  ;;  %vm2853_vm13 = vmor %vm2851_vm10, %vm2852_vm12 }
 0x67f   : > { %v3273_v23 = vadd.f32 %v8732_v49, %v3127_v25  ;;  %v8977_v12 = vpack.c.bf16 %v3399_v1, %v3391_v42  ;;  %v8979_v63 = vpack.c.bf16 %v3400_v9, %v3392_v32  ;;  %v2595_v46 = vmul.f32 %v2523_v27, %v8662_v17  ;;  %v6193_v25 = vld [vmem:[#allocation5 + $0x2e4] sm:$0xf0] }
 0x680   : > { %v2611_v11 = vmul.f32 %v8959_v35, %v8959_v35  ;;  %v3393_v5 = vmax.f32 %v3265_v16, 0.0  ;;  %v2857_v42 = vmul.f32 %v8966_v34, %v2856_v53  ;;  %v3128_v1 = vmul.f32 %v8738_v40, %v2982_v8 }
 0x681   : > { %10627 = vst [vmem:[#allocation14_spill] sm:$0xff] %v8977_v12  ;;  %v3401_v62 = vmax.f32 %v3273_v23, 0.0  ;;  %v3266_v32 = vadd.f32 %v8744_v10, %v3120_v14  ;;  %v5956_v9 = vor.u32 %v6209_v4, %v5955_v15  ;;  %v8992_v33 = vsel %vm2853_vm13, %v8911_v36, %v2850_v7  ;;  %4354 = vmatmul.bf16.gmra.mxu0 %v8977_v12  ;;  %v6191_v12 = vld [vmem:[#allocation5 + $0x2d4] sm:$0xf0] }
 0x682   : > { %10628 = vst [vmem:[#allocation15_spill] sm:$0xff] %v8979_v63  ;;  %v2627_v27 = vsub.f32 %v2595_v46, %v2611_v11  ;;  %v5828_v16 = vor.u32 %v6177_v30, %v5827_v21  ;;  %v6020_v23 = vor.u32 %v6225_v26, %v6019_v45  ;;  %4403 = vmatmul.bf16.gmra.mxu1 %v8979_v63  ;;  %v2237_v14 = vpop.xlane.xlu2 %2236  ;;  %v2858_v30 = vmul.f32 0.5, %v2857_v42 }
 0x683   : > { %v8996_v43 = vpack.c.bf16 %v3401_v62, %v3393_v5  ;;  %v3274_v28 = vadd.f32 %v8744_v10, %v3128_v1  ;;  %4636 = vmatpush.bf16.msrb.mxu2 %v5956_v9  ;;  %v5892_v53 = vor.u32 %v6193_v25, %v5891_v37  ;;  %v2691_v36 = vsub.f32 %v8048_v54, %v8808_v31 }
 0x684   : > { %v2643_v8 = vmax.f32 %v2627_v27, 0.0  ;;  %4538 = vmatpush.bf16.msrb.mxu0 %v5828_v16  ;;  %4685 = vmatpush.bf16.msrb.mxu3 %v6020_v23  ;;  %v10630_v7 = vsub.f32 %v8036_v44, %v8761_v52  ;;  %v2684_v4 = vsub.f32 %v8038_v58, %v8761_v52  ;;  %v9007_v21 = vpop.eup %6279  ;;  %v3394_v45 = vmax.f32 %v3266_v32, 0.0  ;;  %v2532_v11 = vpop.xlane.xlu1 %2531 }
 0x685   : > { %10629 = vst [vmem:[#allocation16_spill] sm:$0xff] %v8996_v43  ;;  %4452 = vmatmul.bf16.gmra.mxu2 %v8996_v43  ;;  %v3402_v26 = vmax.f32 %v3274_v28, 0.0  ;;  %v9011_v46 = vmul.f32 %v8662_v17, %v2237_v14  ;;  %4587 = vmatpush.bf16.msrb.mxu1 %v5892_v53  ;;  %v2866_v54 = vmul.f32 %v9007_v21, %v8956_v51  ;;  %v2859_v27 = vsub.f32 1.5, %v2858_v30 }
 0x686   : > { %v2987_v15 = vmul.f32 %v8969_v59, %v10630_v7  ;;  %v9015_v44 = vadd.f32 1e-05, %v2643_v8  ;;  %v2995_v5 = vmul.f32 %v8992_v33, %v2691_v36  ;;  %v2988_v58 = vmul.f32 %v8969_v59, %v2684_v4 }
 0x687   : > { %v9019_v62 = vpack.c.bf16 %v3402_v26, %v3394_v45  ;;  %v2596_v37 = vmul.f32 %v2532_v11, %v8662_v17  ;;  %v2612_v25 = vmul.f32 %v9011_v46, %v9011_v46  ;;  %v2692_v42 = vsub.f32 %v8050_v57, %v8808_v31 }
 0x688   : > { %v2867_v1 = vmul.f32 %v9007_v21, %v2866_v54  ;;  %6281 = vrsqrt.f32 %v9015_v44  ;;  %v3133_v32 = vmul.f32 %v8707_v41, %v2987_v15  ;;  %v2685_v9 = vsub.f32 %v8044_v48, %v8761_v52 }
 0x689   : > { %10631 = vst [vmem:[#allocation17_spill] sm:$0xff] %v9019_v62  ;;  %4501 = vmatmul.bf16.gmra.mxu3 %v9019_v62  ;;  %v2628_v16 = vsub.f32 %v2596_v37, %v2612_v25  ;;  %v3141_v23 = vmul.f32 %v8707_v41, %v2995_v5  ;;  %v2996_v28 = vmul.f32 %v8992_v33, %v2692_v42  ;;  %vm2862_vm14 = vweird.f32 %v8966_v34 }
 0x68a   : > { %v2868_v53 = vmul.f32 0.5, %v2867_v1  ;;  %v3279_v57 = vadd.f32 %v8717_v18, %v3133_v32  ;;  %v3134_v8 = vmul.f32 %v8709_v29, %v2988_v58  ;;  %v2693_v14 = vsub.f32 %v8052_v60, %v8808_v31  ;;  %v2246_v4 = vpop.xlane.xlu2 %2245 }
 0x68b   : > { %v2644_v36 = vmax.f32 %v2628_v16, 0.0  ;;  %v3287_v7 = vadd.f32 %v8717_v18, %v3141_v23  ;;  %v3142_v48 = vmul.f32 %v8709_v29, %v2996_v28  ;;  %v2989_v15 = vmul.f32 %v8969_v59, %v2685_v9  ;;  %v5947_v16 = vld [vmem:[#allocation5 + $0x350] sm:$0xf]  ;;  %v6207_v23 = vld [vmem:[#allocation5 + $0x354] sm:$0xf0] }
 0x68c   : > { %v3280_v30 = vadd.f32 %v8719_v13, %v3134_v8  ;;  %v2997_v45 = vmul.f32 %v8992_v33, %v2693_v14  ;;  %v2686_v26 = vsub.f32 %v8046_v0, %v8761_v52  ;;  %v9049_v60 = vmul.f32 %v8662_v17, %v2246_v4  ;;  %v2541_v37 = vpop.xlane.xlu1 %2540 }
 0x68d   : > { %v9046_v54 = vadd.f32 1e-05, %v2644_v36  ;;  %v3415_v11 = vmax.f32 %v3287_v7, 0.0  ;;  %v3288_v5 = vadd.f32 %v8719_v13, %v3142_v48  ;;  %vm2872_vm15 = vweird.f32 %v9007_v21  ;;  %v5819_v48 = vld [vmem:[#allocation5 + $0x250] sm:$0xf] }
 0x68e   : > { %v9052_v58 = vpop.eup %6281  ;;  %v3407_v25 = vmax.f32 %v3279_v57, 0.0  ;;  %v3135_v42 = vmul.f32 %v8721_v55, %v2989_v15  ;;  %v3143_v1 = vmul.f32 %v8721_v55, %v2997_v45  ;;  %v2860_v0 = vmul.f32 %v8966_v34, %v2859_v27  ;;  %v6175_v15 = vld [vmem:[#allocation5 + $0x254] sm:$0xf0]  ;;  %v10633_v45 = vld [vmem:[#allocation23_spill] sm:$0xff] }
 0x68f   : > { %v2869_v32 = vsub.f32 1.5, %v2868_v53  ;;  %v2876_v9 = vmul.f32 %v9052_v58, %v9015_v44  ;;  %6283 = vrsqrt.f32 %v9046_v54  ;;  %v2597_v28 = vmul.f32 %v2541_v37, %v8662_v17 }
 0x690   : > { %v2613_v8 = vmul.f32 %v9049_v60, %v9049_v60  ;;  %v9064_v57 = vpack.c.bf16 %v3415_v11, %v3407_v25  ;;  %v3408_v14 = vmax.f32 %v3280_v30, 0.0  ;;  %v3416_v7 = vmax.f32 %v3288_v5, 0.0  ;;  %v6011_v25 = vld [vmem:[#allocation5 + $0x3d0] sm:$0xf]  ;;  %v6223_v30 = vld [vmem:[#allocation5 + $0x3d4] sm:$0xf0] }
 0x691   : > { %v2877_v36 = vmul.f32 %v9052_v58, %v2876_v9  ;;  %v3281_v27 = vadd.f32 %v8732_v49, %v3135_v42  ;;  %v3289_v53 = vadd.f32 %v8732_v49, %v3143_v1  ;;  %v2694_v37 = vsub.f32 %v10633_v45, %v8808_v31  ;;  %v5883_v45 = vld [vmem:[#allocation5 + $0x2d0] sm:$0xf] }
 0x692   : > { %10632 = vst [vmem:[#allocation18_spill] sm:$0xff] %v9064_v57  ;;  %v2629_v4 = vsub.f32 %v2597_v28, %v2613_v8  ;;  %4359 = vmatmul.bf16.gmra.mxu0 %v9064_v57  ;;  %v2990_v62 = vmul.f32 %v8969_v59, %v2686_v26  ;;  %v5948_v11 = vor.u32 %v6207_v23, %v5947_v16  ;;  %v2255_v57 = vpop.xlane.xlu0 %2254  ;;  %vm2861_vm0 = vweird.f32 %v8922_v61 }
 0x693   : > { %v2870_v9 = vmul.f32 %v9007_v21, %v2869_v32  ;;  %v9074_v5 = vpack.c.bf16 %v3416_v7, %v3408_v14  ;;  %v3409_v42 = vmax.f32 %v3281_v27, 0.0  ;;  %v3417_v43 = vmax.f32 %v3289_v53, 0.0  ;;  %vm2863_vm1 = vmor %vm2861_vm0, %vm2862_vm14 }
 0x694   : > { %v2645_v1 = vmax.f32 %v2629_v4, 0.0  ;;  %v2998_v63 = vmul.f32 %v8992_v33, %v2694_v37  ;;  %v3136_v28 = vmul.f32 %v8738_v40, %v2990_v62  ;;  %4637 = vmatpush.bf16.msrb.mxu2 %v5948_v11  ;;  %v5820_v8 = vor.u32 %v6175_v15, %v5819_v48  ;;  %v2550_v27 = vpop.xlane.xlu2 %2549  ;;  %v10638_v37 = vld [vmem:[#allocation28_spill] sm:$0xff] }
 0x695   : > { %10634 = vst [vmem:[#allocation19_spill] sm:$0xff] %v9074_v5  ;;  %v9078_v26 = vpop.eup %6283  ;;  %v2878_v16 = vmul.f32 0.5, %v2877_v36  ;;  %4408 = vmatmul.bf16.gmra.mxu1 %v9074_v5  ;;  %v9081_v32 = vpack.c.bf16 %v3417_v43, %v3409_v42  ;;  %v6012_v23 = vor.u32 %v6223_v30, %v6011_v25  ;;  %v9084_v14 = vmul.f32 %v8662_v17, %v2255_v57  ;;  %v5875_v5 = vld [vmem:[#allocation5 + $0x2c0] sm:$0xf] }
 0x696   : > { %v9087_v7 = vadd.f32 1e-05, %v2645_v1  ;;  %v3144_v62 = vmul.f32 %v8738_v40, %v2998_v63  ;;  %4539 = vmatpush.bf16.msrb.mxu0 %v5820_v8  ;;  %vm2871_vm2 = vweird.f32 %v8956_v51  ;;  %v2886_v43 = vmul.f32 %v9078_v26, %v9046_v54 }
 0x697   : > { %10635 = vst [vmem:[#allocation20_spill] sm:$0xff] %v9081_v32  ;;  %4457 = vmatmul.bf16.gmra.mxu2 %v9081_v32  ;;  %v3282_v57 = vadd.f32 %v8744_v10, %v3136_v28  ;;  %4686 = vmatpush.bf16.msrb.mxu3 %v6012_v23  ;;  %v5884_v61 = vor.u32 %v6191_v12, %v5883_v45  ;;  %vm2873_vm3 = vmor %vm2871_vm2, %vm2872_vm15  ;;  %v2879_v53 = vsub.f32 1.5, %v2878_v16  ;;  %vm2881_vm4 = vweird.f32 %v9015_v44  ;;  %v10641_v45 = vld [vmem:[#allocation29_spill] sm:$0xff]  ;;  %v6173_v32 = vld [vmem:[#allocation5 + $0x244] sm:$0xf0] }
 0x698   : > { %v9098_v36 = vsel %vm2863_vm1, %v8966_v34, %v2860_v0  ;;  %6285 = vrsqrt.f32 %v9087_v7  ;;  %v3290_v63 = vadd.f32 %v8744_v10, %v3144_v62  ;;  %v9105_v51 = vsel %vm2873_vm3, %v9007_v21, %v2870_v9  ;;  %v10637_v0 = vld [vmem:[#allocation24_spill] sm:$0xff]  ;;  %v10639_v21 = vld [vmem:[#allocation25_spill] sm:$0xff] }
 0x699   : > { %10636 = vst [vmem:[#allocation21_spill] sm:$0xff] %v9098_v36  ;;  %4588 = vmatpush.bf16.msrb.mxu1 %v5884_v61  ;;  %v2598_v48 = vmul.f32 %v2550_v27, %v8662_v17  ;;  %v2614_v12 = vmul.f32 %v9084_v14, %v9084_v14  ;;  %v3410_v15 = vmax.f32 %v3282_v57, 0.0  ;;  %v2699_v4 = vsub.f32 %v10637_v0, %v8846_v3 }
 0x69a   : > { %v3418_v34 = vmax.f32 %v3290_v63, 0.0  ;;  %v2707_v11 = vsub.f32 %v10638_v37, %v8916_v6  ;;  %v2887_v25 = vmul.f32 %v9078_v26, %v2886_v43  ;;  %v2700_v9 = vsub.f32 %v10639_v21, %v8846_v3  ;;  %v2264_v1 = vpop.xlane.xlu0 %2263 }
 0x69b   : > { %v2630_v30 = vsub.f32 %v2598_v48, %v2614_v12  ;;  %v3003_v28 = vmul.f32 %v9098_v36, %v2699_v4  ;;  %v2708_v16 = vsub.f32 %v10641_v45, %v8916_v6  ;;  %vm2882_vm5 = vweird.f32 %v9052_v58 }
 0x69c   : > { %v9118_v42 = vpack.c.bf16 %v3418_v34, %v3410_v15  ;;  %v3011_v8 = vmul.f32 %v9105_v51, %v2707_v11  ;;  %v9126_v62 = vmul.f32 %v8662_v17, %v2264_v1  ;;  %v3004_v27 = vmul.f32 %v9098_v36, %v2700_v9  ;;  %v2559_v61 = vpop.xlane.xlu2 %2558  ;;  %v10643_v1 = vld [vmem:[#allocation30_spill] sm:$0xff]  ;;  %vm2883_vm7 = vmor %vm2881_vm4, %vm2882_vm5 }
 0x69d   : > { %v2646_v23 = vmax.f32 %v2630_v30, 0.0  ;;  %v2880_v57 = vmul.f32 %v9052_v58, %v2879_v53  ;;  %v3149_v63 = vmul.f32 %v8707_v41, %v3003_v28  ;;  %v3012_v12 = vmul.f32 %v9105_v51, %v2708_v16  ;;  %v10642_v30 = vld [vmem:[#allocation26_spill] sm:$0xff] }
 0x69e   : > { %10640 = vst [vmem:[#allocation22_spill] sm:$0xff] %v9118_v42  ;;  %v9129_v43 = vpop.eup %6285  ;;  %4506 = vmatmul.bf16.gmra.mxu3 %v9118_v42  ;;  %v3157_v48 = vmul.f32 %v8707_v41, %v3011_v8  ;;  %v2888_v15 = vmul.f32 0.5, %v2887_v25  ;;  %v2599_v4 = vmul.f32 %v2559_v61, %v8662_v17  ;;  %v2615_v53 = vmul.f32 %v9126_v62, %v9126_v62 }
 0x69f   : > { %v2896_v34 = vmul.f32 %v9129_v43, %v9087_v7  ;;  %v9138_v0 = vadd.f32 1e-05, %v2646_v23  ;;  %v3295_v37 = vadd.f32 %v8717_v18, %v3149_v63  ;;  %v2701_v21 = vsub.f32 %v10642_v30, %v8846_v3 }
 0x6a0   : > { %v3303_v11 = vadd.f32 %v8717_v18, %v3157_v48  ;;  %v3150_v25 = vmul.f32 %v8709_v29, %v3004_v27  ;;  %v2709_v28 = vsub.f32 %v10643_v1, %v8916_v6  ;;  %v2631_v8 = vsub.f32 %v2599_v4, %v2615_v53  ;;  %v10645_v4 = vld [vmem:[#allocation27_spill] sm:$0xff] }
 0x6a1   : > { %v2897_v9 = vmul.f32 %v9129_v43, %v2896_v34  ;;  %6287 = vrsqrt.f32 %v9138_v0  ;;  %v3423_v45 = vmax.f32 %v3295_v37, 0.0  ;;  %v3158_v23 = vmul.f32 %v8709_v29, %v3012_v12  ;;  %v5939_v37 = vld [vmem:[#allocation5 + $0x340] sm:$0xf] }
 0x6a2   : > { %v3431_v16 = vmax.f32 %v3303_v11, 0.0  ;;  %v2889_v61 = vsub.f32 1.5, %v2888_v15  ;;  %vm2891_vm6 = vweird.f32 %v9046_v54  ;;  %v3296_v63 = vadd.f32 %v8719_v13, %v3150_v25  ;;  %v6205_v11 = vld [vmem:[#allocation5 + $0x344] sm:$0xf0]  ;;  %v2273_v12 = vpop.xlane.xlu1 %2272 }
 0x6a3   : > { %v3005_v48 = vmul.f32 %v9098_v36, %v2701_v21  ;;  %v3013_v34 = vmul.f32 %v9105_v51, %v2709_v28  ;;  %v2647_v30 = vmax.f32 %v2631_v8, 0.0  ;;  %v3304_v27 = vadd.f32 %v8719_v13, %v3158_v23 }
 0x6a4   : > { %v9157_v42 = vpack.c.bf16 %v3431_v16, %v3423_v45  ;;  %v2702_v53 = vsub.f32 %v10645_v4, %v8846_v3  ;;  %vm2892_vm8 = vweird.f32 %v9078_v26  ;;  %v2898_v15 = vmul.f32 0.5, %v2897_v9  ;;  %v5811_v16 = vld [vmem:[#allocation5 + $0x240] sm:$0xf]  ;;  %v2568_v44 = vpop.xlane.xlu0 %2567 }
 0x6a5   : > { %v3151_v21 = vmul.f32 %v8721_v55, %v3005_v48  ;;  %v3159_v25 = vmul.f32 %v8721_v55, %v3013_v34  ;;  %v9170_v1 = vsel %vm2883_vm7, %v9052_v58, %v2880_v57  ;;  %v9172_v28 = vadd.f32 1e-05, %v2647_v30  ;;  %v6003_v58 = vld [vmem:[#allocation5 + $0x3c0] sm:$0xf]  ;;  %vm2893_vm9 = vmor %vm2891_vm6, %vm2892_vm8 }
 0x6a6   : > { %10644 = vst [vmem:[#allocation23_spill] sm:$0xff] %v9157_v42  ;;  %4364 = vmatmul.bf16.gmra.mxu0 %v9157_v42  ;;  %v3432_v8 = vmax.f32 %v3304_v27, 0.0  ;;  %v3006_v45 = vmul.f32 %v9098_v36, %v2702_v53  ;;  %v3424_v4 = vmax.f32 %v3296_v63, 0.0  ;;  %v5940_v34 = vor.u32 %v6205_v11, %v5939_v37  ;;  %v10646_v27 = vld [vmem:[#allocation31_spill] sm:$0xff]  ;;  %v6221_v42 = vld [vmem:[#allocation5 + $0x3c4] sm:$0xf0] }
 0x6a7   : > { %v9176_v23 = vpop.eup %6287  ;;  %v3297_v9 = vadd.f32 %v8732_v49, %v3151_v21  ;;  %v3305_v48 = vadd.f32 %v8732_v49, %v3159_v25  ;;  %v2890_v57 = vmul.f32 %v9078_v26, %v2889_v61  ;;  %6289 = vrsqrt.f32 %v9172_v28  ;;  %v6189_v63 = vld [vmem:[#allocation5 + $0x2c4] sm:$0xf0] }
 0x6a8   : > { %v2906_v30 = vmul.f32 %v9176_v23, %v9138_v0  ;;  %v2710_v53 = vsub.f32 %v10646_v27, %v8916_v6  ;;  %v2899_v56 = vsub.f32 1.5, %v2898_v15  ;;  %v9186_v21 = vpack.c.bf16 %v3432_v8, %v3424_v4  ;;  %4638 = vmatpush.bf16.msrb.mxu2 %v5940_v34 }
 0x6a9   : > { %v3425_v25 = vmax.f32 %v3297_v9, 0.0  ;;  %v3433_v37 = vmax.f32 %v3305_v48, 0.0  ;;  %v3152_v47 = vmul.f32 %v8738_v40, %v3006_v45  ;;  %v5812_v19 = vor.u32 %v6173_v32, %v5811_v16  ;;  %v10650_v9 = vld [vmem:[#allocation32_spill] sm:$0xff] }
 0x6aa   : > { %10647 = vst [vmem:[#allocation24_spill] sm:$0xff] %v9186_v21  ;;  %v2907_v11 = vmul.f32 %v9176_v23, %v2906_v30  ;;  %v3014_v61 = vmul.f32 %v9105_v51, %v2710_v53  ;;  %4413 = vmatmul.bf16.gmra.mxu1 %v9186_v21  ;;  %v6004_v27 = vor.u32 %v6221_v42, %v6003_v58  ;;  %vm2901_vm10 = vweird.f32 %v9087_v7  ;;  %v2282_v42 = vpop.xlane.xlu1 %2281  ;;  %v10651_v30 = vld [vmem:[#allocation36_spill] sm:$0xff] }
 0x6ab   : > { %v9192_v2 = vpack.c.bf16 %v3433_v37, %v3425_v25  ;;  %v9195_v36 = vmul.f32 %v8662_v17, %v2273_v12  ;;  %v5876_v15 = vor.u32 %v6189_v63, %v5875_v5  ;;  %v3298_v32 = vadd.f32 %v8744_v10, %v3152_v47  ;;  %4540 = vmatpush.bf16.msrb.mxu0 %v5812_v19 }
 0x6ac   : > { %v2908_v8 = vmul.f32 0.5, %v2907_v11  ;;  %v3160_v45 = vmul.f32 %v8738_v40, %v3014_v61  ;;  %v2600_v16 = vmul.f32 %v2568_v44, %v8662_v17  ;;  %v9206_v12 = vsel %vm2893_vm9, %v9078_v26, %v2890_v57  ;;  %4687 = vmatpush.bf16.msrb.mxu3 %v6004_v27  ;;  %v2577_v44 = vpop.xlane.xlu0 %2576 }
 0x6ad   : > { %10648 = vst [vmem:[#allocation28_spill] sm:$0xff] %v9192_v2  ;;  %vm2902_vm11 = vweird.f32 %v9129_v43  ;;  %4462 = vmatmul.bf16.gmra.mxu2 %v9192_v2  ;;  %v2616_v54 = vmul.f32 %v9195_v36, %v9195_v36  ;;  %v9213_v5 = vmul.f32 %v8662_v17, %v2282_v42  ;;  %v9215_v4 = vpop.eup %6289  ;;  %v2900_v19 = vmul.f32 %v9129_v43, %v2899_v56 }
 0x6ae   : > { %v2909_v47 = vsub.f32 1.5, %v2908_v8  ;;  %vm2911_vm12 = vweird.f32 %v9138_v0  ;;  %v3306_v26 = vadd.f32 %v8744_v10, %v3160_v45  ;;  %4589 = vmatpush.bf16.msrb.mxu1 %v5876_v15  ;;  %v2715_v48 = vsub.f32 %v10650_v9, %v8959_v35  ;;  %vm2903_vm14 = vmor %vm2901_vm10, %vm2902_vm11  ;;  %v5803_v0 = vld [vmem:[#allocation5 + $0x230] sm:$0xf] }
 0x6af   : > { %10649 = vst [vmem:[#allocation25_spill] sm:$0xff] %v9213_v5  ;;  %v2916_v34 = vmul.f32 %v9215_v4, %v9172_v28  ;;  %v2632_v58 = vsub.f32 %v2600_v16, %v2616_v54  ;;  %v2601_v57 = vmul.f32 %v2577_v44, %v8662_v17  ;;  %v2723_v53 = vsub.f32 %v10651_v30, %v9011_v46 }
 0x6b0   : > { %v3426_v56 = vmax.f32 %v3298_v32, 0.0  ;;  %v3434_v63 = vmax.f32 %v3306_v26, 0.0  ;;  %v2617_v25 = vmul.f32 %v9213_v5, %v9213_v5  ;;  %v3019_v37 = vmul.f32 %v9170_v1, %v2715_v48  ;;  %v10653_v32 = vld [vmem:[#allocation33_spill] sm:$0xff] }
 0x6b1   : > { %vm2912_vm13 = vweird.f32 %v9176_v23  ;;  %v2917_v11 = vmul.f32 %v9215_v4, %v2916_v34  ;;  %v2648_v61 = vmax.f32 %v2632_v58, 0.0  ;;  %v3027_v27 = vmul.f32 %v9206_v12, %v2723_v53  ;;  %v10654_v34 = vld [vmem:[#allocation37_spill] sm:$0xff]  ;;  %v10655_v53 = vld [vmem:[#allocation34_spill] sm:$0xff] }
 0x6b2   : > { %v9233_v15 = vpack.c.bf16 %v3434_v63, %v3426_v56  ;;  %v2633_v8 = vsub.f32 %v2601_v57, %v2617_v25  ;;  %v3165_v45 = vmul.f32 %v8707_v41, %v3019_v37  ;;  %v2716_v16 = vsub.f32 %v10653_v32, %v8959_v35  ;;  %vm2913_vm15 = vmor %vm2911_vm12, %vm2912_vm13 }
 0x6b3   : > { %v2910_v42 = vmul.f32 %v9176_v23, %v2909_v47  ;;  %v2918_v54 = vmul.f32 0.5, %v2917_v11  ;;  %v9239_v26 = vadd.f32 1e-05, %v2648_v61  ;;  %v3173_v44 = vmul.f32 %v8707_v41, %v3027_v27  ;;  %v10656_v27 = vld [vmem:[#allocation38_spill] sm:$0xff] }
 0x6b4   : > { %10652 = vst [vmem:[#allocation29_spill] sm:$0xff] %v9233_v15  ;;  %4511 = vmatmul.bf16.gmra.mxu3 %v9233_v15  ;;  %v2649_v9 = vmax.f32 %v2633_v8, 0.0  ;;  %v3311_v48 = vadd.f32 %v8717_v18, %v3165_v45  ;;  %v2724_v58 = vsub.f32 %v10654_v34, %v9011_v46  ;;  %v3020_v57 = vmul.f32 %v9170_v1, %v2716_v16 }
 0x6b5   : > { %v2919_v47 = vsub.f32 1.5, %v2918_v54  ;;  %6291 = vrsqrt.f32 %v9239_v26  ;;  %v3319_v30 = vadd.f32 %v8717_v18, %v3173_v44  ;;  %v2717_v56 = vsub.f32 %v10655_v53, %v8959_v35  ;;  %v6203_v54 = vld [vmem:[#allocation5 + $0x334] sm:$0xf0]  ;;  %v10659_v53 = vld [vmem:[#allocation39_spill] sm:$0xff] }
 0x6b6   : > { %v9256_v63 = vsel %vm2903_vm14, %v9129_v43, %v2900_v19  ;;  %v9258_v25 = vadd.f32 1e-05, %v2649_v9  ;;  %v3028_v37 = vmul.f32 %v9206_v12, %v2724_v58  ;;  %v3166_v11 = vmul.f32 %v8709_v29, %v3020_v57  ;;  %v5931_v43 = vld [vmem:[#allocation5 + $0x330] sm:$0xf]  ;;  %v6171_v44 = vld [vmem:[#allocation5 + $0x234] sm:$0xf0] }
 0x6b7   : > { %v3439_v7 = vmax.f32 %v3311_v48, 0.0  ;;  %v3447_v61 = vmax.f32 %v3319_v30, 0.0  ;;  %v2725_v8 = vsub.f32 %v10656_v27, %v9011_v46  ;;  %v3021_v45 = vmul.f32 %v9170_v1, %v2717_v56  ;;  %v10658_v57 = vld [vmem:[#allocation35_spill] sm:$0xff] }
 0x6b8   : > { %v9270_v19 = vsel %vm2913_vm15, %v9176_v23, %v2910_v42  ;;  %6293 = vrsqrt.f32 %v9258_v25  ;;  %v3174_v32 = vmul.f32 %v8709_v29, %v3028_v37  ;;  %v3312_v16 = vadd.f32 %v8719_v13, %v3166_v11  ;;  %v5995_v37 = vld [vmem:[#allocation5 + $0x3b0] sm:$0xf] }
 0x6b9   : > { %v9276_v9 = vmul.f32 %v9215_v4, %v2919_v47  ;;  %v9278_v48 = vpack.c.bf16 %v3447_v61, %v3439_v7  ;;  %v3029_v34 = vmul.f32 %v9206_v12, %v2725_v8  ;;  %v3167_v58 = vmul.f32 %v8721_v55, %v3021_v45  ;;  %v6219_v47 = vld [vmem:[#allocation5 + $0x3b4] sm:$0xf0]  ;;  %v2291_v45 = vpop.xlane.xlu2 %2290 }
 0x6ba   : > { %vm2922_vm0 = vweird.f32 %v9215_v4  ;;  %v3320_v23 = vadd.f32 %v8719_v13, %v3174_v32  ;;  %v3440_v42 = vmax.f32 %v3312_v16, 0.0  ;;  %v2718_v30 = vsub.f32 %v10658_v57, %v8959_v35 }
 0x6bb   : > { %10657 = vst [vmem:[#allocation26_spill] sm:$0xff] %v9278_v48  ;;  %v2726_v56 = vsub.f32 %v10659_v53, %v9011_v46  ;;  %v9288_v11 = vpop.eup %6291  ;;  %4369 = vmatmul.bf16.gmra.mxu0 %v9278_v48  ;;  %v3175_v7 = vmul.f32 %v8721_v55, %v3029_v34  ;;  %v3313_v61 = vadd.f32 %v8732_v49, %v3167_v58  ;;  %vm2921_vm1 = vweird.f32 %v9172_v28 }
 0x6bc   : > { %v5932_v27 = vor.u32 %v6203_v54, %v5931_v43  ;;  %v5804_v8 = vor.u32 %v6171_v44, %v5803_v0  ;;  %v2926_v32 = vmul.f32 %v9288_v11, %v9239_v26  ;;  %vm2932_vm2 = vweird.f32 %v9288_v11  ;;  %v5867_v54 = vld [vmem:[#allocation5 + $0x2b0] sm:$0xf]  ;;  %v6187_v0 = vld [vmem:[#allocation5 + $0x2b4] sm:$0xf0]  ;;  %v2586_v44 = vpop.xlane.xlu1 %2585  ;;  %vm2923_vm6 = vmor %vm2921_vm1, %vm2922_vm0 }
 0x6bd   : > { %v3448_v16 = vmax.f32 %v3320_v23, 0.0  ;;  %v3022_v57 = vmul.f32 %v9170_v1, %v2718_v30  ;;  %vm2931_vm3 = vweird.f32 %v9239_v26  ;;  %v3321_v53 = vadd.f32 %v8732_v49, %v3175_v7 }
 0x6be   : > { %v3441_v34 = vmax.f32 %v3313_v61, 0.0  ;;  %v3030_v58 = vmul.f32 %v9206_v12, %v2726_v56  ;;  %4639 = vmatpush.bf16.msrb.mxu2 %v5932_v27  ;;  %4541 = vmatpush.bf16.msrb.mxu0 %v5804_v8  ;;  %v5996_v43 = vor.u32 %v6219_v47, %v5995_v37  ;;  %v6294_v48 = vpop.eup %6293  ;;  %v2927_v15 = vmul.f32 %v9288_v11, %v2926_v32  ;;  %vm2933_vm7 = vmor %vm2931_vm3, %vm2932_vm2 }
 0x6bf   : > { %v9302_v2 = vpack.c.bf16 %v3448_v16, %v3440_v42  ;;  %v3168_v23 = vmul.f32 %v8738_v40, %v3022_v57  ;;  %v9306_v30 = vmul.f32 %v8662_v17, %v2291_v45  ;;  %v2936_v7 = vmul.f32 %v6294_v48, %v9258_v25 }
 0x6c0   : > { %vm2941_vm4 = vweird.f32 %v9258_v25  ;;  %vm2942_vm5 = vweird.f32 %v6294_v48  ;;  %v3449_v56 = vmax.f32 %v3321_v53, 0.0  ;;  %v3176_v37 = vmul.f32 %v8738_v40, %v3030_v58  ;;  %4688 = vmatpush.bf16.msrb.mxu3 %v5996_v43  ;;  %v10663_v43 = vld [vmem:[#allocation44_spill] sm:$0xff]  ;;  %v5923_v25 = vld [vmem:[#allocation5 + $0x320] sm:$0xf] }
 0x6c1   : > { %10660 = vst [vmem:[#allocation30_spill] sm:$0xff] %v9302_v2  ;;  %v2928_v47 = vmul.f32 0.5, %v2927_v15  ;;  %4418 = vmatmul.bf16.gmra.mxu1 %v9302_v2  ;;  %v3314_v42 = vadd.f32 %v8744_v10, %v3168_v23  ;;  %v5868_v61 = vor.u32 %v6187_v0, %v5867_v54  ;;  %v2602_v27 = vmul.f32 %v2586_v44, %v8662_v17  ;;  %v10662_v15 = vld [vmem:[#allocation40_spill] sm:$0xff]  ;;  %v10664_v0 = vld [vmem:[#allocation41_spill] sm:$0xff]  ;;  %vm2943_vm8 = vmor %vm2941_vm4, %vm2942_vm5 }
 0x6c2   : > { %v2937_v8 = vmul.f32 %v6294_v48, %v2936_v7  ;;  %v9314_v45 = vpack.c.bf16 %v3449_v56, %v3441_v34  ;;  %v3322_v32 = vadd.f32 %v8744_v10, %v3176_v37  ;;  %v2618_v16 = vmul.f32 %v9306_v30, %v9306_v30  ;;  %v6183_v2 = vld [vmem:[#allocation5 + $0x294] sm:$0xf0] }
 0x6c3   : > { %v2929_v57 = vsub.f32 1.5, %v2928_v47  ;;  %v3442_v53 = vmax.f32 %v3314_v42, 0.0  ;;  %4590 = vmatpush.bf16.msrb.mxu1 %v5868_v61  ;;  %v2731_v58 = vsub.f32 %v10662_v15, %v9049_v60  ;;  %v2739_v23 = vsub.f32 %v10663_v43, %v9084_v14  ;;  %v10665_v47 = vld [vmem:[#allocation45_spill] sm:$0xff] }
 0x6c4   : > { %10661 = vst [vmem:[#allocation27_spill] sm:$0xff] %v9314_v45  ;;  %v2938_v54 = vmul.f32 0.5, %v2937_v8  ;;  %4467 = vmatmul.bf16.gmra.mxu2 %v9314_v45  ;;  %v3450_v17 = vmax.f32 %v3322_v32, 0.0  ;;  %v2634_v34 = vsub.f32 %v2602_v27, %v2618_v16  ;;  %v2732_v44 = vsub.f32 %v10664_v0, %v9049_v60  ;;  %v10669_v0 = vld [vmem:[#allocation46_spill] sm:$0xff] }
 0x6c5   : > { %v2930_v7 = vmul.f32 %v9288_v11, %v2929_v57  ;;  %v3035_v56 = vmul.f32 %v9256_v63, %v2731_v58  ;;  %v3043_v37 = vmul.f32 %v9270_v19, %v2739_v23  ;;  %v2740_v42 = vsub.f32 %v10665_v47, %v9084_v14 }
 0x6c6   : > { %v2939_v61 = vsub.f32 1.5, %v2938_v54  ;;  %v9335_v8 = vpack.c.bf16 %v3450_v17, %v3442_v53  ;;  %v2650_v27 = vmax.f32 %v2634_v34, 0.0  ;;  %v3036_v32 = vmul.f32 %v9256_v63, %v2732_v44 }
 0x6c7   : > { %v9340_v16 = vsel %vm2923_vm6, %v9215_v4, %v9276_v9  ;;  %v3181_v57 = vmul.f32 %v8707_v41, %v3035_v56  ;;  %v3189_v28 = vmul.f32 %v8707_v41, %v3043_v37  ;;  %v3044_v15 = vmul.f32 %v9270_v19, %v2740_v42 }
 0x6c8   : > { %10666 = vst [vmem:[#allocation31_spill] sm:$0xff] %v9335_v8  ;;  %v9350_v53 = vsel %vm2933_vm7, %v9288_v11, %v2930_v7  ;;  %v2940_v58 = vmul.f32 %v6294_v48, %v2939_v61  ;;  %4516 = vmatmul.bf16.gmra.mxu3 %v9335_v8  ;;  %v9353_v43 = vadd.f32 1e-05, %v2650_v27  ;;  %v3182_v4 = vmul.f32 %v8709_v29, %v3036_v32  ;;  %v10667_v11 = vld [vmem:[#allocation42_spill] sm:$0xff]  ;;  %v5795_v61 = vld [vmem:[#allocation5 + $0x220] sm:$0xf] }
 0x6c9   : > { %v3327_v26 = vadd.f32 %v8717_v18, %v3181_v57  ;;  %v3335_v9 = vadd.f32 %v8717_v18, %v3189_v28  ;;  %v3190_v23 = vmul.f32 %v8709_v29, %v3044_v15  ;;  %v2733_v54 = vsub.f32 %v10667_v11, %v9049_v60  ;;  %v6201_v7 = vld [vmem:[#allocation5 + $0x324] sm:$0xf0]  ;;  %v10670_v57 = vld [vmem:[#allocation43_spill] sm:$0xff] }
 0x6ca   : > { %v9364_v17 = vsel %vm2943_vm8, %v6294_v48, %v2940_v58  ;;  %6295 = vrsqrt.f32 %v9353_v43  ;;  %v3328_v34 = vadd.f32 %v8719_v13, %v3182_v4  ;;  %v2741_v44 = vsub.f32 %v10669_v0, %v9084_v14  ;;  %v6169_v27 = vld [vmem:[#allocation5 + $0x224] sm:$0xf0]  ;;  %v10671_v15 = vld [vmem:[#allocation47_spill] sm:$0xff]  ;;  %v5987_v4 = vld [vmem:[#allocation5 + $0x3a0] sm:$0xf] }
 0x6cb   : > { %10668 = vst [vmem:[#allocation32_spill] sm:$0xff] %v9364_v17  ;;  %v3455_v56 = vmax.f32 %v3327_v26, 0.0  ;;  %v3463_v37 = vmax.f32 %v3335_v9, 0.0  ;;  %v3336_v47 = vadd.f32 %v8719_v13, %v3190_v23  ;;  %v3037_v42 = vmul.f32 %v9256_v63, %v2733_v54  ;;  %v6217_v11 = vld [vmem:[#allocation5 + $0x3a4] sm:$0xf0] }
 0x6cc   : > { %v3456_v32 = vmax.f32 %v3328_v34, 0.0  ;;  %v3045_v48 = vmul.f32 %v9270_v19, %v2741_v44  ;;  %v2734_v28 = vsub.f32 %v10670_v57, %v9049_v60  ;;  %v2742_v58 = vsub.f32 %v10671_v15, %v9084_v14  ;;  %v5859_v54 = vld [vmem:[#allocation5 + $0x2a0] sm:$0xf]  ;;  %v6185_v8 = vld [vmem:[#allocation5 + $0x2a4] sm:$0xf0] }
 0x6cd   : > { %v9377_v0 = vpack.c.bf16 %v3463_v37, %v3455_v56  ;;  %v3464_v26 = vmax.f32 %v3336_v47, 0.0  ;;  %v3183_v9 = vmul.f32 %v8721_v55, %v3037_v42  ;;  %v5924_v23 = vor.u32 %v6201_v7, %v5923_v25 }
 0x6ce   : > { %v3191_v34 = vmul.f32 %v8721_v55, %v3045_v48  ;;  %v3038_v44 = vmul.f32 %v9256_v63, %v2734_v28  ;;  %v3046_v45 = vmul.f32 %v9270_v19, %v2742_v58  ;;  %v5796_v57 = vor.u32 %v6169_v27, %v5795_v61  ;;  %v10674_v27 = vld [vmem:[#allocation48_spill] sm:$0xff] }
 0x6cf   : > { %10672 = vst [vmem:[#allocation36_spill] sm:$0xff] %v9377_v0  ;;  %4374 = vmatmul.bf16.gmra.mxu0 %v9377_v0  ;;  %v9384_v15 = vpack.c.bf16 %v3464_v26, %v3456_v32  ;;  %v3329_v56 = vadd.f32 %v8732_v49, %v3183_v9  ;;  %4640 = vmatpush.bf16.msrb.mxu2 %v5924_v23  ;;  %v10676_v23 = vld [vmem:[#allocation49_spill] sm:$0xff]  ;;  %vm2951_vm10 = vweird.f32 %v9353_v43  ;;  %v5851_v0 = vld [vmem:[#allocation5 + $0x290] sm:$0xf] }
 0x6d0   : > { %v5988_v37 = vor.u32 %v6217_v11, %v5987_v4  ;;  %v6296_v47 = vpop.eup %6295  ;;  %v3337_v25 = vadd.f32 %v8732_v49, %v3191_v34  ;;  %v3184_v7 = vmul.f32 %v8738_v40, %v3038_v44  ;;  %v3192_v42 = vmul.f32 %v8738_v40, %v3046_v45  ;;  %4542 = vmatpush.bf16.msrb.mxu0 %v5796_v57  ;;  %v10675_v45 = vld [vmem:[#allocation52_spill] sm:$0xff]  ;;  %v10677_v34 = vld [vmem:[#allocation53_spill] sm:$0xff] }
 0x6d1   : > { %10673 = vst [vmem:[#allocation33_spill] sm:$0xff] %v9384_v15  ;;  %v5860_v48 = vor.u32 %v6185_v8, %v5859_v54  ;;  %v2946_v28 = vmul.f32 %v6296_v47, %v9353_v43  ;;  %vm2952_vm9 = vweird.f32 %v6296_v47  ;;  %4423 = vmatmul.bf16.gmra.mxu1 %v9384_v15  ;;  %v3457_v61 = vmax.f32 %v3329_v56, 0.0 }
 0x6d2   : > { %4689 = vmatpush.bf16.msrb.mxu3 %v5988_v37  ;;  %v2747_v32 = vsub.f32 %v10674_v27, %v9126_v62  ;;  %v3465_v58 = vmax.f32 %v3337_v25, 0.0  ;;  %v3330_v4 = vadd.f32 %v8744_v10, %v3184_v7  ;;  %v3338_v11 = vadd.f32 %v8744_v10, %v3192_v42  ;;  %vm2953_vm11 = vmor %vm2951_vm10, %vm2952_vm9 }
 0x6d3   : > { %4591 = vmatpush.bf16.msrb.mxu1 %v5860_v48  ;;  %v2755_v26 = vsub.f32 %v10675_v45, %v9195_v36  ;;  %v2947_v8 = vmul.f32 %v6296_v47, %v2946_v28  ;;  %v2748_v54 = vsub.f32 %v10676_v23, %v9126_v62  ;;  %v2756_v44 = vsub.f32 %v10677_v34, %v9195_v36 }
 0x6d4   : > { %v3051_v9 = vmul.f32 %v9340_v16, %v2747_v32  ;;  %v9403_v57 = vpack.c.bf16 %v3465_v58, %v3457_v61  ;;  %v3458_v56 = vmax.f32 %v3330_v4, 0.0  ;;  %v3466_v37 = vmax.f32 %v3338_v11, 0.0  ;;  %v10680_v61 = vld [vmem:[#allocation50_spill] sm:$0xff] }
 0x6d5   : > { %v3059_v25 = vmul.f32 %v9350_v53, %v2755_v26  ;;  %v2948_v7 = vmul.f32 0.5, %v2947_v8  ;;  %v3052_v48 = vmul.f32 %v9340_v16, %v2748_v54  ;;  %v3060_v28 = vmul.f32 %v9350_v53, %v2756_v44  ;;  %v10681_v4 = vld [vmem:[#allocation54_spill] sm:$0xff] }
 0x6d6   : > { %10678 = vst [vmem:[#allocation37_spill] sm:$0xff] %v9403_v57  ;;  %v3197_v42 = vmul.f32 %v8707_v41, %v3051_v9  ;;  %4472 = vmatmul.bf16.gmra.mxu2 %v9403_v57  ;;  %v9410_v27 = vpack.c.bf16 %v3466_v37, %v3458_v56  ;;  %v2749_v58 = vsub.f32 %v10680_v61, %v9126_v62  ;;  %v10683_v61 = vld [vmem:[#allocation55_spill] sm:$0xff]  ;;  %v6215_v57 = vld [vmem:[#allocation5 + $0x394] sm:$0xf0] }
 0x6d7   : > { %v3205_v32 = vmul.f32 %v8707_v41, %v3059_v25  ;;  %v2757_v11 = vsub.f32 %v10681_v4, %v9195_v36  ;;  %v2949_v45 = vsub.f32 1.5, %v2948_v7  ;;  %v3198_v8 = vmul.f32 %v8709_v29, %v3052_v48  ;;  %v10682_v25 = vld [vmem:[#allocation51_spill] sm:$0xff]  ;;  %v6199_v48 = vld [vmem:[#allocation5 + $0x314] sm:$0xf0] }
 0x6d8   : > { %10679 = vst [vmem:[#allocation34_spill] sm:$0xff] %v9410_v27  ;;  %v3343_v26 = vadd.f32 %v8717_v18, %v3197_v42  ;;  %v3206_v9 = vmul.f32 %v8709_v29, %v3060_v28  ;;  %4521 = vmatmul.bf16.gmra.mxu3 %v9410_v27  ;;  %v3053_v54 = vmul.f32 %v9340_v16, %v2749_v58  ;;  %v5915_v42 = vld [vmem:[#allocation5 + $0x310] sm:$0xf] }
 0x6d9   : > { %v3351_v23 = vadd.f32 %v8717_v18, %v3205_v32  ;;  %v3061_v34 = vmul.f32 %v9350_v53, %v2757_v11  ;;  %v2950_v44 = vmul.f32 %v6296_v47, %v2949_v45  ;;  %v3344_v56 = vadd.f32 %v8719_v13, %v3198_v8  ;;  %v5787_v4 = vld [vmem:[#allocation5 + $0x210] sm:$0xf]  ;;  %v6167_v11 = vld [vmem:[#allocation5 + $0x214] sm:$0xf0] }
 0x6da   : > { %v3352_v37 = vadd.f32 %v8719_v13, %v3206_v9  ;;  %v2750_v7 = vsub.f32 %v10682_v25, %v9126_v62  ;;  %v3199_v28 = vmul.f32 %v8721_v55, %v3053_v54  ;;  %v2758_v58 = vsub.f32 %v10683_v61, %v9195_v36  ;;  %v5979_v27 = vld [vmem:[#allocation5 + $0x390] sm:$0xf] }
 0x6db   : > { %v3479_v43 = vmax.f32 %v3351_v23, 0.0  ;;  %v3207_v32 = vmul.f32 %v8721_v55, %v3061_v34  ;;  %v9434_v45 = vsel %vm2953_vm11, %v6296_v47, %v2950_v44  ;;  %v3471_v8 = vmax.f32 %v3343_v26, 0.0 }
 0x6dc   : > { %10684 = vst [vmem:[#allocation38_spill] sm:$0xff] %v9434_v45  ;;  %v3480_v9 = vmax.f32 %v3352_v37, 0.0  ;;  %v3054_v25 = vmul.f32 %v9340_v16, %v2750_v7  ;;  %v3472_v15 = vmax.f32 %v3344_v56, 0.0  ;;  %v3345_v23 = vadd.f32 %v8732_v49, %v3199_v28 }
 0x6dd   : > { %v3353_v54 = vadd.f32 %v8732_v49, %v3207_v32  ;;  %v3062_v34 = vmul.f32 %v9350_v53, %v2758_v58  ;;  %v9440_v61 = vpack.c.bf16 %v3479_v43, %v3471_v8  ;;  %v5916_v44 = vor.u32 %v6199_v48, %v5915_v42  ;;  %v10687_v58 = vld [vmem:[#allocation56_spill] sm:$0xff] }
 0x6de   : > { %v3200_v47 = vmul.f32 %v8738_v40, %v3054_v25  ;;  %v5788_v26 = vor.u32 %v6167_v11, %v5787_v4  ;;  %v9443_v37 = vpack.c.bf16 %v3480_v9, %v3472_v15  ;;  %v5980_v56 = vor.u32 %v6215_v57, %v5979_v27  ;;  %v10688_v15 = vld [vmem:[#allocation60_spill] sm:$0xff]  ;;  %v10689_v27 = vld [vmem:[#allocation57_spill] sm:$0xff]  ;;  %v10692_v9 = vld [vmem:[#allocation62_spill] sm:$0xff] }
 0x6df   : > { %10685 = vst [vmem:[#allocation35_spill] sm:$0xff] %v9440_v61  ;;  %v3481_v7 = vmax.f32 %v3353_v54, 0.0  ;;  %v3208_v21 = vmul.f32 %v8738_v40, %v3062_v34  ;;  %4379 = vmatmul.bf16.gmra.mxu0 %v9440_v61  ;;  %4641 = vmatpush.bf16.msrb.mxu2 %v5916_v44  ;;  %v5852_v32 = vor.u32 %v6183_v2, %v5851_v0  ;;  %v3473_v8 = vmax.f32 %v3345_v23, 0.0  ;;  %v10690_v2 = vld [vmem:[#allocation61_spill] sm:$0xff] }
 0x6e0   : > { %10686 = vst [vmem:[#allocation39_spill] sm:$0xff] %v9443_v37  ;;  %v3346_v28 = vadd.f32 %v8744_v10, %v3200_v47  ;;  %v2763_v43 = vsub.f32 %v10687_v58, %v9213_v5  ;;  %4543 = vmatpush.bf16.msrb.mxu0 %v5788_v26  ;;  %4690 = vmatpush.bf16.msrb.mxu3 %v5980_v56  ;;  %v10693_v56 = vld [vmem:[#allocation58_spill] sm:$0xff] }
 0x6e1   : > { %v3354_v25 = vadd.f32 %v8744_v10, %v3208_v21  ;;  %v2771_v42 = vsub.f32 %v10688_v15, %v9306_v30  ;;  %4428 = vmatmul.bf16.gmra.mxu1 %v9443_v37  ;;  %v2764_v48 = vsub.f32 %v10689_v27, %v9213_v5  ;;  %v2772_v0 = vsub.f32 %v10690_v2, %v9306_v30  ;;  %v10696_v15 = vld [vmem:[#allocation63_spill] sm:$0xff]  ;;  %v5907_v2 = vld [vmem:[#allocation5 + $0x300] sm:$0xf] }
 0x6e2   : > { %v3067_v57 = vmul.f32 %v9364_v17, %v2763_v43  ;;  %v9459_v4 = vpack.c.bf16 %v3481_v7, %v3473_v8  ;;  %4592 = vmatpush.bf16.msrb.mxu1 %v5852_v32  ;;  %v2773_v23 = vsub.f32 %v10692_v9, %v9306_v30  ;;  %v3474_v54 = vmax.f32 %v3346_v28, 0.0  ;;  %v10694_v32 = vld [vmem:[#allocation59_spill] sm:$0xff]  ;;  %v5779_v9 = vld [vmem:[#allocation5 + $0x200] sm:$0xf] }
 0x6e3   : > { %v3482_v11 = vmax.f32 %v3354_v25, 0.0  ;;  %v3075_v21 = vmul.f32 %v9434_v45, %v2771_v42  ;;  %v3068_v47 = vmul.f32 %v9364_v17, %v2764_v48  ;;  %v3076_v44 = vmul.f32 %v9434_v45, %v2772_v0  ;;  %v6197_v0 = vld [vmem:[#allocation5 + $0x304] sm:$0xf0] }
 0x6e4   : > { %10691 = vst [vmem:[#allocation40_spill] sm:$0xff] %v9459_v4  ;;  %v3213_v34 = vmul.f32 %v8707_v41, %v3067_v57  ;;  %v2765_v7 = vsub.f32 %v10693_v56, %v9213_v5  ;;  %v3077_v58 = vmul.f32 %v9434_v45, %v2773_v23  ;;  %v2766_v43 = vsub.f32 %v10694_v32, %v9213_v5  ;;  %v6165_v23 = vld [vmem:[#allocation5 + $0x204] sm:$0xf0]  ;;  %v10699_v56 = vld [vmem:[#allocation68_spill] sm:$0xff] }
 0x6e5   : > { %v3221_v26 = vmul.f32 %v8707_v41, %v3075_v21  ;;  %v9473_v8 = vpack.c.bf16 %v3482_v11, %v3474_v54  ;;  %v3214_v28 = vmul.f32 %v8709_v29, %v3068_v47  ;;  %v3222_v25 = vmul.f32 %v8709_v29, %v3076_v44  ;;  %v5971_v54 = vld [vmem:[#allocation5 + $0x380] sm:$0xf]  ;;  %v10698_v44 = vld [vmem:[#allocation64_spill] sm:$0xff] }
 0x6e6   : > { %v2774_v42 = vsub.f32 %v10696_v15, %v9306_v30  ;;  %4477 = vmatmul.bf16.gmra.mxu2 %v9459_v4  ;;  %v3359_v41 = vadd.f32 %v8717_v18, %v3213_v34  ;;  %v3069_v27 = vmul.f32 %v9364_v17, %v2765_v7  ;;  %v3223_v48 = vmul.f32 %v8721_v55, %v3077_v58  ;;  %v6213_v34 = vld [vmem:[#allocation5 + $0x384] sm:$0xf0]  ;;  %v5843_v47 = vld [vmem:[#allocation5 + $0x280] sm:$0xf] }
 0x6e7   : > { %10695 = vst [vmem:[#allocation44_spill] sm:$0xff] %v9473_v8  ;;  %v3367_v57 = vadd.f32 %v8717_v18, %v3221_v26  ;;  %v3368_v11 = vadd.f32 %v8719_v13, %v3222_v25  ;;  %v3070_v21 = vmul.f32 %v9364_v17, %v2766_v43  ;;  %v10697_v18 = vld [vmem:[#allocation128_spill] sm:$0xff]  ;;  %v2663_v7 = vsub.f32 %v10699_v56, %v8687_v38  ;;  %v6181_v15 = vld [vmem:[#allocation5 + $0x284] sm:$0xf0] }
 0x6e8   : > { %v3078_v29 = vmul.f32 %v9434_v45, %v2774_v42  ;;  %4526 = vmatmul.bf16.gmra.mxu3 %v9473_v8  ;;  %v2655_v26 = vsub.f32 %v10698_v44, %v10697_v18  ;;  %v3360_v32 = vadd.f32 %v8719_v13, %v3214_v28  ;;  %v5908_v25 = vor.u32 %v6197_v0, %v5907_v2  ;;  %v3695_v42 = vld [vmem:[%s10235_s7] sm:$0x3] }
 0x6e9   : > { %v3495_v58 = vmax.f32 %v3367_v57, 0.0  ;;  %v3487_v8 = vmax.f32 %v3359_v41, 0.0  ;;  %v3215_v4 = vmul.f32 %v8721_v55, %v3069_v27  ;;  %v3369_v37 = vadd.f32 %v8732_v49, %v3223_v48  ;;  %v9502_v44 = vld [vmem:[%s10233_s5] sm:$0xff] }
 0x6ea   : > { %v3224_v43 = vmul.f32 %v8738_v40, %v3078_v29  ;;  %v9505_v13 = vperm.slane %v9502_v44, 4  ;;  %v3496_v28 = vmax.f32 %v3368_v11, 0.0  ;;  %v3216_v57 = vmul.f32 %v8738_v40, %v3070_v21  ;;  %4642 = vmatpush.bf16.msrb.mxu2 %v5908_v25  ;;  %v10700_v27 = vld [vmem:[#allocation9_spill] sm:$0xff] }
 0x6eb   : > { %v5780_v2 = vor.u32 %v6165_v23, %v5779_v9  ;;  %v5972_v0 = vor.u32 %v6213_v34, %v5971_v54  ;;  %v5844_v29 = vor.u32 %v6181_v15, %v5843_v47  ;;  %v9509_v55 = vperm.slane %v3695_v42, 0  ;;  %v10702_v11 = vld [vmem:[#allocation69_spill] sm:$0xff]  ;;  %v10706_v42 = vld [vmem:[#allocation70_spill] sm:$0xff] }
 0x6ec   : > { %v3370_v41 = vadd.f32 %v8744_v10, %v3224_v43  ;;  %v2959_v48 = vmul.f32 %v10700_v27, %v2655_v26  ;;  %v9512_v56 = vpack.c.bf16 %v3495_v58, %v3487_v8  ;;  %v3488_v61 = vmax.f32 %v3360_v32, 0.0  ;;  %v9521_v23 = vld [vmem:[%s10234_s6] sm:$0xff]  ;;  %v10705_v32 = vld [vmem:[#allocation66_spill] sm:$0xff] }
 0x6ed   : > { %4544 = vmatpush.bf16.msrb.mxu0 %v5780_v2  ;;  %4691 = vmatpush.bf16.msrb.mxu3 %v5972_v0  ;;  %v2967_v17 = vmul.f32 %v8812_v39, %v2663_v7  ;;  %v2664_v40 = vsub.f32 %v10702_v11, %v8687_v38  ;;  %v3361_v21 = vadd.f32 %v8732_v49, %v3215_v4  ;;  %v3497_v9 = vmax.f32 %v3369_v37, 0.0  ;;  %v10704_v47 = vld [vmem:[#allocation65_spill] sm:$0xff]  ;;  %v4350_v4 = vpop.f32.mrf.mxu0 }
 0x6ee   : > { %10701 = vst [vmem:[#allocation41_spill] sm:$0xff] %v9512_v56  ;;  %4593 = vmatpush.bf16.msrb.mxu1 %v5844_v29  ;;  %v9524_v8 = vperm.slane %v9521_v23, 4  ;;  %v9527_v54 = vpack.c.bf16 %v3496_v28, %v3488_v61  ;;  %v3362_v34 = vadd.f32 %v8744_v10, %v3216_v57  ;;  %v2656_v26 = vsub.f32 %v10704_v47, %v10697_v18  ;;  %v5709_v47 = vld [vmem:[#allocation5 + $0x178] sm:$0xf0] }
 0x6ef   : > { %4384 = vmatmul.bf16.gmra.mxu0 %v9512_v56  ;;  %v2968_v49 = vmul.f32 %v8812_v39, %v2664_v40  ;;  %v3498_v37 = vmax.f32 %v3370_v41, 0.0  ;;  %v3105_v7 = vmul.f32 %v9505_v13, %v2959_v48  ;;  %v9535_v58 = vperm.slane %v9502_v44, 5  ;;  %v4399_v10 = vpop.f32.mrf.mxu1  ;;  %v6146_v40 = vld [vmem:[#allocation5 + $0x174] sm:$0xf] }
 0x6f0   : > { %10703 = vst [vmem:[#allocation45_spill] sm:$0xff] %v9527_v54  ;;  %v2657_v43 = vsub.f32 %v10705_v32, %v10697_v18  ;;  %v4351_v61 = vadd.f32 %v4350_v4, %v9509_v55  ;;  %v3113_v25 = vmul.f32 %v9505_v13, %v2967_v17  ;;  %v2960_v15 = vmul.f32 %v10700_v27, %v2656_v26  ;;  %v6114_v32 = vld [vmem:[#allocation5 + $0x74] sm:$0xf] }
 0x6f1   : > { %4433 = vmatmul.bf16.gmra.mxu1 %v9527_v54  ;;  %v2665_v28 = vsub.f32 %v10706_v42, %v8687_v38  ;;  %v3489_v57 = vmax.f32 %v3361_v21, 0.0  ;;  %v9547_v0 = vperm.slane %v9502_v44, 6  ;;  %v3490_v41 = vmax.f32 %v3362_v34, 0.0  ;;  %v10708_v21 = vld [vmem:[#allocation71_spill] sm:$0xff] }
 0x6f2   : > { %v2961_v2 = vmul.f32 %v10700_v27, %v2657_v43  ;;  %v4400_v29 = vadd.f32 %v4399_v10, %v4351_v61  ;;  %v3114_v48 = vmul.f32 %v9535_v58, %v2968_v49  ;;  %v9554_v26 = vperm.slane %v9521_v23, 5  ;;  %v5581_v43 = vld [vmem:[#allocation5 + $0x78] sm:$0xf0]  ;;  %v6162_v10 = vld [vmem:[#allocation5 + $0x1f4] sm:$0xf] }
 0x6f3   : > { %v2969_v11 = vmul.f32 %v8812_v39, %v2665_v28  ;;  %v9551_v17 = vpack.c.bf16 %v3497_v9, %v3489_v57  ;;  %v2666_v4 = vsub.f32 %v10708_v21, %v8687_v38  ;;  %v9558_v42 = vpack.c.bf16 %v3498_v37, %v3490_v41  ;;  %v5773_v28 = vld [vmem:[#allocation5 + $0x1f8] sm:$0xf0]  ;;  %v10710_v38 = vld [vmem:[#allocation67_spill] sm:$0xff] }
 0x6f4   : > { %v3251_v34 = vadd.f32 %v9524_v8, %v3105_v7  ;;  %v3259_v49 = vadd.f32 %v9524_v8, %v3113_v25  ;;  %v3106_v61 = vmul.f32 %v9535_v58, %v2960_v15  ;;  %v3107_v9 = vmul.f32 %v9547_v0, %v2961_v2  ;;  %v6130_v41 = vld [vmem:[#allocation5 + $0xf4] sm:$0xf]  ;;  %v5645_v7 = vld [vmem:[#allocation5 + $0xf8] sm:$0xf0] }
 0x6f5   : > { %10707 = vst [vmem:[#allocation42_spill] sm:$0xff] %v9551_v17  ;;  %v9566_v57 = vperm.slane %v9521_v23, 6  ;;  %v2658_v21 = vsub.f32 %v10710_v38, %v10697_v18  ;;  %v2970_v37 = vmul.f32 %v8812_v39, %v2666_v4  ;;  %v3260_v25 = vadd.f32 %v9554_v26, %v3114_v48  ;;  %v9578_v5 = vpop.f32.mrf.mxu0 }
 0x6f6   : > { %10709 = vst [vmem:[#allocation46_spill] sm:$0xff] %v9558_v42  ;;  %4482 = vmatmul.bf16.gmra.mxu2 %v9551_v17  ;;  %v3115_v15 = vmul.f32 %v9547_v0, %v2969_v11  ;;  %v5712_v54 = vor.u32 %v6146_v40, %v5709_v47  ;;  %v5584_v56 = vor.u32 %v6114_v32, %v5581_v43  ;;  %v9576_v17 = vperm.slane %v9502_v44, 7  ;;  %v4497_v4 = vpop.f32.mrf.mxu3 }
 0x6f7   : > { %v2962_v2 = vmul.f32 %v10700_v27, %v2658_v21  ;;  %v5776_v45 = vor.u32 %v6162_v10, %v5773_v28  ;;  %v3387_v18 = vmax.f32 %v3259_v49, 0.0  ;;  %v3252_v39 = vadd.f32 %v9554_v26, %v3106_v61  ;;  %v9582_v27 = vpop.f32.mrf.mxu1  ;;  %v10711_v49 = vld [vmem:[#allocation76_spill] sm:$0xff]  ;;  %v10715_v21 = vld [vmem:[#allocation77_spill] sm:$0xff] }
 0x6f8   : > { %4531 = vmatmul.bf16.gmra.mxu3 %v9558_v42  ;;  %4831 = vmatpush.bf16.msra.mxu2 %v5712_v54  ;;  %v4448_v48 = vpop.f32.mrf.mxu2  ;;  %v5648_v11 = vor.u32 %v6130_v41, %v5645_v7  ;;  %v3379_v40 = vmax.f32 %v3251_v34, 0.0  ;;  %v3116_v47 = vmul.f32 %v9576_v17, %v2970_v37  ;;  %v3388_v44 = vmax.f32 %v3260_v25, 0.0  ;;  %v10717_v25 = vld [vmem:[#allocation73_spill] sm:$0xff] }
 0x6f9   : > { %4733 = vmatpush.bf16.msra.mxu0 %v5584_v56  ;;  %4880 = vmatpush.bf16.msra.mxu3 %v5776_v45  ;;  %v4449_v32 = vadd.f32 %v4448_v48, %v4400_v29  ;;  %v3253_v43 = vadd.f32 %v9566_v57, %v3107_v9  ;;  %v3261_v10 = vadd.f32 %v9566_v57, %v3115_v15  ;;  %v9590_v61 = vperm.slane %v9521_v23, 7  ;;  %v10713_v45 = vld [vmem:[#allocation72_spill] sm:$0xff]  ;;  %v6160_v42 = vld [vmem:[#allocation5 + $0x1e4] sm:$0xf] }
 0x6fa   : > { %4782 = vmatpush.bf16.msra.mxu1 %v5648_v11  ;;  %v2679_v54 = vsub.f32 %v10711_v49, %v8713_v24  ;;  %v3108_v56 = vmul.f32 %v9576_v17, %v2962_v2  ;;  %v2671_v29 = vsub.f32 %v10713_v45, %v8693_v50  ;;  %v9596_v28 = vpack.c.bf16 %v3387_v18, %v3379_v40  ;;  %v10718_v11 = vld [vmem:[#allocation78_spill] sm:$0xff] }
 0x6fb   : > { %v9592_v34 = vadd.f32 %v4497_v4, %v4449_v32  ;;  %v3380_v38 = vmax.f32 %v3252_v39, 0.0  ;;  %v2680_v37 = vsub.f32 %v10715_v21, %v8713_v24  ;;  %v3262_v41 = vadd.f32 %v9590_v61, %v3116_v47  ;;  %v10721_v21 = vld [vmem:[#allocation75_spill] sm:$0xff] }
 0x6fc   : > { %10714 = vst [vmem:[#allocation47_spill] sm:$0xff] %v9596_v28  ;;  %v2983_v9 = vmul.f32 %v8869_v22, %v2679_v54  ;;  %v2975_v7 = vmul.f32 %v8858_v20, %v2671_v29  ;;  %v2672_v15 = vsub.f32 %v10717_v25, %v8693_v50  ;;  %v3381_v18 = vmax.f32 %v3253_v43, 0.0  ;;  %v10720_v54 = vld [vmem:[#allocation74_spill] sm:$0xff] }
 0x6fd   : > { %10712 = vst [vmem:[#allocation43_spill] sm:$0xff] %v9592_v34  ;;  %v9604_v23 = vpack.c.bf16 %v3388_v44, %v3380_v38  ;;  %v2984_v2 = vmul.f32 %v8869_v22, %v2680_v37  ;;  %v3389_v39 = vmax.f32 %v3261_v10, 0.0  ;;  %v3254_v48 = vadd.f32 %v9590_v61, %v3108_v56  ;;  %v6144_v10 = vld [vmem:[#allocation5 + $0x164] sm:$0xf]  ;;  %v5701_v25 = vld [vmem:[#allocation5 + $0x168] sm:$0xf0] }
 0x6fe   : > { %v4355_v4 = vpop.f32.mrf.mxu0  ;;  %v2681_v40 = vsub.f32 %v10718_v11, %v8713_v24  ;;  %v3129_v44 = vmul.f32 %v9505_v13, %v2983_v9  ;;  %v2976_v49 = vmul.f32 %v8858_v20, %v2672_v15  ;;  %v2673_v43 = vsub.f32 %v10720_v54, %v8693_v50  ;;  %v6112_v11 = vld [vmem:[#allocation5 + $0x64] sm:$0xf]  ;;  %v10723_v54 = vld [vmem:[#allocation79_spill] sm:$0xff]  ;;  %v5637_v34 = vld [vmem:[#allocation5 + $0xe8] sm:$0xf0] }
 0x6ff   : > { %4545 = vmatmul.bf16.vlgmr.msrb.gmra.mxu0 %v9596_v28  ;;  %10716 = vst [vmem:[#allocation48_spill] sm:$0xff] %v9604_v23  ;;  %v4356_v32 = vadd.f32 %v4355_v4, %v9509_v55  ;;  %v3390_v45 = vmax.f32 %v3262_v41, 0.0  ;;  %v4404_v56 = vpop.f32.mrf.mxu1  ;;  %v3121_v29 = vmul.f32 %v9505_v13, %v2975_v7  ;;  %v2674_v37 = vsub.f32 %v10721_v21, %v8693_v50  ;;  %v9624_v4 = vpop.f32.mrf.mxu3  ;;  %v5573_v28 = vld [vmem:[#allocation5 + $0x68] sm:$0xf0]  ;;  %v6128_v21 = vld [vmem:[#allocation5 + $0xe4] sm:$0xf] }
 0x700   : > { %v9613_v47 = vpop.f32.mrf.mxu2  ;;  %v2985_v38 = vmul.f32 %v8869_v22, %v2681_v40  ;;  %10722 = vst [vmem:[#allocation49_spill] sm:$0xff] %v9624_v4  ;;  %v3130_v15 = vmul.f32 %v9535_v58, %v2984_v2  ;;  %v2682_v41 = vsub.f32 %v10723_v54, %v8713_v24  ;;  %v5765_v7 = vld [vmem:[#allocation5 + $0x1e8] sm:$0xf0]  ;;  %v3382_v40 = vmax.f32 %v3254_v48, 0.0 }
 0x701   : > { %4594 = vmatmul.bf16.vlgmr.msrb.gmra.mxu1 %v9604_v23  ;;  %10719 = vst [vmem:[#allocation52_spill] sm:$0xff] %v9613_v47  ;;  %v4405_v9 = vadd.f32 %v4404_v56, %v4356_v32  ;;  %v2977_v23 = vmul.f32 %v8858_v20, %v2673_v43  ;;  %v9630_v47 = vpack.c.bf16 %v3389_v39, %v3381_v18 }
 0x702   : > { %v2978_v50 = vmul.f32 %v8858_v20, %v2674_v37  ;;  %v3275_v4 = vadd.f32 %v9524_v8, %v3129_v44  ;;  %v3122_v32 = vmul.f32 %v9535_v58, %v2976_v49  ;;  %v2986_v2 = vmul.f32 %v8869_v22, %v2682_v41 }
 0x703   : > { %10724 = vst [vmem:[#allocation53_spill] sm:$0xff] %v9630_v47  ;;  %v5704_v43 = vor.u32 %v6144_v10, %v5701_v25  ;;  %v9637_v24 = vpack.c.bf16 %v3390_v45, %v3382_v40  ;;  %v3267_v56 = vadd.f32 %v9524_v8, %v3121_v29  ;;  %v3131_v18 = vmul.f32 %v9547_v0, %v2985_v38 }
 0x704   : > { %v5576_v39 = vor.u32 %v6112_v11, %v5573_v28  ;;  %v3276_v20 = vadd.f32 %v9554_v26, %v3130_v15  ;;  %v3123_v48 = vmul.f32 %v9547_v0, %v2977_v23  ;;  %v5768_v44 = vor.u32 %v6160_v42, %v5765_v7  ;;  %v10728_v11 = vld [vmem:[#allocation84_spill] sm:$0xff] }
 0x705   : > { %10725 = vst [vmem:[#allocation50_spill] sm:$0xff] %v9637_v24  ;;  %4832 = vmatpush.bf16.msra.mxu2 %v5704_v43  ;;  %v5640_v37 = vor.u32 %v6128_v21, %v5637_v34  ;;  %v3124_v22 = vmul.f32 %v9576_v17, %v2978_v50  ;;  %v3403_v10 = vmax.f32 %v3275_v4, 0.0  ;;  %v3268_v45 = vadd.f32 %v9554_v26, %v3122_v32  ;;  %v10727_v34 = vld [vmem:[#allocation80_spill] sm:$0xff] }
 0x706   : > { %4643 = vmatmul.bf16.vlgmr.msrb.gmra.mxu2 %v9630_v47  ;;  %4734 = vmatpush.bf16.msra.mxu0 %v5576_v39  ;;  %v9645_v49 = vpop.f32.mrf.mxu0  ;;  %v3132_v29 = vmul.f32 %v9576_v17, %v2986_v2  ;;  %v3277_v23 = vadd.f32 %v9566_v57, %v3131_v18  ;;  %v2687_v25 = vsub.f32 %v10727_v34, %v8761_v52  ;;  %v3395_v54 = vmax.f32 %v3267_v56, 0.0  ;;  %v10731_v56 = vld [vmem:[#allocation85_spill] sm:$0xff]  ;;  %v6142_v34 = vld [vmem:[#allocation5 + $0x154] sm:$0xf] }
 0x707   : > { %4881 = vmatpush.bf16.msra.mxu3 %v5768_v44  ;;  %4783 = vmatpush.bf16.msra.mxu1 %v5640_v37  ;;  %v9650_v42 = vpop.f32.mrf.mxu1  ;;  %v2695_v15 = vsub.f32 %v10728_v11, %v8808_v31  ;;  %v3404_v4 = vmax.f32 %v3276_v20, 0.0  ;;  %v3269_v41 = vadd.f32 %v9566_v57, %v3123_v48  ;;  %v3270_v7 = vadd.f32 %v9590_v61, %v3124_v22 }
 0x708   : > { %4692 = vmatmul.bf16.vlgmr.msrb.gmra.mxu3 %v9637_v24  ;;  %v4453_v28 = vpop.f32.mrf.mxu2  ;;  %10726 = vst [vmem:[#allocation54_spill] sm:$0xff] %v9650_v42  ;;  %v2991_v40 = vmul.f32 %v8969_v59, %v2687_v25  ;;  %v9662_v32 = vpack.c.bf16 %v3403_v10, %v3395_v54  ;;  %v3396_v2 = vmax.f32 %v3268_v45, 0.0  ;;  %v3278_v43 = vadd.f32 %v9590_v61, %v3132_v29  ;;  %v10734_v10 = vld [vmem:[#allocation82_spill] sm:$0xff]  ;;  %v5693_v54 = vld [vmem:[#allocation5 + $0x158] sm:$0xf0] }
 0x709   : > { %v4454_v38 = vadd.f32 %v4453_v28, %v4405_v9  ;;  %v2999_v50 = vmul.f32 %v8992_v33, %v2695_v15  ;;  %v10729_v9 = vld [vmem:[#allocation81_spill] sm:$0xff]  ;;  %v2696_v39 = vsub.f32 %v10731_v56, %v8808_v31  ;;  %v3405_v20 = vmax.f32 %v3277_v23, 0.0  ;;  %v10735_v29 = vld [vmem:[#allocation86_spill] sm:$0xff] }
 0x70a   : > { %v2688_v21 = vsub.f32 %v10729_v9, %v8761_v52  ;;  %10730 = vst [vmem:[#allocation51_spill] sm:$0xff] %v9662_v32  ;;  %v9671_v37 = vpack.c.bf16 %v3404_v4, %v3396_v2  ;;  %v2689_v45 = vsub.f32 %v10734_v10, %v8761_v52  ;;  %v2697_v28 = vsub.f32 %v10735_v29, %v8808_v31  ;;  %v6110_v9 = vld [vmem:[#allocation5 + $0x54] sm:$0xf]  ;;  %v5629_v29 = vld [vmem:[#allocation5 + $0xd8] sm:$0xf0] }
 0x70b   : > { %v3000_v22 = vmul.f32 %v8992_v33, %v2696_v39  ;;  %v3397_v25 = vmax.f32 %v3269_v41, 0.0  ;;  %v3398_v11 = vmax.f32 %v3270_v7, 0.0  ;;  %v3145_v15 = vmul.f32 %v9505_v13, %v2999_v50  ;;  %v5565_v41 = vld [vmem:[#allocation5 + $0x58] sm:$0xf0]  ;;  %v6158_v7 = vld [vmem:[#allocation5 + $0x1d4] sm:$0xf] }
 0x70c   : > { %v4502_v18 = vpop.f32.mrf.mxu3  ;;  %v2992_v44 = vmul.f32 %v8969_v59, %v2688_v21  ;;  %10733 = vst [vmem:[#allocation56_spill] sm:$0xff] %v9671_v37  ;;  %v3406_v4 = vmax.f32 %v3278_v43, 0.0  ;;  %v3001_v56 = vmul.f32 %v8992_v33, %v2697_v28  ;;  %v5757_v50 = vld [vmem:[#allocation5 + $0x1d8] sm:$0xf0]  ;;  %v6126_v10 = vld [vmem:[#allocation5 + $0xd4] sm:$0xf]  ;;  %v5696_v47 = vor.u32 %v6142_v34, %v5693_v54 }
 0x70d   : > { %v9667_v48 = vadd.f32 %v4502_v18, %v4454_v38  ;;  %v3137_v38 = vmul.f32 %v9505_v13, %v2991_v40  ;;  %v2993_v18 = vmul.f32 %v8969_v59, %v2689_v45  ;;  %v9686_v39 = vpack.c.bf16 %v3405_v20, %v3397_v25 }
 0x70e   : > { %v3138_v40 = vmul.f32 %v9535_v58, %v2992_v44  ;;  %v3146_v43 = vmul.f32 %v9535_v58, %v3000_v22  ;;  %v3291_v20 = vadd.f32 %v9524_v8, %v3145_v15  ;;  %v5568_v25 = vor.u32 %v6110_v9, %v5565_v41  ;;  %4833 = vmatpush.bf16.msra.mxu2 %v5696_v47 }
 0x70f   : > { %10732 = vst [vmem:[#allocation55_spill] sm:$0xff] %v9667_v48  ;;  %4550 = vmatmul.bf16.gmra.mxu0 %v9662_v32  ;;  %v4360_v23 = vpop.f32.mrf.mxu0  ;;  %v3139_v44 = vmul.f32 %v9547_v0, %v2993_v18  ;;  %v3147_v48 = vmul.f32 %v9547_v0, %v3001_v56  ;;  %v5760_v42 = vor.u32 %v6158_v7, %v5757_v50 }
 0x710   : > { %v9681_v21 = vpop.f32.mrf.mxu2  ;;  %v4361_v2 = vadd.f32 %v4360_v23, %v9509_v55  ;;  %10737 = vst [vmem:[#allocation57_spill] sm:$0xff] %v9686_v39  ;;  %v10739_v23 = vld [vmem:[#allocation87_spill] sm:$0xff]  ;;  %v5632_v22 = vor.u32 %v6126_v10, %v5629_v29  ;;  %4735 = vmatpush.bf16.msra.mxu0 %v5568_v25  ;;  %v3419_v15 = vmax.f32 %v3291_v20, 0.0  ;;  %v10745_v10 = vld [vmem:[#allocation21_spill] sm:$0xff] }
 0x711   : > { %4599 = vmatmul.bf16.gmra.mxu1 %v9671_v37  ;;  %10736 = vst [vmem:[#allocation60_spill] sm:$0xff] %v9681_v21  ;;  %v10738_v37 = vld [vmem:[#allocation83_spill] sm:$0xff]  ;;  %v2698_v45 = vsub.f32 %v10739_v23, %v8808_v31  ;;  %v3283_v21 = vadd.f32 %v9524_v8, %v3137_v38  ;;  %4882 = vmatpush.bf16.msra.mxu3 %v5760_v42  ;;  %v10743_v42 = vld [vmem:[#allocation89_spill] sm:$0xff] }
 0x712   : > { %v4409_v32 = vpop.f32.mrf.mxu1  ;;  %v2690_v24 = vsub.f32 %v10738_v37, %v8761_v52  ;;  %v9699_v52 = vpack.c.bf16 %v3406_v4, %v3398_v11  ;;  %v3292_v37 = vadd.f32 %v9554_v26, %v3146_v43  ;;  %4784 = vmatpush.bf16.msra.mxu1 %v5632_v22  ;;  %v3285_v11 = vadd.f32 %v9566_v57, %v3139_v44  ;;  %v10741_v4 = vld [vmem:[#allocation88_spill] sm:$0xff]  ;;  %v6140_v22 = vld [vmem:[#allocation5 + $0x144] sm:$0xf] }
 0x713   : > { %v4410_v28 = vadd.f32 %v4409_v32, %v4361_v2  ;;  %v3002_v31 = vmul.f32 %v8992_v33, %v2698_v45  ;;  %v3284_v32 = vadd.f32 %v9554_v26, %v3138_v40  ;;  %v3411_v38 = vmax.f32 %v3283_v21, 0.0 }
 0x714   : > { %10740 = vst [vmem:[#allocation61_spill] sm:$0xff] %v9699_v52  ;;  %v2994_v34 = vmul.f32 %v8969_v59, %v2690_v24  ;;  %v9706_v47 = vpop.f32.mrf.mxu3  ;;  %v3293_v54 = vadd.f32 %v9566_v57, %v3147_v48  ;;  %v2703_v2 = vsub.f32 %v10741_v4, %v8846_v3  ;;  %v10742_v59 = vld [vmem:[#allocation92_spill] sm:$0xff]  ;;  %v2704_v18 = vsub.f32 %v10743_v42, %v8846_v3  ;;  %v10744_v48 = vld [vmem:[#allocation93_spill] sm:$0xff] }
 0x715   : > { %v3148_v33 = vmul.f32 %v9576_v17, %v3002_v31  ;;  %v2711_v24 = vsub.f32 %v10742_v59, %v8916_v6  ;;  %v3412_v56 = vmax.f32 %v3284_v32, 0.0  ;;  %v3420_v21 = vmax.f32 %v3292_v37, 0.0  ;;  %v5685_v31 = vld [vmem:[#allocation5 + $0x148] sm:$0xf0]  ;;  %v6108_v37 = vld [vmem:[#allocation5 + $0x44] sm:$0xf] }
 0x716   : > { %4648 = vmatmul.bf16.gmra.mxu2 %v9686_v39  ;;  %v3140_v41 = vmul.f32 %v9576_v17, %v2994_v34  ;;  %v2712_v40 = vsub.f32 %v10744_v48, %v8916_v6  ;;  %v3007_v29 = vmul.f32 %v10745_v10, %v2703_v2  ;;  %v3008_v23 = vmul.f32 %v10745_v10, %v2704_v18  ;;  %v5557_v34 = vld [vmem:[#allocation5 + $0x48] sm:$0xf0]  ;;  %v6156_v4 = vld [vmem:[#allocation5 + $0x1c4] sm:$0xf] }
 0x717   : > { %v9711_v9 = vpop.f32.mrf.mxu0  ;;  %v3015_v43 = vmul.f32 %v9105_v51, %v2711_v24  ;;  %v9725_v45 = vpack.c.bf16 %v3419_v15, %v3411_v38  ;;  %v3413_v20 = vmax.f32 %v3285_v11, 0.0  ;;  %v3421_v25 = vmax.f32 %v3293_v54, 0.0  ;;  %v10747_v38 = vld [vmem:[#allocation94_spill] sm:$0xff]  ;;  %v6124_v54 = vld [vmem:[#allocation5 + $0xc4] sm:$0xf] }
 0x718   : > { %4697 = vmatmul.bf16.gmra.mxu3 %v9699_v52  ;;  %v3016_v44 = vmul.f32 %v9105_v51, %v2712_v40  ;;  %v3294_v32 = vadd.f32 %v9590_v61, %v3148_v33  ;;  %v3286_v2 = vadd.f32 %v9590_v61, %v3140_v41  ;;  %v2713_v15 = vsub.f32 %v10747_v38, %v8916_v6  ;;  %v5749_v11 = vld [vmem:[#allocation5 + $0x1c8] sm:$0xf0] }
 0x719   : > { %10746 = vst [vmem:[#allocation62_spill] sm:$0xff] %v9725_v45  ;;  %v5621_v24 = vld [vmem:[#allocation5 + $0xc8] sm:$0xf0]  ;;  %v3153_v42 = vmul.f32 %v9505_v13, %v3007_v29  ;;  %v3161_v33 = vmul.f32 %v9505_v13, %v3015_v43  ;;  %v3154_v18 = vmul.f32 %v9535_v58, %v3008_v23  ;;  %v5560_v40 = vor.u32 %v6108_v37, %v5557_v34 }
 0x71a   : > { %v4458_v7 = vpop.f32.mrf.mxu2  ;;  %v9733_v59 = vpop.f32.mrf.mxu1  ;;  %v3017_v48 = vmul.f32 %v9105_v51, %v2713_v15  ;;  %v9745_v38 = vpack.c.bf16 %v3421_v25, %v3413_v20  ;;  %v5752_v29 = vor.u32 %v6156_v4, %v5749_v11  ;;  %v5624_v43 = vor.u32 %v6124_v54, %v5621_v24 }
 0x71b   : > { %v4459_v50 = vadd.f32 %v4458_v7, %v4410_v28  ;;  %v9730_v28 = vpack.c.bf16 %v3420_v21, %v3412_v56  ;;  %v5688_v7 = vor.u32 %v6140_v22, %v5685_v31  ;;  %v3162_v56 = vmul.f32 %v9535_v58, %v3016_v44  ;;  %v10748_v21 = vld [vmem:[#allocation90_spill] sm:$0xff]  ;;  %v10749_v22 = vld [vmem:[#allocation91_spill] sm:$0xff]  ;;  %4736 = vmatpush.bf16.msra.mxu0 %v5560_v40 }
 0x71c   : > { %v2705_v41 = vsub.f32 %v10748_v21, %v8846_v3  ;;  %v2706_v44 = vsub.f32 %v10749_v22, %v8846_v3  ;;  %v10750_v31 = vld [vmem:[#allocation95_spill] sm:$0xff]  ;;  %v3414_v15 = vmax.f32 %v3286_v2, 0.0  ;;  %v3299_v20 = vadd.f32 %v9524_v8, %v3153_v42  ;;  %4883 = vmatpush.bf16.msra.mxu3 %v5752_v29  ;;  %4785 = vmatpush.bf16.msra.mxu1 %v5624_v43  ;;  %v10754_v43 = vld [vmem:[#allocation97_spill] sm:$0xff] }
 0x71d   : > { %4834 = vmatpush.bf16.msra.mxu2 %v5688_v7  ;;  %v2714_v21 = vsub.f32 %v10750_v31, %v8916_v6  ;;  %v3307_v25 = vadd.f32 %v9524_v8, %v3161_v33  ;;  %v10752_v33 = vld [vmem:[#allocation100_spill] sm:$0xff]  ;;  %v6138_v22 = vld [vmem:[#allocation5 + $0x134] sm:$0xf] }
 0x71e   : > { %v3009_v23 = vmul.f32 %v10745_v10, %v2705_v41  ;;  %v3010_v3 = vmul.f32 %v10745_v10, %v2706_v44  ;;  %v3427_v54 = vmax.f32 %v3299_v20, 0.0  ;;  %v2727_v10 = vsub.f32 %v10752_v33, %v9011_v46  ;;  %v5677_v44 = vld [vmem:[#allocation5 + $0x138] sm:$0xf0]  ;;  %v6106_v31 = vld [vmem:[#allocation5 + $0x34] sm:$0xf] }
 0x71f   : > { %4555 = vmatmul.bf16.gmra.mxu0 %v9725_v45  ;;  %v3422_v45 = vmax.f32 %v3294_v32, 0.0  ;;  %v3300_v32 = vadd.f32 %v9554_v26, %v3154_v18  ;;  %v3018_v34 = vmul.f32 %v9105_v51, %v2714_v21  ;;  %v3435_v24 = vmax.f32 %v3307_v25, 0.0  ;;  %v5549_v20 = vld [vmem:[#allocation5 + $0x38] sm:$0xf0]  ;;  %v6154_v25 = vld [vmem:[#allocation5 + $0x1b4] sm:$0xf] }
 0x720   : > { %v3155_v11 = vmul.f32 %v9547_v0, %v3009_v23  ;;  %v3031_v29 = vmul.f32 %v9206_v12, %v2727_v10  ;;  %v2720_v23 = vsub.f32 %v10754_v43, %v8959_v35  ;;  %v6122_v33 = vld [vmem:[#allocation5 + $0xb4] sm:$0xf]  ;;  %v5613_v10 = vld [vmem:[#allocation5 + $0xb8] sm:$0xf0]  ;;  %v5680_v43 = vor.u32 %v6138_v22, %v5677_v44 }
 0x721   : > { %4604 = vmatmul.bf16.gmra.mxu1 %v9730_v28  ;;  %v4507_v52 = vpop.f32.mrf.mxu3  ;;  %v9762_v6 = vpack.c.bf16 %v3422_v45, %v3414_v15  ;;  %v3428_v42 = vmax.f32 %v3300_v32, 0.0  ;;  %v3156_v45 = vmul.f32 %v9576_v17, %v3010_v3  ;;  %v5741_v32 = vld [vmem:[#allocation5 + $0x1b8] sm:$0xf0] }
 0x722   : > { %v9747_v39 = vadd.f32 %v4507_v52, %v4459_v50  ;;  %v3308_v52 = vadd.f32 %v9554_v26, %v3162_v56  ;;  %v3163_v50 = vmul.f32 %v9547_v0, %v3017_v48  ;;  %v9765_v2 = vpop.f32.mrf.mxu2  ;;  %v3164_v56 = vmul.f32 %v9576_v17, %v3018_v34  ;;  %v10753_v48 = vld [vmem:[#allocation96_spill] sm:$0xff]  ;;  %v10756_v34 = vld [vmem:[#allocation101_spill] sm:$0xff]  ;;  %4835 = vmatpush.bf16.msra.mxu2 %v5680_v43 }
 0x723   : > { %v4365_v37 = vpop.f32.mrf.mxu0  ;;  %10751 = vst [vmem:[#allocation58_spill] sm:$0xff] %v9762_v6  ;;  %v2719_v40 = vsub.f32 %v10753_v48, %v8959_v35  ;;  %v3301_v21 = vadd.f32 %v9566_v57, %v3155_v11  ;;  %v3302_v11 = vadd.f32 %v9590_v61, %v3156_v45  ;;  %v10758_v45 = vld [vmem:[#allocation102_spill] sm:$0xff] }
 0x724   : > { %v4366_v4 = vadd.f32 %v4365_v37, %v9509_v55  ;;  %v3436_v51 = vmax.f32 %v3308_v52, 0.0  ;;  %v3309_v7 = vadd.f32 %v9566_v57, %v3163_v50  ;;  %v3024_v37 = vmul.f32 %v9170_v1, %v2720_v23 }
 0x725   : > { %v3023_v15 = vmul.f32 %v9170_v1, %v2719_v40  ;;  %v9782_v52 = vpack.c.bf16 %v3435_v24, %v3427_v54  ;;  %v3310_v48 = vadd.f32 %v9590_v61, %v3164_v56  ;;  %v3177_v40 = vmul.f32 %v9505_v13, %v3031_v29 }
 0x726   : > { %4653 = vmatmul.bf16.gmra.mxu2 %v9745_v38  ;;  %v9784_v50 = vpack.c.bf16 %v3436_v51, %v3428_v42  ;;  %v3437_v3 = vmax.f32 %v3309_v7, 0.0  ;;  %v10757_v42 = vld [vmem:[#allocation98_spill] sm:$0xff]  ;;  %v5552_v7 = vor.u32 %v6106_v31, %v5549_v20  ;;  %v5744_v23 = vor.u32 %v6154_v25, %v5741_v32 }
 0x727   : > { %v4414_v18 = vpop.f32.mrf.mxu1  ;;  %10755 = vst [vmem:[#allocation59_spill] sm:$0xff] %v9782_v52  ;;  %v2721_v51 = vsub.f32 %v10757_v42, %v8959_v35  ;;  %v2729_v56 = vsub.f32 %v10758_v45, %v9011_v46  ;;  %v5616_v29 = vor.u32 %v6122_v33, %v5613_v10  ;;  %v3429_v22 = vmax.f32 %v3301_v21, 0.0  ;;  %v10760_v33 = vld [vmem:[#allocation103_spill] sm:$0xff] }
 0x728   : > { %4702 = vmatmul.bf16.gmra.mxu3 %v9762_v6  ;;  %v4415_v41 = vadd.f32 %v4414_v18, %v4366_v4  ;;  %v2728_v4 = vsub.f32 %v10756_v34, %v9011_v46  ;;  %v3169_v34 = vmul.f32 %v9505_v13, %v3023_v15  ;;  %v3170_v6 = vmul.f32 %v9535_v58, %v3024_v37 }
 0x729   : > { %v9788_v18 = vpop.f32.mrf.mxu3  ;;  %4737 = vmatpush.bf16.msra.mxu0 %v5552_v7  ;;  %v3438_v31 = vmax.f32 %v3310_v48, 0.0  ;;  %v3323_v15 = vadd.f32 %v9524_v8, %v3177_v40  ;;  %v3033_v37 = vmul.f32 %v9206_v12, %v2729_v56  ;;  %4884 = vmatpush.bf16.msra.mxu3 %v5744_v23  ;;  %v9807_v25 = vpack.c.bf16 %v3437_v3, %v3429_v22 }
 0x72a   : > { %v3032_v24 = vmul.f32 %v9206_v12, %v2728_v4  ;;  %v3025_v4 = vmul.f32 %v9170_v1, %v2721_v51  ;;  %4786 = vmatpush.bf16.msra.mxu1 %v5616_v29  ;;  %v3430_v32 = vmax.f32 %v3302_v11, 0.0  ;;  %v2730_v10 = vsub.f32 %v10760_v33, %v9011_v46  ;;  %v10762_v29 = vld [vmem:[#allocation108_spill] sm:$0xff]  ;;  %v5733_v33 = vld [vmem:[#allocation5 + $0x1a8] sm:$0xf0] }
 0x72b   : > { %v4367_v54 = vpop.f32.mrf.mxu0  ;;  %v3451_v11 = vmax.f32 %v3323_v15, 0.0  ;;  %v3179_v46 = vmul.f32 %v9547_v0, %v3033_v37  ;;  %v2743_v22 = vsub.f32 %v10762_v29, %v9084_v14 }
 0x72c   : > { %v3178_v21 = vmul.f32 %v9535_v58, %v3032_v24  ;;  %v4368_v43 = vadd.f32 %v4367_v54, %v9509_v55  ;;  %v3034_v40 = vmul.f32 %v9206_v12, %v2730_v10  ;;  %v9818_v3 = vpack.c.bf16 %v3438_v31, %v3430_v32 }
 0x72d   : > { %v3171_v24 = vmul.f32 %v9547_v0, %v3025_v4  ;;  %v5669_v4 = vld [vmem:[#allocation5 + $0x128] sm:$0xf0]  ;;  %v3325_v32 = vadd.f32 %v9566_v57, %v3179_v46 }
 0x72e   : > { %10761 = vst [vmem:[#allocation63_spill] sm:$0xff] %v9818_v3  ;;  %v3324_v54 = vadd.f32 %v9554_v26, %v3178_v21  ;;  %v3180_v56 = vmul.f32 %v9576_v17, %v3034_v40  ;;  %v5541_v21 = vld [vmem:[#allocation5 + $0x28] sm:$0xf0]  ;;  %v10765_v40 = vld [vmem:[#allocation105_spill] sm:$0xff] }
 0x72f   : > { %4560 = vmatmul.bf16.gmra.mxu0 %v9782_v52  ;;  %v10759_v52 = vld [vmem:[#allocation99_spill] sm:$0xff]  ;;  %v3317_v37 = vadd.f32 %v9566_v57, %v3171_v24  ;;  %v10766_v24 = vld [vmem:[#allocation109_spill] sm:$0xff] }
 0x730   : > { %v4463_v44 = vpop.f32.mrf.mxu2  ;;  %v2722_v42 = vsub.f32 %v10759_v52, %v8959_v35  ;;  %v4416_v35 = vpop.f32.mrf.mxu1  ;;  %v3315_v52 = vadd.f32 %v9524_v8, %v3169_v34 }
 0x731   : > { %4609 = vmatmul.bf16.gmra.mxu1 %v9784_v50  ;;  %v4464_v20 = vadd.f32 %v4463_v44, %v4415_v41  ;;  %v3316_v41 = vadd.f32 %v9554_v26, %v3170_v6  ;;  %v4417_v7 = vadd.f32 %v4416_v35, %v4368_v43  ;;  %v6136_v44 = vld [vmem:[#allocation5 + $0x124] sm:$0xf]  ;;  %v3452_v43 = vmax.f32 %v3324_v54, 0.0  ;;  %v10764_v35 = vld [vmem:[#allocation104_spill] sm:$0xff] }
 0x732   : > { %v3026_v48 = vmul.f32 %v9170_v1, %v2722_v42  ;;  %v3443_v6 = vmax.f32 %v3315_v52, 0.0  ;;  %v6104_v42 = vld [vmem:[#allocation5 + $0x24] sm:$0xf]  ;;  %v2735_v52 = vsub.f32 %v10764_v35, %v9049_v60  ;;  %v5672_v46 = vor.u32 %v6136_v44, %v5669_v4 }
 0x733   : > { %v3444_v23 = vmax.f32 %v3316_v41, 0.0  ;;  %v3047_v41 = vmul.f32 %v9270_v19, %v2743_v22  ;;  %v3445_v44 = vmax.f32 %v3317_v37, 0.0 }
 0x734   : > { %v3172_v1 = vmul.f32 %v9576_v17, %v3026_v48  ;;  %v9830_v15 = vpack.c.bf16 %v3451_v11, %v3443_v6  ;;  %v2736_v11 = vsub.f32 %v10765_v40, %v9049_v60  ;;  %v5605_v6 = vld [vmem:[#allocation5 + $0xa8] sm:$0xf0]  ;;  %v3039_v54 = vmul.f32 %v9256_v63, %v2735_v52  ;;  %4836 = vmatpush.bf16.msra.mxu2 %v5672_v46 }
 0x735   : > { %v3193_v4 = vmul.f32 %v9505_v13, %v3047_v41  ;;  %v3453_v52 = vmax.f32 %v3325_v32, 0.0  ;;  %v10770_v41 = vld [vmem:[#allocation111_spill] sm:$0xff] }
 0x736   : > { %4658 = vmatmul.bf16.gmra.mxu2 %v9807_v25  ;;  %10763 = vst [vmem:[#allocation128_spill] sm:$0xff] %v9830_v15  ;;  %v3318_v48 = vadd.f32 %v9590_v61, %v3172_v1  ;;  %v3040_v22 = vmul.f32 %v9256_v63, %v2736_v11  ;;  %v2746_v32 = vsub.f32 %v10770_v41, %v9084_v14 }
 0x737   : > { %v4512_v51 = vpop.f32.mrf.mxu3 }
 0x738   : > { %4707 = vmatmul.bf16.gmra.mxu3 %v9818_v3  ;;  %v9825_v12 = vadd.f32 %v4512_v51, %v4464_v20  ;;  %v4465_v34 = vpop.f32.mrf.mxu2  ;;  %v4370_v45 = vpop.f32.mrf.mxu0  ;;  %v6152_v20 = vld [vmem:[#allocation5 + $0x1a4] sm:$0xf]  ;;  %v2744_v51 = vsub.f32 %v10766_v24, %v9084_v14  ;;  %v9848_v24 = vpack.c.bf16 %v3452_v43, %v3444_v23  ;;  %v3185_v43 = vmul.f32 %v9505_v13, %v3039_v54 }
 0x739   : > { %v4466_v31 = vadd.f32 %v4465_v34, %v4417_v7  ;;  %v4371_v10 = vadd.f32 %v4370_v45, %v9509_v55  ;;  %v6120_v7 = vld [vmem:[#allocation5 + $0xa4] sm:$0xf]  ;;  %v3326_v34 = vadd.f32 %v9590_v61, %v3180_v56  ;;  %v5544_v45 = vor.u32 %v6104_v42, %v5541_v21  ;;  %v10768_v21 = vld [vmem:[#allocation106_spill] sm:$0xff] }
 0x73a   : > { %v5736_v29 = vor.u32 %v6152_v20, %v5733_v33  ;;  %v3048_v1 = vmul.f32 %v9270_v19, %v2744_v51  ;;  %v5608_v3 = vor.u32 %v6120_v7, %v5605_v6  ;;  %10767 = vst [vmem:[#allocation64_spill] sm:$0xff] %v9848_v24  ;;  %v3446_v42 = vmax.f32 %v3318_v48, 0.0  ;;  %v10769_v33 = vld [vmem:[#allocation110_spill] sm:$0xff]  ;;  %v10771_v6 = vld [vmem:[#allocation107_spill] sm:$0xff] }
 0x73b   : > { %v2737_v20 = vsub.f32 %v10768_v21, %v9049_v60  ;;  %v2745_v11 = vsub.f32 %v10769_v33, %v9084_v14  ;;  %4738 = vmatpush.bf16.msra.mxu0 %v5544_v45  ;;  %v3454_v23 = vmax.f32 %v3326_v34, 0.0  ;;  %v3186_v48 = vmul.f32 %v9535_v58, %v3040_v22  ;;  %v10774_v33 = vld [vmem:[#allocation112_spill] sm:$0xff] }
 0x73c   : > { %4885 = vmatpush.bf16.msra.mxu3 %v5736_v29  ;;  %4787 = vmatpush.bf16.msra.mxu1 %v5608_v3  ;;  %v3194_v51 = vmul.f32 %v9535_v58, %v3048_v1  ;;  %v2738_v34 = vsub.f32 %v10771_v6, %v9049_v60  ;;  %v3050_v54 = vmul.f32 %v9270_v19, %v2746_v32  ;;  %v10776_v6 = vld [vmem:[#allocation117_spill] sm:$0xff] }
 0x73d   : > { %v3041_v46 = vmul.f32 %v9256_v63, %v2737_v20  ;;  %v3049_v7 = vmul.f32 %v9270_v19, %v2745_v11  ;;  %v9870_v45 = vpack.c.bf16 %v3453_v52, %v3445_v44  ;;  %v9872_v14 = vpack.c.bf16 %v3454_v23, %v3446_v42  ;;  %v6134_v23 = vld [vmem:[#allocation5 + $0x114] sm:$0xf] }
 0x73e   : > { %v4419_v35 = vpop.f32.mrf.mxu1  ;;  %v3331_v29 = vadd.f32 %v9524_v8, %v3185_v43  ;;  %v3332_v1 = vadd.f32 %v9554_v26, %v3186_v48  ;;  %v3196_v42 = vmul.f32 %v9576_v17, %v3050_v54  ;;  %v2751_v11 = vsub.f32 %v10774_v33, %v9126_v62  ;;  %v5533_v54 = vld [vmem:[#allocation5 + $0x18] sm:$0xf0] }
 0x73f   : > { %v4420_v40 = vadd.f32 %v4419_v35, %v4371_v10  ;;  %4565 = vmatmul.bf16.gmra.mxu0 %v9830_v15  ;;  %v4514_v56 = vpop.f32.mrf.mxu3  ;;  %10772 = vst [vmem:[#allocation68_spill] sm:$0xff] %v9870_v45  ;;  %v3042_v35 = vmul.f32 %v9256_v63, %v2738_v34  ;;  %v3195_v60 = vmul.f32 %v9547_v0, %v3049_v7 }
 0x740   : > { %v9855_v10 = vadd.f32 %v4514_v56, %v4466_v31  ;;  %v4372_v37 = vpop.f32.mrf.mxu0  ;;  %v3339_v31 = vadd.f32 %v9524_v8, %v3193_v4  ;;  %10773 = vst [vmem:[#allocation9_spill] sm:$0xff] %v9872_v14  ;;  %v3340_v4 = vadd.f32 %v9554_v26, %v3194_v51  ;;  %v3187_v56 = vmul.f32 %v9547_v0, %v3041_v46  ;;  %v6102_v51 = vld [vmem:[#allocation5 + $0x14] sm:$0xf] }
 0x741   : > { %4614 = vmatmul.bf16.gmra.mxu1 %v9848_v24  ;;  %v4373_v3 = vadd.f32 %v4372_v37, %v9509_v55  ;;  %v3459_v63 = vmax.f32 %v3331_v29, 0.0  ;;  %v3188_v20 = vmul.f32 %v9576_v17, %v3042_v35  ;;  %v5661_v37 = vld [vmem:[#allocation5 + $0x118] sm:$0xf0]  ;;  %v3460_v43 = vmax.f32 %v3332_v1, 0.0  ;;  %v6150_v29 = vld [vmem:[#allocation5 + $0x194] sm:$0xf] }
 0x742   : > { %v3467_v52 = vmax.f32 %v3339_v31, 0.0  ;;  %v3468_v41 = vmax.f32 %v3340_v4, 0.0  ;;  %v3333_v32 = vadd.f32 %v9566_v57, %v3187_v56  ;;  %v3341_v48 = vadd.f32 %v9566_v57, %v3195_v60  ;;  %v5725_v35 = vld [vmem:[#allocation5 + $0x198] sm:$0xf0]  ;;  %v10777_v4 = vld [vmem:[#allocation113_spill] sm:$0xff]  ;;  %v10778_v60 = vld [vmem:[#allocation118_spill] sm:$0xff] }
 0x743   : > { %v2760_v34 = vsub.f32 %v10776_v6, %v9195_v36  ;;  %v2752_v56 = vsub.f32 %v10777_v4, %v9126_v62  ;;  %v5728_v4 = vor.u32 %v6150_v29, %v5725_v35  ;;  %v10780_v29 = vld [vmem:[#allocation114_spill] sm:$0xff] }
 0x744   : > { %v9888_v7 = vpack.c.bf16 %v3467_v52, %v3459_v63  ;;  %v5664_v52 = vor.u32 %v6134_v23, %v5661_v37  ;;  %v5597_v63 = vld [vmem:[#allocation5 + $0x98] sm:$0xf0]  ;;  %v9907_v23 = vpack.c.bf16 %v3468_v41, %v3460_v43  ;;  %v3469_v37 = vmax.f32 %v3341_v48, 0.0 }
 0x745   : > { %4886 = vmatpush.bf16.msra.mxu3 %v5728_v4  ;;  %v2753_v35 = vsub.f32 %v10780_v29, %v9126_v62  ;;  %v6132_v29 = vld [vmem:[#allocation5 + $0x104] sm:$0xf] }
 0x746   : > { %4663 = vmatmul.bf16.gmra.mxu2 %v9870_v45  ;;  %v4421_v22 = vpop.f32.mrf.mxu1  ;;  %v5536_v45 = vor.u32 %v6102_v51, %v5533_v54  ;;  %10779 = vst [vmem:[#allocation69_spill] sm:$0xff] %v9907_v23 }
 0x747   : > { %v4468_v19 = vpop.f32.mrf.mxu2  ;;  %v4422_v44 = vadd.f32 %v4421_v22, %v4373_v3  ;;  %v10775_v3 = vld [vmem:[#allocation116_spill] sm:$0xff]  ;;  %4837 = vmatpush.bf16.msra.mxu2 %v5664_v52 }
 0x748   : > { %4712 = vmatmul.bf16.gmra.mxu3 %v9872_v14  ;;  %v4469_v21 = vadd.f32 %v4468_v19, %v4420_v40  ;;  %v3342_v40 = vadd.f32 %v9590_v61, %v3196_v42  ;;  %v2759_v31 = vsub.f32 %v10775_v3, %v9195_v36  ;;  %v2761_v19 = vsub.f32 %v10778_v60, %v9195_v36  ;;  %v6118_v42 = vld [vmem:[#allocation5 + $0x94] sm:$0xf] }
 0x749   : > { %v3055_v3 = vmul.f32 %v9340_v16, %v2751_v11  ;;  %v3064_v14 = vmul.f32 %v9350_v53, %v2760_v34  ;;  %v5600_v24 = vor.u32 %v6118_v42, %v5597_v63  ;;  %v3334_v11 = vadd.f32 %v9590_v61, %v3188_v20  ;;  %4739 = vmatpush.bf16.msra.mxu0 %v5536_v45  ;;  %v10783_v63 = vld [vmem:[#allocation115_spill] sm:$0xff] }
 0x74a   : > { %v3063_v6 = vmul.f32 %v9350_v53, %v2759_v31  ;;  %v3065_v31 = vmul.f32 %v9350_v53, %v2761_v19  ;;  %v3461_v34 = vmax.f32 %v3333_v32, 0.0  ;;  %v3470_v43 = vmax.f32 %v3342_v40, 0.0  ;;  %v10782_v19 = vld [vmem:[#allocation119_spill] sm:$0xff] }
 0x74b   : > { %v4517_v46 = vpop.f32.mrf.mxu3  ;;  %v3210_v54 = vmul.f32 %v9535_v58, %v3064_v14  ;;  %v3201_v41 = vmul.f32 %v9505_v13, %v3055_v3  ;;  %4788 = vmatpush.bf16.msra.mxu1 %v5600_v24  ;;  %v3057_v45 = vmul.f32 %v9340_v16, %v2753_v35  ;;  %v3462_v32 = vmax.f32 %v3334_v11, 0.0  ;;  %v5653_v35 = vld [vmem:[#allocation5 + $0x108] sm:$0xf0] }
 0x74c   : > { %v9895_v22 = vadd.f32 %v4517_v46, %v4469_v21  ;;  %v4375_v1 = vpop.f32.mrf.mxu0  ;;  %v3056_v46 = vmul.f32 %v9340_v16, %v2752_v56  ;;  %v3209_v51 = vmul.f32 %v9505_v13, %v3063_v6  ;;  %v9918_v20 = vpack.c.bf16 %v3469_v37, %v3461_v34 }
 0x74d   : > { %v4376_v33 = vadd.f32 %v4375_v1, %v9509_v55  ;;  %v3211_v14 = vmul.f32 %v9547_v0, %v3065_v31  ;;  %v2762_v52 = vsub.f32 %v10782_v19, %v9195_v36  ;;  %v3356_v24 = vadd.f32 %v9554_v26, %v3210_v54  ;;  %v10788_v19 = vld [vmem:[#allocation38_spill] sm:$0xff] }
 0x74e   : > { %v4424_v21 = vpop.f32.mrf.mxu1  ;;  %10781 = vst [vmem:[#allocation65_spill] sm:$0xff] %v9918_v20  ;;  %v3355_v42 = vadd.f32 %v9524_v8, %v3209_v51  ;;  %v9932_v3 = vpack.c.bf16 %v3470_v43, %v3462_v32  ;;  %v3203_v37 = vmul.f32 %v9547_v0, %v3057_v45  ;;  %v10785_v51 = vld [vmem:[#allocation124_spill] sm:$0xff] }
 0x74f   : > { %v4470_v15 = vpop.f32.mrf.mxu2  ;;  %v4425_v60 = vadd.f32 %v4424_v21, %v4376_v33  ;;  %4570 = vmatmul.bf16.gmra.mxu0 %v9888_v7  ;;  %v2754_v33 = vsub.f32 %v10783_v63, %v9126_v62  ;;  %v3347_v21 = vadd.f32 %v9524_v8, %v3201_v41  ;;  %v3066_v36 = vmul.f32 %v9350_v53, %v2762_v52  ;;  %v6148_v63 = vld [vmem:[#allocation5 + $0x184] sm:$0xf] }
 0x750   : > { %v4471_v1 = vadd.f32 %v4470_v15, %v4422_v44  ;;  %v3202_v15 = vmul.f32 %v9535_v58, %v3056_v46  ;;  %10784 = vst [vmem:[#allocation66_spill] sm:$0xff] %v9932_v3  ;;  %v3483_v31 = vmax.f32 %v3355_v42, 0.0  ;;  %v3484_v34 = vmax.f32 %v3356_v24, 0.0  ;;  %v5525_v24 = vld [vmem:[#allocation5 + $0x8] sm:$0xf0] }
 0x751   : > { %4619 = vmatmul.bf16.gmra.mxu1 %v9907_v23  ;;  %v3058_v62 = vmul.f32 %v9340_v16, %v2754_v33  ;;  %v2775_v54 = vsub.f32 %v10785_v51, %v9306_v30  ;;  %v3475_v41 = vmax.f32 %v3347_v21, 0.0  ;;  %v3349_v32 = vadd.f32 %v9566_v57, %v3203_v37  ;;  %v5717_v33 = vld [vmem:[#allocation5 + $0x188] sm:$0xf0] }
 0x752   : > { %v3348_v46 = vadd.f32 %v9554_v26, %v3202_v15  ;;  %v3212_v15 = vmul.f32 %v9576_v17, %v3066_v36  ;;  %v5656_v36 = vor.u32 %v6132_v29, %v5653_v35  ;;  %v5589_v37 = vld [vmem:[#allocation5 + $0x88] sm:$0xf0]  ;;  %v10791_v29 = vld [vmem:[#allocation32_spill] sm:$0xff] }
 0x753   : > { %v4519_v44 = vpop.f32.mrf.mxu3  ;;  %v3079_v52 = vmul.f32 %v10788_v19, %v2775_v54 }
 0x754   : > { %v9921_v48 = vadd.f32 %v4519_v44, %v4471_v1  ;;  %v4377_v56 = vpop.f32.mrf.mxu0  ;;  %v3357_v1 = vadd.f32 %v9566_v57, %v3211_v14  ;;  %v3476_v53 = vmax.f32 %v3348_v46, 0.0  ;;  %v6100_v44 = vld [vmem:[#allocation5 + $0x4] sm:$0xf]  ;;  %v10787_v14 = vld [vmem:[#allocation120_spill] sm:$0xff]  ;;  %v3204_v46 = vmul.f32 %v9576_v17, %v3058_v62  ;;  %4838 = vmatpush.bf16.msra.mxu2 %v5656_v36 }
 0x755   : > { %v4378_v40 = vadd.f32 %v4377_v56, %v9509_v55  ;;  %v10786_v56 = vld [vmem:[#allocation25_spill] sm:$0xff] }
 0x756   : > { %4668 = vmatmul.bf16.gmra.mxu2 %v9918_v20  ;;  %v4426_v6 = vpop.f32.mrf.mxu1  ;;  %v2767_v16 = vsub.f32 %v10787_v14, %v10786_v56  ;;  %v3485_v21 = vmax.f32 %v3357_v1, 0.0  ;;  %v9954_v14 = vpack.c.bf16 %v3483_v31, %v3475_v41  ;;  %v9956_v54 = vpack.c.bf16 %v3484_v34, %v3476_v53 }
 0x757   : > { %v4427_v4 = vadd.f32 %v4426_v6, %v4378_v40  ;;  %v10789_v40 = vld [vmem:[#allocation121_spill] sm:$0xff]  ;;  %v5720_v1 = vor.u32 %v6148_v63, %v5717_v33  ;;  %v3225_v31 = vmul.f32 %v9505_v13, %v3079_v52  ;;  %v3477_v41 = vmax.f32 %v3349_v32, 0.0 }
 0x758   : > { %4717 = vmatmul.bf16.gmra.mxu3 %v9932_v3  ;;  %v2768_v42 = vsub.f32 %v10789_v40, %v10786_v56  ;;  %v10790_v40 = vld [vmem:[#allocation125_spill] sm:$0xff]  ;;  %v3071_v35 = vmul.f32 %v10791_v29, %v2767_v16  ;;  %v3350_v53 = vadd.f32 %v9590_v61, %v3204_v46  ;;  %v10792_v16 = vld [vmem:[#allocation126_spill] sm:$0xff] }
 0x759   : > { %v4473_v11 = vpop.f32.mrf.mxu2  ;;  %v2776_v3 = vsub.f32 %v10790_v40, %v9306_v30  ;;  %4887 = vmatpush.bf16.msra.mxu3 %v5720_v1  ;;  %v2777_v63 = vsub.f32 %v10792_v16, %v9306_v30  ;;  %v3371_v32 = vadd.f32 %v9524_v8, %v3225_v31  ;;  %v10793_v46 = vld [vmem:[#allocation122_spill] sm:$0xff]  ;;  %v10795_v1 = vld [vmem:[#allocation123_spill] sm:$0xff] }
 0x75a   : > { %v4474_v43 = vadd.f32 %v4473_v11, %v4425_v60  ;;  %v6116_v11 = vld [vmem:[#allocation5 + $0x84] sm:$0xf]  ;;  %v2769_v36 = vsub.f32 %v10793_v46, %v10786_v56 }
 0x75b   : > { %v4522_v45 = vpop.f32.mrf.mxu3  ;;  %v5592_v23 = vor.u32 %v6116_v11, %v5589_v37  ;;  %v3080_v34 = vmul.f32 %v10788_v19, %v2776_v3  ;;  %v3217_v3 = vmul.f32 %v9505_v13, %v3071_v35  ;;  %v10794_v37 = vld [vmem:[#allocation127_spill] sm:$0xff]  ;;  %v2770_v35 = vsub.f32 %v10795_v1, %v10786_v56 }
 0x75c   : > { %v9950_v60 = vadd.f32 %v4522_v45, %v4474_v43  ;;  %v4380_v6 = vpop.f32.mrf.mxu0  ;;  %v3358_v43 = vadd.f32 %v9590_v61, %v3212_v15  ;;  %v5528_v45 = vor.u32 %v6100_v44, %v5525_v24  ;;  %v3072_v15 = vmul.f32 %v10791_v29, %v2768_v42  ;;  %v6194_v1 = vld [vmem:[#allocation5 + $0x2f4] sm:$0xf] }
 0x75d   : > { %v4381_v51 = vadd.f32 %v4380_v6, %v9509_v55  ;;  %4789 = vmatpush.bf16.msra.mxu1 %v5592_v23  ;;  %v3226_v33 = vmul.f32 %v9535_v58, %v3080_v34  ;;  %v3073_v40 = vmul.f32 %v10791_v29, %v2769_v36 }
 0x75e   : > { %v4429_v20 = vpop.f32.mrf.mxu1  ;;  %4740 = vmatpush.bf16.msra.mxu0 %v5528_v45  ;;  %v3486_v24 = vmax.f32 %v3358_v43, 0.0  ;;  %v3218_v13 = vmul.f32 %v9535_v58, %v3072_v15  ;;  %v6210_v15 = vld [vmem:[#allocation5 + $0x374] sm:$0xf] }
 0x75f   : > { %v4430_v62 = vadd.f32 %v4429_v20, %v4381_v51  ;;  %4575 = vmatmul.bf16.gmra.mxu0 %v9954_v14  ;;  %v9968_v20 = vpack.c.bf16 %v3485_v21, %v3477_v41  ;;  %v3081_v21 = vmul.f32 %v10788_v19, %v2777_v63  ;;  %v2778_v51 = vsub.f32 %v10794_v37, %v9306_v30 }
 0x760   : > { %v3363_v41 = vadd.f32 %v9524_v8, %v3217_v3  ;;  %v3499_v30 = vmax.f32 %v3371_v32, 0.0  ;;  %v3364_v56 = vadd.f32 %v9554_v26, %v3218_v13  ;;  %v6226_v8 = vld [vmem:[#allocation5 + $0x3f4] sm:$0xf]  ;;  %v6029_v3 = vld [vmem:[#allocation5 + $0x3f8] sm:$0xf0] }
 0x761   : > { %v4475_v6 = vpop.f32.mrf.mxu2  ;;  %4624 = vmatmul.bf16.gmra.mxu1 %v9956_v54  ;;  %v3082_v31 = vmul.f32 %v10788_v19, %v2778_v51  ;;  %v3227_v58 = vmul.f32 %v9547_v0, %v3081_v21  ;;  %v3219_v19 = vmul.f32 %v9547_v0, %v3073_v40  ;;  %v6032_v36 = vor.u32 %v6226_v8, %v6029_v3  ;;  %v5957_v3 = vld [vmem:[#allocation5 + $0x368] sm:$0xf0] }
 0x762   : > { %v4476_v44 = vadd.f32 %v4475_v6, %v4427_v4  ;;  %v3478_v4 = vmax.f32 %v3350_v53, 0.0  ;;  %v3372_v53 = vadd.f32 %v9554_v26, %v3226_v33  ;;  %v3074_v6 = vmul.f32 %v10791_v29, %v2770_v35  ;;  %v5901_v35 = vld [vmem:[#allocation5 + $0x2f8] sm:$0xf0] }
 0x763   : > { %v4524_v52 = vpop.f32.mrf.mxu3  ;;  %v3228_v33 = vmul.f32 %v9576_v17, %v3082_v31  ;;  %v3373_v26 = vadd.f32 %v9566_v57, %v3227_v58  ;;  %5076 = vmatpush.bf16.msrb.mxu3 %v6032_v36  ;;  %v3365_v40 = vadd.f32 %v9566_v57, %v3219_v19  ;;  %v5829_v36 = vld [vmem:[#allocation5 + $0x268] sm:$0xf0] }
 0x764   : > { %v9977_v11 = vadd.f32 %v4524_v52, %v4476_v44  ;;  %v4382_v42 = vpop.f32.mrf.mxu0  ;;  %v9986_v43 = vpack.c.bf16 %v3486_v24, %v3478_v4  ;;  %v5965_v44 = vld [vmem:[#allocation5 + $0x378] sm:$0xf0]  ;;  %v6178_v24 = vld [vmem:[#allocation5 + $0x274] sm:$0xf]  ;;  %v3500_v29 = vmax.f32 %v3372_v53, 0.0  ;;  %v3220_v0 = vmul.f32 %v9576_v17, %v3074_v6 }
 0x765   : > { %v4383_v23 = vadd.f32 %v4382_v42, %v9509_v55  ;;  %v5968_v63 = vor.u32 %v6210_v15, %v5965_v44  ;;  %v5837_v52 = vld [vmem:[#allocation5 + $0x278] sm:$0xf0]  ;;  %v3491_v42 = vmax.f32 %v3363_v41, 0.0  ;;  %v5904_v17 = vor.u32 %v6194_v1, %v5901_v35  ;;  %v10796_v1 = vld [vmem:[#allocation10_spill] sm:$0xff] }
 0x766   : > { %4673 = vmatmul.bf16.gmra.mxu2 %v9968_v20  ;;  %v4431_v45 = vpop.f32.mrf.mxu1  ;;  %v5840_v46 = vor.u32 %v6178_v24, %v5837_v52  ;;  %v3501_v53 = vmax.f32 %v3373_v26, 0.0  ;;  %v3366_v58 = vadd.f32 %v9590_v61, %v3220_v0  ;;  %v3493_v15 = vmax.f32 %v3365_v40, 0.0  ;;  %v6192_v40 = vld [vmem:[#allocation5 + $0x2e4] sm:$0xf] }
 0x767   : > { %v4432_v34 = vadd.f32 %v4431_v45, %v4383_v23  ;;  %5027 = vmatpush.bf16.msrb.mxu2 %v5968_v63  ;;  %v3492_v23 = vmax.f32 %v3364_v56, 0.0  ;;  %v3374_v45 = vadd.f32 %v9590_v61, %v3228_v33  ;;  %4978 = vmatpush.bf16.msrb.mxu1 %v5904_v17  ;;  %v4353_v17 = vadd.f32 %v9578_v5, %v9509_v55 }
 0x768   : > { %4722 = vmatmul.bf16.gmra.mxu3 %v9986_v43  ;;  %4929 = vmatpush.bf16.msrb.mxu0 %v5840_v46  ;;  %v3494_v56 = vmax.f32 %v3366_v58, 0.0 }
 0x769   : > { %v4478_v16 = vpop.f32.mrf.mxu2  ;;  %v10009_v41 = vpack.c.bf16 %v3500_v29, %v3492_v23  ;;  %v3502_v44 = vmax.f32 %v3374_v45, 0.0  ;;  %v5893_v45 = vld [vmem:[#allocation5 + $0x2e8] sm:$0xf0] }
 0x76a   : > { %v4479_v32 = vadd.f32 %v4478_v16, %v4430_v62  ;;  %v10004_v62 = vpack.c.bf16 %v3499_v30, %v3491_v42  ;;  %v10015_v16 = vpack.c.bf16 %v3501_v53, %v3493_v15  ;;  %v6021_v42 = vld [vmem:[#allocation5 + $0x3e8] sm:$0xf0]  ;;  %v5896_v35 = vor.u32 %v6192_v40, %v5893_v45  ;;  %v10797_v53 = vld [vmem:[#allocation11_spill] sm:$0xff] }
 0x76b   : > { %v4527_v4 = vpop.f32.mrf.mxu3  ;;  %v10019_v52 = vpack.c.bf16 %v3502_v44, %v3494_v56  ;;  %v10798_v44 = vld [vmem:[#allocation43_spill] sm:$0xff] }
 0x76c   : > { %v9999_v21 = vadd.f32 %v4527_v4, %v4479_v32  ;;  %v4385_v37 = vpop.f32.mrf.mxu0  ;;  %v6176_v32 = vld [vmem:[#allocation5 + $0x264] sm:$0xf]  ;;  %4979 = vmatpush.bf16.msrb.mxu1 %v5896_v35 }
 0x76d   : > { %v4386_v51 = vadd.f32 %v4385_v37, %v9509_v55  ;;  %v6224_v4 = vld [vmem:[#allocation5 + $0x3e4] sm:$0xf]  ;;  %v5832_v37 = vor.u32 %v6176_v32, %v5829_v36  ;;  %v6206_v32 = vld [vmem:[#allocation5 + $0x354] sm:$0xf] }
 0x76e   : > { %v4434_v13 = vpop.f32.mrf.mxu1  ;;  %v6024_v26 = vor.u32 %v6224_v4, %v6021_v42  ;;  %v6222_v4 = vld [vmem:[#allocation5 + $0x3d4] sm:$0xf]  ;;  %v6013_v42 = vld [vmem:[#allocation5 + $0x3d8] sm:$0xf0] }
 0x76f   : > { %v4435_v31 = vadd.f32 %v4434_v13, %v4386_v51  ;;  %4580 = vmatmul.bf16.gmra.mxu0 %v10004_v62 }
 0x770   : > { %4930 = vmatpush.bf16.msrb.mxu0 %v5832_v37  ;;  %5077 = vmatpush.bf16.msrb.mxu3 %v6024_v26 }
 0x771   : > { %v4480_v6 = vpop.f32.mrf.mxu2  ;;  %4629 = vmatmul.bf16.gmra.mxu1 %v10009_v41 }
 0x772   : > { %v4481_v30 = vadd.f32 %v4480_v6, %v4432_v34  ;;  %v6208_v34 = vld [vmem:[#allocation5 + $0x364] sm:$0xf] }
 0x773   : > { %v4529_v57 = vpop.f32.mrf.mxu3  ;;  %v5960_v46 = vor.u32 %v6208_v34, %v5957_v3  ;;  %v10801_v3 = vld [vmem:[#allocation13_spill] sm:$0xff] }
 0x774   : > { %v10013_v24 = vadd.f32 %v4529_v57, %v4481_v30  ;;  %v4387_v19 = vpop.f32.mrf.mxu0  ;;  %v4402_v30 = vadd.f32 %v9582_v27, %v4353_v17  ;;  %v5821_v27 = vld [vmem:[#allocation5 + $0x258] sm:$0xf0]  ;;  %v6190_v17 = vld [vmem:[#allocation5 + $0x2d4] sm:$0xf] }
 0x775   : > { %v4388_v63 = vadd.f32 %v4387_v19, %v9509_v55  ;;  %5028 = vmatpush.bf16.msrb.mxu2 %v5960_v46  ;;  %v10799_v19 = vld [vmem:[#allocation52_spill] sm:$0xff] }
 0x776   : > { %4678 = vmatmul.bf16.gmra.mxu2 %v10015_v16  ;;  %v4436_v61 = vpop.f32.mrf.mxu1 }
 0x777   : > { %v4437_v8 = vadd.f32 %v4436_v61, %v4388_v63  ;;  %v4451_v63 = vadd.f32 %v10799_v19, %v4402_v30  ;;  %v10800_v61 = vld [vmem:[#allocation12_spill] sm:$0xff] }
 0x778   : > { %4727 = vmatmul.bf16.gmra.mxu3 %v10019_v52 }
 0x779   : > { %v4483_v33 = vpop.f32.mrf.mxu2 }
 0x77a   : > { %v4484_v29 = vadd.f32 %v4483_v33, %v4435_v31  ;;  %v6174_v33 = vld [vmem:[#allocation5 + $0x254] sm:$0xf] }
 0x77b   : > { %v4532_v0 = vpop.f32.mrf.mxu3 }
 0x77c   : > { %v10022_v51 = vadd.f32 %v4532_v0, %v4484_v29  ;;  %v4546_v23 = vpop.f32.mrf.mxu0  ;;  %v10802_v29 = vld [vmem:[#allocation49_spill] sm:$0xff]  ;;  %v5824_v0 = vor.u32 %v6174_v33, %v5821_v27  ;;  %v10807_v33 = vld [vmem:[#allocation60_spill] sm:$0xff] }
 0x77d   : > { %v4547_v57 = vadd.f32 %v4546_v23, %v10798_v44  ;;  %v4500_v37 = vadd.f32 %v10802_v29, %v4451_v63  ;;  %v6016_v23 = vor.u32 %v6222_v4, %v6013_v42  ;;  %v10805_v63 = vld [vmem:[#allocation54_spill] sm:$0xff]  ;;  %v6204_v4 = vld [vmem:[#allocation5 + $0x344] sm:$0xf] }
 0x77e   : > { %v4595_v13 = vpop.f32.mrf.mxu1  ;;  %4931 = vmatpush.bf16.msrb.mxu0 %v5824_v0  ;;  %v5941_v42 = vld [vmem:[#allocation5 + $0x348] sm:$0xf0]  ;;  %v6172_v29 = vld [vmem:[#allocation5 + $0x244] sm:$0xf] }
 0x77f   : > { %4741 = vmatmul.bf16.vlgmr.msra.gmra.mxu0 %v10796_v1  ;;  %v4596_v5 = vadd.f32 %v4595_v13, %v4547_v57  ;;  %5078 = vmatpush.bf16.msrb.mxu3 %v6016_v23  ;;  %v10804_v57 = vld [vmem:[#allocation15_spill] sm:$0xff]  ;;  %v5813_v0 = vld [vmem:[#allocation5 + $0x248] sm:$0xf0]  ;;  %v6220_v23 = vld [vmem:[#allocation5 + $0x3c4] sm:$0xf] }
 0x781   : > { %v4485_v31 = vpop.f32.mrf.mxu2  ;;  %4790 = vmatmul.bf16.vlgmr.msra.gmra.mxu1 %v10797_v53  ;;  %v10803_v53 = vld [vmem:[#allocation14_spill] sm:$0xff] }
 0x782   : > { %v4486_v58 = vadd.f32 %v4485_v31, %v4437_v8  ;;  %v5949_v8 = vld [vmem:[#allocation5 + $0x358] sm:$0xf0] }
 0x783   : > { %v4534_v6 = vpop.f32.mrf.mxu3  ;;  %v5952_v36 = vor.u32 %v6206_v32, %v5949_v8  ;;  %v5885_v31 = vld [vmem:[#allocation5 + $0x2d8] sm:$0xf0] }
 0x784   : > { %v10029_v15 = vadd.f32 %v4534_v6, %v4486_v58  ;;  %v4548_v56 = vpop.f32.mrf.mxu0  ;;  %v5888_v58 = vor.u32 %v6190_v17, %v5885_v31  ;;  %v4358_v6 = vadd.f32 %v9645_v49, %v9509_v55 }
 0x785   : > { %5029 = vmatpush.bf16.msrb.mxu2 %v5952_v36  ;;  %v4549_v45 = vadd.f32 %v4548_v56, %v4500_v37  ;;  %v10808_v36 = vld [vmem:[#allocation16_spill] sm:$0xff] }
 0x786   : > { %4839 = vmatmul.bf16.vlgmr.msra.gmra.mxu2 %v10800_v61  ;;  %v4597_v34 = vpop.f32.mrf.mxu1  ;;  %4980 = vmatpush.bf16.msrb.mxu1 %v5888_v58  ;;  %v4407_v61 = vadd.f32 %v10805_v63, %v4358_v6 }
 0x787   : > { %v4598_v30 = vadd.f32 %v4597_v34, %v4549_v45  ;;  %v10809_v34 = vld [vmem:[#allocation17_spill] sm:$0xff] }
 0x788   : > { %4888 = vmatmul.bf16.vlgmr.msra.gmra.mxu3 %v10801_v3  ;;  %v10806_v3 = vld [vmem:[#allocation55_spill] sm:$0xff] }
 0x789   : > { %v4644_v46 = vpop.f32.mrf.mxu2 }
 0x78a   : > { %v4645_v26 = vadd.f32 %v4644_v46, %v4596_v5  ;;  %v4456_v46 = vadd.f32 %v10807_v33, %v4407_v61  ;;  %v10811_v61 = vld [vmem:[#allocation19_spill] sm:$0xff] }
 0x78b   : > { %v4693_v13 = vpop.f32.mrf.mxu3 }
 0x78c   : > { %v4694_v40 = vadd.f32 %v4693_v13, %v4645_v26  ;;  %v4551_v1 = vpop.f32.mrf.mxu0  ;;  %v5944_v26 = vor.u32 %v6204_v4, %v5941_v42  ;;  %v6005_v13 = vld [vmem:[#allocation5 + $0x3c8] sm:$0xf0]  ;;  %v5933_v4 = vld [vmem:[#allocation5 + $0x338] sm:$0xf0]  ;;  %v6170_v42 = vld [vmem:[#allocation5 + $0x234] sm:$0xf] }
 0x78d   : > { %v4552_v32 = vadd.f32 %v4551_v1, %v10806_v3  ;;  %v5816_v1 = vor.u32 %v6172_v29, %v5813_v0  ;;  %v6008_v17 = vor.u32 %v6220_v23, %v6005_v13  ;;  %v5997_v0 = vld [vmem:[#allocation5 + $0x3b8] sm:$0xf0] }
 0x78e   : > { %5125 = vst [vmem:[%s10040_s21] sm:$0xff] %v4694_v40  ;;  %v4600_v35 = vpop.f32.mrf.mxu1  ;;  %v4505_v40 = vadd.f32 %v9706_v47, %v4456_v46  ;;  %5030 = vmatpush.bf16.msrb.mxu2 %v5944_v26  ;;  %v4363_v47 = vadd.f32 %v9711_v9, %v9509_v55  ;;  %v10813_v9 = vld [vmem:[#allocation22_spill] sm:$0xff]  ;;  %v6218_v26 = vld [vmem:[#allocation5 + $0x3b4] sm:$0xf] }
 0x78f   : > { %4746 = vmatmul.bf16.gmra.mxu0 %v10803_v53  ;;  %v4601_v49 = vadd.f32 %v4600_v35, %v4552_v32  ;;  %5079 = vmatpush.bf16.msrb.mxu3 %v6008_v17  ;;  %v6000_v13 = vor.u32 %v6218_v26, %v5997_v0  ;;  %v6184_v0 = vld [vmem:[#allocation5 + $0x2a4] sm:$0xf] }
 0x790   : > { %4932 = vmatpush.bf16.msrb.mxu0 %v5816_v1  ;;  %v4412_v32 = vadd.f32 %v9733_v59, %v4363_v47  ;;  %v5805_v59 = vld [vmem:[#allocation5 + $0x238] sm:$0xf0] }
 0x791   : > { %v4646_v44 = vpop.f32.mrf.mxu2  ;;  %4795 = vmatmul.bf16.gmra.mxu1 %v10804_v57  ;;  %v10810_v57 = vld [vmem:[#allocation18_spill] sm:$0xff] }
 0x792   : > { %v4647_v19 = vadd.f32 %v4646_v44, %v4598_v30  ;;  %v6188_v30 = vld [vmem:[#allocation5 + $0x2c4] sm:$0xf]  ;;  %v5877_v44 = vld [vmem:[#allocation5 + $0x2c8] sm:$0xf0] }
 0x793   : > { %v4695_v56 = vpop.f32.mrf.mxu3  ;;  %5080 = vmatpush.bf16.msrb.mxu3 %v6000_v13 }
 0x794   : > { %v4696_v5 = vadd.f32 %v4695_v56, %v4647_v19  ;;  %v4553_v8 = vpop.f32.mrf.mxu0  ;;  %v5880_v19 = vor.u32 %v6188_v30, %v5877_v44  ;;  %v10815_v44 = vld [vmem:[#allocation24_spill] sm:$0xff] }
 0x795   : > { %v4554_v35 = vadd.f32 %v4553_v8, %v4505_v40 }
 0x796   : > { %5127 = vst [vmem:[%s10040_s21 + $0x10] sm:$0xff] %v4696_v5  ;;  %4844 = vmatmul.bf16.gmra.mxu2 %v10808_v36  ;;  %v4602_v27 = vpop.f32.mrf.mxu1  ;;  %4981 = vmatpush.bf16.msrb.mxu1 %v5880_v19  ;;  %v4461_v36 = vadd.f32 %v9765_v2, %v4412_v32  ;;  %v5808_v2 = vor.u32 %v6170_v42, %v5805_v59  ;;  %v10817_v32 = vld [vmem:[#allocation29_spill] sm:$0xff] }
 0x797   : > { %v4603_v56 = vadd.f32 %v4602_v27, %v4554_v35  ;;  %v6202_v27 = vld [vmem:[#allocation5 + $0x334] sm:$0xf]  ;;  %v5869_v35 = vld [vmem:[#allocation5 + $0x2b8] sm:$0xf0] }
 0x798   : > { %4893 = vmatmul.bf16.gmra.mxu3 %v10809_v34  ;;  %4933 = vmatpush.bf16.msrb.mxu0 %v5808_v2 }
 0x799   : > { %v4649_v37 = vpop.f32.mrf.mxu2 }
 0x79a   : > { %v4650_v45 = vadd.f32 %v4649_v37, %v4601_v49  ;;  %v10812_v49 = vld [vmem:[#allocation20_spill] sm:$0xff]  ;;  %v5936_v37 = vor.u32 %v6202_v27, %v5933_v4 }
 0x79b   : > { %v4698_v31 = vpop.f32.mrf.mxu3 }
 0x79c   : > { %v4699_v53 = vadd.f32 %v4698_v31, %v4650_v45  ;;  %v4556_v58 = vpop.f32.mrf.mxu0  ;;  %5031 = vmatpush.bf16.msrb.mxu2 %v5936_v37 }
 0x79d   : > { %v4557_v33 = vadd.f32 %v4556_v58, %v9747_v39  ;;  %v4510_v39 = vadd.f32 %v9788_v18, %v4461_v36  ;;  %v10814_v58 = vld [vmem:[#allocation23_spill] sm:$0xff] }
 0x79e   : > { %5129 = vst [vmem:[%s10040_s21 + $0x20] sm:$0xff] %v4699_v53  ;;  %v4605_v6 = vpop.f32.mrf.mxu1  ;;  %v6186_v53 = vld [vmem:[#allocation5 + $0x2b4] sm:$0xf] }
 0x79f   : > { %4751 = vmatmul.bf16.gmra.mxu0 %v10810_v57  ;;  %v4606_v55 = vadd.f32 %v4605_v6, %v4557_v33  ;;  %v5872_v6 = vor.u32 %v6186_v53, %v5869_v35  ;;  %v5925_v33 = vld [vmem:[#allocation5 + $0x328] sm:$0xf0]  ;;  %v10820_v35 = vld [vmem:[#allocation27_spill] sm:$0xff] }
 0x7a1   : > { %v4651_v63 = vpop.f32.mrf.mxu2  ;;  %4800 = vmatmul.bf16.gmra.mxu1 %v10811_v61  ;;  %v10816_v61 = vld [vmem:[#allocation28_spill] sm:$0xff] }
 0x7a2   : > { %v4652_v5 = vadd.f32 %v4651_v63, %v4603_v56  ;;  %4982 = vmatpush.bf16.msrb.mxu1 %v5872_v6 }
 0x7a3   : > { %v4700_v3 = vpop.f32.mrf.mxu3 }
 0x7a4   : > { %v4701_v8 = vadd.f32 %v4700_v3, %v4652_v5  ;;  %v4558_v46 = vpop.f32.mrf.mxu0 }
 0x7a5   : > { %v4559_v1 = vadd.f32 %v4558_v46, %v4510_v39  ;;  %v6168_v46 = vld [vmem:[#allocation5 + $0x224] sm:$0xf]  ;;  %v5861_v39 = vld [vmem:[#allocation5 + $0x2a8] sm:$0xf0] }
 0x7a6   : > { %5131 = vst [vmem:[%s10040_s21 + $0x30] sm:$0xff] %v4701_v8  ;;  %4849 = vmatmul.bf16.gmra.mxu2 %v10812_v49  ;;  %v4607_v34 = vpop.f32.mrf.mxu1  ;;  %v6200_v8 = vld [vmem:[#allocation5 + $0x324] sm:$0xf]  ;;  %v5864_v2 = vor.u32 %v6184_v0, %v5861_v39 }
 0x7a7   : > { %v4608_v30 = vadd.f32 %v4607_v34, %v4559_v1  ;;  %v5928_v49 = vor.u32 %v6200_v8, %v5925_v33  ;;  %v5797_v34 = vld [vmem:[#allocation5 + $0x228] sm:$0xf0] }
 0x7a8   : > { %4898 = vmatmul.bf16.gmra.mxu3 %v10813_v9  ;;  %v5989_v9 = vld [vmem:[#allocation5 + $0x3a8] sm:$0xf0]  ;;  %v5800_v4 = vor.u32 %v6168_v46, %v5797_v34  ;;  %4983 = vmatpush.bf16.msrb.mxu1 %v5864_v2  ;;  %v5853_v34 = vld [vmem:[#allocation5 + $0x298] sm:$0xf0]  ;;  %v6196_v2 = vld [vmem:[#allocation5 + $0x304] sm:$0xf] }
 0x7a9   : > { %v4654_v29 = vpop.f32.mrf.mxu2  ;;  %5032 = vmatpush.bf16.msrb.mxu2 %v5928_v49  ;;  %v6182_v49 = vld [vmem:[#allocation5 + $0x294] sm:$0xf] }
 0x7aa   : > { %v4655_v23 = vadd.f32 %v4654_v29, %v4606_v55  ;;  %v6216_v55 = vld [vmem:[#allocation5 + $0x3a4] sm:$0xf]  ;;  %4934 = vmatpush.bf16.msrb.mxu0 %v5800_v4 }
 0x7ab   : > { %v4703_v40 = vpop.f32.mrf.mxu3 }
 0x7ac   : > { %v4704_v45 = vadd.f32 %v4703_v40, %v4655_v23  ;;  %v4561_v17 = vpop.f32.mrf.mxu0  ;;  %v10818_v23 = vld [vmem:[#allocation26_spill] sm:$0xff] }
 0x7ad   : > { %v4562_v56 = vadd.f32 %v4561_v17, %v9825_v12  ;;  %v5992_v12 = vor.u32 %v6216_v55, %v5989_v9  ;;  %v10822_v55 = vld [vmem:[#allocation36_spill] sm:$0xff]  ;;  %v5856_v9 = vor.u32 %v6182_v49, %v5853_v34 }
 0x7ae   : > { %5133 = vst [vmem:[%s10040_s21 + $0x40] sm:$0xff] %v4704_v45  ;;  %v4610_v31 = vpop.f32.mrf.mxu1  ;;  %v10819_v45 = vld [vmem:[#allocation30_spill] sm:$0xff]  ;;  %v10829_v49 = vld [vmem:[#allocation44_spill] sm:$0xff] }
 0x7af   : > { %4756 = vmatmul.bf16.gmra.mxu0 %v10814_v58  ;;  %v4611_v3 = vadd.f32 %v4610_v31, %v4562_v56  ;;  %5081 = vmatpush.bf16.msrb.mxu3 %v5992_v12  ;;  %v5789_v56 = vld [vmem:[#allocation5 + $0x218] sm:$0xf0]  ;;  %v10823_v12 = vld [vmem:[#allocation33_spill] sm:$0xff] }
 0x7b0   : > { %4984 = vmatpush.bf16.msrb.mxu1 %v5856_v9 }
 0x7b1   : > { %v4656_v18 = vpop.f32.mrf.mxu2  ;;  %4805 = vmatmul.bf16.gmra.mxu1 %v10815_v44  ;;  %v5917_v44 = vld [vmem:[#allocation5 + $0x318] sm:$0xf0] }
 0x7b2   : > { %v4657_v57 = vadd.f32 %v4656_v18, %v4608_v30  ;;  %v10821_v30 = vld [vmem:[#allocation31_spill] sm:$0xff] }
 0x7b3   : > { %v4705_v19 = vpop.f32.mrf.mxu3  ;;  %v6198_v18 = vld [vmem:[#allocation5 + $0x314] sm:$0xf] }
 0x7b4   : > { %v4706_v47 = vadd.f32 %v4705_v19, %v4657_v57  ;;  %v4563_v63 = vpop.f32.mrf.mxu0  ;;  %v6166_v57 = vld [vmem:[#allocation5 + $0x214] sm:$0xf] }
 0x7b5   : > { %v4564_v37 = vadd.f32 %v4563_v63, %v9855_v10  ;;  %v6214_v63 = vld [vmem:[#allocation5 + $0x394] sm:$0xf] }
 0x7b6   : > { %5135 = vst [vmem:[%s10040_s21 + $0x50] sm:$0xff] %v4706_v47  ;;  %4854 = vmatmul.bf16.gmra.mxu2 %v10816_v61  ;;  %v4612_v5 = vpop.f32.mrf.mxu1  ;;  %v5920_v47 = vor.u32 %v6198_v18, %v5917_v44  ;;  %v5981_v61 = vld [vmem:[#allocation5 + $0x398] sm:$0xf0] }
 0x7b7   : > { %v4613_v13 = vadd.f32 %v4612_v5, %v4564_v37 }
 0x7b8   : > { %4903 = vmatmul.bf16.gmra.mxu3 %v10817_v32  ;;  %5033 = vmatpush.bf16.msrb.mxu2 %v5920_v47  ;;  %v10826_v47 = vld [vmem:[#allocation35_spill] sm:$0xff] }
 0x7b9   : > { %v4659_v36 = vpop.f32.mrf.mxu2 }
 0x7ba   : > { %v4660_v27 = vadd.f32 %v4659_v36, %v4611_v3  ;;  %v5792_v3 = vor.u32 %v6166_v57, %v5789_v56  ;;  %v6180_v57 = vld [vmem:[#allocation5 + $0x284] sm:$0xf] }
 0x7bb   : > { %v4708_v42 = vpop.f32.mrf.mxu3 }
 0x7bc   : > { %v4709_v29 = vadd.f32 %v4708_v42, %v4660_v27  ;;  %v4566_v59 = vpop.f32.mrf.mxu0  ;;  %4935 = vmatpush.bf16.msrb.mxu0 %v5792_v3 }
 0x7bd   : > { %v4567_v10 = vadd.f32 %v4566_v59, %v9895_v22  ;;  %v5984_v22 = vor.u32 %v6214_v63, %v5981_v61 }
 0x7be   : > { %5137 = vst [vmem:[%s10040_s21 + $0x60] sm:$0xff] %v4709_v29  ;;  %v4615_v26 = vpop.f32.mrf.mxu1 }
 0x7bf   : > { %4761 = vmatmul.bf16.gmra.mxu0 %v10818_v23  ;;  %v4616_v6 = vadd.f32 %v4615_v26, %v4567_v10  ;;  %5082 = vmatpush.bf16.msrb.mxu3 %v5984_v22  ;;  %v10824_v26 = vld [vmem:[#allocation37_spill] sm:$0xff]  ;;  %v10825_v23 = vld [vmem:[#allocation34_spill] sm:$0xff] }
 0x7c0   : > { %v5973_v10 = vld [vmem:[#allocation5 + $0x388] sm:$0xf0] }
 0x7c1   : > { %v4661_v40 = vpop.f32.mrf.mxu2  ;;  %4810 = vmatmul.bf16.gmra.mxu1 %v10819_v45 }
 0x7c2   : > { %v4662_v1 = vadd.f32 %v4661_v40, %v4613_v13  ;;  %v5909_v13 = vld [vmem:[#allocation5 + $0x308] sm:$0xf0]  ;;  %v6164_v40 = vld [vmem:[#allocation5 + $0x204] sm:$0xf] }
 0x7c3   : > { %v4710_v17 = vpop.f32.mrf.mxu3 }
 0x7c4   : > { %v4711_v31 = vadd.f32 %v4710_v17, %v4662_v1  ;;  %v4568_v53 = vpop.f32.mrf.mxu0  ;;  %v5912_v1 = vor.u32 %v6196_v2, %v5909_v13  ;;  %v5781_v17 = vld [vmem:[#allocation5 + $0x208] sm:$0xf0] }
 0x7c5   : > { %v4569_v33 = vadd.f32 %v4568_v53, %v9921_v48  ;;  %v10832_v2 = vld [vmem:[#allocation42_spill] sm:$0xff] }
 0x7c6   : > { %5139 = vst [vmem:[%s10040_s21 + $0x70] sm:$0xff] %v4711_v31  ;;  %4859 = vmatmul.bf16.gmra.mxu2 %v10820_v35  ;;  %v4617_v58 = vpop.f32.mrf.mxu1  ;;  %v6212_v31 = vld [vmem:[#allocation5 + $0x384] sm:$0xf]  ;;  %v5784_v35 = vor.u32 %v6164_v40, %v5781_v17  ;;  %v10833_v40 = vld [vmem:[#allocation46_spill] sm:$0xff] }
 0x7c7   : > { %v4618_v27 = vadd.f32 %v4617_v58, %v4569_v33  ;;  %5034 = vmatpush.bf16.msrb.mxu2 %v5912_v1  ;;  %v10828_v33 = vld [vmem:[#allocation40_spill] sm:$0xff]  ;;  %v6299_v1 = vld [vmem:[%s10235_s7] sm:$0x3] }
 0x7c8   : > { %4908 = vmatmul.bf16.gmra.mxu3 %v10821_v30  ;;  %4936 = vmatpush.bf16.msrb.mxu0 %v5784_v35  ;;  %v10108_v17 = vperm.slane %v6299_v1, 1  ;;  %v10842_v1 = vld [vmem:[#allocation62_spill] sm:$0xff] }
 0x7c9   : > { %v4664_v19 = vpop.f32.mrf.mxu2 }
 0x7ca   : > { %v4665_v5 = vadd.f32 %v4664_v19, %v4616_v6  ;;  %v5845_v19 = vld [vmem:[#allocation5 + $0x288] sm:$0xf0] }
 0x7cb   : > { %v4713_v32 = vpop.f32.mrf.mxu3  ;;  %v5848_v56 = vor.u32 %v6180_v57, %v5845_v19  ;;  %v10835_v57 = vld [vmem:[#allocation48_spill] sm:$0xff] }
 0x7cc   : > { %v4714_v8 = vadd.f32 %v4713_v32, %v4665_v5  ;;  %v4571_v46 = vpop.f32.mrf.mxu0  ;;  %v10827_v5 = vld [vmem:[#allocation39_spill] sm:$0xff] }
 0x7cd   : > { %v4572_v48 = vadd.f32 %v4571_v46, %v9950_v60  ;;  %v5976_v60 = vor.u32 %v6212_v31, %v5973_v10  ;;  %4985 = vmatpush.bf16.msrb.mxu1 %v5848_v56 }
 0x7ce   : > { %5141 = vst [vmem:[%s10040_s21 + $0x80] sm:$0xff] %v4714_v8  ;;  %v4620_v36 = vpop.f32.mrf.mxu1 }
 0x7cf   : > { %4766 = vmatmul.bf16.gmra.mxu0 %v10822_v55  ;;  %v4621_v39 = vadd.f32 %v4620_v36, %v4572_v48  ;;  %5083 = vmatpush.bf16.msrb.mxu3 %v5976_v60  ;;  %v10831_v48 = vld [vmem:[#allocation45_spill] sm:$0xff] }
 0x7d1   : > { %v4666_v4 = vpop.f32.mrf.mxu2  ;;  %4815 = vmatmul.bf16.gmra.mxu1 %v10823_v12 }
 0x7d2   : > { %v4667_v42 = vadd.f32 %v4666_v4, %v4618_v27 }
 0x7d3   : > { %v4715_v29 = vpop.f32.mrf.mxu3 }
 0x7d4   : > { %v4716_v37 = vadd.f32 %v4715_v29, %v4667_v42  ;;  %v4573_v59 = vpop.f32.mrf.mxu0  ;;  %v10830_v29 = vld [vmem:[#allocation41_spill] sm:$0xff] }
 0x7d5   : > { %v4574_v30 = vadd.f32 %v4573_v59, %v9977_v11 }
 0x7d6   : > { %5143 = vst [vmem:[%s10040_s21 + $0x90] sm:$0xff] %v4716_v37  ;;  %4864 = vmatmul.bf16.gmra.mxu2 %v10824_v26  ;;  %v4622_v0 = vpop.f32.mrf.mxu1 }
 0x7d7   : > { %v4623_v63 = vadd.f32 %v4622_v0, %v4574_v30  ;;  %v10834_v30 = vld [vmem:[#allocation47_spill] sm:$0xff] }
 0x7d8   : > { %4913 = vmatmul.bf16.gmra.mxu3 %v10825_v23 }
 0x7d9   : > { %v4669_v45 = vpop.f32.mrf.mxu2 }
 0x7da   : > { %v4670_v53 = vadd.f32 %v4669_v45, %v4621_v39 }
 0x7db   : > { %v4718_v58 = vpop.f32.mrf.mxu3 }
 0x7dc   : > { %v4719_v6 = vadd.f32 %v4718_v58, %v4670_v53  ;;  %v4576_v18 = vpop.f32.mrf.mxu0 }
 0x7dd   : > { %v4577_v32 = vadd.f32 %v4576_v18, %v9999_v21 }
 0x7de   : > { %5145 = vst [vmem:[%s10040_s21 + $0xa0] sm:$0xff] %v4719_v6  ;;  %v4625_v44 = vpop.f32.mrf.mxu1 }
 0x7df   : > { %4771 = vmatmul.bf16.gmra.mxu0 %v10826_v47  ;;  %v4626_v36 = vadd.f32 %v4625_v44, %v4577_v32 }
 0x7e1   : > { %v4671_v61 = vpop.f32.mrf.mxu2  ;;  %4820 = vmatmul.bf16.gmra.mxu1 %v10827_v5 }
 0x7e2   : > { %v4672_v3 = vadd.f32 %v4671_v61, %v4623_v63 }
 0x7e3   : > { %v4720_v22 = vpop.f32.mrf.mxu3 }
 0x7e4   : > { %v4721_v11 = vadd.f32 %v4720_v22, %v4672_v3  ;;  %v4578_v8 = vpop.f32.mrf.mxu0  ;;  %v10837_v22 = vld [vmem:[#allocation50_spill] sm:$0xff] }
 0x7e5   : > { %v4579_v4 = vadd.f32 %v4578_v8, %v10013_v24 }
 0x7e6   : > { %5147 = vst [vmem:[%s10040_s21 + $0xb0] sm:$0xff] %v4721_v11  ;;  %4869 = vmatmul.bf16.gmra.mxu2 %v10828_v33  ;;  %v4627_v46 = vpop.f32.mrf.mxu1 }
 0x7e7   : > { %v4628_v21 = vadd.f32 %v4627_v46, %v4579_v4 }
 0x7e8   : > { %4918 = vmatmul.bf16.gmra.mxu3 %v10829_v49 }
 0x7e9   : > { %v4674_v34 = vpop.f32.mrf.mxu2 }
 0x7ea   : > { %v4675_v55 = vadd.f32 %v4674_v34, %v4626_v36 }
 0x7eb   : > { %v4723_v9 = vpop.f32.mrf.mxu3 }
 0x7ec   : > { %v4724_v27 = vadd.f32 %v4723_v9, %v4675_v55  ;;  %v4581_v12 = vpop.f32.mrf.mxu0  ;;  %v10838_v55 = vld [vmem:[#allocation51_spill] sm:$0xff] }
 0x7ed   : > { %v4582_v39 = vadd.f32 %v4581_v12, %v10022_v51 }
 0x7ee   : > { %5149 = vst [vmem:[%s10040_s21 + $0xc0] sm:$0xff] %v4724_v27  ;;  %v4630_v42 = vpop.f32.mrf.mxu1  ;;  %v10839_v27 = vld [vmem:[#allocation56_spill] sm:$0xff] }
 0x7ef   : > { %4776 = vmatmul.bf16.gmra.mxu0 %v10830_v29  ;;  %v4631_v13 = vadd.f32 %v4630_v42, %v4582_v39 }
 0x7f1   : > { %v4676_v37 = vpop.f32.mrf.mxu2  ;;  %4825 = vmatmul.bf16.gmra.mxu1 %v10831_v48 }
 0x7f2   : > { %v4677_v59 = vadd.f32 %v4676_v37, %v4628_v21  ;;  %v10840_v37 = vld [vmem:[#allocation57_spill] sm:$0xff] }
 0x7f3   : > { %v4725_v26 = vpop.f32.mrf.mxu3 }
 0x7f4   : > { %v4726_v0 = vadd.f32 %v4725_v26, %v4677_v59  ;;  %v4583_v23 = vpop.f32.mrf.mxu0  ;;  %v10841_v26 = vld [vmem:[#allocation61_spill] sm:$0xff] }
 0x7f5   : > { %v4584_v51 = vadd.f32 %v4583_v23, %v10029_v15  ;;  %v10836_v15 = vld [vmem:[#allocation53_spill] sm:$0xff] }
 0x7f6   : > { %5151 = vst [vmem:[%s10040_s21 + $0xd0] sm:$0xff] %v4726_v0  ;;  %4874 = vmatmul.bf16.gmra.mxu2 %v10832_v2  ;;  %v4632_v24 = vpop.f32.mrf.mxu1 }
 0x7f7   : > { %v4633_v18 = vadd.f32 %v4632_v24, %v4584_v51 }
 0x7f8   : > { %4923 = vmatmul.bf16.gmra.mxu3 %v10833_v40 }
 0x7f9   : > { %v4679_v45 = vpop.f32.mrf.mxu2 }
 0x7fa   : > { %v4680_v31 = vadd.f32 %v4679_v45, %v4631_v13 }
 0x7fb   : > { %v4728_v10 = vpop.f32.mrf.mxu3 }
 0x7fc   : > { %v4729_v53 = vadd.f32 %v4728_v10, %v4680_v31  ;;  %v4742_v35 = vpop.f32.mrf.mxu0 }
 0x7fd   : > { %v4743_v60 = vadd.f32 %v4742_v35, %v10108_v17 }
 0x7fe   : > { %5153 = vst [vmem:[%s10040_s21 + $0xe0] sm:$0xff] %v4729_v53  ;;  %v4791_v58 = vpop.f32.mrf.mxu1 }
 0x7ff   : > { %v4792_v6 = vadd.f32 %v4791_v58, %v4743_v60  ;;  %4937 = vmatmul.bf16.vlgmr.msrb.gmra.mxu0 %v10834_v30  ;;  %v10843_v30 = vld [vmem:[#allocation58_spill] sm:$0xff] }
 0x801   : > { %v4681_v44 = vpop.f32.mrf.mxu2  ;;  %4986 = vmatmul.bf16.vlgmr.msrb.gmra.mxu1 %v10835_v57 }
 0x802   : > { %v4682_v19 = vadd.f32 %v4681_v44, %v4633_v18 }
 0x803   : > { %v4730_v47 = vpop.f32.mrf.mxu3 }
 0x804   : > { %v4731_v56 = vadd.f32 %v4730_v47, %v4682_v19  ;;  %v4744_v63 = vpop.f32.mrf.mxu0 }
 0x805   : > { %v4745_v61 = vadd.f32 %v4744_v63, %v10108_v17 }
 0x806   : > { %5155 = vst [vmem:[%s10040_s21 + $0xf0] sm:$0xff] %v4731_v56  ;;  %5035 = vmatmul.bf16.vlgmr.msrb.gmra.mxu2 %v10836_v15  ;;  %v4793_v5 = vpop.f32.mrf.mxu1 }
 0x807   : > { %v4794_v3 = vadd.f32 %v4793_v5, %v4745_v61  ;;  %v10844_v61 = vld [vmem:[#allocation59_spill] sm:$0xff] }
 0x808   : > { %5084 = vmatmul.bf16.vlgmr.msrb.gmra.mxu3 %v10837_v22 }
 0x809   : > { %v4840_v11 = vpop.f32.mrf.mxu2 }
 0x80a   : > { %v4841_v32 = vadd.f32 %v4840_v11, %v4792_v6 }
 0x80b   : > { %v4889_v8 = vpop.f32.mrf.mxu3 }
 0x80c   : > { %v10119_v33 = vadd.f32 %v4889_v8, %v4841_v32  ;;  %v4747_v46 = vpop.f32.mrf.mxu0 }
 0x80d   : > { %v4748_v36 = vadd.f32 %v4747_v46, %v10108_v17  ;;  %v10845_v46 = vld [vmem:[#allocation63_spill] sm:$0xff] }
 0x80e   : > { %v4796_v49 = vpop.f32.mrf.mxu1 }
 0x80f   : > { %v4797_v34 = vadd.f32 %v4796_v49, %v4748_v36  ;;  %4942 = vmatmul.bf16.gmra.mxu0 %v10838_v55 }
 0x811   : > { %v4842_v9 = vpop.f32.mrf.mxu2  ;;  %4991 = vmatmul.bf16.gmra.mxu1 %v10839_v27 }
 0x812   : > { %v4843_v4 = vadd.f32 %v4842_v9, %v4794_v3 }
 0x813   : > { %v4891_v12 = vpop.f32.mrf.mxu3 }
 0x814   : > { %v10124_v42 = vadd.f32 %v4891_v12, %v4843_v4  ;;  %v4749_v29 = vpop.f32.mrf.mxu0  ;;  %v10846_v12 = vld [vmem:[#allocation128_spill] sm:$0xff] }
 0x815   : > { %v4750_v21 = vadd.f32 %v4749_v29, %v10108_v17 }
 0x816   : > { %5040 = vmatmul.bf16.gmra.mxu2 %v10840_v37  ;;  %v4798_v48 = vpop.f32.mrf.mxu1 }
 0x817   : > { %v4799_v59 = vadd.f32 %v4798_v48, %v4750_v21  ;;  %v10847_v21 = vld [vmem:[#allocation64_spill] sm:$0xff] }
 0x818   : > { %5089 = vmatmul.bf16.gmra.mxu3 %v10841_v26 }
 0x819   : > { %v4845_v0 = vpop.f32.mrf.mxu2 }
 0x81a   : > { %v4846_v39 = vadd.f32 %v4845_v0, %v4797_v34  ;;  %v10848_v0 = vld [vmem:[#allocation68_spill] sm:$0xff] }
 0x81b   : > { %v4894_v23 = vpop.f32.mrf.mxu3 }
 0x81c   : > { %v10129_v2 = vadd.f32 %v4894_v23, %v4846_v39  ;;  %v4752_v24 = vpop.f32.mrf.mxu0 }
 0x81d   : > { %v4753_v13 = vadd.f32 %v4752_v24, %v10108_v17  ;;  %v10849_v24 = vld [vmem:[#allocation9_spill] sm:$0xff] }
 0x81e   : > { %v4801_v40 = vpop.f32.mrf.mxu1 }
 0x81f   : > { %v4802_v45 = vadd.f32 %v4801_v40, %v4753_v13  ;;  %4947 = vmatmul.bf16.gmra.mxu0 %v10842_v1 }
 0x821   : > { %v4847_v31 = vpop.f32.mrf.mxu2  ;;  %4996 = vmatmul.bf16.gmra.mxu1 %v9730_v28 }
 0x822   : > { %v4848_v10 = vadd.f32 %v4847_v31, %v4799_v59 }
 0x823   : > { %v4896_v53 = vpop.f32.mrf.mxu3 }
 0x824   : > { %v10134_v51 = vadd.f32 %v4896_v53, %v4848_v10  ;;  %v4754_v35 = vpop.f32.mrf.mxu0 }
 0x825   : > { %v4755_v60 = vadd.f32 %v4754_v35, %v10108_v17 }
 0x826   : > { %5045 = vmatmul.bf16.gmra.mxu2 %v9745_v38  ;;  %v4803_v58 = vpop.f32.mrf.mxu1 }
 0x827   : > { %v4804_v6 = vadd.f32 %v4803_v58, %v4755_v60  ;;  %v10850_v58 = vld [vmem:[#allocation69_spill] sm:$0xff] }
 0x828   : > { %5094 = vmatmul.bf16.gmra.mxu3 %v10843_v30 }
 0x829   : > { %v4850_v18 = vpop.f32.mrf.mxu2 }
 0x82a   : > { %v4851_v44 = vadd.f32 %v4850_v18, %v4802_v45 }
 0x82b   : > { %v4899_v57 = vpop.f32.mrf.mxu3 }
 0x82c   : > { %v10139_v19 = vadd.f32 %v4899_v57, %v4851_v44  ;;  %v4757_v47 = vpop.f32.mrf.mxu0 }
 0x82d   : > { %v4758_v28 = vadd.f32 %v4757_v47, %v10108_v17  ;;  %v10851_v47 = vld [vmem:[#allocation65_spill] sm:$0xff] }
 0x82e   : > { %v4806_v56 = vpop.f32.mrf.mxu1 }
 0x82f   : > { %v4807_v63 = vadd.f32 %v4806_v56, %v4758_v28  ;;  %4952 = vmatmul.bf16.gmra.mxu0 %v10844_v61 }
 0x831   : > { %v4852_v15 = vpop.f32.mrf.mxu2  ;;  %5001 = vmatmul.bf16.gmra.mxu1 %v9784_v50 }
 0x832   : > { %v4853_v38 = vadd.f32 %v4852_v15, %v4804_v6 }
 0x833   : > { %v4901_v5 = vpop.f32.mrf.mxu3 }
 0x834   : > { %v10144_v3 = vadd.f32 %v4901_v5, %v4853_v38  ;;  %v4759_v22 = vpop.f32.mrf.mxu0 }
 0x835   : > { %v4760_v11 = vadd.f32 %v4759_v22, %v10108_v17 }
 0x836   : > { %5050 = vmatmul.bf16.gmra.mxu2 %v9807_v25  ;;  %v4808_v32 = vpop.f32.mrf.mxu1 }
 0x837   : > { %v4809_v8 = vadd.f32 %v4808_v32, %v4760_v11 }
 0x838   : > { %5099 = vmatmul.bf16.gmra.mxu3 %v10845_v46 }
 0x839   : > { %v4855_v36 = vpop.f32.mrf.mxu2 }
 0x83a   : > { %v4856_v49 = vadd.f32 %v4855_v36, %v4807_v63  ;;  %v10852_v63 = vld [vmem:[#allocation66_spill] sm:$0xff] }
 0x83b   : > { %v4904_v34 = vpop.f32.mrf.mxu3 }
 0x83c   : > { %v10149_v55 = vadd.f32 %v4904_v34, %v4856_v49  ;;  %v4762_v9 = vpop.f32.mrf.mxu0 }
 0x83d   : > { %v4763_v50 = vadd.f32 %v4762_v9, %v10108_v17 }
 0x83e   : > { %v4811_v27 = vpop.f32.mrf.mxu1 }
 0x83f   : > { %v4812_v4 = vadd.f32 %v4811_v27, %v4763_v50  ;;  %4957 = vmatmul.bf16.gmra.mxu0 %v10846_v12 }
 0x841   : > { %v4857_v29 = vpop.f32.mrf.mxu2  ;;  %5006 = vmatmul.bf16.gmra.mxu1 %v10847_v21 }
 0x842   : > { %v4858_v25 = vadd.f32 %v4857_v29, %v4809_v8 }
 0x843   : > { %v4906_v37 = vpop.f32.mrf.mxu3 }
 0x844   : > { %v10154_v48 = vadd.f32 %v4906_v37, %v4858_v25  ;;  %v4764_v59 = vpop.f32.mrf.mxu0 }
 0x845   : > { %v4765_v26 = vadd.f32 %v4764_v59, %v10108_v17 }
 0x846   : > { %5055 = vmatmul.bf16.gmra.mxu2 %v10848_v0  ;;  %v4813_v39 = vpop.f32.mrf.mxu1 }
 0x847   : > { %v4814_v23 = vadd.f32 %v4813_v39, %v4765_v26 }
 0x848   : > { %5104 = vmatmul.bf16.gmra.mxu3 %v10849_v24 }
 0x849   : > { %v4860_v13 = vpop.f32.mrf.mxu2 }
 0x84a   : > { %v4861_v40 = vadd.f32 %v4860_v13, %v4812_v4 }
 0x84b   : > { %v4909_v45 = vpop.f32.mrf.mxu3 }
 0x84c   : > { %v10159_v1 = vadd.f32 %v4909_v45, %v4861_v40  ;;  %v4767_v31 = vpop.f32.mrf.mxu0 }
 0x84d   : > { %v4768_v10 = vadd.f32 %v4767_v31, %v10108_v17 }
 0x84e   : > { %v4816_v53 = vpop.f32.mrf.mxu1 }
 0x84f   : > { %v4817_v35 = vadd.f32 %v4816_v53, %v4768_v10  ;;  %4962 = vmatmul.bf16.gmra.mxu0 %v9888_v7 }
 0x851   : > { %v4862_v60 = vpop.f32.mrf.mxu2  ;;  %5011 = vmatmul.bf16.gmra.mxu1 %v10850_v58 }
 0x852   : > { %v4863_v6 = vadd.f32 %v4862_v60, %v4814_v23 }
 0x853   : > { %v4911_v30 = vpop.f32.mrf.mxu3 }
 0x854   : > { %v10164_v18 = vadd.f32 %v4911_v30, %v4863_v6  ;;  %v4769_v44 = vpop.f32.mrf.mxu0 }
 0x855   : > { %v4770_v57 = vadd.f32 %v4769_v44, %v10108_v17 }
 0x856   : > { %5060 = vmatmul.bf16.gmra.mxu2 %v10851_v47  ;;  %v4818_v28 = vpop.f32.mrf.mxu1 }
 0x857   : > { %v4819_v56 = vadd.f32 %v4818_v28, %v4770_v57 }
 0x858   : > { %5109 = vmatmul.bf16.gmra.mxu3 %v10852_v63 }
 0x859   : > { %v4865_v61 = vpop.f32.mrf.mxu2 }
 0x85a   : > { %v4866_v15 = vadd.f32 %v4865_v61, %v4817_v35 }
 0x85b   : > { %v4914_v38 = vpop.f32.mrf.mxu3 }
 0x85c   : > { %v10169_v7 = vadd.f32 %v4914_v38, %v4866_v15  ;;  %v4772_v5 = vpop.f32.mrf.mxu0 }
 0x85d   : > { %v4773_v22 = vadd.f32 %v4772_v5, %v10108_v17 }
 0x85e   : > { %v4821_v11 = vpop.f32.mrf.mxu1 }
 0x85f   : > { %v4822_v32 = vadd.f32 %v4821_v11, %v4773_v22  ;;  %4967 = vmatmul.bf16.gmra.mxu0 %v9954_v14 }
 0x861   : > { %v4867_v8 = vpop.f32.mrf.mxu2  ;;  %5016 = vmatmul.bf16.gmra.mxu1 %v9956_v54 }
 0x862   : > { %v4868_v46 = vadd.f32 %v4867_v8, %v4819_v56 }
 0x863   : > { %v4916_v36 = vpop.f32.mrf.mxu3 }
 0x864   : > { %v10174_v49 = vadd.f32 %v4916_v36, %v4868_v46  ;;  %v4774_v34 = vpop.f32.mrf.mxu0 }
 0x865   : > { %v4775_v9 = vadd.f32 %v4774_v34, %v10108_v17 }
 0x866   : > { %5065 = vmatmul.bf16.gmra.mxu2 %v9968_v20  ;;  %v4823_v50 = vpop.f32.mrf.mxu1 }
 0x867   : > { %v4824_v27 = vadd.f32 %v4823_v50, %v4775_v9 }
 0x868   : > { %5114 = vmatmul.bf16.gmra.mxu3 %v9986_v43 }
 0x869   : > { %v4870_v4 = vpop.f32.mrf.mxu2 }
 0x86a   : > { %v4871_v12 = vadd.f32 %v4870_v4, %v4822_v32 }
 0x86b   : > { %v4919_v29 = vpop.f32.mrf.mxu3 }
 0x86c   : > { %v10179_v14 = vadd.f32 %v4919_v29, %v4871_v12  ;;  %v4777_v21 = vpop.f32.mrf.mxu0 }
 0x86d   : > { %v4778_v54 = vadd.f32 %v4777_v21, %v10108_v17 }
 0x86e   : > { %v4826_v25 = vpop.f32.mrf.mxu1 }
 0x86f   : > { %v4827_v37 = vadd.f32 %v4826_v25, %v4778_v54  ;;  %4972 = vmatmul.bf16.gmra.mxu0 %v10004_v62 }
 0x871   : > { %v4872_v59 = vpop.f32.mrf.mxu2  ;;  %5021 = vmatmul.bf16.gmra.mxu1 %v10009_v41 }
 0x872   : > { %v4873_v20 = vadd.f32 %v4872_v59, %v4824_v27 }
 0x873   : > { %v4921_v26 = vpop.f32.mrf.mxu3 }
 0x874   : > { %v10184_v0 = vadd.f32 %v4921_v26, %v4873_v20  ;;  %v4779_v43 = vpop.f32.mrf.mxu0 }
 0x875   : > { %v4780_v39 = vadd.f32 %v4779_v43, %v10108_v17 }
 0x876   : > { %5070 = vmatmul.bf16.gmra.mxu2 %v10015_v16  ;;  %v4828_v23 = vpop.f32.mrf.mxu1 }
 0x877   : > { %v4829_v24 = vadd.f32 %v4828_v23, %v4780_v39 }
 0x878   : > { %5119 = vmatmul.bf16.gmra.mxu3 %v10019_v52 }
 0x879   : > { %v4875_v13 = vpop.f32.mrf.mxu2 }
 0x87a   : > { %v4876_v40 = vadd.f32 %v4875_v13, %v4827_v37 }
 0x87b   : > { %v4924_v45 = vpop.f32.mrf.mxu3 }
 0x87c   : > { %v10189_v62 = vadd.f32 %v4924_v45, %v4876_v40  ;;  %v4938_v31 = vpop.f32.mrf.mxu0 }
 0x87d   : > { %v4939_v17 = vadd.f32 %v4938_v31, %v10119_v33 }
 0x87e   : > { %v4987_v41 = vpop.f32.mrf.mxu1 }
 0x87f   : > { %v4988_v6 = vadd.f32 %v4987_v41, %v4939_v17 }
 0x881   : > { %v4877_v10 = vpop.f32.mrf.mxu2 }
 0x882   : > { %v4878_v53 = vadd.f32 %v4877_v10, %v4829_v24 }
 0x883   : > { %v4926_v35 = vpop.f32.mrf.mxu3 }
 0x884   : > { %v10191_v60 = vadd.f32 %v4926_v35, %v4878_v53  ;;  %v4940_v16 = vpop.f32.mrf.mxu0 }
 0x885   : > { %v4941_v47 = vadd.f32 %v4940_v16, %v10124_v42 }
 0x886   : > { %v4989_v58 = vpop.f32.mrf.mxu1 }
 0x887   : > { %v4990_v63 = vadd.f32 %v4989_v58, %v4941_v47 }
 0x889   : > { %v5036_v52 = vpop.f32.mrf.mxu2 }
 0x88a   : > { %v5037_v30 = vadd.f32 %v5036_v52, %v4988_v6 }
 0x88b   : > { %v5085_v44 = vpop.f32.mrf.mxu3 }
 0x88c   : > { %v5086_v57 = vadd.f32 %v5085_v44, %v5037_v30  ;;  %v4943_v28 = vpop.f32.mrf.mxu0 }
 0x88d   : > { %v4944_v33 = vadd.f32 %v4943_v28, %v10129_v2 }
 0x88e   : > { %5126 = vst [vmem:[%s10040_s21 + $0x8] sm:$0xff] %v5086_v57  ;;  %v4992_v56 = vpop.f32.mrf.mxu1 }
 0x88f   : > { %v4993_v32 = vadd.f32 %v4992_v56, %v4944_v33 }
 0x891   : > { %v5038_v61 = vpop.f32.mrf.mxu2 }
 0x892   : > { %v5039_v15 = vadd.f32 %v5038_v61, %v4990_v63 }
 0x893   : > { %v5087_v38 = vpop.f32.mrf.mxu3 }
 0x894   : > { %v5088_v5 = vadd.f32 %v5087_v38, %v5039_v15  ;;  %v4945_v22 = vpop.f32.mrf.mxu0 }
 0x895   : > { %v4946_v34 = vadd.f32 %v4945_v22, %v10134_v51 }
 0x896   : > { %5128 = vst [vmem:[%s10040_s21 + $0x18] sm:$0xff] %v5088_v5  ;;  %v4994_v11 = vpop.f32.mrf.mxu1 }
 0x897   : > { %v4995_v27 = vadd.f32 %v4994_v11, %v4946_v34 }
 0x899   : > { %v5041_v8 = vpop.f32.mrf.mxu2 }
 0x89a   : > { %v5042_v46 = vadd.f32 %v5041_v8, %v4993_v32 }
 0x89b   : > { %v5090_v36 = vpop.f32.mrf.mxu3 }
 0x89c   : > { %v5091_v42 = vadd.f32 %v5090_v36, %v5042_v46  ;;  %v4948_v9 = vpop.f32.mrf.mxu0 }
 0x89d   : > { %v4949_v21 = vadd.f32 %v4948_v9, %v10139_v19 }
 0x89e   : > { %5130 = vst [vmem:[%s10040_s21 + $0x28] sm:$0xff] %v5091_v42  ;;  %v4997_v50 = vpop.f32.mrf.mxu1 }
 0x89f   : > { %v4998_v37 = vadd.f32 %v4997_v50, %v4949_v21 }
 0x8a1   : > { %v5043_v4 = vpop.f32.mrf.mxu2 }
 0x8a2   : > { %v5044_v12 = vadd.f32 %v5043_v4, %v4995_v27 }
 0x8a3   : > { %v5092_v29 = vpop.f32.mrf.mxu3 }
 0x8a4   : > { %v5093_v2 = vadd.f32 %v5092_v29, %v5044_v12  ;;  %v4950_v54 = vpop.f32.mrf.mxu0 }
 0x8a5   : > { %v4951_v43 = vadd.f32 %v4950_v54, %v10144_v3 }
 0x8a6   : > { %5132 = vst [vmem:[%s10040_s21 + $0x38] sm:$0xff] %v5093_v2  ;;  %v4999_v25 = vpop.f32.mrf.mxu1 }
 0x8a7   : > { %v5000_v24 = vadd.f32 %v4999_v25, %v4951_v43 }
 0x8a9   : > { %v5046_v59 = vpop.f32.mrf.mxu2 }
 0x8aa   : > { %v5047_v20 = vadd.f32 %v5046_v59, %v4998_v37 }
 0x8ab   : > { %v5095_v26 = vpop.f32.mrf.mxu3 }
 0x8ac   : > { %v5096_v51 = vadd.f32 %v5095_v26, %v5047_v20  ;;  %v4953_v39 = vpop.f32.mrf.mxu0 }
 0x8ad   : > { %v4954_v31 = vadd.f32 %v4953_v39, %v10149_v55 }
 0x8ae   : > { %5134 = vst [vmem:[%s10040_s21 + $0x48] sm:$0xff] %v5096_v51  ;;  %v5002_v23 = vpop.f32.mrf.mxu1 }
 0x8af   : > { %v5003_v53 = vadd.f32 %v5002_v23, %v4954_v31 }
 0x8b1   : > { %v5048_v13 = vpop.f32.mrf.mxu2 }
 0x8b2   : > { %v5049_v40 = vadd.f32 %v5048_v13, %v5000_v24 }
 0x8b3   : > { %v5097_v45 = vpop.f32.mrf.mxu3 }
 0x8b4   : > { %v5098_v19 = vadd.f32 %v5097_v45, %v5049_v40  ;;  %v4955_v41 = vpop.f32.mrf.mxu0 }
 0x8b5   : > { %v4956_v58 = vadd.f32 %v4955_v41, %v10154_v48 }
 0x8b6   : > { %5136 = vst [vmem:[%s10040_s21 + $0x58] sm:$0xff] %v5098_v19  ;;  %v5004_v10 = vpop.f32.mrf.mxu1 }
 0x8b7   : > { %v5005_v30 = vadd.f32 %v5004_v10, %v4956_v58 }
 0x8b9   : > { %v5051_v35 = vpop.f32.mrf.mxu2 }
 0x8ba   : > { %v5052_v17 = vadd.f32 %v5051_v35, %v5003_v53 }
 0x8bb   : > { %v5100_v16 = vpop.f32.mrf.mxu3 }
 0x8bc   : > { %v5101_v3 = vadd.f32 %v5100_v16, %v5052_v17  ;;  %v4958_v6 = vpop.f32.mrf.mxu0 }
 0x8bd   : > { %v4959_v28 = vadd.f32 %v4958_v6, %v10159_v1 }
 0x8be   : > { %5138 = vst [vmem:[%s10040_s21 + $0x68] sm:$0xff] %v5101_v3  ;;  %v5007_v52 = vpop.f32.mrf.mxu1 }
 0x8bf   : > { %v5008_v61 = vadd.f32 %v5007_v52, %v4959_v28 }
 0x8c1   : > { %v5053_v44 = vpop.f32.mrf.mxu2 }
 0x8c2   : > { %v5054_v57 = vadd.f32 %v5053_v44, %v5005_v30 }
 0x8c3   : > { %v5102_v47 = vpop.f32.mrf.mxu3 }
 0x8c4   : > { %v5103_v55 = vadd.f32 %v5102_v47, %v5054_v57  ;;  %v4960_v56 = vpop.f32.mrf.mxu0 }
 0x8c5   : > { %v4961_v33 = vadd.f32 %v4960_v56, %v10164_v18 }
 0x8c6   : > { %5140 = vst [vmem:[%s10040_s21 + $0x78] sm:$0xff] %v5103_v55  ;;  %v5009_v63 = vpop.f32.mrf.mxu1 }
 0x8c7   : > { %v5010_v32 = vadd.f32 %v5009_v63, %v4961_v33 }
 0x8c9   : > { %v5056_v15 = vpop.f32.mrf.mxu2 }
 0x8ca   : > { %v5057_v38 = vadd.f32 %v5056_v15, %v5008_v61 }
 0x8cb   : > { %v5105_v5 = vpop.f32.mrf.mxu3 }
 0x8cc   : > { %v5106_v48 = vadd.f32 %v5105_v5, %v5057_v38  ;;  %v4963_v22 = vpop.f32.mrf.mxu0 }
 0x8cd   : > { %v4964_v42 = vadd.f32 %v4963_v22, %v10169_v7 }
 0x8ce   : > { %5142 = vst [vmem:[%s10040_s21 + $0x88] sm:$0xff] %v5106_v48  ;;  %v5012_v11 = vpop.f32.mrf.mxu1 }
 0x8cf   : > { %v5013_v50 = vadd.f32 %v5012_v11, %v4964_v42 }
 0x8d1   : > { %v5058_v8 = vpop.f32.mrf.mxu2 }
 0x8d2   : > { %v5059_v46 = vadd.f32 %v5058_v8, %v5010_v32 }
 0x8d3   : > { %v5107_v36 = vpop.f32.mrf.mxu3 }
 0x8d4   : > { %v5108_v1 = vadd.f32 %v5107_v36, %v5059_v46  ;;  %v4965_v34 = vpop.f32.mrf.mxu0 }
 0x8d5   : > { %v4966_v29 = vadd.f32 %v4965_v34, %v10174_v49 }
 0x8d6   : > { %5144 = vst [vmem:[%s10040_s21 + $0x98] sm:$0xff] %v5108_v1  ;;  %v5014_v9 = vpop.f32.mrf.mxu1 }
 0x8d7   : > { %v5015_v21 = vadd.f32 %v5014_v9, %v4966_v29 }
 0x8d9   : > { %v5061_v27 = vpop.f32.mrf.mxu2 }
 0x8da   : > { %v5062_v4 = vadd.f32 %v5061_v27, %v5013_v50 }
 0x8db   : > { %v5110_v12 = vpop.f32.mrf.mxu3 }
 0x8dc   : > { %v5111_v18 = vadd.f32 %v5110_v12, %v5062_v4  ;;  %v4968_v2 = vpop.f32.mrf.mxu0 }
 0x8dd   : > { %v4969_v20 = vadd.f32 %v4968_v2, %v10179_v14 }
 0x8de   : > { %5146 = vst [vmem:[%s10040_s21 + $0xa8] sm:$0xff] %v5111_v18  ;;  %v5017_v25 = vpop.f32.mrf.mxu1 }
 0x8df   : > { %v5018_v51 = vadd.f32 %v5017_v25, %v4969_v20 }
 0x8e1   : > { %v5063_v54 = vpop.f32.mrf.mxu2 }
 0x8e2   : > { %v5064_v37 = vadd.f32 %v5063_v54, %v5015_v21 }
 0x8e3   : > { %v5112_v59 = vpop.f32.mrf.mxu3 }
 0x8e4   : > { %v5113_v7 = vadd.f32 %v5112_v59, %v5064_v37  ;;  %v4970_v26 = vpop.f32.mrf.mxu0 }
 0x8e5   : > { %v4971_v13 = vadd.f32 %v4970_v26, %v10184_v0 }
 0x8e6   : > { %5148 = vst [vmem:[%s10040_s21 + $0xb8] sm:$0xff] %v5113_v7  ;;  %v5019_v24 = vpop.f32.mrf.mxu1 }
 0x8e7   : > { %v5020_v45 = vadd.f32 %v5019_v24, %v4971_v13 }
 0x8e9   : > { %v5066_v43 = vpop.f32.mrf.mxu2 }
 0x8ea   : > { %v5067_v39 = vadd.f32 %v5066_v43, %v5018_v51 }
 0x8eb   : > { %v5115_v23 = vpop.f32.mrf.mxu3 }
 0x8ec   : > { %v5116_v49 = vadd.f32 %v5115_v23, %v5067_v39  ;;  %v4973_v40 = vpop.f32.mrf.mxu0 }
 0x8ed   : > { %v4974_v14 = vadd.f32 %v4973_v40, %v10189_v62 }
 0x8ee   : > { %5150 = vst [vmem:[%s10040_s21 + $0xc8] sm:$0xff] %v5116_v49  ;;  %v5022_v53 = vpop.f32.mrf.mxu1 }
 0x8ef   : > { %v5023_v35 = vadd.f32 %v5022_v53, %v4974_v14 }
 0x8f1   : > { %v5068_v19 = vpop.f32.mrf.mxu2 }
 0x8f2   : > { %v5069_v31 = vadd.f32 %v5068_v19, %v5020_v45 }
 0x8f3   : > { %v5117_v41 = vpop.f32.mrf.mxu3 }
 0x8f4   : > { %v5118_v10 = vadd.f32 %v5117_v41, %v5069_v31  ;;  %v4975_v16 = vpop.f32.mrf.mxu0 }
 0x8f5   : > { %v4976_v0 = vadd.f32 %v4975_v16, %v10191_v60 }
 0x8f6   : > { %5152 = vst [vmem:[%s10040_s21 + $0xd8] sm:$0xff] %v5118_v10  ;;  %v5024_v52 = vpop.f32.mrf.mxu1 }
 0x8f7   : > { %v5025_v30 = vadd.f32 %v5024_v52, %v4976_v0 }
 0x8f9   : > { %v5071_v17 = vpop.f32.mrf.mxu2 }
 0x8fa   : > { %v5072_v3 = vadd.f32 %v5071_v17, %v5023_v35 }
 0x8fb   : > { %v5120_v58 = vpop.f32.mrf.mxu3 }
 0x8fc   : > { %v5121_v6 = vadd.f32 %v5120_v58, %v5072_v3 }
 0x8fe   : > { %5154 = vst [vmem:[%s10040_s21 + $0xe8] sm:$0xff] %v5121_v6 }
 0x901   : > { %v5073_v44 = vpop.f32.mrf.mxu2 }
 0x902   : > { %v5074_v57 = vadd.f32 %v5073_v44, %v5025_v30 }
 0x903   : > { %v5122_v47 = vpop.f32.mrf.mxu3 }
 0x904   : > { %v5123_v55 = vadd.f32 %v5122_v47, %v5074_v57 }
 0x906   : > { %5156 = vst [vmem:[%s10040_s21 + $0xf8] sm:$0xff] %v5123_v55 }
 0x907 PF: > { %s20_s27 = sadd.s32 1, %s6374_s27  }
 0x908   : > { %p17_p7 = scmp.ge.s32.totalorder %s20_s27, 4  }
 0x90a   :  { %19 = sbr.rel (!%p17_p7) target bundleno = 2 (0x2), region = 94 }
 0x90f   :  { %5181 = vsyncpa [#allocation4], 1 }
 0x910   :  { %5183 = vsyncpa [#allocation4 + $0x1], 1 }
 0x911   :  { %5184 = vsyncpa [#allocation6], 1 }

</bundles_post_ra>
